<compile_context>
chip_gen: v5e
topology: v5e:2x2
jax: 0.10.0
libtpu: 0.0.40
codegen_flags: <defaults>
</compile_context>

<pallas_src>
import functools

import jax
import jax.numpy as jnp
from jax import lax
from jax.experimental import pallas as pl
from jax.experimental.pallas import tpu as pltpu

AUDIO_DIM = 464
MOUTH_DIM = 31
HIDDEN = 128
NUM_LAYERS = 2

LANE = 128
SUBLANE = 8
_FULL_UNROLL_T = 128   # fully unroll the recurrence at trace time up to this length


def _round_up(x, m):
    return (x + m - 1) // m * m


def lipsync_kernel(x_ref, w_in_ref, b_in_ref,
                   w_ih0_ref, w_hh0_ref, b0_ref,
                   w_ih1_ref, w_hh1_ref, b1_ref,
                   w_out_ref, b_out_ref,
                   out_ref,
                   gates_scr, hseq_scr,
                   *, T, Bp):
    H = HIDDEN

    # ---- input projection over the whole sequence: one lane-aligned GEMM ----
    # (T*Bp, Apad) @ (Apad, H)
    xp = jnp.dot(x_ref[...], w_in_ref[...],
                 preferred_element_type=jnp.float32) + b_in_ref[...]

    # ---- hoisted input-to-hidden gates for layer 0 (off the serial path) ----
    # (T*Bp, H) @ (H, 4H) + (b_ih + b_hh)
    gates_scr[...] = jnp.dot(xp, w_ih0_ref[...],
                             preferred_element_type=jnp.float32) + b0_ref[...]

    def run_layer(w_hh_ref):
        w_hh = w_hh_ref[...]   # (H, 4H), kept resident across the whole time loop

        def step(row_start, carry):
            h, c = carry
            rows = pl.ds(row_start, Bp)
            gates = gates_scr[rows, :] + jnp.dot(
                h, w_hh, preferred_element_type=jnp.float32)       # (Bp, 4H)
            i = jax.nn.sigmoid(gates[:, 0 * H:1 * H])
            f = jax.nn.sigmoid(gates[:, 1 * H:2 * H])
            g = jnp.tanh(gates[:, 2 * H:3 * H])
            o = jax.nn.sigmoid(gates[:, 3 * H:4 * H])
            c = f * c + i * g
            h = o * jnp.tanh(c)
            hseq_scr[rows, :] = h
            return (h, c)

        carry = (jnp.zeros((Bp, H), jnp.float32),
                 jnp.zeros((Bp, H), jnp.float32))
        if T <= _FULL_UNROLL_T:
            # Full unroll (static row offsets) -> LLO interleaves MXU push/pop,
            # EUP sigmoid/tanh and VPU gate math across adjacent timesteps.
            for t in range(T):
                carry = step(t * Bp, carry)
        else:
            # TODO(synk): for very long T, stream gate/hidden chunks from HBM
            # (memory_space=pl.ANY + make_async_copy) to stay inside v7x's 64 MiB VMEM.
            def body(t, carry):
                return step(pl.multiple_of(t * Bp, Bp), carry)
            lax.fori_loop(0, T, body, carry)

    # ---- layer 0 ----
    run_layer(w_hh0_ref)

    # ---- hoisted input-to-hidden gates for layer 1 from layer-0 hidden seq ----
    gates_scr[...] = jnp.dot(hseq_scr[...], w_ih1_ref[...],
                             preferred_element_type=jnp.float32) + b1_ref[...]

    # ---- layer 1 (eval mode: no inter-layer dropout) ----
    run_layer(w_hh1_ref)

    # ---- output projection, lane-dense (Mpad = 128): (T*Bp, H) @ (H, Mpad) ----
    out_ref[...] = jnp.dot(hseq_scr[...], w_out_ref[...],
                           preferred_element_type=jnp.float32) + b_out_ref[...]


def lipsync_forward(audio, params):
    """audio: (B, T, AUDIO_DIM) float32, batch_first like the PyTorch module."""
    B, T, A = audio.shape
    assert A == AUDIO_DIM
    H = HIDDEN
    Bp = _round_up(max(B, SUBLANE), SUBLANE)      # pad tiny batch to full sublanes
    Apad = _round_up(A, LANE)                     # 464 -> 512: clean 128-lane K tiles
    Mpad = _round_up(MOUTH_DIM, LANE)             # 31 -> 128: unmasked (lane-dense) stores

    # Wrapper-side layout plumbing (free relative to in-kernel XLU / VMEM copies):
    # time-major, zero-padded, flattened to a 2-D (T*Bp, Apad) slab.
    x = jnp.transpose(audio, (1, 0, 2))                              # (T, B, A)
    x = jnp.pad(x, ((0, 0), (0, Bp - B), (0, Apad - A)))             # (T, Bp, Apad)
    x = x.reshape(T * Bp, Apad)

    w_in = jnp.pad(params["w_in"], ((0, Apad - A), (0, 0)))          # zero-filled pad rows
    w_out = jnp.pad(params["w_out"], ((0, 0), (0, Mpad - MOUTH_DIM)))
    b_out = jnp.pad(params["b_out"], ((0, 0), (0, Mpad - MOUTH_DIM)))
    b0 = params["b_ih0"] + params["b_hh0"]                           # combined LSTM biases
    b1 = params["b_ih1"] + params["b_hh1"]

    args = (x, w_in, params["b_in"],
            params["w_ih0"], params["w_hh0"], b0,
            params["w_ih1"], params["w_hh1"], b1,
            w_out, b_out)

    kernel = functools.partial(lipsync_kernel, T=T, Bp=Bp)
    out2d = pl.pallas_call(
        kernel,
        out_shape=jax.ShapeDtypeStruct((T * Bp, Mpad), jnp.float32),
        in_specs=[pl.BlockSpec(memory_space=pltpu.MemorySpace.VMEM)] * len(args),
        out_specs=pl.BlockSpec(memory_space=pltpu.MemorySpace.VMEM),
        scratch_shapes=[pltpu.VMEM((T * Bp, 4 * H), jnp.float32),   # hoisted ih-gates
                        pltpu.VMEM((T * Bp, H), jnp.float32)],      # hidden sequence
    )(*args)

    out = out2d.reshape(T, Bp, Mpad).transpose(1, 0, 2)              # (Bp, T, Mpad)
    return out[:B, :, :MOUTH_DIM]                                    # (B, T, 31)


def init_params(key):
    """Deterministic PyTorch-style uniform(-1/sqrt(fan), 1/sqrt(fan)) init."""
    ks = jax.random.split(key, 12)
    H, A, M = HIDDEN, AUDIO_DIM, MOUTH_DIM

    def u(k, shape, fan):
        bound = 1.0 / jnp.sqrt(fan)
        return jax.random.uniform(k, shape, jnp.float32, -bound, bound)

    return {
        # input_proj: nn.Linear(A, H) -> stored transposed (A, H)
        "w_in": u(ks[0], (A, H), A),
        "b_in": u(ks[1], (1, H), A),
        # LSTM layer 0 (input size H), weights stored transposed (in, 4H)
        "w_ih0": u(ks[2], (H, 4 * H), H),
        "w_hh0": u(ks[3], (H, 4 * H), H),
        "b_ih0": u(ks[4], (1, 4 * H), H),
        "b_hh0": u(ks[5], (1, 4 * H), H),
        # LSTM layer 1 (input size H)
        "w_ih1": u(ks[6], (H, 4 * H), H),
        "w_hh1": u(ks[7], (H, 4 * H), H),
        "b_ih1": u(ks[8], (1, 4 * H), H),
        "b_hh1": u(ks[9], (1, 4 * H), H),
        # output_proj: nn.Linear(H, M) -> stored transposed (H, M)
        "w_out": u(ks[10], (H, M), H),
        "b_out": u(ks[11], (1, M), H),
    }


def reference_forward(audio, p):
    """Pure-JAX reference of the same forward pass (for sanity checking)."""
    B, T, _ = audio.shape
    H = HIDDEN
    x = audio @ p["w_in"] + p["b_in"]                      # (B, T, H)

    def layer(x_seq, w_ih, w_hh, b_ih, b_hh):
        bias = b_ih + b_hh

        def step(carry, x_t):
            h, c = carry
            g = x_t @ w_ih + h @ w_hh + bias
            i = jax.nn.sigmoid(g[:, 0 * H:1 * H])
            f = jax.nn.sigmoid(g[:, 1 * H:2 * H])
            gg = jnp.tanh(g[:, 2 * H:3 * H])
            o = jax.nn.sigmoid(g[:, 3 * H:4 * H])
            c = f * c + i * gg
            h = o * jnp.tanh(c)
            return (h, c), h

        h0 = jnp.zeros((B, H), jnp.float32)
        _, hs = lax.scan(step, (h0, h0), x_seq.transpose(1, 0, 2))
        return hs.transpose(1, 0, 2)

    x = layer(x, p["w_ih0"], p["w_hh0"], p["b_ih0"], p["b_hh0"])
    x = layer(x, p["w_ih1"], p["w_hh1"], p["b_ih1"], p["b_hh1"])
    return x @ p["w_out"] + p["b_out"]


if __name__ == "__main__":
    B, T = 2, 8
    key = jax.random.PRNGKey(0)
    k_x, k_p = jax.random.split(key)
    audio = jax.random.normal(k_x, (B, T, AUDIO_DIM), jnp.float32)
    params = init_params(k_p)

    out = jax.block_until_ready(lipsync_forward(audio, params))
    assert out.shape == (B, T, MOUTH_DIM), out.shape

    ref = reference_forward(audio, params)
    err = float(jnp.max(jnp.abs(out - ref)))
    assert jnp.allclose(out, ref, rtol=1e-4, atol=1e-4), err

    print("KERNEL_OK")
</pallas_src>

<mosaic_0001>
module attributes {stable_mosaic.version = 11 : i64} {
  func.func @lipsync_kernel(%arg0: memref<64x512xf32, #tpu.memory_space<vmem>>, %arg1: memref<512x128xf32, #tpu.memory_space<vmem>>, %arg2: memref<1x128xf32, #tpu.memory_space<vmem>>, %arg3: memref<128x512xf32, #tpu.memory_space<vmem>>, %arg4: memref<128x512xf32, #tpu.memory_space<vmem>>, %arg5: memref<1x512xf32, #tpu.memory_space<vmem>>, %arg6: memref<128x512xf32, #tpu.memory_space<vmem>>, %arg7: memref<128x512xf32, #tpu.memory_space<vmem>>, %arg8: memref<1x512xf32, #tpu.memory_space<vmem>>, %arg9: memref<128x128xf32, #tpu.memory_space<vmem>>, %arg10: memref<1x128xf32, #tpu.memory_space<vmem>>, %arg11: memref<64x128xf32, #tpu.memory_space<vmem>>, %arg12: memref<64x512xf32, #tpu.memory_space<vmem>>, %arg13: memref<64x128xf32, #tpu.memory_space<vmem>>) attributes {dimension_semantics = [], scalar_prefetch = 0 : i64, scratch_operands = 2 : i64, tpu.core_type = #tpu.core_type<tc>} {
    %c0 = arith.constant 0 : index
    %c0_0 = arith.constant 0 : index
    %0 = vector.load %arg0[%c0, %c0_0] : memref<64x512xf32, #tpu.memory_space<vmem>>, vector<64x512xf32>
    %c0_1 = arith.constant 0 : index
    %c0_2 = arith.constant 0 : index
    %1 = vector.load %arg1[%c0_1, %c0_2] : memref<512x128xf32, #tpu.memory_space<vmem>>, vector<512x128xf32>
    %cst = arith.constant dense<0.000000e+00> : vector<64x128xf32>
    %2 = tpu.matmul %0, %1, %cst {dimension_numbers = #tpu.dot_dimension_numbers<[1], [0], [0], [1], [0, 0, 1, 1], [], []>} : vector<64x512xf32>, vector<512x128xf32>, vector<64x128xf32> -> vector<64x128xf32>
    %c0_3 = arith.constant 0 : index
    %c0_4 = arith.constant 0 : index
    %3 = vector.load %arg2[%c0_3, %c0_4] : memref<1x128xf32, #tpu.memory_space<vmem>>, vector<1x128xf32>
    %4 = vector.broadcast %3 : vector<1x128xf32> to vector<64x128xf32>
    %5 = arith.addf %2, %4 : vector<64x128xf32>
    %c0_5 = arith.constant 0 : index
    %c0_6 = arith.constant 0 : index
    %6 = vector.load %arg3[%c0_5, %c0_6] : memref<128x512xf32, #tpu.memory_space<vmem>>, vector<128x512xf32>
    %cst_7 = arith.constant dense<0.000000e+00> : vector<64x512xf32>
    %7 = tpu.matmul %5, %6, %cst_7 {dimension_numbers = #tpu.dot_dimension_numbers<[1], [0], [0], [1], [0, 0, 1, 1], [], []>} : vector<64x128xf32>, vector<128x512xf32>, vector<64x512xf32> -> vector<64x512xf32>
    %c0_8 = arith.constant 0 : index
    %c0_9 = arith.constant 0 : index
    %8 = vector.load %arg5[%c0_8, %c0_9] : memref<1x512xf32, #tpu.memory_space<vmem>>, vector<1x512xf32>
    %9 = vector.broadcast %8 : vector<1x512xf32> to vector<64x512xf32>
    %10 = arith.addf %7, %9 : vector<64x512xf32>
    %c0_10 = arith.constant 0 : index
    %c0_11 = arith.constant 0 : index
    %11 = vector.load %arg12[%c0_10, %c0_11] : memref<64x512xf32, #tpu.memory_space<vmem>>, vector<64x512xf32>
    tpu.vector_store %arg12[%c0_10, %c0_11], %10 {strides = array<i32>} : memref<64x512xf32, #tpu.memory_space<vmem>>, vector<64x512xf32>,
    %c0_12 = arith.constant 0 : index
    %c0_13 = arith.constant 0 : index
    %12 = vector.load %arg4[%c0_12, %c0_13] : memref<128x512xf32, #tpu.memory_space<vmem>>, vector<128x512xf32>
    %cst_14 = arith.constant 0.000000e+00 : f32
    %13 = vector.broadcast %cst_14 : f32 to vector<8x128xf32>
    %cst_15 = arith.constant 0.000000e+00 : f32
    %14 = vector.broadcast %cst_15 : f32 to vector<8x128xf32>
    %c0_16 = arith.constant 0 : index
    %c0_17 = arith.constant 0 : index
    %15 = vector.load %arg12[%c0_16, %c0_17] : memref<64x512xf32, #tpu.memory_space<vmem>>, vector<8x512xf32>
    %cst_18 = arith.constant dense<0.000000e+00> : vector<8x512xf32>
    %16 = tpu.matmul %13, %12, %cst_18 {dimension_numbers = #tpu.dot_dimension_numbers<[1], [0], [0], [1], [0, 0, 1, 1], [], []>} : vector<8x128xf32>, vector<128x512xf32>, vector<8x512xf32> -> vector<8x512xf32>
    %17 = arith.addf %15, %16 : vector<8x512xf32>
    %18 = vector.extract_strided_slice %17 {offsets = [0, 0], sizes = [8, 128], strides = [1, 1]} : vector<8x512xf32> to vector<8x128xf32>
    %19 = arith.negf %18 : vector<8x128xf32>
    %20 = math.exp %19 : vector<8x128xf32>
    %cst_19 = arith.constant 1.000000e+00 : f32
    %21 = vector.broadcast %cst_19 : f32 to vector<8x128xf32>
    %22 = arith.addf %21, %20 : vector<8x128xf32>
    %23 = arith.divf %21, %22 : vector<8x128xf32>
    %24 = vector.extract_strided_slice %17 {offsets = [0, 128], sizes = [8, 128], strides = [1, 1]} : vector<8x512xf32> to vector<8x128xf32>
    %25 = arith.negf %24 : vector<8x128xf32>
    %26 = math.exp %25 : vector<8x128xf32>
    %cst_20 = arith.constant 1.000000e+00 : f32
    %27 = vector.broadcast %cst_20 : f32 to vector<8x128xf32>
    %28 = arith.addf %27, %26 : vector<8x128xf32>
    %29 = arith.divf %27, %28 : vector<8x128xf32>
    %30 = vector.extract_strided_slice %17 {offsets = [0, 256], sizes = [8, 128], strides = [1, 1]} : vector<8x512xf32> to vector<8x128xf32>
    %31 = math.tanh %30 : vector<8x128xf32>
    %32 = vector.extract_strided_slice %17 {offsets = [0, 384], sizes = [8, 128], strides = [1, 1]} : vector<8x512xf32> to vector<8x128xf32>
    %33 = arith.negf %32 : vector<8x128xf32>
    %34 = math.exp %33 : vector<8x128xf32>
    %cst_21 = arith.constant 1.000000e+00 : f32
    %35 = vector.broadcast %cst_21 : f32 to vector<8x128xf32>
    %36 = arith.addf %35, %34 : vector<8x128xf32>
    %37 = arith.divf %35, %36 : vector<8x128xf32>
    %38 = arith.mulf %29, %14 : vector<8x128xf32>
    %39 = arith.mulf %23, %31 : vector<8x128xf32>
    %40 = arith.addf %38, %39 : vector<8x128xf32>
    %41 = math.tanh %40 : vector<8x128xf32>
    %42 = arith.mulf %37, %41 : vector<8x128xf32>
    %c0_22 = arith.constant 0 : index
    %c0_23 = arith.constant 0 : index
    %43 = vector.load %arg13[%c0_22, %c0_23] : memref<64x128xf32, #tpu.memory_space<vmem>>, vector<8x128xf32>
    tpu.vector_store %arg13[%c0_22, %c0_23], %42 {strides = array<i32>} : memref<64x128xf32, #tpu.memory_space<vmem>>, vector<8x128xf32>,
    %c8 = arith.constant 8 : index
    %c0_24 = arith.constant 0 : index
    %44 = vector.load %arg12[%c8, %c0_24] : memref<64x512xf32, #tpu.memory_space<vmem>>, vector<8x512xf32>
    %cst_25 = arith.constant dense<0.000000e+00> : vector<8x512xf32>
    %45 = tpu.matmul %42, %12, %cst_25 {dimension_numbers = #tpu.dot_dimension_numbers<[1], [0], [0], [1], [0, 0, 1, 1], [], []>} : vector<8x128xf32>, vector<128x512xf32>, vector<8x512xf32> -> vector<8x512xf32>
    %46 = arith.addf %44, %45 : vector<8x512xf32>
    %47 = vector.extract_strided_slice %46 {offsets = [0, 0], sizes = [8, 128], strides = [1, 1]} : vector<8x512xf32> to vector<8x128xf32>
    %48 = arith.negf %47 : vector<8x128xf32>
    %49 = math.exp %48 : vector<8x128xf32>
    %cst_26 = arith.constant 1.000000e+00 : f32
    %50 = vector.broadcast %cst_26 : f32 to vector<8x128xf32>
    %51 = arith.addf %50, %49 : vector<8x128xf32>
    %52 = arith.divf %50, %51 : vector<8x128xf32>
    %53 = vector.extract_strided_slice %46 {offsets = [0, 128], sizes = [8, 128], strides = [1, 1]} : vector<8x512xf32> to vector<8x128xf32>
    %54 = arith.negf %53 : vector<8x128xf32>
    %55 = math.exp %54 : vector<8x128xf32>
    %cst_27 = arith.constant 1.000000e+00 : f32
    %56 = vector.broadcast %cst_27 : f32 to vector<8x128xf32>
    %57 = arith.addf %56, %55 : vector<8x128xf32>
    %58 = arith.divf %56, %57 : vector<8x128xf32>
    %59 = vector.extract_strided_slice %46 {offsets = [0, 256], sizes = [8, 128], strides = [1, 1]} : vector<8x512xf32> to vector<8x128xf32>
    %60 = math.tanh %59 : vector<8x128xf32>
    %61 = vector.extract_strided_slice %46 {offsets = [0, 384], sizes = [8, 128], strides = [1, 1]} : vector<8x512xf32> to vector<8x128xf32>
    %62 = arith.negf %61 : vector<8x128xf32>
    %63 = math.exp %62 : vector<8x128xf32>
    %cst_28 = arith.constant 1.000000e+00 : f32
    %64 = vector.broadcast %cst_28 : f32 to vector<8x128xf32>
    %65 = arith.addf %64, %63 : vector<8x128xf32>
    %66 = arith.divf %64, %65 : vector<8x128xf32>
    %67 = arith.mulf %58, %40 : vector<8x128xf32>
    %68 = arith.mulf %52, %60 : vector<8x128xf32>
    %69 = arith.addf %67, %68 : vector<8x128xf32>
    %70 = math.tanh %69 : vector<8x128xf32>
    %71 = arith.mulf %66, %70 : vector<8x128xf32>
    %c8_29 = arith.constant 8 : index
    %c0_30 = arith.constant 0 : index
    %72 = vector.load %arg13[%c8_29, %c0_30] : memref<64x128xf32, #tpu.memory_space<vmem>>, vector<8x128xf32>
    tpu.vector_store %arg13[%c8_29, %c0_30], %71 {strides = array<i32>} : memref<64x128xf32, #tpu.memory_space<vmem>>, vector<8x128xf32>,
    %c16 = arith.constant 16 : index
    %c0_31 = arith.constant 0 : index
    %73 = vector.load %arg12[%c16, %c0_31] : memref<64x512xf32, #tpu.memory_space<vmem>>, vector<8x512xf32>
    %cst_32 = arith.constant dense<0.000000e+00> : vector<8x512xf32>
    %74 = tpu.matmul %71, %12, %cst_32 {dimension_numbers = #tpu.dot_dimension_numbers<[1], [0], [0], [1], [0, 0, 1, 1], [], []>} : vector<8x128xf32>, vector<128x512xf32>, vector<8x512xf32> -> vector<8x512xf32>
    %75 = arith.addf %73, %74 : vector<8x512xf32>
    %76 = vector.extract_strided_slice %75 {offsets = [0, 0], sizes = [8, 128], strides = [1, 1]} : vector<8x512xf32> to vector<8x128xf32>
    %77 = arith.negf %76 : vector<8x128xf32>
    %78 = math.exp %77 : vector<8x128xf32>
    %cst_33 = arith.constant 1.000000e+00 : f32
    %79 = vector.broadcast %cst_33 : f32 to vector<8x128xf32>
    %80 = arith.addf %79, %78 : vector<8x128xf32>
    %81 = arith.divf %79, %80 : vector<8x128xf32>
    %82 = vector.extract_strided_slice %75 {offsets = [0, 128], sizes = [8, 128], strides = [1, 1]} : vector<8x512xf32> to vector<8x128xf32>
    %83 = arith.negf %82 : vector<8x128xf32>
    %84 = math.exp %83 : vector<8x128xf32>
    %cst_34 = arith.constant 1.000000e+00 : f32
    %85 = vector.broadcast %cst_34 : f32 to vector<8x128xf32>
    %86 = arith.addf %85, %84 : vector<8x128xf32>
    %87 = arith.divf %85, %86 : vector<8x128xf32>
    %88 = vector.extract_strided_slice %75 {offsets = [0, 256], sizes = [8, 128], strides = [1, 1]} : vector<8x512xf32> to vector<8x128xf32>
    %89 = math.tanh %88 : vector<8x128xf32>
    %90 = vector.extract_strided_slice %75 {offsets = [0, 384], sizes = [8, 128], strides = [1, 1]} : vector<8x512xf32> to vector<8x128xf32>
    %91 = arith.negf %90 : vector<8x128xf32>
    %92 = math.exp %91 : vector<8x128xf32>
    %cst_35 = arith.constant 1.000000e+00 : f32
    %93 = vector.broadcast %cst_35 : f32 to vector<8x128xf32>
    %94 = arith.addf %93, %92 : vector<8x128xf32>
    %95 = arith.divf %93, %94 : vector<8x128xf32>
    %96 = arith.mulf %87, %69 : vector<8x128xf32>
    %97 = arith.mulf %81, %89 : vector<8x128xf32>
    %98 = arith.addf %96, %97 : vector<8x128xf32>
    %99 = math.tanh %98 : vector<8x128xf32>
    %100 = arith.mulf %95, %99 : vector<8x128xf32>
    %c16_36 = arith.constant 16 : index
    %c0_37 = arith.constant 0 : index
    %101 = vector.load %arg13[%c16_36, %c0_37] : memref<64x128xf32, #tpu.memory_space<vmem>>, vector<8x128xf32>
    tpu.vector_store %arg13[%c16_36, %c0_37], %100 {strides = array<i32>} : memref<64x128xf32, #tpu.memory_space<vmem>>, vector<8x128xf32>,
    %c24 = arith.constant 24 : index
    %c0_38 = arith.constant 0 : index
    %102 = vector.load %arg12[%c24, %c0_38] : memref<64x512xf32, #tpu.memory_space<vmem>>, vector<8x512xf32>
    %cst_39 = arith.constant dense<0.000000e+00> : vector<8x512xf32>
    %103 = tpu.matmul %100, %12, %cst_39 {dimension_numbers = #tpu.dot_dimension_numbers<[1], [0], [0], [1], [0, 0, 1, 1], [], []>} : vector<8x128xf32>, vector<128x512xf32>, vector<8x512xf32> -> vector<8x512xf32>
    %104 = arith.addf %102, %103 : vector<8x512xf32>
    %105 = vector.extract_strided_slice %104 {offsets = [0, 0], sizes = [8, 128], strides = [1, 1]} : vector<8x512xf32> to vector<8x128xf32>
    %106 = arith.negf %105 : vector<8x128xf32>
    %107 = math.exp %106 : vector<8x128xf32>
    %cst_40 = arith.constant 1.000000e+00 : f32
    %108 = vector.broadcast %cst_40 : f32 to vector<8x128xf32>
    %109 = arith.addf %108, %107 : vector<8x128xf32>
    %110 = arith.divf %108, %109 : vector<8x128xf32>
    %111 = vector.extract_strided_slice %104 {offsets = [0, 128], sizes = [8, 128], strides = [1, 1]} : vector<8x512xf32> to vector<8x128xf32>
    %112 = arith.negf %111 : vector<8x128xf32>
    %113 = math.exp %112 : vector<8x128xf32>
    %cst_41 = arith.constant 1.000000e+00 : f32
    %114 = vector.broadcast %cst_41 : f32 to vector<8x128xf32>
    %115 = arith.addf %114, %113 : vector<8x128xf32>
    %116 = arith.divf %114, %115 : vector<8x128xf32>
    %117 = vector.extract_strided_slice %104 {offsets = [0, 256], sizes = [8, 128], strides = [1, 1]} : vector<8x512xf32> to vector<8x128xf32>
    %118 = math.tanh %117 : vector<8x128xf32>
    %119 = vector.extract_strided_slice %104 {offsets = [0, 384], sizes = [8, 128], strides = [1, 1]} : vector<8x512xf32> to vector<8x128xf32>
    %120 = arith.negf %119 : vector<8x128xf32>
    %121 = math.exp %120 : vector<8x128xf32>
    %cst_42 = arith.constant 1.000000e+00 : f32
    %122 = vector.broadcast %cst_42 : f32 to vector<8x128xf32>
    %123 = arith.addf %122, %121 : vector<8x128xf32>
    %124 = arith.divf %122, %123 : vector<8x128xf32>
    %125 = arith.mulf %116, %98 : vector<8x128xf32>
    %126 = arith.mulf %110, %118 : vector<8x128xf32>
    %127 = arith.addf %125, %126 : vector<8x128xf32>
    %128 = math.tanh %127 : vector<8x128xf32>
    %129 = arith.mulf %124, %128 : vector<8x128xf32>
    %c24_43 = arith.constant 24 : index
    %c0_44 = arith.constant 0 : index
    %130 = vector.load %arg13[%c24_43, %c0_44] : memref<64x128xf32, #tpu.memory_space<vmem>>, vector<8x128xf32>
    tpu.vector_store %arg13[%c24_43, %c0_44], %129 {strides = array<i32>} : memref<64x128xf32, #tpu.memory_space<vmem>>, vector<8x128xf32>,
    %c32 = arith.constant 32 : index
    %c0_45 = arith.constant 0 : index
    %131 = vector.load %arg12[%c32, %c0_45] : memref<64x512xf32, #tpu.memory_space<vmem>>, vector<8x512xf32>
    %cst_46 = arith.constant dense<0.000000e+00> : vector<8x512xf32>
    %132 = tpu.matmul %129, %12, %cst_46 {dimension_numbers = #tpu.dot_dimension_numbers<[1], [0], [0], [1], [0, 0, 1, 1], [], []>} : vector<8x128xf32>, vector<128x512xf32>, vector<8x512xf32> -> vector<8x512xf32>
    %133 = arith.addf %131, %132 : vector<8x512xf32>
    %134 = vector.extract_strided_slice %133 {offsets = [0, 0], sizes = [8, 128], strides = [1, 1]} : vector<8x512xf32> to vector<8x128xf32>
    %135 = arith.negf %134 : vector<8x128xf32>
    %136 = math.exp %135 : vector<8x128xf32>
    %cst_47 = arith.constant 1.000000e+00 : f32
    %137 = vector.broadcast %cst_47 : f32 to vector<8x128xf32>
    %138 = arith.addf %137, %136 : vector<8x128xf32>
    %139 = arith.divf %137, %138 : vector<8x128xf32>
    %140 = vector.extract_strided_slice %133 {offsets = [0, 128], sizes = [8, 128], strides = [1, 1]} : vector<8x512xf32> to vector<8x128xf32>
    %141 = arith.negf %140 : vector<8x128xf32>
    %142 = math.exp %141 : vector<8x128xf32>
    %cst_48 = arith.constant 1.000000e+00 : f32
    %143 = vector.broadcast %cst_48 : f32 to vector<8x128xf32>
    %144 = arith.addf %143, %142 : vector<8x128xf32>
    %145 = arith.divf %143, %144 : vector<8x128xf32>
    %146 = vector.extract_strided_slice %133 {offsets = [0, 256], sizes = [8, 128], strides = [1, 1]} : vector<8x512xf32> to vector<8x128xf32>
    %147 = math.tanh %146 : vector<8x128xf32>
    %148 = vector.extract_strided_slice %133 {offsets = [0, 384], sizes = [8, 128], strides = [1, 1]} : vector<8x512xf32> to vector<8x128xf32>
    %149 = arith.negf %148 : vector<8x128xf32>
    %150 = math.exp %149 : vector<8x128xf32>
    %cst_49 = arith.constant 1.000000e+00 : f32
    %151 = vector.broadcast %cst_49 : f32 to vector<8x128xf32>
    %152 = arith.addf %151, %150 : vector<8x128xf32>
    %153 = arith.divf %151, %152 : vector<8x128xf32>
    %154 = arith.mulf %145, %127 : vector<8x128xf32>
    %155 = arith.mulf %139, %147 : vector<8x128xf32>
    %156 = arith.addf %154, %155 : vector<8x128xf32>
    %157 = math.tanh %156 : vector<8x128xf32>
    %158 = arith.mulf %153, %157 : vector<8x128xf32>
    %c32_50 = arith.constant 32 : index
    %c0_51 = arith.constant 0 : index
    %159 = vector.load %arg13[%c32_50, %c0_51] : memref<64x128xf32, #tpu.memory_space<vmem>>, vector<8x128xf32>
    tpu.vector_store %arg13[%c32_50, %c0_51], %158 {strides = array<i32>} : memref<64x128xf32, #tpu.memory_space<vmem>>, vector<8x128xf32>,
    %c40 = arith.constant 40 : index
    %c0_52 = arith.constant 0 : index
    %160 = vector.load %arg12[%c40, %c0_52] : memref<64x512xf32, #tpu.memory_space<vmem>>, vector<8x512xf32>
    %cst_53 = arith.constant dense<0.000000e+00> : vector<8x512xf32>
    %161 = tpu.matmul %158, %12, %cst_53 {dimension_numbers = #tpu.dot_dimension_numbers<[1], [0], [0], [1], [0, 0, 1, 1], [], []>} : vector<8x128xf32>, vector<128x512xf32>, vector<8x512xf32> -> vector<8x512xf32>
    %162 = arith.addf %160, %161 : vector<8x512xf32>
    %163 = vector.extract_strided_slice %162 {offsets = [0, 0], sizes = [8, 128], strides = [1, 1]} : vector<8x512xf32> to vector<8x128xf32>
    %164 = arith.negf %163 : vector<8x128xf32>
    %165 = math.exp %164 : vector<8x128xf32>
    %cst_54 = arith.constant 1.000000e+00 : f32
    %166 = vector.broadcast %cst_54 : f32 to vector<8x128xf32>
    %167 = arith.addf %166, %165 : vector<8x128xf32>
    %168 = arith.divf %166, %167 : vector<8x128xf32>
    %169 = vector.extract_strided_slice %162 {offsets = [0, 128], sizes = [8, 128], strides = [1, 1]} : vector<8x512xf32> to vector<8x128xf32>
    %170 = arith.negf %169 : vector<8x128xf32>
    %171 = math.exp %170 : vector<8x128xf32>
    %cst_55 = arith.constant 1.000000e+00 : f32
    %172 = vector.broadcast %cst_55 : f32 to vector<8x128xf32>
    %173 = arith.addf %172, %171 : vector<8x128xf32>
    %174 = arith.divf %172, %173 : vector<8x128xf32>
    %175 = vector.extract_strided_slice %162 {offsets = [0, 256], sizes = [8, 128], strides = [1, 1]} : vector<8x512xf32> to vector<8x128xf32>
    %176 = math.tanh %175 : vector<8x128xf32>
    %177 = vector.extract_strided_slice %162 {offsets = [0, 384], sizes = [8, 128], strides = [1, 1]} : vector<8x512xf32> to vector<8x128xf32>
    %178 = arith.negf %177 : vector<8x128xf32>
    %179 = math.exp %178 : vector<8x128xf32>
    %cst_56 = arith.constant 1.000000e+00 : f32
    %180 = vector.broadcast %cst_56 : f32 to vector<8x128xf32>
    %181 = arith.addf %180, %179 : vector<8x128xf32>
    %182 = arith.divf %180, %181 : vector<8x128xf32>
    %183 = arith.mulf %174, %156 : vector<8x128xf32>
    %184 = arith.mulf %168, %176 : vector<8x128xf32>
    %185 = arith.addf %183, %184 : vector<8x128xf32>
    %186 = math.tanh %185 : vector<8x128xf32>
    %187 = arith.mulf %182, %186 : vector<8x128xf32>
    %c40_57 = arith.constant 40 : index
    %c0_58 = arith.constant 0 : index
    %188 = vector.load %arg13[%c40_57, %c0_58] : memref<64x128xf32, #tpu.memory_space<vmem>>, vector<8x128xf32>
    tpu.vector_store %arg13[%c40_57, %c0_58], %187 {strides = array<i32>} : memref<64x128xf32, #tpu.memory_space<vmem>>, vector<8x128xf32>,
    %c48 = arith.constant 48 : index
    %c0_59 = arith.constant 0 : index
    %189 = vector.load %arg12[%c48, %c0_59] : memref<64x512xf32, #tpu.memory_space<vmem>>, vector<8x512xf32>
    %cst_60 = arith.constant dense<0.000000e+00> : vector<8x512xf32>
    %190 = tpu.matmul %187, %12, %cst_60 {dimension_numbers = #tpu.dot_dimension_numbers<[1], [0], [0], [1], [0, 0, 1, 1], [], []>} : vector<8x128xf32>, vector<128x512xf32>, vector<8x512xf32> -> vector<8x512xf32>
    %191 = arith.addf %189, %190 : vector<8x512xf32>
    %192 = vector.extract_strided_slice %191 {offsets = [0, 0], sizes = [8, 128], strides = [1, 1]} : vector<8x512xf32> to vector<8x128xf32>
    %193 = arith.negf %192 : vector<8x128xf32>
    %194 = math.exp %193 : vector<8x128xf32>
    %cst_61 = arith.constant 1.000000e+00 : f32
    %195 = vector.broadcast %cst_61 : f32 to vector<8x128xf32>
    %196 = arith.addf %195, %194 : vector<8x128xf32>
    %197 = arith.divf %195, %196 : vector<8x128xf32>
    %198 = vector.extract_strided_slice %191 {offsets = [0, 128], sizes = [8, 128], strides = [1, 1]} : vector<8x512xf32> to vector<8x128xf32>
    %199 = arith.negf %198 : vector<8x128xf32>
    %200 = math.exp %199 : vector<8x128xf32>
    %cst_62 = arith.constant 1.000000e+00 : f32
    %201 = vector.broadcast %cst_62 : f32 to vector<8x128xf32>
    %202 = arith.addf %201, %200 : vector<8x128xf32>
    %203 = arith.divf %201, %202 : vector<8x128xf32>
    %204 = vector.extract_strided_slice %191 {offsets = [0, 256], sizes = [8, 128], strides = [1, 1]} : vector<8x512xf32> to vector<8x128xf32>
    %205 = math.tanh %204 : vector<8x128xf32>
    %206 = vector.extract_strided_slice %191 {offsets = [0, 384], sizes = [8, 128], strides = [1, 1]} : vector<8x512xf32> to vector<8x128xf32>
    %207 = arith.negf %206 : vector<8x128xf32>
    %208 = math.exp %207 : vector<8x128xf32>
    %cst_63 = arith.constant 1.000000e+00 : f32
    %209 = vector.broadcast %cst_63 : f32 to vector<8x128xf32>
    %210 = arith.addf %209, %208 : vector<8x128xf32>
    %211 = arith.divf %209, %210 : vector<8x128xf32>
    %212 = arith.mulf %203, %185 : vector<8x128xf32>
    %213 = arith.mulf %197, %205 : vector<8x128xf32>
    %214 = arith.addf %212, %213 : vector<8x128xf32>
    %215 = math.tanh %214 : vector<8x128xf32>
    %216 = arith.mulf %211, %215 : vector<8x128xf32>
    %c48_64 = arith.constant 48 : index
    %c0_65 = arith.constant 0 : index
    %217 = vector.load %arg13[%c48_64, %c0_65] : memref<64x128xf32, #tpu.memory_space<vmem>>, vector<8x128xf32>
    tpu.vector_store %arg13[%c48_64, %c0_65], %216 {strides = array<i32>} : memref<64x128xf32, #tpu.memory_space<vmem>>, vector<8x128xf32>,
    %c56 = arith.constant 56 : index
    %c0_66 = arith.constant 0 : index
    %218 = vector.load %arg12[%c56, %c0_66] : memref<64x512xf32, #tpu.memory_space<vmem>>, vector<8x512xf32>
    %cst_67 = arith.constant dense<0.000000e+00> : vector<8x512xf32>
    %219 = tpu.matmul %216, %12, %cst_67 {dimension_numbers = #tpu.dot_dimension_numbers<[1], [0], [0], [1], [0, 0, 1, 1], [], []>} : vector<8x128xf32>, vector<128x512xf32>, vector<8x512xf32> -> vector<8x512xf32>
    %220 = arith.addf %218, %219 : vector<8x512xf32>
    %221 = vector.extract_strided_slice %220 {offsets = [0, 0], sizes = [8, 128], strides = [1, 1]} : vector<8x512xf32> to vector<8x128xf32>
    %222 = arith.negf %221 : vector<8x128xf32>
    %223 = math.exp %222 : vector<8x128xf32>
    %cst_68 = arith.constant 1.000000e+00 : f32
    %224 = vector.broadcast %cst_68 : f32 to vector<8x128xf32>
    %225 = arith.addf %224, %223 : vector<8x128xf32>
    %226 = arith.divf %224, %225 : vector<8x128xf32>
    %227 = vector.extract_strided_slice %220 {offsets = [0, 128], sizes = [8, 128], strides = [1, 1]} : vector<8x512xf32> to vector<8x128xf32>
    %228 = arith.negf %227 : vector<8x128xf32>
    %229 = math.exp %228 : vector<8x128xf32>
    %cst_69 = arith.constant 1.000000e+00 : f32
    %230 = vector.broadcast %cst_69 : f32 to vector<8x128xf32>
    %231 = arith.addf %230, %229 : vector<8x128xf32>
    %232 = arith.divf %230, %231 : vector<8x128xf32>
    %233 = vector.extract_strided_slice %220 {offsets = [0, 256], sizes = [8, 128], strides = [1, 1]} : vector<8x512xf32> to vector<8x128xf32>
    %234 = math.tanh %233 : vector<8x128xf32>
    %235 = vector.extract_strided_slice %220 {offsets = [0, 384], sizes = [8, 128], strides = [1, 1]} : vector<8x512xf32> to vector<8x128xf32>
    %236 = arith.negf %235 : vector<8x128xf32>
    %237 = math.exp %236 : vector<8x128xf32>
    %cst_70 = arith.constant 1.000000e+00 : f32
    %238 = vector.broadcast %cst_70 : f32 to vector<8x128xf32>
    %239 = arith.addf %238, %237 : vector<8x128xf32>
    %240 = arith.divf %238, %239 : vector<8x128xf32>
    %241 = arith.mulf %232, %214 : vector<8x128xf32>
    %242 = arith.mulf %226, %234 : vector<8x128xf32>
    %243 = arith.addf %241, %242 : vector<8x128xf32>
    %244 = math.tanh %243 : vector<8x128xf32>
    %245 = arith.mulf %240, %244 : vector<8x128xf32>
    %c56_71 = arith.constant 56 : index
    %c0_72 = arith.constant 0 : index
    %246 = vector.load %arg13[%c56_71, %c0_72] : memref<64x128xf32, #tpu.memory_space<vmem>>, vector<8x128xf32>
    tpu.vector_store %arg13[%c56_71, %c0_72], %245 {strides = array<i32>} : memref<64x128xf32, #tpu.memory_space<vmem>>, vector<8x128xf32>,
    %c0_73 = arith.constant 0 : index
    %c0_74 = arith.constant 0 : index
    %247 = vector.load %arg13[%c0_73, %c0_74] : memref<64x128xf32, #tpu.memory_space<vmem>>, vector<64x128xf32>
    %c0_75 = arith.constant 0 : index
    %c0_76 = arith.constant 0 : index
    %248 = vector.load %arg6[%c0_75, %c0_76] : memref<128x512xf32, #tpu.memory_space<vmem>>, vector<128x512xf32>
    %cst_77 = arith.constant dense<0.000000e+00> : vector<64x512xf32>
    %249 = tpu.matmul %247, %248, %cst_77 {dimension_numbers = #tpu.dot_dimension_numbers<[1], [0], [0], [1], [0, 0, 1, 1], [], []>} : vector<64x128xf32>, vector<128x512xf32>, vector<64x512xf32> -> vector<64x512xf32>
    %c0_78 = arith.constant 0 : index
    %c0_79 = arith.constant 0 : index
    %250 = vector.load %arg8[%c0_78, %c0_79] : memref<1x512xf32, #tpu.memory_space<vmem>>, vector<1x512xf32>
    %251 = vector.broadcast %250 : vector<1x512xf32> to vector<64x512xf32>
    %252 = arith.addf %249, %251 : vector<64x512xf32>
    %c0_80 = arith.constant 0 : index
    %c0_81 = arith.constant 0 : index
    %253 = vector.load %arg12[%c0_80, %c0_81] : memref<64x512xf32, #tpu.memory_space<vmem>>, vector<64x512xf32>
    tpu.vector_store %arg12[%c0_80, %c0_81], %252 {strides = array<i32>} : memref<64x512xf32, #tpu.memory_space<vmem>>, vector<64x512xf32>,
    %c0_82 = arith.constant 0 : index
    %c0_83 = arith.constant 0 : index
    %254 = vector.load %arg7[%c0_82, %c0_83] : memref<128x512xf32, #tpu.memory_space<vmem>>, vector<128x512xf32>
    %cst_84 = arith.constant 0.000000e+00 : f32
    %255 = vector.broadcast %cst_84 : f32 to vector<8x128xf32>
    %cst_85 = arith.constant 0.000000e+00 : f32
    %256 = vector.broadcast %cst_85 : f32 to vector<8x128xf32>
    %c0_86 = arith.constant 0 : index
    %c0_87 = arith.constant 0 : index
    %257 = vector.load %arg12[%c0_86, %c0_87] : memref<64x512xf32, #tpu.memory_space<vmem>>, vector<8x512xf32>
    %cst_88 = arith.constant dense<0.000000e+00> : vector<8x512xf32>
    %258 = tpu.matmul %255, %254, %cst_88 {dimension_numbers = #tpu.dot_dimension_numbers<[1], [0], [0], [1], [0, 0, 1, 1], [], []>} : vector<8x128xf32>, vector<128x512xf32>, vector<8x512xf32> -> vector<8x512xf32>
    %259 = arith.addf %257, %258 : vector<8x512xf32>
    %260 = vector.extract_strided_slice %259 {offsets = [0, 0], sizes = [8, 128], strides = [1, 1]} : vector<8x512xf32> to vector<8x128xf32>
    %261 = arith.negf %260 : vector<8x128xf32>
    %262 = math.exp %261 : vector<8x128xf32>
    %cst_89 = arith.constant 1.000000e+00 : f32
    %263 = vector.broadcast %cst_89 : f32 to vector<8x128xf32>
    %264 = arith.addf %263, %262 : vector<8x128xf32>
    %265 = arith.divf %263, %264 : vector<8x128xf32>
    %266 = vector.extract_strided_slice %259 {offsets = [0, 128], sizes = [8, 128], strides = [1, 1]} : vector<8x512xf32> to vector<8x128xf32>
    %267 = arith.negf %266 : vector<8x128xf32>
    %268 = math.exp %267 : vector<8x128xf32>
    %cst_90 = arith.constant 1.000000e+00 : f32
    %269 = vector.broadcast %cst_90 : f32 to vector<8x128xf32>
    %270 = arith.addf %269, %268 : vector<8x128xf32>
    %271 = arith.divf %269, %270 : vector<8x128xf32>
    %272 = vector.extract_strided_slice %259 {offsets = [0, 256], sizes = [8, 128], strides = [1, 1]} : vector<8x512xf32> to vector<8x128xf32>
    %273 = math.tanh %272 : vector<8x128xf32>
    %274 = vector.extract_strided_slice %259 {offsets = [0, 384], sizes = [8, 128], strides = [1, 1]} : vector<8x512xf32> to vector<8x128xf32>
    %275 = arith.negf %274 : vector<8x128xf32>
    %276 = math.exp %275 : vector<8x128xf32>
    %cst_91 = arith.constant 1.000000e+00 : f32
    %277 = vector.broadcast %cst_91 : f32 to vector<8x128xf32>
    %278 = arith.addf %277, %276 : vector<8x128xf32>
    %279 = arith.divf %277, %278 : vector<8x128xf32>
    %280 = arith.mulf %271, %256 : vector<8x128xf32>
    %281 = arith.mulf %265, %273 : vector<8x128xf32>
    %282 = arith.addf %280, %281 : vector<8x128xf32>
    %283 = math.tanh %282 : vector<8x128xf32>
    %284 = arith.mulf %279, %283 : vector<8x128xf32>
    %c0_92 = arith.constant 0 : index
    %c0_93 = arith.constant 0 : index
    %285 = vector.load %arg13[%c0_92, %c0_93] : memref<64x128xf32, #tpu.memory_space<vmem>>, vector<8x128xf32>
    tpu.vector_store %arg13[%c0_92, %c0_93], %284 {strides = array<i32>} : memref<64x128xf32, #tpu.memory_space<vmem>>, vector<8x128xf32>,
    %c8_94 = arith.constant 8 : index
    %c0_95 = arith.constant 0 : index
    %286 = vector.load %arg12[%c8_94, %c0_95] : memref<64x512xf32, #tpu.memory_space<vmem>>, vector<8x512xf32>
    %cst_96 = arith.constant dense<0.000000e+00> : vector<8x512xf32>
    %287 = tpu.matmul %284, %254, %cst_96 {dimension_numbers = #tpu.dot_dimension_numbers<[1], [0], [0], [1], [0, 0, 1, 1], [], []>} : vector<8x128xf32>, vector<128x512xf32>, vector<8x512xf32> -> vector<8x512xf32>
    %288 = arith.addf %286, %287 : vector<8x512xf32>
    %289 = vector.extract_strided_slice %288 {offsets = [0, 0], sizes = [8, 128], strides = [1, 1]} : vector<8x512xf32> to vector<8x128xf32>
    %290 = arith.negf %289 : vector<8x128xf32>
    %291 = math.exp %290 : vector<8x128xf32>
    %cst_97 = arith.constant 1.000000e+00 : f32
    %292 = vector.broadcast %cst_97 : f32 to vector<8x128xf32>
    %293 = arith.addf %292, %291 : vector<8x128xf32>
    %294 = arith.divf %292, %293 : vector<8x128xf32>
    %295 = vector.extract_strided_slice %288 {offsets = [0, 128], sizes = [8, 128], strides = [1, 1]} : vector<8x512xf32> to vector<8x128xf32>
    %296 = arith.negf %295 : vector<8x128xf32>
    %297 = math.exp %296 : vector<8x128xf32>
    %cst_98 = arith.constant 1.000000e+00 : f32
    %298 = vector.broadcast %cst_98 : f32 to vector<8x128xf32>
    %299 = arith.addf %298, %297 : vector<8x128xf32>
    %300 = arith.divf %298, %299 : vector<8x128xf32>
    %301 = vector.extract_strided_slice %288 {offsets = [0, 256], sizes = [8, 128], strides = [1, 1]} : vector<8x512xf32> to vector<8x128xf32>
    %302 = math.tanh %301 : vector<8x128xf32>
    %303 = vector.extract_strided_slice %288 {offsets = [0, 384], sizes = [8, 128], strides = [1, 1]} : vector<8x512xf32> to vector<8x128xf32>
    %304 = arith.negf %303 : vector<8x128xf32>
    %305 = math.exp %304 : vector<8x128xf32>
    %cst_99 = arith.constant 1.000000e+00 : f32
    %306 = vector.broadcast %cst_99 : f32 to vector<8x128xf32>
    %307 = arith.addf %306, %305 : vector<8x128xf32>
    %308 = arith.divf %306, %307 : vector<8x128xf32>
    %309 = arith.mulf %300, %282 : vector<8x128xf32>
    %310 = arith.mulf %294, %302 : vector<8x128xf32>
    %311 = arith.addf %309, %310 : vector<8x128xf32>
    %312 = math.tanh %311 : vector<8x128xf32>
    %313 = arith.mulf %308, %312 : vector<8x128xf32>
    %c8_100 = arith.constant 8 : index
    %c0_101 = arith.constant 0 : index
    %314 = vector.load %arg13[%c8_100, %c0_101] : memref<64x128xf32, #tpu.memory_space<vmem>>, vector<8x128xf32>
    tpu.vector_store %arg13[%c8_100, %c0_101], %313 {strides = array<i32>} : memref<64x128xf32, #tpu.memory_space<vmem>>, vector<8x128xf32>,
    %c16_102 = arith.constant 16 : index
    %c0_103 = arith.constant 0 : index
    %315 = vector.load %arg12[%c16_102, %c0_103] : memref<64x512xf32, #tpu.memory_space<vmem>>, vector<8x512xf32>
    %cst_104 = arith.constant dense<0.000000e+00> : vector<8x512xf32>
    %316 = tpu.matmul %313, %254, %cst_104 {dimension_numbers = #tpu.dot_dimension_numbers<[1], [0], [0], [1], [0, 0, 1, 1], [], []>} : vector<8x128xf32>, vector<128x512xf32>, vector<8x512xf32> -> vector<8x512xf32>
    %317 = arith.addf %315, %316 : vector<8x512xf32>
    %318 = vector.extract_strided_slice %317 {offsets = [0, 0], sizes = [8, 128], strides = [1, 1]} : vector<8x512xf32> to vector<8x128xf32>
    %319 = arith.negf %318 : vector<8x128xf32>
    %320 = math.exp %319 : vector<8x128xf32>
    %cst_105 = arith.constant 1.000000e+00 : f32
    %321 = vector.broadcast %cst_105 : f32 to vector<8x128xf32>
    %322 = arith.addf %321, %320 : vector<8x128xf32>
    %323 = arith.divf %321, %322 : vector<8x128xf32>
    %324 = vector.extract_strided_slice %317 {offsets = [0, 128], sizes = [8, 128], strides = [1, 1]} : vector<8x512xf32> to vector<8x128xf32>
    %325 = arith.negf %324 : vector<8x128xf32>
    %326 = math.exp %325 : vector<8x128xf32>
    %cst_106 = arith.constant 1.000000e+00 : f32
    %327 = vector.broadcast %cst_106 : f32 to vector<8x128xf32>
    %328 = arith.addf %327, %326 : vector<8x128xf32>
    %329 = arith.divf %327, %328 : vector<8x128xf32>
    %330 = vector.extract_strided_slice %317 {offsets = [0, 256], sizes = [8, 128], strides = [1, 1]} : vector<8x512xf32> to vector<8x128xf32>
    %331 = math.tanh %330 : vector<8x128xf32>
    %332 = vector.extract_strided_slice %317 {offsets = [0, 384], sizes = [8, 128], strides = [1, 1]} : vector<8x512xf32> to vector<8x128xf32>
    %333 = arith.negf %332 : vector<8x128xf32>
    %334 = math.exp %333 : vector<8x128xf32>
    %cst_107 = arith.constant 1.000000e+00 : f32
    %335 = vector.broadcast %cst_107 : f32 to vector<8x128xf32>
    %336 = arith.addf %335, %334 : vector<8x128xf32>
    %337 = arith.divf %335, %336 : vector<8x128xf32>
    %338 = arith.mulf %329, %311 : vector<8x128xf32>
    %339 = arith.mulf %323, %331 : vector<8x128xf32>
    %340 = arith.addf %338, %339 : vector<8x128xf32>
    %341 = math.tanh %340 : vector<8x128xf32>
    %342 = arith.mulf %337, %341 : vector<8x128xf32>
    %c16_108 = arith.constant 16 : index
    %c0_109 = arith.constant 0 : index
    %343 = vector.load %arg13[%c16_108, %c0_109] : memref<64x128xf32, #tpu.memory_space<vmem>>, vector<8x128xf32>
    tpu.vector_store %arg13[%c16_108, %c0_109], %342 {strides = array<i32>} : memref<64x128xf32, #tpu.memory_space<vmem>>, vector<8x128xf32>,
    %c24_110 = arith.constant 24 : index
    %c0_111 = arith.constant 0 : index
    %344 = vector.load %arg12[%c24_110, %c0_111] : memref<64x512xf32, #tpu.memory_space<vmem>>, vector<8x512xf32>
    %cst_112 = arith.constant dense<0.000000e+00> : vector<8x512xf32>
    %345 = tpu.matmul %342, %254, %cst_112 {dimension_numbers = #tpu.dot_dimension_numbers<[1], [0], [0], [1], [0, 0, 1, 1], [], []>} : vector<8x128xf32>, vector<128x512xf32>, vector<8x512xf32> -> vector<8x512xf32>
    %346 = arith.addf %344, %345 : vector<8x512xf32>
    %347 = vector.extract_strided_slice %346 {offsets = [0, 0], sizes = [8, 128], strides = [1, 1]} : vector<8x512xf32> to vector<8x128xf32>
    %348 = arith.negf %347 : vector<8x128xf32>
    %349 = math.exp %348 : vector<8x128xf32>
    %cst_113 = arith.constant 1.000000e+00 : f32
    %350 = vector.broadcast %cst_113 : f32 to vector<8x128xf32>
    %351 = arith.addf %350, %349 : vector<8x128xf32>
    %352 = arith.divf %350, %351 : vector<8x128xf32>
    %353 = vector.extract_strided_slice %346 {offsets = [0, 128], sizes = [8, 128], strides = [1, 1]} : vector<8x512xf32> to vector<8x128xf32>
    %354 = arith.negf %353 : vector<8x128xf32>
    %355 = math.exp %354 : vector<8x128xf32>
    %cst_114 = arith.constant 1.000000e+00 : f32
    %356 = vector.broadcast %cst_114 : f32 to vector<8x128xf32>
    %357 = arith.addf %356, %355 : vector<8x128xf32>
    %358 = arith.divf %356, %357 : vector<8x128xf32>
    %359 = vector.extract_strided_slice %346 {offsets = [0, 256], sizes = [8, 128], strides = [1, 1]} : vector<8x512xf32> to vector<8x128xf32>
    %360 = math.tanh %359 : vector<8x128xf32>
    %361 = vector.extract_strided_slice %346 {offsets = [0, 384], sizes = [8, 128], strides = [1, 1]} : vector<8x512xf32> to vector<8x128xf32>
    %362 = arith.negf %361 : vector<8x128xf32>
    %363 = math.exp %362 : vector<8x128xf32>
    %cst_115 = arith.constant 1.000000e+00 : f32
    %364 = vector.broadcast %cst_115 : f32 to vector<8x128xf32>
    %365 = arith.addf %364, %363 : vector<8x128xf32>
    %366 = arith.divf %364, %365 : vector<8x128xf32>
    %367 = arith.mulf %358, %340 : vector<8x128xf32>
    %368 = arith.mulf %352, %360 : vector<8x128xf32>
    %369 = arith.addf %367, %368 : vector<8x128xf32>
    %370 = math.tanh %369 : vector<8x128xf32>
    %371 = arith.mulf %366, %370 : vector<8x128xf32>
    %c24_116 = arith.constant 24 : index
    %c0_117 = arith.constant 0 : index
    %372 = vector.load %arg13[%c24_116, %c0_117] : memref<64x128xf32, #tpu.memory_space<vmem>>, vector<8x128xf32>
    tpu.vector_store %arg13[%c24_116, %c0_117], %371 {strides = array<i32>} : memref<64x128xf32, #tpu.memory_space<vmem>>, vector<8x128xf32>,
    %c32_118 = arith.constant 32 : index
    %c0_119 = arith.constant 0 : index
    %373 = vector.load %arg12[%c32_118, %c0_119] : memref<64x512xf32, #tpu.memory_space<vmem>>, vector<8x512xf32>
    %cst_120 = arith.constant dense<0.000000e+00> : vector<8x512xf32>
    %374 = tpu.matmul %371, %254, %cst_120 {dimension_numbers = #tpu.dot_dimension_numbers<[1], [0], [0], [1], [0, 0, 1, 1], [], []>} : vector<8x128xf32>, vector<128x512xf32>, vector<8x512xf32> -> vector<8x512xf32>
    %375 = arith.addf %373, %374 : vector<8x512xf32>
    %376 = vector.extract_strided_slice %375 {offsets = [0, 0], sizes = [8, 128], strides = [1, 1]} : vector<8x512xf32> to vector<8x128xf32>
    %377 = arith.negf %376 : vector<8x128xf32>
    %378 = math.exp %377 : vector<8x128xf32>
    %cst_121 = arith.constant 1.000000e+00 : f32
    %379 = vector.broadcast %cst_121 : f32 to vector<8x128xf32>
    %380 = arith.addf %379, %378 : vector<8x128xf32>
    %381 = arith.divf %379, %380 : vector<8x128xf32>
    %382 = vector.extract_strided_slice %375 {offsets = [0, 128], sizes = [8, 128], strides = [1, 1]} : vector<8x512xf32> to vector<8x128xf32>
    %383 = arith.negf %382 : vector<8x128xf32>
    %384 = math.exp %383 : vector<8x128xf32>
    %cst_122 = arith.constant 1.000000e+00 : f32
    %385 = vector.broadcast %cst_122 : f32 to vector<8x128xf32>
    %386 = arith.addf %385, %384 : vector<8x128xf32>
    %387 = arith.divf %385, %386 : vector<8x128xf32>
    %388 = vector.extract_strided_slice %375 {offsets = [0, 256], sizes = [8, 128], strides = [1, 1]} : vector<8x512xf32> to vector<8x128xf32>
    %389 = math.tanh %388 : vector<8x128xf32>
    %390 = vector.extract_strided_slice %375 {offsets = [0, 384], sizes = [8, 128], strides = [1, 1]} : vector<8x512xf32> to vector<8x128xf32>
    %391 = arith.negf %390 : vector<8x128xf32>
    %392 = math.exp %391 : vector<8x128xf32>
    %cst_123 = arith.constant 1.000000e+00 : f32
    %393 = vector.broadcast %cst_123 : f32 to vector<8x128xf32>
    %394 = arith.addf %393, %392 : vector<8x128xf32>
    %395 = arith.divf %393, %394 : vector<8x128xf32>
    %396 = arith.mulf %387, %369 : vector<8x128xf32>
    %397 = arith.mulf %381, %389 : vector<8x128xf32>
    %398 = arith.addf %396, %397 : vector<8x128xf32>
    %399 = math.tanh %398 : vector<8x128xf32>
    %400 = arith.mulf %395, %399 : vector<8x128xf32>
    %c32_124 = arith.constant 32 : index
    %c0_125 = arith.constant 0 : index
    %401 = vector.load %arg13[%c32_124, %c0_125] : memref<64x128xf32, #tpu.memory_space<vmem>>, vector<8x128xf32>
    tpu.vector_store %arg13[%c32_124, %c0_125], %400 {strides = array<i32>} : memref<64x128xf32, #tpu.memory_space<vmem>>, vector<8x128xf32>,
    %c40_126 = arith.constant 40 : index
    %c0_127 = arith.constant 0 : index
    %402 = vector.load %arg12[%c40_126, %c0_127] : memref<64x512xf32, #tpu.memory_space<vmem>>, vector<8x512xf32>
    %cst_128 = arith.constant dense<0.000000e+00> : vector<8x512xf32>
    %403 = tpu.matmul %400, %254, %cst_128 {dimension_numbers = #tpu.dot_dimension_numbers<[1], [0], [0], [1], [0, 0, 1, 1], [], []>} : vector<8x128xf32>, vector<128x512xf32>, vector<8x512xf32> -> vector<8x512xf32>
    %404 = arith.addf %402, %403 : vector<8x512xf32>
    %405 = vector.extract_strided_slice %404 {offsets = [0, 0], sizes = [8, 128], strides = [1, 1]} : vector<8x512xf32> to vector<8x128xf32>
    %406 = arith.negf %405 : vector<8x128xf32>
    %407 = math.exp %406 : vector<8x128xf32>
    %cst_129 = arith.constant 1.000000e+00 : f32
    %408 = vector.broadcast %cst_129 : f32 to vector<8x128xf32>
    %409 = arith.addf %408, %407 : vector<8x128xf32>
    %410 = arith.divf %408, %409 : vector<8x128xf32>
    %411 = vector.extract_strided_slice %404 {offsets = [0, 128], sizes = [8, 128], strides = [1, 1]} : vector<8x512xf32> to vector<8x128xf32>
    %412 = arith.negf %411 : vector<8x128xf32>
    %413 = math.exp %412 : vector<8x128xf32>
    %cst_130 = arith.constant 1.000000e+00 : f32
    %414 = vector.broadcast %cst_130 : f32 to vector<8x128xf32>
    %415 = arith.addf %414, %413 : vector<8x128xf32>
    %416 = arith.divf %414, %415 : vector<8x128xf32>
    %417 = vector.extract_strided_slice %404 {offsets = [0, 256], sizes = [8, 128], strides = [1, 1]} : vector<8x512xf32> to vector<8x128xf32>
    %418 = math.tanh %417 : vector<8x128xf32>
    %419 = vector.extract_strided_slice %404 {offsets = [0, 384], sizes = [8, 128], strides = [1, 1]} : vector<8x512xf32> to vector<8x128xf32>
    %420 = arith.negf %419 : vector<8x128xf32>
    %421 = math.exp %420 : vector<8x128xf32>
    %cst_131 = arith.constant 1.000000e+00 : f32
    %422 = vector.broadcast %cst_131 : f32 to vector<8x128xf32>
    %423 = arith.addf %422, %421 : vector<8x128xf32>
    %424 = arith.divf %422, %423 : vector<8x128xf32>
    %425 = arith.mulf %416, %398 : vector<8x128xf32>
    %426 = arith.mulf %410, %418 : vector<8x128xf32>
    %427 = arith.addf %425, %426 : vector<8x128xf32>
    %428 = math.tanh %427 : vector<8x128xf32>
    %429 = arith.mulf %424, %428 : vector<8x128xf32>
    %c40_132 = arith.constant 40 : index
    %c0_133 = arith.constant 0 : index
    %430 = vector.load %arg13[%c40_132, %c0_133] : memref<64x128xf32, #tpu.memory_space<vmem>>, vector<8x128xf32>
    tpu.vector_store %arg13[%c40_132, %c0_133], %429 {strides = array<i32>} : memref<64x128xf32, #tpu.memory_space<vmem>>, vector<8x128xf32>,
    %c48_134 = arith.constant 48 : index
    %c0_135 = arith.constant 0 : index
    %431 = vector.load %arg12[%c48_134, %c0_135] : memref<64x512xf32, #tpu.memory_space<vmem>>, vector<8x512xf32>
    %cst_136 = arith.constant dense<0.000000e+00> : vector<8x512xf32>
    %432 = tpu.matmul %429, %254, %cst_136 {dimension_numbers = #tpu.dot_dimension_numbers<[1], [0], [0], [1], [0, 0, 1, 1], [], []>} : vector<8x128xf32>, vector<128x512xf32>, vector<8x512xf32> -> vector<8x512xf32>
    %433 = arith.addf %431, %432 : vector<8x512xf32>
    %434 = vector.extract_strided_slice %433 {offsets = [0, 0], sizes = [8, 128], strides = [1, 1]} : vector<8x512xf32> to vector<8x128xf32>
    %435 = arith.negf %434 : vector<8x128xf32>
    %436 = math.exp %435 : vector<8x128xf32>
    %cst_137 = arith.constant 1.000000e+00 : f32
    %437 = vector.broadcast %cst_137 : f32 to vector<8x128xf32>
    %438 = arith.addf %437, %436 : vector<8x128xf32>
    %439 = arith.divf %437, %438 : vector<8x128xf32>
    %440 = vector.extract_strided_slice %433 {offsets = [0, 128], sizes = [8, 128], strides = [1, 1]} : vector<8x512xf32> to vector<8x128xf32>
    %441 = arith.negf %440 : vector<8x128xf32>
    %442 = math.exp %441 : vector<8x128xf32>
    %cst_138 = arith.constant 1.000000e+00 : f32
    %443 = vector.broadcast %cst_138 : f32 to vector<8x128xf32>
    %444 = arith.addf %443, %442 : vector<8x128xf32>
    %445 = arith.divf %443, %444 : vector<8x128xf32>
    %446 = vector.extract_strided_slice %433 {offsets = [0, 256], sizes = [8, 128], strides = [1, 1]} : vector<8x512xf32> to vector<8x128xf32>
    %447 = math.tanh %446 : vector<8x128xf32>
    %448 = vector.extract_strided_slice %433 {offsets = [0, 384], sizes = [8, 128], strides = [1, 1]} : vector<8x512xf32> to vector<8x128xf32>
    %449 = arith.negf %448 : vector<8x128xf32>
    %450 = math.exp %449 : vector<8x128xf32>
    %cst_139 = arith.constant 1.000000e+00 : f32
    %451 = vector.broadcast %cst_139 : f32 to vector<8x128xf32>
    %452 = arith.addf %451, %450 : vector<8x128xf32>
    %453 = arith.divf %451, %452 : vector<8x128xf32>
    %454 = arith.mulf %445, %427 : vector<8x128xf32>
    %455 = arith.mulf %439, %447 : vector<8x128xf32>
    %456 = arith.addf %454, %455 : vector<8x128xf32>
    %457 = math.tanh %456 : vector<8x128xf32>
    %458 = arith.mulf %453, %457 : vector<8x128xf32>
    %c48_140 = arith.constant 48 : index
    %c0_141 = arith.constant 0 : index
    %459 = vector.load %arg13[%c48_140, %c0_141] : memref<64x128xf32, #tpu.memory_space<vmem>>, vector<8x128xf32>
    tpu.vector_store %arg13[%c48_140, %c0_141], %458 {strides = array<i32>} : memref<64x128xf32, #tpu.memory_space<vmem>>, vector<8x128xf32>,
    %c56_142 = arith.constant 56 : index
    %c0_143 = arith.constant 0 : index
    %460 = vector.load %arg12[%c56_142, %c0_143] : memref<64x512xf32, #tpu.memory_space<vmem>>, vector<8x512xf32>
    %cst_144 = arith.constant dense<0.000000e+00> : vector<8x512xf32>
    %461 = tpu.matmul %458, %254, %cst_144 {dimension_numbers = #tpu.dot_dimension_numbers<[1], [0], [0], [1], [0, 0, 1, 1], [], []>} : vector<8x128xf32>, vector<128x512xf32>, vector<8x512xf32> -> vector<8x512xf32>
    %462 = arith.addf %460, %461 : vector<8x512xf32>
    %463 = vector.extract_strided_slice %462 {offsets = [0, 0], sizes = [8, 128], strides = [1, 1]} : vector<8x512xf32> to vector<8x128xf32>
    %464 = arith.negf %463 : vector<8x128xf32>
    %465 = math.exp %464 : vector<8x128xf32>
    %cst_145 = arith.constant 1.000000e+00 : f32
    %466 = vector.broadcast %cst_145 : f32 to vector<8x128xf32>
    %467 = arith.addf %466, %465 : vector<8x128xf32>
    %468 = arith.divf %466, %467 : vector<8x128xf32>
    %469 = vector.extract_strided_slice %462 {offsets = [0, 128], sizes = [8, 128], strides = [1, 1]} : vector<8x512xf32> to vector<8x128xf32>
    %470 = arith.negf %469 : vector<8x128xf32>
    %471 = math.exp %470 : vector<8x128xf32>
    %cst_146 = arith.constant 1.000000e+00 : f32
    %472 = vector.broadcast %cst_146 : f32 to vector<8x128xf32>
    %473 = arith.addf %472, %471 : vector<8x128xf32>
    %474 = arith.divf %472, %473 : vector<8x128xf32>
    %475 = vector.extract_strided_slice %462 {offsets = [0, 256], sizes = [8, 128], strides = [1, 1]} : vector<8x512xf32> to vector<8x128xf32>
    %476 = math.tanh %475 : vector<8x128xf32>
    %477 = vector.extract_strided_slice %462 {offsets = [0, 384], sizes = [8, 128], strides = [1, 1]} : vector<8x512xf32> to vector<8x128xf32>
    %478 = arith.negf %477 : vector<8x128xf32>
    %479 = math.exp %478 : vector<8x128xf32>
    %cst_147 = arith.constant 1.000000e+00 : f32
    %480 = vector.broadcast %cst_147 : f32 to vector<8x128xf32>
    %481 = arith.addf %480, %479 : vector<8x128xf32>
    %482 = arith.divf %480, %481 : vector<8x128xf32>
    %483 = arith.mulf %474, %456 : vector<8x128xf32>
    %484 = arith.mulf %468, %476 : vector<8x128xf32>
    %485 = arith.addf %483, %484 : vector<8x128xf32>
    %486 = math.tanh %485 : vector<8x128xf32>
    %487 = arith.mulf %482, %486 : vector<8x128xf32>
    %c56_148 = arith.constant 56 : index
    %c0_149 = arith.constant 0 : index
    %488 = vector.load %arg13[%c56_148, %c0_149] : memref<64x128xf32, #tpu.memory_space<vmem>>, vector<8x128xf32>
    tpu.vector_store %arg13[%c56_148, %c0_149], %487 {strides = array<i32>} : memref<64x128xf32, #tpu.memory_space<vmem>>, vector<8x128xf32>,
    %c0_150 = arith.constant 0 : index
    %c0_151 = arith.constant 0 : index
    %489 = vector.load %arg13[%c0_150, %c0_151] : memref<64x128xf32, #tpu.memory_space<vmem>>, vector<64x128xf32>
    %c0_152 = arith.constant 0 : index
    %c0_153 = arith.constant 0 : index
    %490 = vector.load %arg9[%c0_152, %c0_153] : memref<128x128xf32, #tpu.memory_space<vmem>>, vector<128x128xf32>
    %cst_154 = arith.constant dense<0.000000e+00> : vector<64x128xf32>
    %491 = tpu.matmul %489, %490, %cst_154 {dimension_numbers = #tpu.dot_dimension_numbers<[1], [0], [0], [1], [0, 0, 1, 1], [], []>} : vector<64x128xf32>, vector<128x128xf32>, vector<64x128xf32> -> vector<64x128xf32>
    %c0_155 = arith.constant 0 : index
    %c0_156 = arith.constant 0 : index
    %492 = vector.load %arg10[%c0_155, %c0_156] : memref<1x128xf32, #tpu.memory_space<vmem>>, vector<1x128xf32>
    %493 = vector.broadcast %492 : vector<1x128xf32> to vector<64x128xf32>
    %494 = arith.addf %491, %493 : vector<64x128xf32>
    %c0_157 = arith.constant 0 : index
    %c0_158 = arith.constant 0 : index
    %495 = vector.load %arg11[%c0_157, %c0_158] : memref<64x128xf32, #tpu.memory_space<vmem>>, vector<64x128xf32>
    tpu.vector_store %arg11[%c0_157, %c0_158], %494 {strides = array<i32>} : memref<64x128xf32, #tpu.memory_space<vmem>>, vector<64x128xf32>,
    return
  }
}

</mosaic_0001>

<bundles_post_ra>
// kernel: tpu_custom_call.1
= control target key start
LH: loop header
LB: loop body
LE: loop exit
PB: predicated region body
PF: predicated region fallthrough
CT: control target
= control target key end

     0   :  { %16 = vsyncpa [#allocation5], 0  ;;  %s6537_s0 = inlined_call_operand.hbm [shape: f32[64,512], index: 0, kind: input, shape index: {}]   ;;  %s6538_s1 = inlined_call_operand.hbm [shape: f32[512,128], index: 1, kind: input, shape index: {}]   ;;  %s6539_s2 = inlined_call_operand.hbm [shape: f32[1,128], index: 2, kind: input, shape index: {}]   ;;  %s6540_s3 = inlined_call_operand.hbm [shape: f32[128,512], index: 3, kind: input, shape index: {}]   ;;  %s6541_s4 = inlined_call_operand.hbm [shape: f32[128,512], index: 4, kind: input, shape index: {}]   ;;  %s6542_s5 = inlined_call_operand.vmem [shape: f32[1,512], index: 5, kind: input, shape index: {}]   ;;  %s6543_s6 = inlined_call_operand.hbm [shape: f32[128,512], index: 6, kind: input, shape index: {}]   ;;  %s6544_s7 = inlined_call_operand.hbm [shape: f32[128,512], index: 7, kind: input, shape index: {}]   ;;  %s6545_s8 = inlined_call_operand.hbm [shape: f32[1,512], index: 8, kind: input, shape index: {}]   ;;  %s6546_s9 = inlined_call_operand.hbm [shape: f32[128,128], index: 9, kind: input, shape index: {}]   ;;  %s6547_s10 = inlined_call_operand.vmem [shape: f32[1,128], index: 10, kind: input, shape index: {}]   ;;  %s6548_s11 = inlined_call_operand.hbm [shape: f32[64,128], index: 11, kind: output, shape index: {}]  }
   0x1   :  { %17 = vsyncpa [#allocation8], 0 }
   0x2   :  { %18 = vsyncpa [#allocation11], 0 }
   0x3   :  { %19 = vsyncpa [#allocation14], 0 }
   0x4   :  { %20 = vsyncpa [#allocation17], 0  ;;  %s39_s19 = sshll.u32 %s6538_s1, 4  ;;  %s40_s19 = int_to_ptr.hbm [resolvable:$true] %s39_s19 }
   0x5   :  { %21 = vsyncpa [#allocation6], 0  ;;  %s4364_s20 = smov [#allocation7]   ;;  %s4365_s22 = smov 128  }
   0x6   :  { %s41_s21 = sshll.u32 %s4364_s20, 4  ;;  %s4366_s23 = smov 8   ;;  %s42_s21 = int_to_ptr.vmem [resolvable:$true] %s41_s21 }
   0x7   :  { %47 = dma.hbm_to_vmem [thread:$0]  %s40_s19, 8192, %s42_s21, [#allocation8], %s4365_s22, %s4365_s22, %s4366_s23  }
   0x8   :  { %s63_s26 = sshll.u32 %s6540_s3, 4  ;;  %s4367_s27 = smov [#allocation10]   ;;  %s64_s26 = int_to_ptr.hbm [resolvable:$true] %s63_s26 }
   0x9   :  { %s65_s28 = sshll.u32 %s4367_s27, 4  ;;  %s91_s30 = sshll.u32 %s6543_s6, 4  ;;  %s66_s28 = int_to_ptr.vmem [resolvable:$true] %s65_s28  ;;  %s92_s30 = int_to_ptr.hbm [resolvable:$true] %s91_s30 }
   0xa   :  { %s4368_s12 = smov 512   ;;  %s4369_s13 = smov 32  }
   0xb   :  { %71 = dma.hbm_to_vmem [thread:$0]  %s64_s26, 8192, %s66_s28, [#allocation11], %s4368_s12, %s4368_s12, %s4369_s13  }
   0xc   :  { %s118_s16 = sshll.u32 %s6545_s8, 4  ;;  %s4370_s3 = smov [#allocation13]   ;;  %s119_s16 = int_to_ptr.hbm [resolvable:$true] %s118_s16 }
   0xd   :  { %s93_s17 = sshll.u32 %s4370_s3, 4  ;;  %s4371_s6 = smov [#allocation16]   ;;  %s94_s17 = int_to_ptr.vmem [resolvable:$true] %s93_s17 }
   0xe   :  { %99 = dma.hbm_to_vmem [thread:$0]  %s92_s30, 8192, %s94_s17, [#allocation14], %s4368_s12, %s4368_s12, %s4369_s13  }
   0xf   :  { %s120_s18 = sshll.u32 %s4371_s6, 4  ;;  %s26_s21 = sshll.u32 %s6537_s0, 4  ;;  %s121_s18 = int_to_ptr.vmem [resolvable:$true] %s120_s18  ;;  %s27_s21 = int_to_ptr.hbm [resolvable:$true] %s26_s21 }
  0x10   :  { %123 = dma.hbm_to_vmem [thread:$0]  %s119_s16, 64, %s121_s18, [#allocation17]  }
  0x11   :  { %s53_s8 = sshll.u32 %s6539_s2, 4  ;;  %s4372_s26 = smov [#allocation4]   ;;  %s54_s8 = int_to_ptr.hbm [resolvable:$true] %s53_s8 }
  0x12   :  { %s28_s27 = sshll.u32 %s4372_s26, 4  ;;  %s4373_s28 = smov [#allocation9]   ;;  %s29_s27 = int_to_ptr.vmem [resolvable:$true] %s28_s27 }
  0x13   :  { %34 = dma.hbm_to_vmem [thread:$0]  %s27_s21, 4096, %s29_s27, [#allocation5], %s4368_s12, %s4368_s12, %s4369_s13  }
  0x14   :  { %s55_s29 = sshll.u32 %s4373_s28, 4  ;;  %s76_s0 = sshll.u32 %s6541_s4, 4  ;;  %s56_s29 = int_to_ptr.vmem [resolvable:$true] %s55_s29  ;;  %s77_s0 = int_to_ptr.hbm [resolvable:$true] %s76_s0 }
  0x15   :  { %58 = dma.hbm_to_vmem [thread:$0]  %s54_s8, 16, %s56_s29, [#allocation8]  }
  0x16   :  { %s104_s2 = sshll.u32 %s6544_s7, 4  ;;  %s4374_s16 = smov [#allocation12]   ;;  %s105_s2 = int_to_ptr.hbm [resolvable:$true] %s104_s2 }
  0x17   :  { %s78_s3 = sshll.u32 %s4374_s16, 4  ;;  %s4375_s17 = smov [#allocation15]   ;;  %s79_s3 = int_to_ptr.vmem [resolvable:$true] %s78_s3 }
  0x18   :  { %84 = dma.hbm_to_vmem [thread:$0]  %s77_s0, 8192, %s79_s3, [#allocation11], %s4368_s12, %s4368_s12, %s4369_s13  }
  0x19   :  { %s106_s6 = sshll.u32 %s4375_s17, 4  ;;  %s128_s4 = sshll.u32 %s6546_s9, 4  ;;  %s107_s6 = int_to_ptr.vmem [resolvable:$true] %s106_s6  ;;  %s129_s4 = int_to_ptr.hbm [resolvable:$true] %s128_s4 }
  0x1a   :  { %112 = dma.hbm_to_vmem [thread:$0]  %s105_s2, 8192, %s107_s6, [#allocation14], %s4368_s12, %s4368_s12, %s4369_s13  }
  0x1b   :  { %s4376_s7 = smov [#allocation18]  }
  0x1c   :  { %s130_s20 = sshll.u32 %s4376_s7, 4  ;;  %s131_s20 = int_to_ptr.vmem [resolvable:$true] %s130_s20 }
  0x1d   :  { %136 = dma.hbm_to_vmem [thread:$0]  %s129_s4, 2048, %s131_s20, [#allocation17], %s4365_s22, %s4365_s22, %s4366_s23  }
  0x1e   :  { %4352 = dma.done.wait [#allocation5], 4096  }
  0x1f   :  { %4353 = vsyncadd [#allocation5], 4294963200 }
  0x20   :  { %4354 = dma.done.wait [#allocation8], 8208  }
  0x21   :  { %4355 = vsyncadd [#allocation8], 4294959088 }
  0x22   :  { %4356 = dma.done.wait [#allocation11], 16384  }
  0x23   :  { %4357 = vsyncadd [#allocation11], 4294950912 }
  0x24   :  { %4358 = dma.done.wait [#allocation14], 16384  }
  0x25   :  { %4359 = vsyncadd [#allocation14], 4294950912 }
  0x26   :  { %4360 = dma.done.wait [#allocation17], 2112  }
  0x27   :  { %4361 = vsyncadd [#allocation17], 4294965184  ;;  %v222_v0 = vld [vmem:[#allocation7 + $0x78] sm:$0xff]  ;;  %v221_v1 = vld [vmem:[#allocation7 + $0x70] sm:$0xff]  ;;  %s3630_s8 = sshll.u32 %s6548_s11, 4  ;;  %s3631_s8 = int_to_ptr.hbm [resolvable:$true] %s3630_s8 }
  0x28   :  { %275 = vmatpush.msra.mxu1 %v222_v0  ;;  %3695 = vmatpush.msra.mxu2 %v222_v0  ;;  %v220_v2 = vld [vmem:[#allocation7 + $0x68] sm:$0xff]  ;;  %v219_v3 = vld [vmem:[#allocation7 + $0x60] sm:$0xff]  ;;  %v218_v4 = vld [vmem:[#allocation7 + $0x58] sm:$0xff] }
  0x29   :  { %v270_v5 = vld [vmem:[#allocation7 + $0x1f8] sm:$0xff]  ;;  %v217_v6 = vld [vmem:[#allocation7 + $0x50] sm:$0xff]  ;;  %v268_v8 = vld [vmem:[#allocation7 + $0x1e8] sm:$0xff] }
  0x2a   :  { %276 = vmatpush.msra.mxu1 %v221_v1  ;;  %3696 = vmatpush.msra.mxu2 %v221_v1  ;;  %v269_v7 = vld [vmem:[#allocation7 + $0x1f0] sm:$0xff]  ;;  %v216_v9 = vld [vmem:[#allocation7 + $0x48] sm:$0xff]  ;;  %v267_v10 = vld [vmem:[#allocation7 + $0x1e0] sm:$0xff] }
  0x2b   :  { %398 = vmatpush.msra.mxu3 %v270_v5  ;;  %v215_v11 = vld [vmem:[#allocation7 + $0x40] sm:$0xff]  ;;  %v266_v12 = vld [vmem:[#allocation7 + $0x1d8] sm:$0xff]  ;;  %v265_v14 = vld [vmem:[#allocation7 + $0x1d0] sm:$0xff] }
  0x2c   :  { %277 = vmatpush.msra.mxu1 %v220_v2  ;;  %3697 = vmatpush.msra.mxu2 %v220_v2  ;;  %v214_v13 = vld [vmem:[#allocation7 + $0x38] sm:$0xff]  ;;  %v213_v15 = vld [vmem:[#allocation7 + $0x30] sm:$0xff]  ;;  %v264_v16 = vld [vmem:[#allocation7 + $0x1c8] sm:$0xff] }
  0x2d   :  { %399 = vmatpush.msra.mxu3 %v269_v7  ;;  %v212_v17 = vld [vmem:[#allocation7 + $0x28] sm:$0xff]  ;;  %v263_v18 = vld [vmem:[#allocation7 + $0x1c0] sm:$0xff]  ;;  %v262_v20 = vld [vmem:[#allocation7 + $0x1b8] sm:$0xff] }
  0x2e   :  { %278 = vmatpush.msra.mxu1 %v219_v3  ;;  %3698 = vmatpush.msra.mxu2 %v219_v3  ;;  %v211_v19 = vld [vmem:[#allocation7 + $0x20] sm:$0xff]  ;;  %v210_v21 = vld [vmem:[#allocation7 + $0x18] sm:$0xff]  ;;  %v261_v22 = vld [vmem:[#allocation7 + $0x1b0] sm:$0xff] }
  0x2f   :  { %400 = vmatpush.msra.mxu3 %v268_v8  ;;  %v209_v23 = vld [vmem:[#allocation7 + $0x10] sm:$0xff]  ;;  %v260_v24 = vld [vmem:[#allocation7 + $0x1a8] sm:$0xff]  ;;  %v259_v26 = vld [vmem:[#allocation7 + $0x1a0] sm:$0xff] }
  0x30   :  { %279 = vmatpush.msra.mxu1 %v218_v4  ;;  %3699 = vmatpush.msra.mxu2 %v218_v4  ;;  %v208_v25 = vld [vmem:[#allocation7 + $0x8] sm:$0xff]  ;;  %v207_v27 = vld [vmem:[#allocation7] sm:$0xff]  ;;  %v254_v30 = vld [vmem:[#allocation7 + $0x178] sm:$0xff] }
  0x31   :  { %401 = vmatpush.msra.mxu3 %v267_v10  ;;  %v175_v28 = vld [vmem:[#allocation4] sm:$0xff]  ;;  %v238_v31 = vld [vmem:[#allocation7 + $0xf8] sm:$0xff]  ;;  %v253_v33 = vld [vmem:[#allocation7 + $0x170] sm:$0xff] }
  0x32   :  { %280 = vmatpush.msra.mxu1 %v217_v6  ;;  %3700 = vmatpush.msra.mxu2 %v217_v6  ;;  %v191_v29 = vld [vmem:[#allocation4 + $0x80] sm:$0xff]  ;;  %v258_v32 = vld [vmem:[#allocation7 + $0x198] sm:$0xff]  ;;  %v237_v34 = vld [vmem:[#allocation7 + $0xf0] sm:$0xff] }
  0x33   :  { %402 = vmatpush.msra.mxu3 %v266_v12  ;;  %v257_v35 = vld [vmem:[#allocation7 + $0x190] sm:$0xff]  ;;  %v252_v36 = vld [vmem:[#allocation7 + $0x168] sm:$0xff]  ;;  %v251_v39 = vld [vmem:[#allocation7 + $0x160] sm:$0xff] }
  0x34   :  { %281 = vmatpush.msra.mxu1 %v216_v9  ;;  %3701 = vmatpush.msra.mxu2 %v216_v9  ;;  %v236_v37 = vld [vmem:[#allocation7 + $0xe8] sm:$0xff]  ;;  %v235_v40 = vld [vmem:[#allocation7 + $0xe0] sm:$0xff]  ;;  %v250_v43 = vld [vmem:[#allocation7 + $0x158] sm:$0xff] }
  0x35   :  { %403 = vmatpush.msra.mxu3 %v265_v14  ;;  %v256_v38 = vld [vmem:[#allocation7 + $0x188] sm:$0xff]  ;;  %v179_v41 = vld [vmem:[#allocation4 + $0x20] sm:$0xff]  ;;  %v234_v44 = vld [vmem:[#allocation7 + $0xd8] sm:$0xff] }
  0x36   :  { %282 = vmatpush.msra.mxu1 %v215_v11  ;;  %3702 = vmatpush.msra.mxu2 %v215_v11  ;;  %v195_v42 = vld [vmem:[#allocation4 + $0xa0] sm:$0xff]  ;;  %v249_v46 = vld [vmem:[#allocation7 + $0x150] sm:$0xff]  ;;  %v178_v48 = vld [vmem:[#allocation4 + $0x18] sm:$0xff] }
  0x37   :  { %404 = vmatpush.msra.mxu3 %v264_v16  ;;  %v255_v45 = vld [vmem:[#allocation7 + $0x180] sm:$0xff]  ;;  %v233_v47 = vld [vmem:[#allocation7 + $0xd0] sm:$0xff]  ;;  %v248_v49 = vld [vmem:[#allocation7 + $0x148] sm:$0xff] }
  0x38   :  { %283 = vmatpush.msra.mxu1 %v214_v13  ;;  %3703 = vmatpush.msra.mxu2 %v214_v13  ;;  %v232_v50 = vld [vmem:[#allocation7 + $0xc8] sm:$0xff]  ;;  %v247_v51 = vld [vmem:[#allocation7 + $0x140] sm:$0xff]  ;;  %v246_v55 = vld [vmem:[#allocation7 + $0x138] sm:$0xff] }
  0x39   :  { %405 = vmatpush.msra.mxu3 %v263_v18  ;;  %v231_v52 = vld [vmem:[#allocation7 + $0xc0] sm:$0xff]  ;;  %v230_v56 = vld [vmem:[#allocation7 + $0xb8] sm:$0xff]  ;;  %v245_v57 = vld [vmem:[#allocation7 + $0x130] sm:$0xff] }
  0x3a   :  { %284 = vmatpush.msra.mxu1 %v213_v15  ;;  %3704 = vmatpush.msra.mxu2 %v213_v15  ;;  %v183_v53 = vld [vmem:[#allocation4 + $0x40] sm:$0xff]  ;;  %v229_v58 = vld [vmem:[#allocation7 + $0xb0] sm:$0xff]  ;;  %v182_v59 = vld [vmem:[#allocation4 + $0x38] sm:$0xff] }
  0x3b   :  { %406 = vmatpush.msra.mxu3 %v262_v20  ;;  %v199_v54 = vld [vmem:[#allocation4 + $0xc0] sm:$0xff]  ;;  %v244_v60 = vld [vmem:[#allocation7 + $0x128] sm:$0xff]  ;;  %v242_v2 = vld [vmem:[#allocation7 + $0x118] sm:$0xff] }
  0x3c   :  { %285 = vmatpush.msra.mxu1 %v212_v17  ;;  %3705 = vmatpush.msra.mxu2 %v212_v17  ;;  %v228_v61 = vld [vmem:[#allocation7 + $0xa8] sm:$0xff]  ;;  %v243_v62 = vld [vmem:[#allocation7 + $0x120] sm:$0xff]  ;;  %v226_v3 = vld [vmem:[#allocation7 + $0x98] sm:$0xff] }
  0x3d   :  { %407 = vmatpush.msra.mxu3 %v261_v22  ;;  %v227_v63 = vld [vmem:[#allocation7 + $0xa0] sm:$0xff]  ;;  %v241_v4 = vld [vmem:[#allocation7 + $0x110] sm:$0xff]  ;;  %v186_v6 = vld [vmem:[#allocation4 + $0x58] sm:$0xff] }
  0x3e   :  { %286 = vmatpush.msra.mxu1 %v211_v19  ;;  %3706 = vmatpush.msra.mxu2 %v211_v19  ;;  %v187_v0 = vld [vmem:[#allocation4 + $0x60] sm:$0xff]  ;;  %v225_v5 = vld [vmem:[#allocation7 + $0x90] sm:$0xff]  ;;  %v240_v7 = vld [vmem:[#allocation7 + $0x108] sm:$0xff] }
  0x3f   :  { %408 = vmatpush.msra.mxu3 %v260_v24  ;;  %v203_v1 = vld [vmem:[#allocation4 + $0xe0] sm:$0xff]  ;;  %v224_v8 = vld [vmem:[#allocation7 + $0x88] sm:$0xff]  ;;  %v177_v12 = vld [vmem:[#allocation4 + $0x10] sm:$0xff] }
  0x40   :  { %287 = vmatpush.msra.mxu1 %v210_v21  ;;  %3707 = vmatpush.msra.mxu2 %v210_v21  ;;  %v239_v9 = vld [vmem:[#allocation7 + $0x100] sm:$0xff]  ;;  %v176_v11 = vld [vmem:[#allocation4 + $0x8] sm:$0xff]  ;;  %v190_v13 = vld [vmem:[#allocation4 + $0x78] sm:$0xff] }
  0x41   :  { %409 = vmatpush.msra.mxu3 %v259_v26  ;;  %v223_v10 = vld [vmem:[#allocation7 + $0x80] sm:$0xff]  ;;  %v180_v14 = vld [vmem:[#allocation4 + $0x28] sm:$0xff]  ;;  %v181_v15 = vld [vmem:[#allocation4 + $0x30] sm:$0xff] }
  0x42   :  { %288 = vmatpush.msra.mxu1 %v209_v23  ;;  %3708 = vmatpush.msra.mxu2 %v209_v23  ;;  %v194_v16 = vld [vmem:[#allocation4 + $0x98] sm:$0xff]  ;;  %v184_v17 = vld [vmem:[#allocation4 + $0x48] sm:$0xff]  ;;  %v185_v18 = vld [vmem:[#allocation4 + $0x50] sm:$0xff] }
  0x43   :  { %410 = vmatpush.msra.mxu3 %v258_v32  ;;  %v198_v19 = vld [vmem:[#allocation4 + $0xb8] sm:$0xff]  ;;  %v188_v20 = vld [vmem:[#allocation4 + $0x68] sm:$0xff]  ;;  %v189_v21 = vld [vmem:[#allocation4 + $0x70] sm:$0xff] }
  0x44   :  { %289 = vmatpush.msra.mxu1 %v208_v25  ;;  %3709 = vmatpush.msra.mxu2 %v208_v25  ;;  %v500_v22 = vld [vmem:[#allocation10 + $0x1e8] sm:$0xff]  ;;  %v202_v24 = vld [vmem:[#allocation4 + $0xd8] sm:$0xff] }
  0x45   :  { %411 = vmatpush.msra.mxu3 %v257_v35  ;;  %v496_v23 = vld [vmem:[#allocation10 + $0x1c8] sm:$0xff]  ;;  %v502_v25 = vld [vmem:[#allocation10 + $0x1f8] sm:$0xff] }
  0x46   :  { %290 = vmatpush.msra.mxu1 %v207_v27  ;;  %3710 = vmatpush.msra.mxu2 %v207_v27  ;;  %v492_v26 = vld [vmem:[#allocation10 + $0x1a8] sm:$0xff]  ;;  %v498_v27 = vld [vmem:[#allocation10 + $0x1d8] sm:$0xff] }
  0x47   :  { %291 = vmatmul.f32.vlgmr.msra.gmra.mxu1 %v175_v28  ;;  %303 = vmatmul.f32.vlgmr.msra.gmra.mxu2 %v191_v29  ;;  %v501_v28 = vld [vmem:[#allocation10 + $0x1f0] sm:$0xff]  ;;  %v192_v32 = vld [vmem:[#allocation4 + $0x88] sm:$0xff]  ;;  %v490_v35 = vld [vmem:[#allocation10 + $0x198] sm:$0xff] }
  0x48   :  { %357 = vmatpush.msrb.mxu2 %v254_v30  ;;  %316 = vmatpush.msrb.mxu1 %v238_v31  ;;  %v497_v29 = vld [vmem:[#allocation10 + $0x1d0] sm:$0xff]  ;;  %v488_v30 = vld [vmem:[#allocation10 + $0x188] sm:$0xff]  ;;  %v494_v31 = vld [vmem:[#allocation10 + $0x1b8] sm:$0xff] }
  0x49   :  { %412 = vmatpush.msra.mxu3 %v256_v38  ;;  %v196_v38 = vld [vmem:[#allocation4 + $0xa8] sm:$0xff] }
  0x4a   :  { %358 = vmatpush.msrb.mxu2 %v253_v33  ;;  %317 = vmatpush.msrb.mxu1 %v237_v34  ;;  %v193_v33 = vld [vmem:[#allocation4 + $0x90] sm:$0xff] }
  0x4b   :  { %413 = vmatpush.msra.mxu3 %v255_v45  ;;  %v484_v34 = vld [vmem:[#allocation10 + $0x168] sm:$0xff]  ;;  %v493_v45 = vld [vmem:[#allocation10 + $0x1b0] sm:$0xff] }
  0x4c   :  { %359 = vmatpush.msrb.mxu2 %v252_v36  ;;  %318 = vmatpush.msrb.mxu1 %v236_v37  ;;  %v480_v36 = vld [vmem:[#allocation10 + $0x148] sm:$0xff]  ;;  %v206_v37 = vld [vmem:[#allocation4 + $0xf8] sm:$0xff] }
  0x4d   :  { %414 = vmatmul.f32.vlgmr.msra.gmra.mxu3 %v178_v48  ;;  %v489_v48 = vld [vmem:[#allocation10 + $0x190] sm:$0xff] }
  0x4e   :  { %360 = vmatpush.msrb.mxu2 %v251_v39  ;;  %319 = vmatpush.msrb.mxu1 %v235_v40  ;;  %v197_v39 = vld [vmem:[#allocation4 + $0xb0] sm:$0xff]  ;;  %v200_v40 = vld [vmem:[#allocation4 + $0xc8] sm:$0xff] }
  0x4f   :  { %294 = vmatmul.f32.gmra.mxu1 %v179_v41  ;;  %306 = vmatmul.f32.gmra.mxu2 %v195_v42  ;;  %v201_v41 = vld [vmem:[#allocation4 + $0xd0] sm:$0xff]  ;;  %v204_v42 = vld [vmem:[#allocation4 + $0xe8] sm:$0xff] }
  0x50   :  { %361 = vmatpush.msrb.mxu2 %v250_v43  ;;  %320 = vmatpush.msrb.mxu1 %v234_v44  ;;  %v205_v43 = vld [vmem:[#allocation4 + $0xf0] sm:$0xff]  ;;  %v486_v44 = vld [vmem:[#allocation10 + $0x178] sm:$0xff] }
  0x51   :  { %636 = vmatpush.msrb.mxu3 %v502_v25  ;;  %v449_v25 = vld [vmem:[#allocation10 + $0x50] sm:$0xff] }
  0x52   :  { %362 = vmatpush.msrb.mxu2 %v249_v46  ;;  %321 = vmatpush.msrb.mxu1 %v233_v47  ;;  %v476_v46 = vld [vmem:[#allocation10 + $0x128] sm:$0xff]  ;;  %v482_v47 = vld [vmem:[#allocation10 + $0x158] sm:$0xff] }
  0x53   :  { %637 = vmatpush.msrb.mxu3 %v498_v27  ;;  %v440_v27 = vld [vmem:[#allocation10 + $0x8] sm:$0xff] }
  0x54   :  { %363 = vmatpush.msrb.mxu2 %v248_v49  ;;  %322 = vmatpush.msrb.mxu1 %v232_v50  ;;  %v472_v49 = vld [vmem:[#allocation10 + $0x108] sm:$0xff]  ;;  %v478_v50 = vld [vmem:[#allocation10 + $0x138] sm:$0xff] }
  0x55   :  { %417 = vmatmul.f32.gmra.mxu3 %v182_v59  ;;  %v470_v59 = vld [vmem:[#allocation10 + $0xf8] sm:$0xff] }
  0x56   :  { %364 = vmatpush.msrb.mxu2 %v247_v51  ;;  %323 = vmatpush.msrb.mxu1 %v231_v52  ;;  %v485_v51 = vld [vmem:[#allocation10 + $0x170] sm:$0xff]  ;;  %v468_v52 = vld [vmem:[#allocation10 + $0xe8] sm:$0xff] }
  0x57   :  { %297 = vmatmul.f32.gmra.mxu1 %v183_v53  ;;  %309 = vmatmul.f32.gmra.mxu2 %v199_v54  ;;  %v499_v53 = vld [vmem:[#allocation10 + $0x1e0] sm:$0xff]  ;;  %v474_v54 = vld [vmem:[#allocation10 + $0x118] sm:$0xff] }
  0x58   :  { %365 = vmatpush.msrb.mxu2 %v246_v55  ;;  %324 = vmatpush.msrb.mxu1 %v230_v56  ;;  %v495_v55 = vld [vmem:[#allocation10 + $0x1c0] sm:$0xff]  ;;  %v481_v56 = vld [vmem:[#allocation10 + $0x150] sm:$0xff] }
  0x59   :  { %638 = vmatpush.msrb.mxu3 %v494_v31  ;;  %513 = vmatpush.msra.mxu0 %v499_v53  ;;  %v446_v31 = vld [vmem:[#allocation10 + $0x38] sm:$0xff]  ;;  %v4539_v53 = vld [vmem:[#allocation12 + $0x168] sm:$0xff] }
  0x5a   :  { %366 = vmatpush.msrb.mxu2 %v245_v57  ;;  %325 = vmatpush.msrb.mxu1 %v229_v58  ;;  %v464_v57 = vld [vmem:[#allocation10 + $0xc8] sm:$0xff]  ;;  %v491_v58 = vld [vmem:[#allocation10 + $0x1a0] sm:$0xff] }
  0x5b   :  { %639 = vmatpush.msrb.mxu3 %v490_v35  ;;  %514 = vmatpush.msra.mxu0 %v495_v55  ;;  %v4493_v35 = vld [vmem:[#allocation12 + $0x1e0] sm:$0xff]  ;;  %v4545_v55 = vld [vmem:[#allocation9] ss:$0 sm:$0xff] }
  0x5c   :  { %367 = vmatpush.msrb.mxu2 %v244_v60  ;;  %326 = vmatpush.msrb.mxu1 %v228_v61  ;;  %v487_v60 = vld [vmem:[#allocation10 + $0x180] sm:$0xff]  ;;  %v477_v61 = vld [vmem:[#allocation10 + $0x130] sm:$0xff] }
  0x5d   :  { %420 = vmatmul.f32.gmra.mxu3 %v186_v6  ;;  %515 = vmatpush.msra.mxu0 %v491_v58  ;;  %v471_v6 = vld [vmem:[#allocation10 + $0x100] sm:$0xff] }
  0x5e   :  { %368 = vmatpush.msrb.mxu2 %v243_v62  ;;  %327 = vmatpush.msrb.mxu1 %v227_v63  ;;  %v460_v62 = vld [vmem:[#allocation10 + $0xa8] sm:$0xff]  ;;  %v483_v63 = vld [vmem:[#allocation10 + $0x160] sm:$0xff] }
  0x5f   :  { %300 = vmatmul.f32.gmra.mxu1 %v187_v0  ;;  %312 = vmatmul.f32.gmra.mxu2 %v203_v1  ;;  %v466_v0 = vld [vmem:[#allocation10 + $0xd8] sm:$0xff]  ;;  %v479_v1 = vld [vmem:[#allocation10 + $0x140] sm:$0xff] }
  0x60   :  { %369 = vmatpush.msrb.mxu2 %v242_v2  ;;  %328 = vmatpush.msrb.mxu1 %v226_v3  ;;  %v473_v2 = vld [vmem:[#allocation10 + $0x110] sm:$0xff]  ;;  %v456_v3 = vld [vmem:[#allocation10 + $0x88] sm:$0xff]  ;;  %v4552_v58 = vld [vmem:[#allocation12 + $0x140] sm:$0xff] }
  0x61   :  { %640 = vmatpush.msrb.mxu3 %v486_v44  ;;  %516 = vmatpush.msra.mxu0 %v487_v60  ;;  %v4516_v44 = vld [vmem:[#allocation12 + $0x1d8] sm:$0xff] }
  0x62   :  { %370 = vmatpush.msrb.mxu2 %v241_v4  ;;  %329 = vmatpush.msrb.mxu1 %v225_v5  ;;  %v475_v4 = vld [vmem:[#allocation10 + $0x120] sm:$0xff]  ;;  %v462_v5 = vld [vmem:[#allocation10 + $0xb8] sm:$0xff] }
  0x63   :  { %641 = vmatpush.msrb.mxu3 %v482_v47  ;;  %517 = vmatpush.msra.mxu0 %v483_v63  ;;  %v4525_v47 = vld [vmem:[#allocation12 + $0x188] sm:$0xff] }
  0x64   :  { %371 = vmatpush.msrb.mxu2 %v240_v7  ;;  %330 = vmatpush.msrb.mxu1 %v224_v8  ;;  %v469_v7 = vld [vmem:[#allocation10 + $0xf0] sm:$0xff]  ;;  %v452_v8 = vld [vmem:[#allocation10 + $0x68] sm:$0xff] }
  0x65   :  { %423 = vmatmul.f32.gmra.mxu3 %v190_v13  ;;  %518 = vmatpush.msra.mxu0 %v479_v1  ;;  %v448_v13 = vld [vmem:[#allocation10 + $0x48] sm:$0xff]  ;;  %v4567_v1 = vld [vmem:[#allocation12 + $0x120] sm:$0xff] }
  0x66   :  { %372 = vmatpush.msrb.mxu2 %v239_v9  ;;  %331 = vmatpush.msrb.mxu1 %v223_v10  ;;  %v467_v9 = vld [vmem:[#allocation10 + $0xe0] sm:$0xff]  ;;  %v458_v10 = vld [vmem:[#allocation10 + $0x98] sm:$0xff] }
  0x67   :  { %332 = vmatmul.f32.vlgmr.msrb.gmra.mxu1 %v176_v11  ;;  %373 = vmatmul.f32.vlgmr.msrb.gmra.mxu2 %v177_v12  ;;  %v463_v11 = vld [vmem:[#allocation10 + $0xc0] sm:$0xff]  ;;  %v465_v12 = vld [vmem:[#allocation10 + $0xd0] sm:$0xff] }
  0x68   :  { %554 = vmatpush.msra.mxu1 %v500_v22  ;;  %595 = vmatpush.msra.mxu2 %v501_v28  ;;  %v453_v22 = vld [vmem:[#allocation10 + $0x70] sm:$0xff]  ;;  %v443_v28 = vld [vmem:[#allocation10 + $0x20] sm:$0xff] }
  0x69   :  { %642 = vmatpush.msrb.mxu3 %v478_v50  ;;  %519 = vmatpush.msra.mxu0 %v475_v4  ;;  %v4531_v50 = vld [vmem:[#allocation12 + $0x1b8] sm:$0xff] }
  0x6a   :  { %555 = vmatpush.msra.mxu1 %v496_v23  ;;  %596 = vmatpush.msra.mxu2 %v497_v29  ;;  %v450_v23 = vld [vmem:[#allocation10 + $0x58] sm:$0xff]  ;;  %v445_v29 = vld [vmem:[#allocation10 + $0x30] sm:$0xff] }
  0x6b   :  { %643 = vmatpush.msrb.mxu3 %v474_v54  ;;  %520 = vmatpush.msra.mxu0 %v471_v6  ;;  %v4541_v54 = vld [vmem:[#allocation12 + $0x198] sm:$0xff] }
  0x6c   :  { %556 = vmatpush.msra.mxu1 %v492_v26  ;;  %597 = vmatpush.msra.mxu2 %v493_v45 }
  0x6d   :  { %426 = vmatmul.f32.gmra.mxu3 %v194_v16  ;;  %521 = vmatpush.msra.mxu0 %v467_v9  ;;  %v4580_v9 = vld [vmem:[#allocation12 + $0x108] sm:$0xff] }
  0x6e   :  { %557 = vmatpush.msra.mxu1 %v488_v30  ;;  %598 = vmatpush.msra.mxu2 %v489_v48 }
  0x6f   :  { %335 = vmatmul.f32.gmra.mxu1 %v180_v14  ;;  %376 = vmatmul.f32.gmra.mxu2 %v181_v15  ;;  %v459_v14 = vld [vmem:[#allocation10 + $0xa0] sm:$0xff]  ;;  %v461_v15 = vld [vmem:[#allocation10 + $0xb0] sm:$0xff] }
  0x70   :  { %558 = vmatpush.msra.mxu1 %v484_v34  ;;  %599 = vmatpush.msra.mxu2 %v485_v51  ;;  %v442_v34 = vld [vmem:[#allocation10 + $0x18] sm:$0xff]  ;;  %v4533_v51 = vld [vmem:[#allocation12 + $0x1f0] sm:$0xff] }
  0x71   :  { %644 = vmatpush.msrb.mxu3 %v470_v59  ;;  %522 = vmatpush.msra.mxu0 %v463_v11  ;;  %v4554_v59 = vld [vmem:[#allocation12 + $0x148] sm:$0xff] }
  0x72   :  { %559 = vmatpush.msra.mxu1 %v480_v36  ;;  %600 = vmatpush.msra.mxu2 %v481_v56  ;;  %v4495_v36 = vld [vmem:[#allocation12 + $0x1e8] sm:$0xff] }
  0x73   :  { %645 = vmatpush.msrb.mxu3 %v466_v0  ;;  %523 = vmatpush.msra.mxu0 %v459_v14  ;;  %6813 = vst [vmem:[#allocation26_spill] sm:$0xff] %v4495_v36 }
  0x74   :  { %560 = vmatpush.msra.mxu1 %v476_v46  ;;  %601 = vmatpush.msra.mxu2 %v477_v61  ;;  %v4523_v46 = vld [vmem:[#allocation12 + $0x180] sm:$0xff]  ;;  %v4559_v61 = vld [vmem:[#allocation12 + $0x178] sm:$0xff] }
  0x75   :  { %429 = vmatmul.f32.gmra.mxu3 %v198_v19  ;;  %v457_v19 = vld [vmem:[#allocation10 + $0x90] sm:$0xff] }
  0x76   :  { %561 = vmatpush.msra.mxu1 %v472_v49  ;;  %602 = vmatpush.msra.mxu2 %v473_v2  ;;  %v4569_v2 = vld [vmem:[#allocation12 + $0x128] sm:$0xff] }
  0x77   :  { %338 = vmatmul.f32.gmra.mxu1 %v184_v17  ;;  %379 = vmatmul.f32.gmra.mxu2 %v185_v18  ;;  %v454_v17 = vld [vmem:[#allocation10 + $0x78] sm:$0xff]  ;;  %v455_v18 = vld [vmem:[#allocation10 + $0x80] sm:$0xff] }
  0x78   :  { %562 = vmatpush.msra.mxu1 %v468_v52  ;;  %646 = vmatpush.msrb.mxu3 %v462_v5  ;;  %v4537_v52 = vld [vmem:[#allocation12 + $0x160] sm:$0xff] }
  0x79   :  { %603 = vmatpush.msra.mxu2 %v469_v7  ;;  %524 = vmatpush.msra.mxu0 %v455_v18  ;;  %v4576_v7 = vld [vmem:[#allocation12 + $0x190] sm:$0xff]  ;;  %v4597_v18 = vld [vmem:[#allocation12 + $0x118] sm:$0xff] }
  0x7a   :  { %563 = vmatpush.msra.mxu1 %v464_v57  ;;  %647 = vmatpush.msrb.mxu3 %v458_v10  ;;  %v4550_v57 = vld [vmem:[#allocation12 + $0x1d0] sm:$0xff] }
  0x7b   :  { %604 = vmatpush.msra.mxu2 %v465_v12  ;;  %v4585_v12 = vld [vmem:[#allocation12 + $0x138] sm:$0xff] }
  0x7c   :  { %564 = vmatpush.msra.mxu1 %v460_v62  ;;  %648 = vmatpush.msrb.mxu3 %v454_v17  ;;  %v4561_v62 = vld [vmem:[#allocation12 + $0x1b0] sm:$0xff]  ;;  %v4595_v17 = vld [vmem:[#allocation12 + $0xe8] sm:$0xff] }
  0x7d   :  { %432 = vmatmul.f32.gmra.mxu3 %v202_v24  ;;  %605 = vmatpush.msra.mxu2 %v461_v15  ;;  %v447_v24 = vld [vmem:[#allocation10 + $0x40] sm:$0xff] }
  0x7e   :  { %565 = vmatpush.msra.mxu1 %v456_v3  ;;  %649 = vmatpush.msrb.mxu3 %v450_v23  ;;  %v4571_v3 = vld [vmem:[#allocation12 + $0x158] sm:$0xff]  ;;  %v4604_v23 = vld [vmem:[#allocation12 + $0xc0] sm:$0xff] }
  0x7f   :  { %341 = vmatmul.f32.gmra.mxu1 %v188_v20  ;;  %382 = vmatmul.f32.gmra.mxu2 %v189_v21  ;;  %v444_v20 = vld [vmem:[#allocation10 + $0x28] sm:$0xff]  ;;  %v451_v21 = vld [vmem:[#allocation10 + $0x60] sm:$0xff] }
  0x80   :  { %566 = vmatpush.msra.mxu1 %v452_v8  ;;  %606 = vmatpush.msra.mxu2 %v457_v19  ;;  %v4578_v8 = vld [vmem:[#allocation12 + $0x100] sm:$0xff] }
  0x81   :  { %525 = vmatpush.msra.mxu0 %v451_v21  ;;  %650 = vmatpush.msrb.mxu3 %v446_v31  ;;  %v4619_v31 = vld [vmem:[#allocation12 + $0xa0] sm:$0xff] }
  0x82   :  { %567 = vmatpush.msra.mxu1 %v448_v13  ;;  %607 = vmatpush.msra.mxu2 %v453_v22  ;;  %v4587_v13 = vld [vmem:[#allocation12 + $0x170] sm:$0xff]  ;;  %6814 = vst [vmem:[#allocation27_spill] sm:$0xff] %v4619_v31 }
  0x83   :  { %526 = vmatpush.msra.mxu0 %v447_v24  ;;  %651 = vmatpush.msrb.mxu3 %v442_v34  ;;  %v4602_v22 = vld [vmem:[#allocation12 + $0x150] sm:$0xff]  ;;  %v4606_v24 = vld [vmem:[#allocation12 + $0xc8] sm:$0xff] }
  0x84   :  { %568 = vmatpush.msra.mxu1 %v444_v20  ;;  %608 = vmatpush.msra.mxu2 %v449_v25 }
  0x85   :  { %435 = vmatmul.f32.gmra.mxu3 %v206_v37  ;;  %527 = vmatpush.msra.mxu0 %v443_v28  ;;  %v4611_v28 = vld [vmem:[#allocation12 + $0xf8] sm:$0xff] }
  0x86   :  { %569 = vmatpush.msra.mxu1 %v440_v27  ;;  %609 = vmatpush.msra.mxu2 %v445_v29  ;;  %v4613_v29 = vld [vmem:[#allocation12 + $0x130] sm:$0xff] }
  0x87   :  { %344 = vmatmul.f32.gmra.mxu1 %v192_v32  ;;  %385 = vmatmul.f32.gmra.mxu2 %v193_v33  ;;  %v439_v32 = vld [vmem:[#allocation10] sm:$0xff]  ;;  %v441_v33 = vld [vmem:[#allocation10 + $0x10] sm:$0xff] }
  0x88   :  { %610 = vmatpush.msra.mxu2 %v441_v33  ;;  %528 = vmatpush.msra.mxu0 %v439_v32  ;;  %v4621_v32 = vld [vmem:[#allocation12 + $0xa8] sm:$0xff]  ;;  %v4623_v33 = vld [vmem:[#allocation12 + $0xd8] sm:$0xff] }
  0x89   :  { %797 = vmatpush.msrb.mxu1 %v4495_v36  ;;  %6815 = vst [vmem:[#allocation28_spill] sm:$0xff] %v4621_v32 }
  0x8a   :  { %777 = vmatpush.msrb.mxu0 %v4493_v35  ;;  %817 = vmatpush.msrb.mxu2 %v4533_v51  ;;  %6816 = vst [vmem:[#allocation29_spill] sm:$0xff] %v4623_v33 }
  0x8c   :  { %818 = vmatpush.msrb.mxu2 %v4550_v57 }
  0x8e   :  { %819 = vmatpush.msrb.mxu2 %v4561_v62 }
  0x8f   :  { %347 = vmatmul.f32.gmra.mxu1 %v196_v38  ;;  %388 = vmatmul.f32.gmra.mxu2 %v197_v39  ;;  %v4501_v38 = vld [vmem:[#allocation12 + $0x1c0] sm:$0xff]  ;;  %v4503_v39 = vld [vmem:[#allocation12 + $0x1c8] sm:$0xff] }
  0x90   :  { %778 = vmatpush.msrb.mxu0 %v4501_v38  ;;  %798 = vmatpush.msrb.mxu1 %v4503_v39 }
  0x91   :  { %820 = vmatpush.msrb.mxu2 %v4576_v7 }
  0x93   :  { %821 = vmatpush.msrb.mxu2 %v4587_v13 }
  0x95   :  { %822 = vmatpush.msrb.mxu2 %v4602_v22 }
  0x97   :  { %350 = vmatmul.f32.gmra.mxu1 %v200_v40  ;;  %391 = vmatmul.f32.gmra.mxu2 %v201_v41  ;;  %v4509_v41 = vld [vmem:[#allocation12 + $0x1f8] sm:$0xff] }
  0x98   :  { %837 = vmatpush.msra.mxu3 %v4509_v41  ;;  %823 = vmatpush.msrb.mxu2 %v4613_v29 }
  0x9a   :  { %838 = vmatpush.msra.mxu3 %v4516_v44 }
  0x9c   :  { %839 = vmatpush.msra.mxu3 %v4531_v50 }
  0x9e   :  { %840 = vmatpush.msra.mxu3 %v4541_v54 }
  0x9f   :  { %353 = vmatmul.f32.gmra.mxu1 %v204_v42  ;;  %394 = vmatmul.f32.gmra.mxu2 %v205_v43  ;;  %v4512_v42 = vld [vmem:[#allocation12 + $0x1a0] sm:$0xff]  ;;  %v4514_v43 = vld [vmem:[#allocation12 + $0x1a8] sm:$0xff] }
  0xa0   :  { %779 = vmatpush.msrb.mxu0 %v4512_v42  ;;  %799 = vmatpush.msrb.mxu1 %v4514_v43 }
  0xa1   :  { %841 = vmatpush.msra.mxu3 %v4559_v61 }
  0xa2   :  { %780 = vmatpush.msrb.mxu0 %v4523_v46  ;;  %800 = vmatpush.msrb.mxu1 %v4525_v47 }
  0xa3   :  { %842 = vmatpush.msra.mxu3 %v4571_v3 }
  0xa4   :  { %781 = vmatpush.msrb.mxu0 %v4537_v52  ;;  %801 = vmatpush.msrb.mxu1 %v4539_v53 }
  0xa5   :  { %843 = vmatpush.msra.mxu3 %v4585_v12 }
  0xa6   :  { %782 = vmatpush.msrb.mxu0 %v4552_v58  ;;  %802 = vmatpush.msrb.mxu1 %v4554_v59 }
  0xa7   :  { %844 = vmatpush.msra.mxu3 %v4597_v18 }
  0xa8   :  { %783 = vmatpush.msrb.mxu0 %v4567_v1  ;;  %803 = vmatpush.msrb.mxu1 %v4569_v2 }
  0xa9   :  { %845 = vmatpush.msra.mxu3 %v4611_v28 }
  0xaa   :  { %784 = vmatpush.msrb.mxu0 %v4578_v8  ;;  %804 = vmatpush.msrb.mxu1 %v4580_v9 }
  0xab   :  { %846 = vmatpush.msra.mxu3 %v4623_v33 }
  0xac   :  { %805 = vmatpush.msrb.mxu1 %v4595_v17 }
  0xae   :  { %806 = vmatpush.msrb.mxu1 %v4606_v24 }
  0xb0   :  { %807 = vmatpush.msrb.mxu1 %v4621_v32 }
  0xc4   :  { %v4487_v16 = vpop.f32.mrf.mxu1 }
  0xc5   :  { %v293_v0 = vadd.f32 %v4545_v55, %v4487_v16  ;;  %v4593_v16 = vld [vmem:[#allocation12 + $0xe0] sm:$0xff] }
  0xc6   :  { %785 = vmatpush.msrb.mxu0 %v4593_v16 }
  0xc8   :  { %786 = vmatpush.msrb.mxu0 %v4604_v23 }
  0xca   :  { %v4489_v26 = vpop.f32.mrf.mxu2  ;;  %787 = vmatpush.msrb.mxu0 %v4619_v31 }
  0xcc   :  { %v4491_v30 = vpop.f32.mrf.mxu1 }
  0xcd   :  { %v296_v14 = vadd.f32 %v4545_v55, %v4491_v30 }
  0xd0   :  { %v415_v49 = vpop.f32.mrf.mxu3 }
  0xd2   :  { %v4499_v37 = vpop.f32.mrf.mxu2 }
  0xd4   :  { %v4505_v40 = vpop.f32.mrf.mxu1 }
  0xd5   :  { %v299_v30 = vadd.f32 %v4545_v55, %v4505_v40 }
  0xd8   :  { %v418_v63 = vpop.f32.mrf.mxu3 }
  0xda   :  { %v4520_v45 = vpop.f32.mrf.mxu2 }
  0xdc   :  { %v4527_v48 = vpop.f32.mrf.mxu1 }
  0xe0   :  { %v421_v15 = vpop.f32.mrf.mxu3 }
  0xe2   :  { %v4547_v56 = vpop.f32.mrf.mxu2 }
  0xe4   :  { %v333_v60 = vpop.f32.mrf.mxu1 }
  0xe5   :  { %v334_v4 = vadd.f32 %v333_v60, %v293_v0  ;;  %v4630_v0 = vld [vmem:[#allocation12 + $0x80] sm:$0xff] }
  0xe6   :  { %6817 = vst [vmem:[#allocation30_spill] sm:$0xff] %v4630_v0  ;;  %788 = vmatpush.msrb.mxu0 %v4630_v0 }
  0xe8   :  { %v424_v60 = vpop.f32.mrf.mxu3 }
  0xea   :  { %v374_v5 = vpop.f32.mrf.mxu2 }
  0xeb   :  { %v375_v6 = vadd.f32 %v374_v5, %v334_v4  ;;  %v4632_v4 = vld [vmem:[#allocation12 + $0x88] sm:$0xff] }
  0xec   :  { %v336_v10 = vpop.f32.mrf.mxu1  ;;  %6818 = vst [vmem:[#allocation31_spill] sm:$0xff] %v4632_v4  ;;  %808 = vmatpush.msrb.mxu1 %v4632_v4 }
  0xed   :  { %v416_v11 = vadd.f32 %v415_v49, %v375_v6  ;;  %v337_v19 = vadd.f32 %v336_v10, %v296_v14  ;;  %v4637_v10 = vld [vmem:[#allocation12 + $0xb8] sm:$0xff]  ;;  %v302_v14 = vadd.f32 %v4545_v55, %v4527_v48 }
  0xee   :  { %6819 = vst [vmem:[#allocation32_spill] sm:$0xff] %v4637_v10  ;;  %847 = vmatpush.msra.mxu3 %v4637_v10 }
  0xef   :  { %529 = vmatmul.f32.vlgmr.msra.gmra.mxu0 %v416_v11  ;;  %570 = vmatmul.f32.vlgmr.msra.gmra.mxu1 %v416_v11 }
  0xf0   :  { %611 = vmatmul.f32.vlgmr.msra.gmra.mxu2 %v416_v11  ;;  %652 = vmatmul.f32.vlgmr.msrb.gmra.mxu3 %v416_v11  ;;  %v4639_v11 = vld [vmem:[#allocation12 + $0xf0] sm:$0xff] }
  0xf2   :  { %v377_v20 = vpop.f32.mrf.mxu2 }
  0xf3   :  { %v378_v21 = vadd.f32 %v377_v20, %v337_v19  ;;  %v4645_v19 = vld [vmem:[#allocation12 + $0x60] sm:$0xff]  ;;  %v4649_v20 = vld [vmem:[#allocation12 + $0x98] sm:$0xff] }
  0xf4   :  { %v339_v25 = vpop.f32.mrf.mxu1  ;;  %6820 = vst [vmem:[#allocation33_spill] sm:$0xff] %v4645_v19  ;;  %789 = vmatpush.msrb.mxu0 %v4645_v19  ;;  %848 = vmatpush.msra.mxu3 %v4649_v20  ;;  %v4689_v19 = vld [vmem:[#allocation12 + $0x8] sm:$0xff] }
  0xf5   :  { %v419_v27 = vadd.f32 %v418_v63, %v378_v21  ;;  %v340_v34 = vadd.f32 %v339_v25, %v299_v30  ;;  %v4628_v63 = vld [vmem:[#allocation12 + $0x110] sm:$0xff]  ;;  %6822 = vst [vmem:[#allocation35_spill] sm:$0xff] %v4649_v20  ;;  %v4657_v30 = vld [vmem:[#allocation12 + $0x40] sm:$0xff]  ;;  %v4691_v20 = vld [vmem:[#allocation12 + $0x38] sm:$0xff] }
  0xf6   :  { %824 = vmatpush.msrb.mxu2 %v4628_v63  ;;  %6824 = vst [vmem:[#allocation37_spill] sm:$0xff] %v4657_v30  ;;  %790 = vmatpush.msrb.mxu0 %v4657_v30  ;;  %v4673_v30 = vld [vmem:[#allocation12 + $0x20] sm:$0xff] }
  0xf7   :  { %532 = vmatmul.f32.gmra.mxu0 %v419_v27  ;;  %573 = vmatmul.f32.gmra.mxu1 %v419_v27  ;;  %6829 = vst [vmem:[#allocation42_spill] sm:$0xff] %v4673_v30 }
  0xf8   :  { %614 = vmatmul.f32.gmra.mxu2 %v419_v27  ;;  %655 = vmatmul.f32.gmra.mxu3 %v419_v27  ;;  %v4654_v27 = vld [vmem:[#allocation12 + $0xd0] sm:$0xff]  ;;  %6835 = vst [vmem:[#allocation48_spill] sm:$0xff] %v4689_v19 }
  0xf9   :  { %825 = vmatpush.msrb.mxu2 %v4639_v11  ;;  %6823 = vst [vmem:[#allocation36_spill] sm:$0xff] %v4654_v27  ;;  %791 = vmatpush.msrb.mxu0 %v4673_v30 }
  0xfa   :  { %v380_v49 = vpop.f32.mrf.mxu2  ;;  %6836 = vst [vmem:[#allocation49_spill] sm:$0xff] %v4691_v20 }
  0xfb   :  { %v381_v40 = vadd.f32 %v380_v49, %v340_v34  ;;  %826 = vmatpush.msrb.mxu2 %v4654_v27  ;;  %v4659_v34 = vld [vmem:[#allocation12 + $0x48] sm:$0xff] }
  0xfc   :  { %v342_v5 = vpop.f32.mrf.mxu1  ;;  %6825 = vst [vmem:[#allocation38_spill] sm:$0xff] %v4659_v34 }
  0xfd   :  { %v422_v6 = vadd.f32 %v421_v15, %v381_v40  ;;  %v4647_v15 = vld [vmem:[#allocation12 + $0x68] sm:$0xff]  ;;  %v343_v21 = vadd.f32 %v342_v5, %v302_v14  ;;  %v427_v40 = vpop.f32.mrf.mxu3  ;;  %v4663_v5 = vld [vmem:[#allocation12 + $0xb0] sm:$0xff]  ;;  %v4666_v14 = vld [vmem:[#allocation12 + $0x78] sm:$0xff] }
  0xfe   :  { %6821 = vst [vmem:[#allocation34_spill] sm:$0xff] %v4647_v15  ;;  %809 = vmatpush.msrb.mxu1 %v4647_v15  ;;  %827 = vmatpush.msrb.mxu2 %v4663_v5  ;;  %v4683_v15 = vld [vmem:[#allocation12] sm:$0xff] }
  0xff   :  { %535 = vmatmul.f32.gmra.mxu0 %v422_v6  ;;  %576 = vmatmul.f32.gmra.mxu1 %v422_v6  ;;  %6826 = vst [vmem:[#allocation39_spill] sm:$0xff] %v4663_v5 }
 0x100   :  { %617 = vmatmul.f32.gmra.mxu2 %v422_v6  ;;  %658 = vmatmul.f32.gmra.mxu3 %v422_v6  ;;  %6827 = vst [vmem:[#allocation40_spill] sm:$0xff] %v4666_v14 }
 0x101   :  { %810 = vmatpush.msrb.mxu1 %v4659_v34  ;;  %849 = vmatpush.msra.mxu3 %v4666_v14  ;;  %v4675_v34 = vld [vmem:[#allocation12 + $0x28] sm:$0xff]  ;;  %v4681_v14 = vld [vmem:[#allocation12 + $0x58] sm:$0xff]  ;;  %6833 = vst [vmem:[#allocation46_spill] sm:$0xff] %v4683_v15 }
 0x102   :  { %v383_v25 = vpop.f32.mrf.mxu2  ;;  %6830 = vst [vmem:[#allocation43_spill] sm:$0xff] %v4675_v34  ;;  %792 = vmatpush.msrb.mxu0 %v4683_v15 }
 0x103   :  { %v384_v48 = vadd.f32 %v383_v25, %v343_v21  ;;  %v4669_v21 = vld [vmem:[#allocation12 + $0x90] sm:$0xff]  ;;  %v305_v25 = vadd.f32 %v4545_v55, %v4489_v26  ;;  %6832 = vst [vmem:[#allocation45_spill] sm:$0xff] %v4681_v14  ;;  %811 = vmatpush.msrb.mxu1 %v4675_v34  ;;  %850 = vmatpush.msra.mxu3 %v4681_v14 }
 0x104   :  { %v345_v49 = vpop.f32.mrf.mxu1  ;;  %6828 = vst [vmem:[#allocation41_spill] sm:$0xff] %v4669_v21  ;;  %828 = vmatpush.msrb.mxu2 %v4669_v21  ;;  %929 = vmatpush.msra.mxu0 %v4493_v35  ;;  %v4701_v21 = vld [vmem:[#allocation12 + $0x30] sm:$0xff] }
 0x105   :  { %v425_v6 = vadd.f32 %v424_v60, %v384_v48  ;;  %v4677_v60 = vld [vmem:[#allocation12 + $0x70] sm:$0xff]  ;;  %v346_v48 = vadd.f32 %v345_v49, %v305_v25  ;;  %v4695_v25 = vld [vmem:[#allocation12 + $0x18] sm:$0xff]  ;;  %812 = vmatpush.msrb.mxu1 %v4689_v19  ;;  %851 = vmatpush.msra.mxu3 %v4691_v20  ;;  %v430_v14 = vpop.f32.mrf.mxu3  ;;  %6838 = vst [vmem:[#allocation51_spill] sm:$0xff] %v4701_v21 }
 0x106   :  { %6831 = vst [vmem:[#allocation44_spill] sm:$0xff] %v4677_v60  ;;  %829 = vmatpush.msrb.mxu2 %v4677_v60  ;;  %930 = vmatpush.msra.mxu0 %v4501_v38 }
 0x107   :  { %538 = vmatmul.f32.gmra.mxu0 %v425_v6  ;;  %579 = vmatmul.f32.gmra.mxu1 %v425_v6  ;;  %6837 = vst [vmem:[#allocation50_spill] sm:$0xff] %v4695_v25 }
 0x108   :  { %620 = vmatmul.f32.gmra.mxu2 %v425_v6  ;;  %661 = vmatmul.f32.gmra.mxu3 %v425_v6  ;;  %v4687_v6 = vld [vmem:[#allocation12 + $0x50] sm:$0xff] }
 0x109   :  { %6834 = vst [vmem:[#allocation47_spill] sm:$0xff] %v4687_v6  ;;  %830 = vmatpush.msrb.mxu2 %v4687_v6  ;;  %852 = vmatpush.msra.mxu3 %v4695_v25 }
 0x10a   :  { %v386_v26 = vpop.f32.mrf.mxu2  ;;  %949 = vmatpush.msra.mxu1 %v4495_v36  ;;  %931 = vmatpush.msra.mxu0 %v4512_v42 }
 0x10b   :  { %v387_v49 = vadd.f32 %v386_v26, %v346_v48  ;;  %v308_v48 = vadd.f32 %v4545_v55, %v4499_v37  ;;  %v4707_v26 = vld [vmem:[#allocation12 + $0x10] sm:$0xff]  ;;  %831 = vmatpush.msrb.mxu2 %v4701_v21  ;;  %989 = vmatpush.msrb.mxu3 %v4509_v41 }
 0x10c   :  { %v348_v30 = vpop.f32.mrf.mxu1  ;;  %6839 = vst [vmem:[#allocation52_spill] sm:$0xff] %v4707_v26  ;;  %950 = vmatpush.msra.mxu1 %v4503_v39  ;;  %932 = vmatpush.msra.mxu0 %v4523_v46 }
 0x10d   :  { %v428_v34 = vadd.f32 %v427_v40, %v387_v49  ;;  %v349_v40 = vadd.f32 %v348_v30, %v308_v48  ;;  %832 = vmatpush.msrb.mxu2 %v4707_v26  ;;  %990 = vmatpush.msrb.mxu3 %v4516_v44  ;;  %v433_v48 = vpop.f32.mrf.mxu3 }
 0x10e   :  { %951 = vmatpush.msra.mxu1 %v4514_v43  ;;  %933 = vmatpush.msra.mxu0 %v4537_v52 }
 0x10f   :  { %541 = vmatmul.f32.gmra.mxu0 %v428_v34  ;;  %582 = vmatmul.f32.gmra.mxu1 %v428_v34 }
 0x110   :  { %623 = vmatmul.f32.gmra.mxu2 %v428_v34  ;;  %664 = vmatmul.f32.gmra.mxu3 %v428_v34  ;;  %v311_v34 = vadd.f32 %v4545_v55, %v4520_v45 }
 0x111   :  { %969 = vmatpush.msra.mxu2 %v4533_v51  ;;  %991 = vmatpush.msrb.mxu3 %v4531_v50 }
 0x112   :  { %v389_v49 = vpop.f32.mrf.mxu2  ;;  %952 = vmatpush.msra.mxu1 %v4525_v47  ;;  %934 = vmatpush.msra.mxu0 %v4552_v58 }
 0x113   :  { %v390_v36 = vadd.f32 %v389_v49, %v349_v40  ;;  %970 = vmatpush.msra.mxu2 %v4550_v57  ;;  %992 = vmatpush.msrb.mxu3 %v4541_v54 }
 0x114   :  { %v351_v37 = vpop.f32.mrf.mxu1  ;;  %953 = vmatpush.msra.mxu1 %v4539_v53  ;;  %935 = vmatpush.msra.mxu0 %v4567_v1 }
 0x115   :  { %v431_v30 = vadd.f32 %v430_v14, %v390_v36  ;;  %v352_v40 = vadd.f32 %v351_v37, %v311_v34  ;;  %971 = vmatpush.msra.mxu2 %v4561_v62  ;;  %993 = vmatpush.msrb.mxu3 %v4559_v61  ;;  %v314_v37 = vadd.f32 %v4545_v55, %v4547_v56  ;;  %v6840_v56 = vld [vmem:[#allocation35_spill] sm:$0xff] }
 0x116   :  { %954 = vmatpush.msra.mxu1 %v4554_v59  ;;  %936 = vmatpush.msra.mxu0 %v4578_v8 }
 0x117   :  { %544 = vmatmul.f32.gmra.mxu0 %v431_v30  ;;  %585 = vmatmul.f32.gmra.mxu1 %v431_v30 }
 0x118   :  { %626 = vmatmul.f32.gmra.mxu2 %v431_v30  ;;  %667 = vmatmul.f32.gmra.mxu3 %v431_v30 }
 0x119   :  { %972 = vmatpush.msra.mxu2 %v4576_v7  ;;  %994 = vmatpush.msrb.mxu3 %v4571_v3 }
 0x11a   :  { %v392_v36 = vpop.f32.mrf.mxu2  ;;  %955 = vmatpush.msra.mxu1 %v4569_v2  ;;  %937 = vmatpush.msra.mxu0 %v4593_v16 }
 0x11b   :  { %v393_v14 = vadd.f32 %v392_v36, %v352_v40  ;;  %973 = vmatpush.msra.mxu2 %v4587_v13  ;;  %995 = vmatpush.msrb.mxu3 %v4585_v12  ;;  %v6841_v36 = vld [vmem:[#allocation33_spill] sm:$0xff] }
 0x11c   :  { %v354_v49 = vpop.f32.mrf.mxu1  ;;  %956 = vmatpush.msra.mxu1 %v4580_v9  ;;  %938 = vmatpush.msra.mxu0 %v4604_v23 }
 0x11d   :  { %v434_v45 = vadd.f32 %v433_v48, %v393_v14  ;;  %v355_v30 = vadd.f32 %v354_v49, %v314_v37  ;;  %974 = vmatpush.msra.mxu2 %v4602_v22  ;;  %v436_v48 = vpop.f32.mrf.mxu3  ;;  %996 = vmatpush.msrb.mxu3 %v4597_v18  ;;  %v6571_v14 = vmov 0.0   ;;  %v6843_v49 = vld [vmem:[#allocation34_spill] sm:$0xff]  ;;  %v6844_v37 = vld [vmem:[#allocation40_spill] sm:$0xff] }
 0x11e   :  { %957 = vmatpush.msra.mxu1 %v4595_v17  ;;  %939 = vmatpush.msra.mxu0 %v4619_v31 }
 0x11f   :  { %547 = vmatmul.f32.gmra.mxu0 %v434_v45  ;;  %588 = vmatmul.f32.gmra.mxu1 %v434_v45 }
 0x120   :  { %629 = vmatmul.f32.gmra.mxu2 %v434_v45  ;;  %670 = vmatmul.f32.gmra.mxu3 %v434_v45  ;;  %v6842_v45 = vld [vmem:[#allocation41_spill] sm:$0xff] }
 0x121   :  { %975 = vmatpush.msra.mxu2 %v4613_v29  ;;  %997 = vmatpush.msrb.mxu3 %v4611_v28 }
 0x122   :  { %v395_v34 = vpop.f32.mrf.mxu2  ;;  %958 = vmatpush.msra.mxu1 %v4606_v24  ;;  %940 = vmatpush.msra.mxu0 %v4630_v0 }
 0x123   :  { %v396_v40 = vadd.f32 %v395_v34, %v355_v30  ;;  %976 = vmatpush.msra.mxu2 %v4628_v63  ;;  %998 = vmatpush.msrb.mxu3 %v4623_v33  ;;  %v6845_v30 = vld [vmem:[#allocation37_spill] sm:$0xff]  ;;  %v6846_v34 = vld [vmem:[#allocation38_spill] sm:$0xff] }
 0x124   :  { %959 = vmatpush.msra.mxu1 %v4621_v32  ;;  %941 = vmatpush.msra.mxu0 %v6841_v36 }
 0x125   :  { %v437_v55 = vadd.f32 %v436_v48, %v396_v40  ;;  %977 = vmatpush.msra.mxu2 %v4639_v11  ;;  %999 = vmatpush.msrb.mxu3 %v4637_v10  ;;  %v6847_v48 = vld [vmem:[#allocation45_spill] sm:$0xff]  ;;  %v6848_v40 = vld [vmem:[#allocation42_spill] sm:$0xff] }
 0x126   :  { %960 = vmatpush.msra.mxu1 %v4632_v4  ;;  %942 = vmatpush.msra.mxu0 %v6845_v30 }
 0x127   :  { %550 = vmatmul.f32.gmra.mxu0 %v437_v55  ;;  %591 = vmatmul.f32.gmra.mxu1 %v437_v55 }
 0x128   :  { %632 = vmatmul.f32.gmra.mxu2 %v437_v55  ;;  %673 = vmatmul.f32.gmra.mxu3 %v437_v55  ;;  %v6849_v55 = vld [vmem:[#allocation43_spill] sm:$0xff] }
 0x129   :  { %978 = vmatpush.msra.mxu2 %v4654_v27  ;;  %1000 = vmatpush.msrb.mxu3 %v6840_v56 }
 0x12a   :  { %961 = vmatpush.msra.mxu1 %v6843_v49  ;;  %943 = vmatpush.msra.mxu0 %v6848_v40 }
 0x12b   :  { %979 = vmatpush.msra.mxu2 %v4663_v5  ;;  %1001 = vmatpush.msrb.mxu3 %v6844_v37 }
 0x12c   :  { %962 = vmatpush.msra.mxu1 %v6846_v34  ;;  %944 = vmatpush.msra.mxu0 %v4683_v15 }
 0x12d   :  { %980 = vmatpush.msra.mxu2 %v6842_v45  ;;  %1002 = vmatpush.msrb.mxu3 %v6847_v48 }
 0x12e   :  { %963 = vmatpush.msra.mxu1 %v6849_v55 }
 0x12f   :  { %793 = vmatmul.f32.vlgmr.msrb.gmra.mxu0 %v6571_v14  ;;  %813 = vmatmul.f32.vlgmr.msrb.gmra.mxu1 %v6571_v14 }
 0x130   :  { %833 = vmatmul.f32.vlgmr.msrb.gmra.mxu2 %v6571_v14  ;;  %853 = vmatmul.f32.vlgmr.msra.gmra.mxu3 %v6571_v14  ;;  %v6850_v14 = vld [vmem:[#allocation26_spill] sm:$0xff] }
 0x131   :  { %981 = vmatpush.msra.mxu2 %v4677_v60  ;;  %1003 = vmatpush.msrb.mxu3 %v4691_v20 }
 0x132   :  { %964 = vmatpush.msra.mxu1 %v4689_v19  ;;  %1081 = vmatpush.msrb.mxu0 %v4493_v35 }
 0x133   :  { %982 = vmatpush.msra.mxu2 %v4687_v6  ;;  %1004 = vmatpush.msrb.mxu3 %v4695_v25 }
 0x134   :  { %1101 = vmatpush.msrb.mxu1 %v6850_v14  ;;  %1082 = vmatpush.msrb.mxu0 %v4501_v38 }
 0x135   :  { %983 = vmatpush.msra.mxu2 %v4701_v21  ;;  %1141 = vmatpush.msra.mxu3 %v4509_v41 }
 0x136   :  { %1102 = vmatpush.msrb.mxu1 %v4503_v39  ;;  %1083 = vmatpush.msrb.mxu0 %v4512_v42 }
 0x137   :  { %984 = vmatpush.msra.mxu2 %v4707_v26  ;;  %1142 = vmatpush.msra.mxu3 %v4516_v44 }
 0x138   :  { %1103 = vmatpush.msrb.mxu1 %v4514_v43  ;;  %1084 = vmatpush.msrb.mxu0 %v4523_v46 }
 0x139   :  { %1121 = vmatpush.msrb.mxu2 %v4533_v51  ;;  %1143 = vmatpush.msra.mxu3 %v4531_v50 }
 0x13a   :  { %1104 = vmatpush.msrb.mxu1 %v4525_v47  ;;  %1085 = vmatpush.msrb.mxu0 %v4537_v52 }
 0x13b   :  { %1122 = vmatpush.msrb.mxu2 %v4550_v57  ;;  %1144 = vmatpush.msra.mxu3 %v4541_v54 }
 0x13c   :  { %1105 = vmatpush.msrb.mxu1 %v4539_v53  ;;  %1086 = vmatpush.msrb.mxu0 %v4552_v58 }
 0x13d   :  { %1123 = vmatpush.msrb.mxu2 %v4561_v62  ;;  %1145 = vmatpush.msra.mxu3 %v4559_v61 }
 0x13e   :  { %1106 = vmatpush.msrb.mxu1 %v4554_v59  ;;  %1087 = vmatpush.msrb.mxu0 %v4567_v1 }
 0x13f   :  { %1124 = vmatpush.msrb.mxu2 %v4576_v7  ;;  %1146 = vmatpush.msra.mxu3 %v4571_v3 }
 0x140   :  { %1107 = vmatpush.msrb.mxu1 %v4569_v2  ;;  %1088 = vmatpush.msrb.mxu0 %v4578_v8 }
 0x141   :  { %1125 = vmatpush.msrb.mxu2 %v4587_v13  ;;  %1147 = vmatpush.msra.mxu3 %v4585_v12 }
 0x142   :  { %1108 = vmatpush.msrb.mxu1 %v4580_v9  ;;  %1089 = vmatpush.msrb.mxu0 %v4593_v16 }
 0x143   :  { %1126 = vmatpush.msrb.mxu2 %v4602_v22  ;;  %1148 = vmatpush.msra.mxu3 %v4597_v18 }
 0x144   :  { %1109 = vmatpush.msrb.mxu1 %v4595_v17  ;;  %1090 = vmatpush.msrb.mxu0 %v4604_v23 }
 0x145   :  { %1127 = vmatpush.msrb.mxu2 %v4613_v29  ;;  %1149 = vmatpush.msra.mxu3 %v4611_v28 }
 0x146   :  { %1110 = vmatpush.msrb.mxu1 %v4606_v24  ;;  %1091 = vmatpush.msrb.mxu0 %v4619_v31 }
 0x147   :  { %1128 = vmatpush.msrb.mxu2 %v4628_v63  ;;  %1150 = vmatpush.msra.mxu3 %v4623_v33 }
 0x148   :  { %1111 = vmatpush.msrb.mxu1 %v4621_v32  ;;  %1092 = vmatpush.msrb.mxu0 %v4630_v0 }
 0x149   :  { %1129 = vmatpush.msrb.mxu2 %v4639_v11  ;;  %1151 = vmatpush.msra.mxu3 %v4637_v10 }
 0x14a   :  { %1112 = vmatpush.msrb.mxu1 %v4632_v4  ;;  %1093 = vmatpush.msrb.mxu0 %v6841_v36 }
 0x14b   :  { %1130 = vmatpush.msrb.mxu2 %v4654_v27  ;;  %1152 = vmatpush.msra.mxu3 %v6840_v56 }
 0x14c   :  { %1113 = vmatpush.msrb.mxu1 %v6843_v49  ;;  %1094 = vmatpush.msrb.mxu0 %v6845_v30 }
 0x14d   :  { %1131 = vmatpush.msrb.mxu2 %v4663_v5  ;;  %1153 = vmatpush.msra.mxu3 %v6844_v37 }
 0x14e   :  { %1114 = vmatpush.msrb.mxu1 %v6846_v34  ;;  %1095 = vmatpush.msrb.mxu0 %v6848_v40 }
 0x14f   :  { %1132 = vmatpush.msrb.mxu2 %v6842_v45  ;;  %1154 = vmatpush.msra.mxu3 %v6847_v48 }
 0x150   :  { %1115 = vmatpush.msrb.mxu1 %v6849_v55  ;;  %1096 = vmatpush.msrb.mxu0 %v4683_v15 }
 0x151   :  { %1133 = vmatpush.msrb.mxu2 %v4677_v60  ;;  %1155 = vmatpush.msra.mxu3 %v4691_v20 }
 0x152   :  { %1116 = vmatpush.msrb.mxu1 %v4689_v19 }
 0x153   :  { %1134 = vmatpush.msrb.mxu2 %v4687_v6  ;;  %1156 = vmatpush.msra.mxu3 %v4695_v25 }
 0x155   :  { %1135 = vmatpush.msrb.mxu2 %v4701_v21 }
 0x157   :  { %1136 = vmatpush.msrb.mxu2 %v4707_v26 }
 0x16c   :  { %v530_v34 = vpop.f32.mrf.mxu0  ;;  %v571_v6 = vpop.f32.mrf.mxu1 }
 0x173   :  { %v612_v30 = vpop.f32.mrf.mxu2  ;;  %v653_v48 = vpop.f32.mrf.mxu3 }
 0x174   :  { %v4845_v37 = vpop.f32.mrf.mxu0  ;;  %v4847_v40 = vpop.f32.mrf.mxu1 }
 0x175   :  { %6851 = vst [vmem:[#allocation26_spill] sm:$0xff] %v4845_v37 }
 0x176   :  { %6852 = vst [vmem:[#allocation53_spill] sm:$0xff] %v4847_v40 }
 0x17b   :  { %v4849_v55 = vpop.f32.mrf.mxu2  ;;  %v4851_v21 = vpop.f32.mrf.mxu3 }
 0x17c   :  { %6853 = vst [vmem:[#allocation54_spill] sm:$0xff] %v4849_v55  ;;  %v4853_v20 = vpop.f32.mrf.mxu0  ;;  %v4855_v15 = vpop.f32.mrf.mxu1 }
 0x17d   :  { %6854 = vst [vmem:[#allocation55_spill] sm:$0xff] %v4851_v21 }
 0x17e   :  { %6855 = vst [vmem:[#allocation56_spill] sm:$0xff] %v4853_v20 }
 0x17f   :  { %6856 = vst [vmem:[#allocation57_spill] sm:$0xff] %v4855_v15 }
 0x183   :  { %v4857_v19 = vpop.f32.mrf.mxu2  ;;  %v4859_v26 = vpop.f32.mrf.mxu3 }
 0x184   :  { %6857 = vst [vmem:[#allocation58_spill] sm:$0xff] %v4857_v19  ;;  %v4861_v25 = vpop.f32.mrf.mxu0  ;;  %v4863_v60 = vpop.f32.mrf.mxu1 }
 0x185   :  { %6858 = vst [vmem:[#allocation59_spill] sm:$0xff] %v4859_v26 }
 0x186   :  { %6859 = vst [vmem:[#allocation60_spill] sm:$0xff] %v4861_v25 }
 0x187   :  { %6860 = vst [vmem:[#allocation61_spill] sm:$0xff] %v4863_v60 }
 0x18b   :  { %v4865_v49 = vpop.f32.mrf.mxu2  ;;  %v4867_v37 = vpop.f32.mrf.mxu3 }
 0x18c   :  { %6861 = vst [vmem:[#allocation62_spill] sm:$0xff] %v4865_v49  ;;  %v4869_v40 = vpop.f32.mrf.mxu0  ;;  %v4871_v55 = vpop.f32.mrf.mxu1 }
 0x18d   :  { %6862 = vst [vmem:[#allocation63_spill] sm:$0xff] %v4867_v37 }
 0x18e   :  { %6863 = vst [vmem:[#allocation64_spill] sm:$0xff] %v4869_v40 }
 0x18f   :  { %6864 = vst [vmem:[#allocation65_spill] sm:$0xff] %v4871_v55 }
 0x193   :  { %v4873_v21 = vpop.f32.mrf.mxu3  ;;  %v4879_v19 = vpop.f32.mrf.mxu2 }
 0x194   :  { %6865 = vst [vmem:[#allocation66_spill] sm:$0xff] %v4873_v21  ;;  %v4875_v20 = vpop.f32.mrf.mxu0  ;;  %v4877_v15 = vpop.f32.mrf.mxu1  ;;  %v503_v21 = vld [vmem:[%s6542_s5] sm:$0xf] }
 0x195   :  { %6866 = vst [vmem:[#allocation67_spill] sm:$0xff] %v4875_v20  ;;  %v4908_v45 = vperm.slane %v503_v21, 3 }
 0x196   :  { %6867 = vst [vmem:[#allocation68_spill] sm:$0xff] %v4877_v15  ;;  %v4898_v15 = vperm.slane %v503_v21, 0 }
 0x197   :  { %6868 = vst [vmem:[#allocation69_spill] sm:$0xff] %v4879_v19  ;;  %v4900_v19 = vperm.slane %v503_v21, 1  ;;  %v654_v4 = vadd.f32 %v653_v48, %v4908_v45 }
 0x198   :  { %6876 = vst [vmem:[#allocation77_spill] sm:$0xff] %v4898_v15 }
 0x199   :  { %6877 = vst [vmem:[#allocation78_spill] sm:$0xff] %v4900_v19 }
 0x19a   :  { %6880 = vst [vmem:[#allocation81_spill] sm:$0xff] %v4908_v45 }
 0x19b   :  { %v4881_v26 = vpop.f32.mrf.mxu3  ;;  %v4887_v49 = vpop.f32.mrf.mxu2 }
 0x19c   :  { %6869 = vst [vmem:[#allocation70_spill] sm:$0xff] %v4881_v26  ;;  %v4883_v25 = vpop.f32.mrf.mxu0  ;;  %v4885_v60 = vpop.f32.mrf.mxu1 }
 0x19d   :  { %6870 = vst [vmem:[#allocation71_spill] sm:$0xff] %v4883_v25  ;;  %v572_v25 = vadd.f32 %v571_v6, %v4900_v19 }
 0x19e   :  { %6871 = vst [vmem:[#allocation72_spill] sm:$0xff] %v4885_v60  ;;  %v531_v60 = vadd.f32 %v530_v34, %v4898_v15 }
 0x19f   :  { %6872 = vst [vmem:[#allocation73_spill] sm:$0xff] %v4887_v49 }
 0x1a3   :  { %v4889_v37 = vpop.f32.mrf.mxu3  ;;  %v4902_v26 = vpop.f32.mrf.mxu2 }
 0x1a4   :  { %6873 = vst [vmem:[#allocation74_spill] sm:$0xff] %v4889_v37  ;;  %v4894_v55 = vpop.f32.mrf.mxu0  ;;  %v4896_v20 = vpop.f32.mrf.mxu1 }
 0x1a5   :  { %6874 = vst [vmem:[#allocation75_spill] sm:$0xff] %v4894_v55 }
 0x1a6   :  { %6875 = vst [vmem:[#allocation76_spill] sm:$0xff] %v4896_v20 }
 0x1a7   :  { %6878 = vst [vmem:[#allocation79_spill] sm:$0xff] %v4902_v26 }
 0x1ab   :  { %v4906_v49 = vpop.f32.mrf.mxu3  ;;  %v4911_v0 = vpop.f32.mrf.mxu2 }
 0x1ac   :  { %6879 = vst [vmem:[#allocation80_spill] sm:$0xff] %v4906_v49  ;;  %v794_v37 = vpop.f32.mrf.mxu0  ;;  %v814_v40 = vpop.f32.mrf.mxu1 }
 0x1ad   :  { %v857_v36 = vadd.f32 %v794_v37, %v531_v60  ;;  %v858_v56 = vadd.f32 %v814_v40, %v572_v25  ;;  %6881 = vst [vmem:[#allocation82_spill] sm:$0xff] %v4911_v0  ;;  %v4913_v60 = vperm.slane %v503_v21, 2 }
 0x1af   :  { %v3647_v55 = vmul.f32 -1.442695, %v857_v36  ;;  %v3648_v20 = vmul.f32 -1.442695, %v858_v56  ;;  %6882 = vst [vmem:[#allocation83_spill] sm:$0xff] %v4913_v60  ;;  %v613_v36 = vadd.f32 %v612_v30, %v4913_v60 }
 0x1b1   :  { %3728 = vpow2.f32 %v3647_v55 }
 0x1b2   :  { %3730 = vpow2.f32 %v3648_v20 }
 0x1b3   :  { %v854_v26 = vpop.f32.mrf.mxu3  ;;  %v834_v25 = vpop.f32.mrf.mxu2 }
 0x1b4   :  { %v860_v34 = vadd.f32 %v854_v26, %v654_v4  ;;  %v859_v48 = vadd.f32 %v834_v25, %v613_v36 }
 0x1b6   :  { %v3649_v15 = vmul.f32 -1.442695, %v860_v34 }
 0x1b7   :  { %v3729_v6 = vpop.eup %3728 }
 0x1b8   :  { %v3731_v19 = vpop.eup %3730  ;;  %v864_v49 = vadd.f32 1.0, %v3729_v6  ;;  %3732 = vpow2.f32 %v3649_v15 }
 0x1b9   :  { %v883_v10 = vadd.f32 1.0, %v3731_v19 }
 0x1ba   :  { %3734 = vrcp.f32 %v864_v49  ;;  %v876_v6 = vand.u32 2147483648, %v864_v49  ;;  %v874_v21 = vand.u32 2147483647, %v864_v49  ;;  %vm870_vm2 = vweird.f32 %v864_v49 }
 0x1bb   :  { %3736 = vrcp.f32 %v883_v10  ;;  %v895_v19 = vand.u32 2147483648, %v883_v10  ;;  %v893_v45 = vand.u32 2147483647, %v883_v10  ;;  %vm889_vm3 = vweird.f32 %v883_v10 }
 0x1bc   :  { %v877_v25 = vor.u32 1.1754944e-38, %v876_v6  ;;  %vm875_vm5 = vcmp.eq.f32.partialorder %v874_v21, 8.507059e+37 }
 0x1bd   :  { %v896_v60 = vor.u32 1.1754944e-38, %v895_v19  ;;  %vm894_vm7 = vcmp.eq.f32.partialorder %v893_v45, 8.507059e+37 }
 0x1be   :  { %v3733_v56 = vpop.eup %3732 }
 0x1bf   :  { %v903_v37 = vadd.f32 1.0, %v3733_v56 }
 0x1c0   :  { %v3735_v20 = vpop.eup %3734 }
 0x1c1   :  { %v3737_v40 = vpop.eup %3736  ;;  %v866_v55 = vmul.f32 %v3735_v20, %v864_v49  ;;  %3738 = vrcp.f32 %v903_v37  ;;  %vm871_vm0 = vweird.f32 %v3735_v20  ;;  %vm909_vm9 = vweird.f32 %v903_v37 }
 0x1c2   :  { %v885_v4 = vmul.f32 %v3737_v40, %v883_v10  ;;  %3740 = vtanh.f32 %v859_v48  ;;  %vm890_vm1 = vweird.f32 %v3737_v40  ;;  %vm872_vm4 = vmor %vm870_vm2, %vm871_vm0  ;;  %v913_v49 = vand.u32 2147483647, %v903_v37 }
 0x1c3   :  { %v867_v26 = vsub.f32 1.0, %v866_v55  ;;  %vm891_vm6 = vmor %vm889_vm3, %vm890_vm1 }
 0x1c4   :  { %v886_v34 = vsub.f32 1.0, %v885_v4  ;;  %vm914_vm11 = vcmp.eq.f32.partialorder %v913_v49, 8.507059e+37 }
 0x1c5   :  { %v868_v15 = vmul.f32 %v3735_v20, %v867_v26 }
 0x1c6   :  { %v887_v0 = vmul.f32 %v3737_v40, %v886_v34 }
 0x1c7   :  { %v3739_v5 = vpop.eup %3738  ;;  %v869_v30 = vadd.f32 %v3735_v20, %v868_v15 }
 0x1c8   :  { %v888_v56 = vadd.f32 %v3737_v40, %v887_v0  ;;  %v905_v36 = vmul.f32 %v3739_v5, %v903_v37  ;;  %v3741_v48 = vpop.eup %3740  ;;  %vm910_vm8 = vweird.f32 %v3739_v5  ;;  %v915_v0 = vand.u32 2147483648, %v903_v37 }
 0x1c9   :  { %v873_v55 = vsel %vm872_vm4, %v3735_v20, %v869_v30  ;;  %vm911_vm10 = vmor %vm909_vm9, %vm910_vm8 }
 0x1ca   :  { %v878_v4 = vsel %vm875_vm5, %v877_v25, %v873_v55  ;;  %v892_v26 = vsel %vm891_vm6, %v3737_v40, %v888_v56  ;;  %v906_v32 = vsub.f32 1.0, %v905_v36  ;;  %v916_v6 = vor.u32 1.1754944e-38, %v915_v0  ;;  %v6916_v55 = vld [vmem:[#allocation83_spill] sm:$0xff] }
 0x1cb   :  { %v897_v34 = vsel %vm894_vm7, %v896_v60, %v892_v26  ;;  %v920_v31 = vmul.f32 %v3741_v48, %v878_v4  ;;  %v6917_v48 = vld [vmem:[#allocation54_spill] sm:$0xff] }
 0x1cc   :  { %v919_v33 = vmul.f32 0.0, %v897_v34  ;;  %v907_v27 = vmul.f32 %v3739_v5, %v906_v32  ;;  %v616_v4 = vadd.f32 %v6917_v48, %v6916_v55  ;;  %v5040_v48 = vld [vmem:[#allocation12 + $0x1b8] sm:$0xff] }
 0x1ce   :  { %v4916_v15 = vadd.f32 %v920_v31, %v919_v33  ;;  %v908_v10 = vadd.f32 %v3739_v5, %v907_v27 }
 0x1d0   :  { %3742 = vtanh.f32 %v4916_v15  ;;  %v912_v20 = vsel %vm911_vm10, %v3739_v5, %v908_v10 }
 0x1d1   :  { %v917_v45 = vsel %vm914_vm11, %v916_v6, %v912_v20 }
 0x1d6   :  { %v3743_v40 = vpop.eup %3742 }
 0x1d7   :  { %v4919_v19 = vmul.f32 %v3743_v40, %v917_v45 }
 0x1d9   :  { %6883 = vst [vmem:[#allocation84_spill] sm:$0xff] %v4919_v19  ;;  %945 = vmatmul.f32.vlgmr.msra.gmra.mxu0 %v4919_v19  ;;  %965 = vmatmul.f32.vlgmr.msra.gmra.mxu1 %v4919_v19 }
 0x1da   :  { %985 = vmatmul.f32.vlgmr.msra.gmra.mxu2 %v4919_v19  ;;  %1005 = vmatmul.f32.vlgmr.msrb.gmra.mxu3 %v4919_v19  ;;  %v5158_v19 = vld [vmem:[#allocation12 + $0x78] sm:$0xff] }
 0x1db   :  { %1233 = vmatpush.msra.mxu0 %v4493_v35  ;;  %1253 = vmatpush.msra.mxu1 %v6850_v14  ;;  %v6884_v35 = vld [vmem:[#allocation36_spill] sm:$0xff] }
 0x1dc   :  { %1273 = vmatpush.msra.mxu2 %v4533_v51  ;;  %1293 = vmatpush.msrb.mxu3 %v4509_v41  ;;  %v6887_v41 = vld [vmem:[#allocation28_spill] sm:$0xff]  ;;  %v6894_v51 = vld [vmem:[#allocation33_spill] sm:$0xff] }
 0x1dd   :  { %1234 = vmatpush.msra.mxu0 %v4501_v38  ;;  %1254 = vmatpush.msra.mxu1 %v4503_v39  ;;  %v6885_v38 = vld [vmem:[#allocation29_spill] sm:$0xff]  ;;  %v6886_v39 = vld [vmem:[#allocation27_spill] sm:$0xff] }
 0x1de   :  { %1274 = vmatpush.msra.mxu2 %v4550_v57  ;;  %1294 = vmatpush.msrb.mxu3 %v4516_v44  ;;  %v6890_v44 = vld [vmem:[#allocation30_spill] sm:$0xff]  ;;  %v6898_v57 = vld [vmem:[#allocation37_spill] sm:$0xff] }
 0x1df   :  { %1235 = vmatpush.msra.mxu0 %v4512_v42  ;;  %1255 = vmatpush.msra.mxu1 %v4514_v43  ;;  %v6888_v42 = vld [vmem:[#allocation39_spill] sm:$0xff]  ;;  %v6889_v43 = vld [vmem:[#allocation32_spill] sm:$0xff] }
 0x1e0   :  { %1275 = vmatpush.msra.mxu2 %v4561_v62  ;;  %1295 = vmatpush.msrb.mxu3 %v4531_v50  ;;  %v6893_v50 = vld [vmem:[#allocation35_spill] sm:$0xff]  ;;  %v6902_v62 = vld [vmem:[#allocation42_spill] sm:$0xff] }
 0x1e1   :  { %1236 = vmatpush.msra.mxu0 %v4523_v46  ;;  %1256 = vmatpush.msra.mxu1 %v4525_v47  ;;  %v6891_v46 = vld [vmem:[#allocation31_spill] sm:$0xff]  ;;  %v6892_v47 = vld [vmem:[#allocation41_spill] sm:$0xff] }
 0x1e2   :  { %1276 = vmatpush.msra.mxu2 %v4576_v7  ;;  %1296 = vmatpush.msrb.mxu3 %v4541_v54  ;;  %v6897_v54 = vld [vmem:[#allocation40_spill] sm:$0xff]  ;;  %v6906_v7 = vld [vmem:[#allocation46_spill] sm:$0xff] }
 0x1e3   :  { %1237 = vmatpush.msra.mxu0 %v4537_v52  ;;  %1257 = vmatpush.msra.mxu1 %v4539_v53  ;;  %v6895_v52 = vld [vmem:[#allocation34_spill] sm:$0xff]  ;;  %v6896_v53 = vld [vmem:[#allocation44_spill] sm:$0xff]  ;;  %6931 = vst [vmem:[#allocation40_spill] sm:$0xff] %v5158_v19 }
 0x1e4   :  { %1277 = vmatpush.msra.mxu2 %v4587_v13  ;;  %1297 = vmatpush.msrb.mxu3 %v4559_v61  ;;  %v6901_v61 = vld [vmem:[#allocation45_spill] sm:$0xff] }
 0x1e5   :  { %1238 = vmatpush.msra.mxu0 %v4552_v58  ;;  %1258 = vmatpush.msra.mxu1 %v4554_v59  ;;  %v6899_v58 = vld [vmem:[#allocation38_spill] sm:$0xff]  ;;  %v6900_v59 = vld [vmem:[#allocation47_spill] sm:$0xff]  ;;  %v6910_v13 = vld [vmem:[#allocation77_spill] sm:$0xff] }
 0x1e6   :  { %1278 = vmatpush.msra.mxu2 %v4602_v22  ;;  %1298 = vmatpush.msrb.mxu3 %v4571_v3  ;;  %v6905_v3 = vld [vmem:[#allocation49_spill] sm:$0xff] }
 0x1e7   :  { %1239 = vmatpush.msra.mxu0 %v4567_v1  ;;  %1259 = vmatpush.msra.mxu1 %v4569_v2  ;;  %v6903_v1 = vld [vmem:[#allocation43_spill] sm:$0xff]  ;;  %v6913_v22 = vld [vmem:[#allocation53_spill] sm:$0xff] }
 0x1e8   :  { %1279 = vmatpush.msra.mxu2 %v4613_v29  ;;  %1299 = vmatpush.msrb.mxu3 %v4585_v12  ;;  %v6904_v2 = vld [vmem:[#allocation51_spill] sm:$0xff]  ;;  %v6909_v12 = vld [vmem:[#allocation50_spill] sm:$0xff] }
 0x1e9   :  { %1240 = vmatpush.msra.mxu0 %v4578_v8  ;;  %1260 = vmatpush.msra.mxu1 %v4580_v9  ;;  %v6907_v8 = vld [vmem:[#allocation48_spill] sm:$0xff] }
 0x1ea   :  { %1280 = vmatpush.msra.mxu2 %v4628_v63  ;;  %1300 = vmatpush.msrb.mxu3 %v4597_v18  ;;  %v6908_v9 = vld [vmem:[#allocation52_spill] sm:$0xff]  ;;  %v6912_v18 = vld [vmem:[#allocation78_spill] sm:$0xff]  ;;  %v6914_v63 = vld [vmem:[#allocation81_spill] sm:$0xff] }
 0x1eb   :  { %1241 = vmatpush.msra.mxu0 %v4593_v16  ;;  %1261 = vmatpush.msra.mxu1 %v4595_v17  ;;  %v6911_v16 = vld [vmem:[#allocation26_spill] sm:$0xff] }
 0x1ec   :  { %1281 = vmatpush.msra.mxu2 %v4639_v11  ;;  %1301 = vmatpush.msrb.mxu3 %v4611_v28  ;;  %v534_v17 = vadd.f32 %v6911_v16, %v6910_v13  ;;  %v6915_v11 = vld [vmem:[#allocation55_spill] sm:$0xff] }
 0x1ed   :  { %1242 = vmatpush.msra.mxu0 %v4604_v23  ;;  %1262 = vmatpush.msra.mxu1 %v4606_v24  ;;  %v575_v23 = vadd.f32 %v6913_v22, %v6912_v18  ;;  %v657_v27 = vadd.f32 %v6915_v11, %v6914_v63 }
 0x1ee   :  { %1282 = vmatpush.msra.mxu2 %v6884_v35  ;;  %1302 = vmatpush.msrb.mxu3 %v6885_v38 }
 0x1ef   :  { %1243 = vmatpush.msra.mxu0 %v6886_v39  ;;  %1263 = vmatpush.msra.mxu1 %v6887_v41 }
 0x1f0   :  { %1283 = vmatpush.msra.mxu2 %v6888_v42  ;;  %1303 = vmatpush.msrb.mxu3 %v6889_v43 }
 0x1f1   :  { %1244 = vmatpush.msra.mxu0 %v6890_v44  ;;  %1264 = vmatpush.msra.mxu1 %v6891_v46 }
 0x1f2   :  { %1284 = vmatpush.msra.mxu2 %v6892_v47  ;;  %1304 = vmatpush.msrb.mxu3 %v6893_v50 }
 0x1f3   :  { %1245 = vmatpush.msra.mxu0 %v6894_v51  ;;  %1265 = vmatpush.msra.mxu1 %v6895_v52 }
 0x1f4   :  { %1285 = vmatpush.msra.mxu2 %v6896_v53  ;;  %1305 = vmatpush.msrb.mxu3 %v6897_v54 }
 0x1f5   :  { %1246 = vmatpush.msra.mxu0 %v6898_v57  ;;  %1266 = vmatpush.msra.mxu1 %v6899_v58 }
 0x1f6   :  { %1286 = vmatpush.msra.mxu2 %v6900_v59  ;;  %1306 = vmatpush.msrb.mxu3 %v6901_v61 }
 0x1f7   :  { %1247 = vmatpush.msra.mxu0 %v6902_v62  ;;  %1267 = vmatpush.msra.mxu1 %v6903_v1 }
 0x1f8   :  { %1287 = vmatpush.msra.mxu2 %v6904_v2  ;;  %1307 = vmatpush.msrb.mxu3 %v6905_v3 }
 0x1f9   :  { %1248 = vmatpush.msra.mxu0 %v6906_v7  ;;  %1268 = vmatpush.msra.mxu1 %v6907_v8 }
 0x1fa   :  { %1288 = vmatpush.msra.mxu2 %v6908_v9  ;;  %1308 = vmatpush.msrb.mxu3 %v6909_v12 }
 0x256   :  { %v946_v24 = vpop.f32.mrf.mxu0  ;;  %v966_v28 = vpop.f32.mrf.mxu1 }
 0x257   :  { %v1009_v29 = vadd.f32 %v946_v24, %v534_v17  ;;  %v1010_v31 = vadd.f32 %v966_v28, %v575_v23 }
 0x259   :  { %v3650_v32 = vmul.f32 -1.442695, %v1009_v29  ;;  %v3651_v33 = vmul.f32 -1.442695, %v1010_v31 }
 0x25b   :  { %3744 = vpow2.f32 %v3650_v32 }
 0x25c   :  { %3746 = vpow2.f32 %v3651_v33 }
 0x25d   :  { %v1006_v5 = vpop.f32.mrf.mxu3  ;;  %v986_v56 = vpop.f32.mrf.mxu2 }
 0x25e   :  { %v1012_v14 = vadd.f32 %v1006_v5, %v657_v27  ;;  %v1011_v10 = vadd.f32 %v986_v56, %v616_v4  ;;  %v5010_v27 = vld [vmem:[#allocation12 + $0x1e8] sm:$0xff]  ;;  %v5013_v5 = vld [vmem:[#allocation12 + $0x1f0] sm:$0xff]  ;;  %v5043_v4 = vld [vmem:[#allocation12 + $0x180] sm:$0xff] }
 0x25f   :  { %v5034_v56 = vld [vmem:[#allocation12 + $0x1a8] sm:$0xff] }
 0x260   :  { %v3652_v60 = vmul.f32 -1.442695, %v1012_v14  ;;  %v5016_v14 = vld [vmem:[#allocation12 + $0x1f8] sm:$0xff] }
 0x261   :  { %v3745_v37 = vpop.eup %3744 }
 0x262   :  { %v3747_v21 = vpop.eup %3746  ;;  %v1016_v30 = vadd.f32 1.0, %v3745_v37  ;;  %3748 = vpow2.f32 %v3652_v60  ;;  %v5019_v60 = vld [vmem:[#allocation12 + $0x1c0] sm:$0xff]  ;;  %v5022_v37 = vld [vmem:[#allocation12 + $0x1c8] sm:$0xff] }
 0x263   :  { %v1035_v25 = vadd.f32 1.0, %v3747_v21  ;;  %v5025_v21 = vld [vmem:[#allocation12 + $0x1d0] sm:$0xff] }
 0x264   :  { %3750 = vrcp.f32 %v1016_v30  ;;  %v1028_v45 = vand.u32 2147483648, %v1016_v30  ;;  %v1026_v39 = vand.u32 2147483647, %v1016_v30  ;;  %vm1022_vm14 = vweird.f32 %v1016_v30 }
 0x265   :  { %3752 = vrcp.f32 %v1035_v25  ;;  %v1047_v35 = vand.u32 2147483648, %v1035_v25  ;;  %v1045_v42 = vand.u32 2147483647, %v1035_v25  ;;  %vm1041_vm15 = vweird.f32 %v1035_v25 }
 0x266   :  { %v1029_v46 = vor.u32 1.1754944e-38, %v1028_v45  ;;  %vm1027_vm2 = vcmp.eq.f32.partialorder %v1026_v39, 8.507059e+37  ;;  %v5070_v45 = vld [vmem:[#allocation12 + $0x148] sm:$0xff]  ;;  %v5079_v39 = vld [vmem:[#allocation12 + $0x120] sm:$0xff] }
 0x267   :  { %v1048_v51 = vor.u32 1.1754944e-38, %v1047_v35  ;;  %vm1046_vm3 = vcmp.eq.f32.partialorder %v1045_v42, 8.507059e+37  ;;  %v5073_v35 = vld [vmem:[#allocation12 + $0x150] sm:$0xff] }
 0x268   :  { %v3749_v36 = vpop.eup %3748  ;;  %v5085_v42 = vld [vmem:[#allocation12 + $0x130] sm:$0xff] }
 0x269   :  { %v1055_v26 = vadd.f32 1.0, %v3749_v36  ;;  %v5037_v36 = vld [vmem:[#allocation12 + $0x1b0] sm:$0xff] }
 0x26a   :  { %v3751_v34 = vpop.eup %3750 }
 0x26b   :  { %v3753_v0 = vpop.eup %3752  ;;  %v1018_v49 = vmul.f32 %v3751_v34, %v1016_v30  ;;  %3754 = vrcp.f32 %v1055_v26  ;;  %vm1023_vm12 = vweird.f32 %v3751_v34  ;;  %v1067_v24 = vand.u32 2147483648, %v1055_v26  ;;  %v5028_v30 = vld [vmem:[#allocation12 + $0x1d8] sm:$0xff] }
 0x26c   :  { %v1037_v20 = vmul.f32 %v3753_v0, %v1035_v25  ;;  %3756 = vtanh.f32 %v1011_v10  ;;  %vm1042_vm13 = vweird.f32 %v3753_v0  ;;  %vm1024_vm0 = vmor %vm1022_vm14, %vm1023_vm12  ;;  %vm1061_vm5 = vweird.f32 %v1055_v26  ;;  %v5031_v25 = vld [vmem:[#allocation12 + $0x1a0] sm:$0xff]  ;;  %v5052_v10 = vld [vmem:[#allocation12 + $0x198] sm:$0xff] }
 0x26d   :  { %v1019_v6 = vsub.f32 1.0, %v1018_v49  ;;  %vm1043_vm1 = vmor %vm1041_vm15, %vm1042_vm13  ;;  %v1065_v28 = vand.u32 2147483647, %v1055_v26  ;;  %v1068_v31 = vor.u32 1.1754944e-38, %v1067_v24  ;;  %v5058_v49 = vld [vmem:[#allocation12 + $0x168] sm:$0xff]  ;;  %v5136_v24 = vld [vmem:[#allocation12 + $0xb8] sm:$0xff] }
 0x26e   :  { %v1038_v40 = vsub.f32 1.0, %v1037_v20  ;;  %v5061_v20 = vld [vmem:[#allocation12 + $0x170] sm:$0xff]  ;;  %6924 = vst [vmem:[#allocation30_spill] sm:$0xff] %v5136_v24 }
 0x26f   :  { %v1020_v38 = vmul.f32 %v3751_v34, %v1019_v6  ;;  %vm1066_vm7 = vcmp.eq.f32.partialorder %v1065_v28, 8.507059e+37  ;;  %v5064_v6 = vld [vmem:[#allocation12 + $0x178] sm:$0xff]  ;;  %v5139_v28 = vld [vmem:[#allocation12 + $0x80] sm:$0xff] }
 0x270   :  { %v1039_v41 = vmul.f32 %v3753_v0, %v1038_v40  ;;  %v5067_v40 = vld [vmem:[#allocation12 + $0x140] sm:$0xff]  ;;  %6925 = vst [vmem:[#allocation31_spill] sm:$0xff] %v5139_v28 }
 0x271   :  { %v3755_v43 = vpop.eup %3754  ;;  %v1021_v44 = vadd.f32 %v3751_v34, %v1020_v38  ;;  %v5076_v38 = vld [vmem:[#allocation12 + $0x158] sm:$0xff] }
 0x272   :  { %v1040_v47 = vadd.f32 %v3753_v0, %v1039_v41  ;;  %v1057_v50 = vmul.f32 %v3755_v43, %v1055_v26  ;;  %v3757_v54 = vpop.eup %3756  ;;  %vm1062_vm4 = vweird.f32 %v3755_v43  ;;  %v5046_v26 = vld [vmem:[#allocation12 + $0x188] sm:$0xff] }
 0x273   :  { %v1025_v52 = vsel %vm1024_vm0, %v3751_v34, %v1021_v44  ;;  %vm1063_vm6 = vmor %vm1061_vm5, %vm1062_vm4  ;;  %v5049_v34 = vld [vmem:[#allocation12 + $0x190] sm:$0xff]  ;;  %v5082_v41 = vld [vmem:[#allocation12 + $0x128] sm:$0xff] }
 0x274   :  { %v1030_v57 = vsel %vm1027_vm2, %v1029_v46, %v1025_v52  ;;  %v1044_v58 = vsel %vm1043_vm1, %v3753_v0, %v1040_v47  ;;  %v1058_v62 = vsub.f32 1.0, %v1057_v50  ;;  %v5055_v0 = vld [vmem:[#allocation12 + $0x160] sm:$0xff]  ;;  %v5094_v46 = vld [vmem:[#allocation12 + $0x108] sm:$0xff]  ;;  %v5097_v47 = vld [vmem:[#allocation12 + $0x110] sm:$0xff] }
 0x275   :  { %v1049_v1 = vsel %vm1046_vm3, %v1048_v51, %v1044_v58  ;;  %v1072_v7 = vmul.f32 %v3757_v54, %v1030_v57  ;;  %v5091_v44 = vld [vmem:[#allocation12 + $0x100] sm:$0xff]  ;;  %v5100_v50 = vld [vmem:[#allocation12 + $0x118] sm:$0xff]  ;;  %v5106_v52 = vld [vmem:[#allocation12 + $0xe8] sm:$0xff] }
 0x276   :  { %v1071_v16 = vmul.f32 %v1049_v1, %v4916_v15  ;;  %v1059_v17 = vmul.f32 %v3755_v43, %v1058_v62  ;;  %v5007_v15 = vld [vmem:[#allocation12 + $0x1e0] sm:$0xff]  ;;  %v5109_v54 = vld [vmem:[#allocation12 + $0xf0] sm:$0xff]  ;;  %v5112_v57 = vld [vmem:[#allocation12 + $0xf8] sm:$0xff] }
 0x277   :  { %v5103_v51 = vld [vmem:[#allocation12 + $0xe0] sm:$0xff]  ;;  %v5118_v62 = vld [vmem:[#allocation12 + $0xc8] sm:$0xff]  ;;  %v5121_v1 = vld [vmem:[#allocation12 + $0xd0] sm:$0xff] }
 0x278   :  { %v4998_v22 = vadd.f32 %v1072_v7, %v1071_v16  ;;  %v1060_v23 = vadd.f32 %v3755_v43, %v1059_v17  ;;  %v5115_v58 = vld [vmem:[#allocation12 + $0xc0] sm:$0xff]  ;;  %6919 = vst [vmem:[#allocation29_spill] sm:$0xff] %v5121_v1  ;;  %v5124_v7 = vld [vmem:[#allocation12 + $0xd8] sm:$0xff]  ;;  %v5130_v17 = vld [vmem:[#allocation12 + $0xa8] sm:$0xff] }
 0x279   :  { %6920 = vst [vmem:[#allocation27_spill] sm:$0xff] %v5124_v7  ;;  %v5127_v16 = vld [vmem:[#allocation12 + $0xa0] sm:$0xff] }
 0x27a   :  { %3758 = vtanh.f32 %v4998_v22  ;;  %v1064_v29 = vsel %vm1063_vm6, %v3755_v43, %v1060_v23  ;;  %v5088_v43 = vld [vmem:[#allocation12 + $0x138] sm:$0xff]  ;;  %6921 = vst [vmem:[#allocation28_spill] sm:$0xff] %v5127_v16  ;;  %v5133_v23 = vld [vmem:[#allocation12 + $0xb0] sm:$0xff] }
 0x27b   :  { %v1069_v33 = vsel %vm1066_vm7, %v1068_v31, %v1064_v29  ;;  %6922 = vst [vmem:[#allocation39_spill] sm:$0xff] %v5130_v17  ;;  %v5142_v29 = vld [vmem:[#allocation12 + $0x88] sm:$0xff]  ;;  %v5145_v31 = vld [vmem:[#allocation12 + $0x90] sm:$0xff] }
 0x27c   :  { %6923 = vst [vmem:[#allocation32_spill] sm:$0xff] %v5133_v23 }
 0x27d   :  { %6926 = vst [vmem:[#allocation41_spill] sm:$0xff] %v5142_v29 }
 0x27e   :  { %6927 = vst [vmem:[#allocation35_spill] sm:$0xff] %v5145_v31 }
 0x280   :  { %v3759_v32 = vpop.eup %3758 }
 0x281   :  { %v5001_v11 = vmul.f32 %v3759_v32, %v1069_v33  ;;  %v5148_v32 = vld [vmem:[#allocation12 + $0x98] sm:$0xff]  ;;  %v5151_v33 = vld [vmem:[#allocation12 + $0x60] sm:$0xff] }
 0x282   :  { %6928 = vst [vmem:[#allocation33_spill] sm:$0xff] %v5148_v32 }
 0x283   :  { %6918 = vst [vmem:[#allocation36_spill] sm:$0xff] %v5001_v11  ;;  %1097 = vmatmul.f32.vlgmr.msrb.gmra.mxu0 %v5001_v11  ;;  %1117 = vmatmul.f32.vlgmr.msrb.gmra.mxu1 %v5001_v11 }
 0x284   :  { %1137 = vmatmul.f32.vlgmr.msrb.gmra.mxu2 %v5001_v11  ;;  %1157 = vmatmul.f32.vlgmr.msra.gmra.mxu3 %v5001_v11  ;;  %6929 = vst [vmem:[#allocation34_spill] sm:$0xff] %v5151_v33  ;;  %v5154_v11 = vld [vmem:[#allocation12 + $0x68] sm:$0xff] }
 0x285   :  { %1385 = vmatpush.msrb.mxu0 %v5007_v15  ;;  %1405 = vmatpush.msrb.mxu1 %v5010_v27  ;;  %6930 = vst [vmem:[#allocation44_spill] sm:$0xff] %v5154_v11 }
 0x286   :  { %1425 = vmatpush.msrb.mxu2 %v5013_v5  ;;  %1445 = vmatpush.msra.mxu3 %v5016_v14 }
 0x287   :  { %1386 = vmatpush.msrb.mxu0 %v5019_v60  ;;  %1406 = vmatpush.msrb.mxu1 %v5022_v37 }
 0x288   :  { %1426 = vmatpush.msrb.mxu2 %v5025_v21  ;;  %1446 = vmatpush.msra.mxu3 %v5028_v30 }
 0x289   :  { %1387 = vmatpush.msrb.mxu0 %v5031_v25  ;;  %1407 = vmatpush.msrb.mxu1 %v5034_v56 }
 0x28a   :  { %1427 = vmatpush.msrb.mxu2 %v5037_v36  ;;  %1447 = vmatpush.msra.mxu3 %v5040_v48 }
 0x28b   :  { %1388 = vmatpush.msrb.mxu0 %v5043_v4  ;;  %1408 = vmatpush.msrb.mxu1 %v5046_v26 }
 0x28c   :  { %1428 = vmatpush.msrb.mxu2 %v5049_v34  ;;  %1448 = vmatpush.msra.mxu3 %v5052_v10 }
 0x28d   :  { %1389 = vmatpush.msrb.mxu0 %v5055_v0  ;;  %1409 = vmatpush.msrb.mxu1 %v5058_v49 }
 0x28e   :  { %1429 = vmatpush.msrb.mxu2 %v5061_v20  ;;  %1449 = vmatpush.msra.mxu3 %v5064_v6 }
 0x28f   :  { %1390 = vmatpush.msrb.mxu0 %v5067_v40  ;;  %1410 = vmatpush.msrb.mxu1 %v5070_v45 }
 0x290   :  { %1430 = vmatpush.msrb.mxu2 %v5073_v35  ;;  %1450 = vmatpush.msra.mxu3 %v5076_v38 }
 0x291   :  { %1391 = vmatpush.msrb.mxu0 %v5079_v39  ;;  %1411 = vmatpush.msrb.mxu1 %v5082_v41 }
 0x292   :  { %1431 = vmatpush.msrb.mxu2 %v5085_v42  ;;  %1451 = vmatpush.msra.mxu3 %v5088_v43 }
 0x293   :  { %1392 = vmatpush.msrb.mxu0 %v5091_v44  ;;  %1412 = vmatpush.msrb.mxu1 %v5094_v46 }
 0x294   :  { %1432 = vmatpush.msrb.mxu2 %v5097_v47  ;;  %1452 = vmatpush.msra.mxu3 %v5100_v50 }
 0x295   :  { %1393 = vmatpush.msrb.mxu0 %v5103_v51  ;;  %1413 = vmatpush.msrb.mxu1 %v5106_v52 }
 0x296   :  { %1433 = vmatpush.msrb.mxu2 %v5109_v54  ;;  %1453 = vmatpush.msra.mxu3 %v5112_v57 }
 0x297   :  { %1394 = vmatpush.msrb.mxu0 %v5115_v58  ;;  %1414 = vmatpush.msrb.mxu1 %v5118_v62 }
 0x298   :  { %1434 = vmatpush.msrb.mxu2 %v5121_v1  ;;  %1454 = vmatpush.msra.mxu3 %v5124_v7 }
 0x299   :  { %1395 = vmatpush.msrb.mxu0 %v5127_v16  ;;  %1415 = vmatpush.msrb.mxu1 %v5130_v17 }
 0x29a   :  { %1435 = vmatpush.msrb.mxu2 %v5133_v23  ;;  %1455 = vmatpush.msra.mxu3 %v5136_v24 }
 0x29b   :  { %1396 = vmatpush.msrb.mxu0 %v5139_v28  ;;  %1416 = vmatpush.msrb.mxu1 %v5142_v29  ;;  %v5161_v29 = vld [vmem:[#allocation12 + $0x40] sm:$0xff] }
 0x29c   :  { %1436 = vmatpush.msrb.mxu2 %v5145_v31  ;;  %1456 = vmatpush.msra.mxu3 %v5148_v32  ;;  %6932 = vst [vmem:[#allocation37_spill] sm:$0xff] %v5161_v29  ;;  %v5164_v31 = vld [vmem:[#allocation12 + $0x48] sm:$0xff] }
 0x29d   :  { %1397 = vmatpush.msrb.mxu0 %v5151_v33  ;;  %1417 = vmatpush.msrb.mxu1 %v5154_v11  ;;  %6933 = vst [vmem:[#allocation38_spill] sm:$0xff] %v5164_v31  ;;  %v5169_v33 = vld [vmem:[#allocation12 + $0x20] sm:$0xff] }
 0x29e   :  { %1437 = vmatpush.msrb.mxu2 %v6896_v53  ;;  %1457 = vmatpush.msra.mxu3 %v5158_v19  ;;  %6934 = vst [vmem:[#allocation47_spill] sm:$0xff] %v5169_v33  ;;  %v5172_v53 = vld [vmem:[#allocation12 + $0x28] sm:$0xff] }
 0x29f   :  { %1398 = vmatpush.msrb.mxu0 %v5161_v29  ;;  %1418 = vmatpush.msrb.mxu1 %v5164_v31  ;;  %6935 = vst [vmem:[#allocation45_spill] sm:$0xff] %v5172_v53  ;;  %v5177_v29 = vld [vmem:[#allocation12] sm:$0xff] }
 0x2a0   :  { %1438 = vmatpush.msrb.mxu2 %v6900_v59  ;;  %1458 = vmatpush.msra.mxu3 %v6901_v61  ;;  %6936 = vst [vmem:[#allocation42_spill] sm:$0xff] %v5177_v29  ;;  %v6937_v59 = vld [vmem:[#allocation56_spill] sm:$0xff] }
 0x2a1   :  { %1399 = vmatpush.msrb.mxu0 %v5169_v33  ;;  %1419 = vmatpush.msrb.mxu1 %v5172_v53  ;;  %v537_v61 = vadd.f32 %v6937_v59, %v6910_v13  ;;  %v6938_v33 = vld [vmem:[#allocation57_spill] sm:$0xff] }
 0x2a2   :  { %1439 = vmatpush.msrb.mxu2 %v6904_v2  ;;  %1459 = vmatpush.msra.mxu3 %v6905_v3  ;;  %v578_v53 = vadd.f32 %v6938_v33, %v6912_v18 }
 0x2a3   :  { %1400 = vmatpush.msrb.mxu0 %v5177_v29  ;;  %1420 = vmatpush.msrb.mxu1 %v6907_v8  ;;  %v6939_v29 = vld [vmem:[#allocation59_spill] sm:$0xff] }
 0x2a4   :  { %1440 = vmatpush.msrb.mxu2 %v6908_v9  ;;  %1460 = vmatpush.msra.mxu3 %v6909_v12  ;;  %v660_v8 = vadd.f32 %v6939_v29, %v6914_v63 }
 0x300   :  { %v1098_v31 = vpop.f32.mrf.mxu0  ;;  %v1118_v2 = vpop.f32.mrf.mxu1 }
 0x301   :  { %v1161_v19 = vadd.f32 %v1098_v31, %v537_v61  ;;  %v1162_v3 = vadd.f32 %v1118_v2, %v578_v53 }
 0x303   :  { %v3653_v11 = vmul.f32 -1.442695, %v1161_v19  ;;  %v3654_v32 = vmul.f32 -1.442695, %v1162_v3  ;;  %v6940_v19 = vld [vmem:[#allocation58_spill] sm:$0xff] }
 0x304   :  { %v619_v53 = vadd.f32 %v6940_v19, %v6916_v55 }
 0x305   :  { %3760 = vpow2.f32 %v3653_v11 }
 0x306   :  { %3762 = vpow2.f32 %v3654_v32 }
 0x307   :  { %v1158_v9 = vpop.f32.mrf.mxu3  ;;  %v1138_v33 = vpop.f32.mrf.mxu2 }
 0x308   :  { %v1164_v28 = vadd.f32 %v1158_v9, %v660_v8  ;;  %v1163_v2 = vadd.f32 %v1138_v33, %v619_v53 }
 0x30a   :  { %v3655_v12 = vmul.f32 -1.442695, %v1164_v28 }
 0x30b   :  { %v3761_v24 = vpop.eup %3760 }
 0x30c   :  { %v3763_v23 = vpop.eup %3762  ;;  %v1168_v59 = vadd.f32 1.0, %v3761_v24  ;;  %3764 = vpow2.f32 %v3655_v12 }
 0x30d   :  { %v1187_v13 = vadd.f32 1.0, %v3763_v23 }
 0x30e   :  { %3766 = vrcp.f32 %v1168_v59  ;;  %v1180_v9 = vand.u32 2147483648, %v1168_v59  ;;  %v1178_v12 = vand.u32 2147483647, %v1168_v59  ;;  %vm1174_vm10 = vweird.f32 %v1168_v59 }
 0x30f   :  { %3768 = vrcp.f32 %v1187_v13  ;;  %v1199_v24 = vand.u32 2147483648, %v1187_v13  ;;  %v1197_v18 = vand.u32 2147483647, %v1187_v13  ;;  %vm1193_vm11 = vweird.f32 %v1187_v13 }
 0x310   :  { %v1181_v33 = vor.u32 1.1754944e-38, %v1180_v9  ;;  %vm1179_vm14 = vcmp.eq.f32.partialorder %v1178_v12, 8.507059e+37 }
 0x311   :  { %vm1198_vm15 = vcmp.eq.f32.partialorder %v1197_v18, 8.507059e+37 }
 0x312   :  { %v3765_v31 = vpop.eup %3764 }
 0x313   :  { %v1207_v11 = vadd.f32 1.0, %v3765_v31 }
 0x314   :  { %v3767_v61 = vpop.eup %3766 }
 0x315   :  { %v3769_v29 = vpop.eup %3768  ;;  %v1170_v32 = vmul.f32 %v3767_v61, %v1168_v59  ;;  %3770 = vrcp.f32 %v1207_v11  ;;  %vm1175_vm8 = vweird.f32 %v3767_v61  ;;  %vm1213_vm1 = vweird.f32 %v1207_v11 }
 0x316   :  { %v1189_v3 = vmul.f32 %v3769_v29, %v1187_v13  ;;  %3772 = vtanh.f32 %v1163_v2  ;;  %vm1194_vm9 = vweird.f32 %v3769_v29  ;;  %vm1176_vm12 = vmor %vm1174_vm10, %vm1175_vm8 }
 0x317   :  { %v1171_v28 = vsub.f32 1.0, %v1170_v32  ;;  %vm1195_vm13 = vmor %vm1193_vm11, %vm1194_vm9  ;;  %v1200_v32 = vor.u32 1.1754944e-38, %v1199_v24 }
 0x318   :  { %v1190_v8 = vsub.f32 1.0, %v1189_v3 }
 0x319   :  { %v1172_v23 = vmul.f32 %v3767_v61, %v1171_v28 }
 0x31a   :  { %v1191_v63 = vmul.f32 %v3769_v29, %v1190_v8 }
 0x31b   :  { %v3771_v17 = vpop.eup %3770  ;;  %v1173_v19 = vadd.f32 %v3767_v61, %v1172_v23 }
 0x31c   :  { %v1192_v31 = vadd.f32 %v3769_v29, %v1191_v63  ;;  %v1209_v53 = vmul.f32 %v3771_v17, %v1207_v11  ;;  %v3773_v2 = vpop.eup %3772  ;;  %vm1214_vm0 = vweird.f32 %v3771_v17  ;;  %v1219_v63 = vand.u32 2147483648, %v1207_v11 }
 0x31d   :  { %v1177_v3 = vsel %vm1176_vm12, %v3767_v61, %v1173_v19  ;;  %v1217_v61 = vand.u32 2147483647, %v1207_v11  ;;  %vm1215_vm2 = vmor %vm1213_vm1, %vm1214_vm0  ;;  %v6948_v11 = vld [vmem:[#allocation31_spill] sm:$0xff]  ;;  %v6949_v19 = vld [vmem:[#allocation41_spill] sm:$0xff] }
 0x31e   :  { %v1182_v55 = vsel %vm1179_vm14, %v1181_v33, %v1177_v3  ;;  %v1196_v28 = vsel %vm1195_vm13, %v3769_v29, %v1192_v31  ;;  %v1210_v16 = vsub.f32 1.0, %v1209_v53  ;;  %v1220_v24 = vor.u32 1.1754944e-38, %v1219_v63  ;;  %v6950_v33 = vld [vmem:[#allocation35_spill] sm:$0xff]  ;;  %v6951_v31 = vld [vmem:[#allocation33_spill] sm:$0xff]  ;;  %v6952_v53 = vld [vmem:[#allocation34_spill] sm:$0xff] }
 0x31f   :  { %v1201_v8 = vsel %vm1198_vm15, %v1200_v32, %v1196_v28  ;;  %v1224_v7 = vmul.f32 %v3773_v2, %v1182_v55  ;;  %vm1218_vm3 = vcmp.eq.f32.partialorder %v1217_v61, 8.507059e+37  ;;  %v6942_v55 = vld [vmem:[#allocation29_spill] sm:$0xff]  ;;  %v6953_v32 = vld [vmem:[#allocation44_spill] sm:$0xff]  ;;  %v6960_v63 = vld [vmem:[#allocation47_spill] sm:$0xff] }
 0x320   :  { %v1223_v1 = vmul.f32 %v1201_v8, %v4998_v22  ;;  %v1211_v23 = vmul.f32 %v3771_v17, %v1210_v16  ;;  %v6943_v22 = vld [vmem:[#allocation27_spill] sm:$0xff]  ;;  %v6946_v16 = vld [vmem:[#allocation32_spill] sm:$0xff]  ;;  %v6956_v28 = vld [vmem:[#allocation37_spill] sm:$0xff] }
 0x321   :  { %v5251_v3 = vld [vmem:[#allocation12 + $0x70] sm:$0xff]  ;;  %v6957_v8 = vld [vmem:[#allocation38_spill] sm:$0xff]  ;;  %v6961_v61 = vld [vmem:[#allocation45_spill] sm:$0xff] }
 0x322   :  { %v5192_v59 = vadd.f32 %v1224_v7, %v1223_v1  ;;  %v1212_v13 = vadd.f32 %v3771_v17, %v1211_v23  ;;  %v6944_v1 = vld [vmem:[#allocation28_spill] sm:$0xff]  ;;  %v6945_v7 = vld [vmem:[#allocation39_spill] sm:$0xff]  ;;  %6954 = vst [vmem:[#allocation51_spill] sm:$0xff] %v5251_v3 }
 0x323   :  { %v6955_v2 = vld [vmem:[#allocation40_spill] sm:$0xff] }
 0x324   :  { %3774 = vtanh.f32 %v5192_v59  ;;  %v1216_v9 = vsel %vm1215_vm2, %v3771_v17, %v1212_v13  ;;  %v6947_v17 = vld [vmem:[#allocation30_spill] sm:$0xff]  ;;  %v5257_v23 = vld [vmem:[#allocation12 + $0x50] sm:$0xff]  ;;  %v5260_v13 = vld [vmem:[#allocation12 + $0x58] sm:$0xff] }
 0x325   :  { %v1221_v29 = vsel %vm1218_vm3, %v1220_v24, %v1216_v9  ;;  %6958 = vst [vmem:[#allocation49_spill] sm:$0xff] %v5257_v23  ;;  %v5265_v9 = vld [vmem:[#allocation12 + $0x30] sm:$0xff]  ;;  %v5268_v24 = vld [vmem:[#allocation12 + $0x38] sm:$0xff] }
 0x326   :  { %6959 = vst [vmem:[#allocation46_spill] sm:$0xff] %v5260_v13 }
 0x327   :  { %6962 = vst [vmem:[#allocation48_spill] sm:$0xff] %v5265_v9 }
 0x328   :  { %6963 = vst [vmem:[#allocation52_spill] sm:$0xff] %v5268_v24 }
 0x32a   :  { %v3775_v18 = vpop.eup %3774 }
 0x32b   :  { %v5195_v12 = vmul.f32 %v3775_v18, %v1221_v29  ;;  %v6964_v18 = vld [vmem:[#allocation42_spill] sm:$0xff] }
 0x32c   :  { %v5272_v29 = vld [vmem:[#allocation12 + $0x8] sm:$0xff] }
 0x32d   :  { %6941 = vst [vmem:[#allocation43_spill] sm:$0xff] %v5195_v12  ;;  %1249 = vmatmul.f32.vlgmr.msra.gmra.mxu0 %v5195_v12  ;;  %1269 = vmatmul.f32.vlgmr.msra.gmra.mxu1 %v5195_v12 }
 0x32e   :  { %1289 = vmatmul.f32.vlgmr.msra.gmra.mxu2 %v5195_v12  ;;  %1309 = vmatmul.f32.vlgmr.msrb.gmra.mxu3 %v5195_v12  ;;  %6965 = vst [vmem:[#allocation50_spill] sm:$0xff] %v5272_v29  ;;  %v5275_v12 = vld [vmem:[#allocation12 + $0x10] sm:$0xff] }
 0x32f   :  { %1537 = vmatpush.msra.mxu0 %v5007_v15  ;;  %1557 = vmatpush.msra.mxu1 %v5010_v27  ;;  %6966 = vst [vmem:[#allocation26_spill] sm:$0xff] %v5275_v12 }
 0x330   :  { %1577 = vmatpush.msra.mxu2 %v5013_v5  ;;  %1597 = vmatpush.msrb.mxu3 %v5016_v14 }
 0x331   :  { %1538 = vmatpush.msra.mxu0 %v5019_v60  ;;  %1558 = vmatpush.msra.mxu1 %v5022_v37 }
 0x332   :  { %1578 = vmatpush.msra.mxu2 %v5025_v21  ;;  %1598 = vmatpush.msrb.mxu3 %v5028_v30 }
 0x333   :  { %1539 = vmatpush.msra.mxu0 %v5031_v25  ;;  %1559 = vmatpush.msra.mxu1 %v5034_v56 }
 0x334   :  { %1579 = vmatpush.msra.mxu2 %v5037_v36  ;;  %1599 = vmatpush.msrb.mxu3 %v5040_v48 }
 0x335   :  { %1540 = vmatpush.msra.mxu0 %v5043_v4  ;;  %1560 = vmatpush.msra.mxu1 %v5046_v26 }
 0x336   :  { %1580 = vmatpush.msra.mxu2 %v5049_v34  ;;  %1600 = vmatpush.msrb.mxu3 %v5052_v10 }
 0x337   :  { %1541 = vmatpush.msra.mxu0 %v5055_v0  ;;  %1561 = vmatpush.msra.mxu1 %v5058_v49 }
 0x338   :  { %1581 = vmatpush.msra.mxu2 %v5061_v20  ;;  %1601 = vmatpush.msrb.mxu3 %v5064_v6 }
 0x339   :  { %1542 = vmatpush.msra.mxu0 %v5067_v40  ;;  %1562 = vmatpush.msra.mxu1 %v5070_v45 }
 0x33a   :  { %1582 = vmatpush.msra.mxu2 %v5073_v35  ;;  %1602 = vmatpush.msrb.mxu3 %v5076_v38 }
 0x33b   :  { %1543 = vmatpush.msra.mxu0 %v5079_v39  ;;  %1563 = vmatpush.msra.mxu1 %v5082_v41 }
 0x33c   :  { %1583 = vmatpush.msra.mxu2 %v5085_v42  ;;  %1603 = vmatpush.msrb.mxu3 %v5088_v43 }
 0x33d   :  { %1544 = vmatpush.msra.mxu0 %v5091_v44  ;;  %1564 = vmatpush.msra.mxu1 %v5094_v46 }
 0x33e   :  { %1584 = vmatpush.msra.mxu2 %v5097_v47  ;;  %1604 = vmatpush.msrb.mxu3 %v5100_v50 }
 0x33f   :  { %1545 = vmatpush.msra.mxu0 %v5103_v51  ;;  %1565 = vmatpush.msra.mxu1 %v5106_v52 }
 0x340   :  { %1585 = vmatpush.msra.mxu2 %v5109_v54  ;;  %1605 = vmatpush.msrb.mxu3 %v5112_v57 }
 0x341   :  { %1546 = vmatpush.msra.mxu0 %v5115_v58  ;;  %1566 = vmatpush.msra.mxu1 %v5118_v62 }
 0x342   :  { %1586 = vmatpush.msra.mxu2 %v6942_v55  ;;  %1606 = vmatpush.msrb.mxu3 %v6943_v22 }
 0x343   :  { %1547 = vmatpush.msra.mxu0 %v6944_v1  ;;  %1567 = vmatpush.msra.mxu1 %v6945_v7 }
 0x344   :  { %1587 = vmatpush.msra.mxu2 %v6946_v16  ;;  %1607 = vmatpush.msrb.mxu3 %v6947_v17 }
 0x345   :  { %1548 = vmatpush.msra.mxu0 %v6948_v11  ;;  %1568 = vmatpush.msra.mxu1 %v6949_v19 }
 0x346   :  { %1588 = vmatpush.msra.mxu2 %v6950_v33  ;;  %1608 = vmatpush.msrb.mxu3 %v6951_v31  ;;  %v6973_v31 = vld [vmem:[#allocation63_spill] sm:$0xff] }
 0x347   :  { %1549 = vmatpush.msra.mxu0 %v6952_v53  ;;  %1569 = vmatpush.msra.mxu1 %v6953_v32  ;;  %v6972_v53 = vld [vmem:[#allocation81_spill] sm:$0xff] }
 0x348   :  { %1589 = vmatpush.msra.mxu2 %v5251_v3  ;;  %1609 = vmatpush.msrb.mxu3 %v6955_v2 }
 0x349   :  { %1550 = vmatpush.msra.mxu0 %v6956_v28  ;;  %1570 = vmatpush.msra.mxu1 %v6957_v8  ;;  %v6971_v8 = vld [vmem:[#allocation61_spill] sm:$0xff] }
 0x34a   :  { %1590 = vmatpush.msra.mxu2 %v5257_v23  ;;  %1610 = vmatpush.msrb.mxu3 %v5260_v13  ;;  %v6970_v23 = vld [vmem:[#allocation78_spill] sm:$0xff] }
 0x34b   :  { %1551 = vmatpush.msra.mxu0 %v6960_v63  ;;  %1571 = vmatpush.msra.mxu1 %v6961_v61  ;;  %v5278_v63 = vld [vmem:[#allocation12 + $0x18] sm:$0xff] }
 0x34c   :  { %1591 = vmatpush.msra.mxu2 %v5265_v9  ;;  %1611 = vmatpush.msrb.mxu3 %v5268_v24  ;;  %6967 = vst [vmem:[#allocation53_spill] sm:$0xff] %v5278_v63  ;;  %v6968_v61 = vld [vmem:[#allocation77_spill] sm:$0xff]  ;;  %v6969_v9 = vld [vmem:[#allocation60_spill] sm:$0xff]  ;;  %v581_v24 = vadd.f32 %v6971_v8, %v6970_v23 }
 0x34d   :  { %1552 = vmatpush.msra.mxu0 %v6964_v18  ;;  %1572 = vmatpush.msra.mxu1 %v5272_v29  ;;  %v540_v13 = vadd.f32 %v6969_v9, %v6968_v61 }
 0x34e   :  { %1592 = vmatpush.msra.mxu2 %v5275_v12  ;;  %1612 = vmatpush.msrb.mxu3 %v5278_v63  ;;  %v663_v12 = vadd.f32 %v6973_v31, %v6972_v53 }
 0x3aa   :  { %v1250_v28 = vpop.f32.mrf.mxu0  ;;  %v1270_v18 = vpop.f32.mrf.mxu1 }
 0x3ab   :  { %v1313_v2 = vadd.f32 %v1250_v28, %v540_v13  ;;  %v1314_v3 = vadd.f32 %v1270_v18, %v581_v24  ;;  %v6974_v13 = vld [vmem:[#allocation83_spill] sm:$0xff] }
 0x3ad   :  { %v3656_v32 = vmul.f32 -1.442695, %v1313_v2  ;;  %v3657_v29 = vmul.f32 -1.442695, %v1314_v3  ;;  %v6975_v2 = vld [vmem:[#allocation62_spill] sm:$0xff] }
 0x3ae   :  { %v622_v3 = vadd.f32 %v6975_v2, %v6974_v13 }
 0x3af   :  { %3776 = vpow2.f32 %v3656_v32 }
 0x3b0   :  { %3778 = vpow2.f32 %v3657_v29 }
 0x3b1   :  { %v1310_v33 = vpop.f32.mrf.mxu3  ;;  %v1290_v8 = vpop.f32.mrf.mxu2 }
 0x3b2   :  { %v1316_v19 = vadd.f32 %v1310_v33, %v663_v12  ;;  %v1315_v18 = vadd.f32 %v1290_v8, %v622_v3 }
 0x3b4   :  { %v3658_v63 = vmul.f32 -1.442695, %v1316_v19 }
 0x3b5   :  { %v3777_v11 = vpop.eup %3776 }
 0x3b6   :  { %v3779_v17 = vpop.eup %3778  ;;  %v1320_v9 = vadd.f32 1.0, %v3777_v11  ;;  %3780 = vpow2.f32 %v3658_v63 }
 0x3b7   :  { %v1339_v61 = vadd.f32 1.0, %v3779_v17 }
 0x3b8   :  { %3782 = vrcp.f32 %v1320_v9  ;;  %v1332_v53 = vand.u32 2147483648, %v1320_v9  ;;  %v1330_v63 = vand.u32 2147483647, %v1320_v9  ;;  %vm1326_vm6 = vweird.f32 %v1320_v9 }
 0x3b9   :  { %3784 = vrcp.f32 %v1339_v61  ;;  %v1351_v11 = vand.u32 2147483648, %v1339_v61  ;;  %v1349_v16 = vand.u32 2147483647, %v1339_v61  ;;  %vm1345_vm7 = vweird.f32 %v1339_v61 }
 0x3ba   :  { %v1333_v8 = vor.u32 1.1754944e-38, %v1332_v53  ;;  %vm1331_vm10 = vcmp.eq.f32.partialorder %v1330_v63, 8.507059e+37 }
 0x3bb   :  { %vm1350_vm11 = vcmp.eq.f32.partialorder %v1349_v16, 8.507059e+37 }
 0x3bc   :  { %v3781_v28 = vpop.eup %3780 }
 0x3bd   :  { %v1359_v32 = vadd.f32 1.0, %v3781_v28 }
 0x3be   :  { %v3783_v24 = vpop.eup %3782 }
 0x3bf   :  { %v3785_v31 = vpop.eup %3784  ;;  %v1322_v29 = vmul.f32 %v3783_v24, %v1320_v9  ;;  %3786 = vrcp.f32 %v1359_v32  ;;  %vm1327_vm4 = vweird.f32 %v3783_v24  ;;  %v1371_v53 = vand.u32 2147483648, %v1359_v32 }
 0x3c0   :  { %v1341_v12 = vmul.f32 %v3785_v31, %v1339_v61  ;;  %3788 = vtanh.f32 %v1315_v18  ;;  %vm1346_vm5 = vweird.f32 %v3785_v31  ;;  %vm1328_vm8 = vmor %vm1326_vm6, %vm1327_vm4  ;;  %vm1365_vm13 = vweird.f32 %v1359_v32 }
 0x3c1   :  { %v1323_v19 = vsub.f32 1.0, %v1322_v29  ;;  %vm1347_vm9 = vmor %vm1345_vm7, %vm1346_vm5  ;;  %v1352_v29 = vor.u32 1.1754944e-38, %v1351_v11  ;;  %v1372_v11 = vor.u32 1.1754944e-38, %v1371_v53  ;;  %v6995_v53 = vld [vmem:[#allocation47_spill] sm:$0xff] }
 0x3c2   :  { %v1342_v33 = vsub.f32 1.0, %v1341_v12 }
 0x3c3   :  { %v1324_v17 = vmul.f32 %v3783_v24, %v1323_v19 }
 0x3c4   :  { %v1343_v23 = vmul.f32 %v3785_v31, %v1342_v33 }
 0x3c5   :  { %v3787_v7 = vpop.eup %3786  ;;  %v1325_v2 = vadd.f32 %v3783_v24, %v1324_v17 }
 0x3c6   :  { %v1344_v28 = vadd.f32 %v3785_v31, %v1343_v23  ;;  %v1361_v3 = vmul.f32 %v3787_v7, %v1359_v32  ;;  %v3789_v18 = vpop.eup %3788  ;;  %vm1366_vm12 = vweird.f32 %v3787_v7  ;;  %v1369_v23 = vand.u32 2147483647, %v1359_v32  ;;  %v6983_v32 = vld [vmem:[#allocation31_spill] sm:$0xff] }
 0x3c7   :  { %v1329_v12 = vsel %vm1328_vm8, %v3783_v24, %v1325_v2  ;;  %vm1367_vm14 = vmor %vm1365_vm13, %vm1366_vm12  ;;  %v6984_v2 = vld [vmem:[#allocation41_spill] sm:$0xff] }
 0x3c8   :  { %v1334_v13 = vsel %vm1331_vm10, %v1333_v8, %v1329_v12  ;;  %v1348_v19 = vsel %vm1347_vm9, %v3785_v31, %v1344_v28  ;;  %v1362_v1 = vsub.f32 1.0, %v1361_v3  ;;  %vm1370_vm15 = vcmp.eq.f32.partialorder %v1369_v23, 8.507059e+37  ;;  %v6985_v8 = vld [vmem:[#allocation35_spill] sm:$0xff]  ;;  %v6986_v28 = vld [vmem:[#allocation33_spill] sm:$0xff]  ;;  %v6987_v3 = vld [vmem:[#allocation34_spill] sm:$0xff] }
 0x3c9   :  { %v1353_v33 = vsel %vm1350_vm11, %v1352_v29, %v1348_v19  ;;  %v1376_v22 = vmul.f32 %v3789_v18, %v1334_v13  ;;  %v6982_v13 = vld [vmem:[#allocation30_spill] sm:$0xff]  ;;  %v6988_v29 = vld [vmem:[#allocation44_spill] sm:$0xff]  ;;  %v6989_v12 = vld [vmem:[#allocation51_spill] sm:$0xff] }
 0x3ca   :  { %v1375_v55 = vmul.f32 %v1353_v33, %v5192_v59  ;;  %v1363_v17 = vmul.f32 %v3787_v7, %v1362_v1  ;;  %v6977_v59 = vld [vmem:[#allocation29_spill] sm:$0xff]  ;;  %v6980_v1 = vld [vmem:[#allocation39_spill] sm:$0xff]  ;;  %v6990_v18 = vld [vmem:[#allocation40_spill] sm:$0xff] }
 0x3cb   :  { %v6991_v19 = vld [vmem:[#allocation37_spill] sm:$0xff]  ;;  %v6992_v33 = vld [vmem:[#allocation38_spill] sm:$0xff] }
 0x3cc   :  { %v5290_v9 = vadd.f32 %v1376_v22, %v1375_v55  ;;  %v1364_v61 = vadd.f32 %v3787_v7, %v1363_v17  ;;  %v6978_v55 = vld [vmem:[#allocation27_spill] sm:$0xff]  ;;  %v6979_v22 = vld [vmem:[#allocation28_spill] sm:$0xff]  ;;  %v6993_v17 = vld [vmem:[#allocation49_spill] sm:$0xff] }
 0x3cd   :  { %v6996_v23 = vld [vmem:[#allocation45_spill] sm:$0xff] }
 0x3ce   :  { %3790 = vtanh.f32 %v5290_v9  ;;  %v1368_v24 = vsel %vm1367_vm14, %v3787_v7, %v1364_v61  ;;  %v6981_v7 = vld [vmem:[#allocation32_spill] sm:$0xff]  ;;  %v6994_v61 = vld [vmem:[#allocation46_spill] sm:$0xff] }
 0x3cf   :  { %v1373_v31 = vsel %vm1370_vm15, %v1372_v11, %v1368_v24  ;;  %v6997_v24 = vld [vmem:[#allocation48_spill] sm:$0xff] }
 0x3d0   :  { %v6998_v11 = vld [vmem:[#allocation52_spill] sm:$0xff] }
 0x3d4   :  { %v3791_v16 = vpop.eup %3790 }
 0x3d5   :  { %v5293_v63 = vmul.f32 %v3791_v16, %v1373_v31  ;;  %v6999_v16 = vld [vmem:[#allocation42_spill] sm:$0xff] }
 0x3d6   :  { %v7000_v31 = vld [vmem:[#allocation50_spill] sm:$0xff] }
 0x3d7   :  { %6976 = vst [vmem:[#allocation55_spill] sm:$0xff] %v5293_v63  ;;  %1401 = vmatmul.f32.vlgmr.msrb.gmra.mxu0 %v5293_v63  ;;  %1421 = vmatmul.f32.vlgmr.msrb.gmra.mxu1 %v5293_v63 }
 0x3d8   :  { %1441 = vmatmul.f32.vlgmr.msrb.gmra.mxu2 %v5293_v63  ;;  %1461 = vmatmul.f32.vlgmr.msra.gmra.mxu3 %v5293_v63  ;;  %v7001_v63 = vld [vmem:[#allocation26_spill] sm:$0xff] }
 0x3d9   :  { %1689 = vmatpush.msrb.mxu0 %v5007_v15  ;;  %1709 = vmatpush.msrb.mxu1 %v5010_v27 }
 0x3da   :  { %1729 = vmatpush.msrb.mxu2 %v5013_v5  ;;  %1749 = vmatpush.msra.mxu3 %v5016_v14 }
 0x3db   :  { %1690 = vmatpush.msrb.mxu0 %v5019_v60  ;;  %1710 = vmatpush.msrb.mxu1 %v5022_v37 }
 0x3dc   :  { %1730 = vmatpush.msrb.mxu2 %v5025_v21  ;;  %1750 = vmatpush.msra.mxu3 %v5028_v30 }
 0x3dd   :  { %1691 = vmatpush.msrb.mxu0 %v5031_v25  ;;  %1711 = vmatpush.msrb.mxu1 %v5034_v56 }
 0x3de   :  { %1731 = vmatpush.msrb.mxu2 %v5037_v36  ;;  %1751 = vmatpush.msra.mxu3 %v5040_v48 }
 0x3df   :  { %1692 = vmatpush.msrb.mxu0 %v5043_v4  ;;  %1712 = vmatpush.msrb.mxu1 %v5046_v26 }
 0x3e0   :  { %1732 = vmatpush.msrb.mxu2 %v5049_v34  ;;  %1752 = vmatpush.msra.mxu3 %v5052_v10 }
 0x3e1   :  { %1693 = vmatpush.msrb.mxu0 %v5055_v0  ;;  %1713 = vmatpush.msrb.mxu1 %v5058_v49 }
 0x3e2   :  { %1733 = vmatpush.msrb.mxu2 %v5061_v20  ;;  %1753 = vmatpush.msra.mxu3 %v5064_v6 }
 0x3e3   :  { %1694 = vmatpush.msrb.mxu0 %v5067_v40  ;;  %1714 = vmatpush.msrb.mxu1 %v5070_v45 }
 0x3e4   :  { %1734 = vmatpush.msrb.mxu2 %v5073_v35  ;;  %1754 = vmatpush.msra.mxu3 %v5076_v38 }
 0x3e5   :  { %1695 = vmatpush.msrb.mxu0 %v5079_v39  ;;  %1715 = vmatpush.msrb.mxu1 %v5082_v41 }
 0x3e6   :  { %1735 = vmatpush.msrb.mxu2 %v5085_v42  ;;  %1755 = vmatpush.msra.mxu3 %v5088_v43 }
 0x3e7   :  { %1696 = vmatpush.msrb.mxu0 %v5091_v44  ;;  %1716 = vmatpush.msrb.mxu1 %v5094_v46 }
 0x3e8   :  { %1736 = vmatpush.msrb.mxu2 %v5097_v47  ;;  %1756 = vmatpush.msra.mxu3 %v5100_v50 }
 0x3e9   :  { %1697 = vmatpush.msrb.mxu0 %v5103_v51  ;;  %1717 = vmatpush.msrb.mxu1 %v5106_v52 }
 0x3ea   :  { %1737 = vmatpush.msrb.mxu2 %v5109_v54  ;;  %1757 = vmatpush.msra.mxu3 %v5112_v57 }
 0x3eb   :  { %1698 = vmatpush.msrb.mxu0 %v5115_v58  ;;  %1718 = vmatpush.msrb.mxu1 %v5118_v62 }
 0x3ec   :  { %1738 = vmatpush.msrb.mxu2 %v6977_v59  ;;  %1758 = vmatpush.msra.mxu3 %v6978_v55 }
 0x3ed   :  { %1699 = vmatpush.msrb.mxu0 %v6979_v22  ;;  %1719 = vmatpush.msrb.mxu1 %v6980_v1 }
 0x3ee   :  { %1739 = vmatpush.msrb.mxu2 %v6981_v7  ;;  %1759 = vmatpush.msra.mxu3 %v6982_v13 }
 0x3ef   :  { %1700 = vmatpush.msrb.mxu0 %v6983_v32  ;;  %1720 = vmatpush.msrb.mxu1 %v6984_v2 }
 0x3f0   :  { %1740 = vmatpush.msrb.mxu2 %v6985_v8  ;;  %1760 = vmatpush.msra.mxu3 %v6986_v28  ;;  %v7008_v8 = vld [vmem:[#allocation66_spill] sm:$0xff] }
 0x3f1   :  { %1701 = vmatpush.msrb.mxu0 %v6987_v3  ;;  %1721 = vmatpush.msrb.mxu1 %v6988_v29 }
 0x3f2   :  { %1741 = vmatpush.msrb.mxu2 %v6989_v12  ;;  %1761 = vmatpush.msra.mxu3 %v6990_v18  ;;  %v7006_v12 = vld [vmem:[#allocation65_spill] sm:$0xff] }
 0x3f3   :  { %1702 = vmatpush.msrb.mxu0 %v6991_v19  ;;  %1722 = vmatpush.msrb.mxu1 %v6992_v33  ;;  %v7002_v19 = vld [vmem:[#allocation53_spill] sm:$0xff] }
 0x3f4   :  { %1742 = vmatpush.msrb.mxu2 %v6993_v17  ;;  %1762 = vmatpush.msra.mxu3 %v6994_v61  ;;  %v7003_v33 = vld [vmem:[#allocation77_spill] sm:$0xff]  ;;  %v7004_v17 = vld [vmem:[#allocation64_spill] sm:$0xff]  ;;  %v7005_v61 = vld [vmem:[#allocation78_spill] sm:$0xff] }
 0x3f5   :  { %1703 = vmatpush.msrb.mxu0 %v6995_v53  ;;  %1723 = vmatpush.msrb.mxu1 %v6996_v23  ;;  %v543_v18 = vadd.f32 %v7004_v17, %v7003_v33  ;;  %v584_v53 = vadd.f32 %v7006_v12, %v7005_v61 }
 0x3f6   :  { %1743 = vmatpush.msrb.mxu2 %v6997_v24  ;;  %1763 = vmatpush.msra.mxu3 %v6998_v11 }
 0x3f7   :  { %1704 = vmatpush.msrb.mxu0 %v6999_v16  ;;  %1724 = vmatpush.msrb.mxu1 %v7000_v31  ;;  %v7007_v16 = vld [vmem:[#allocation81_spill] sm:$0xff] }
 0x3f8   :  { %1744 = vmatpush.msrb.mxu2 %v7001_v63  ;;  %1764 = vmatpush.msra.mxu3 %v7002_v19  ;;  %v666_v31 = vadd.f32 %v7008_v8, %v7007_v16 }
 0x454   :  { %v1402_v29 = vpop.f32.mrf.mxu0  ;;  %v1422_v23 = vpop.f32.mrf.mxu1 }
 0x455   :  { %v1465_v3 = vadd.f32 %v1402_v29, %v543_v18  ;;  %v1466_v24 = vadd.f32 %v1422_v23, %v584_v53  ;;  %v7009_v18 = vld [vmem:[#allocation83_spill] sm:$0xff] }
 0x457   :  { %v3659_v28 = vmul.f32 -1.442695, %v1465_v3  ;;  %v3660_v11 = vmul.f32 -1.442695, %v1466_v24  ;;  %v7010_v3 = vld [vmem:[#allocation69_spill] sm:$0xff] }
 0x458   :  { %v625_v53 = vadd.f32 %v7010_v3, %v7009_v18 }
 0x459   :  { %3792 = vpow2.f32 %v3659_v28 }
 0x45a   :  { %3794 = vpow2.f32 %v3660_v11 }
 0x45b   :  { %v1462_v63 = vpop.f32.mrf.mxu3  ;;  %v1442_v12 = vpop.f32.mrf.mxu2 }
 0x45c   :  { %v1468_v2 = vadd.f32 %v1462_v63, %v666_v31  ;;  %v1467_v24 = vadd.f32 %v1442_v12, %v625_v53 }
 0x45e   :  { %v3661_v19 = vmul.f32 -1.442695, %v1468_v2 }
 0x45f   :  { %v3793_v32 = vpop.eup %3792 }
 0x460   :  { %v3795_v13 = vpop.eup %3794  ;;  %v1472_v17 = vadd.f32 1.0, %v3793_v32  ;;  %3796 = vpow2.f32 %v3661_v19 }
 0x461   :  { %v1491_v33 = vadd.f32 1.0, %v3795_v13 }
 0x462   :  { %3798 = vrcp.f32 %v1472_v17  ;;  %v1484_v16 = vand.u32 2147483648, %v1472_v17  ;;  %v1482_v19 = vand.u32 2147483647, %v1472_v17  ;;  %vm1478_vm2 = vweird.f32 %v1472_v17 }
 0x463   :  { %3800 = vrcp.f32 %v1491_v33  ;;  %v1503_v32 = vand.u32 2147483648, %v1491_v33  ;;  %v1501_v7 = vand.u32 2147483647, %v1491_v33  ;;  %vm1497_vm3 = vweird.f32 %v1491_v33 }
 0x464   :  { %v1485_v12 = vor.u32 1.1754944e-38, %v1484_v16  ;;  %vm1483_vm6 = vcmp.eq.f32.partialorder %v1482_v19, 8.507059e+37 }
 0x465   :  { %vm1502_vm7 = vcmp.eq.f32.partialorder %v1501_v7, 8.507059e+37 }
 0x466   :  { %v3797_v29 = vpop.eup %3796 }
 0x467   :  { %v1511_v28 = vadd.f32 1.0, %v3797_v29 }
 0x468   :  { %v3799_v23 = vpop.eup %3798 }
 0x469   :  { %v3801_v8 = vpop.eup %3800  ;;  %v1474_v11 = vmul.f32 %v3799_v23, %v1472_v17  ;;  %3802 = vrcp.f32 %v1511_v28  ;;  %vm1479_vm0 = vweird.f32 %v3799_v23  ;;  %vm1517_vm9 = vweird.f32 %v1511_v28 }
 0x46a   :  { %v1493_v63 = vmul.f32 %v3801_v8, %v1491_v33  ;;  %3804 = vtanh.f32 %v1467_v24  ;;  %vm1498_vm1 = vweird.f32 %v3801_v8  ;;  %vm1480_vm4 = vmor %vm1478_vm2, %vm1479_vm0  ;;  %v1521_v16 = vand.u32 2147483647, %v1511_v28 }
 0x46b   :  { %v1475_v2 = vsub.f32 1.0, %v1474_v11  ;;  %vm1499_vm5 = vmor %vm1497_vm3, %vm1498_vm1  ;;  %v1504_v11 = vor.u32 1.1754944e-38, %v1503_v32 }
 0x46c   :  { %v1494_v31 = vsub.f32 1.0, %v1493_v63  ;;  %vm1522_vm11 = vcmp.eq.f32.partialorder %v1521_v16, 8.507059e+37 }
 0x46d   :  { %v1476_v13 = vmul.f32 %v3799_v23, %v1475_v2 }
 0x46e   :  { %v1495_v61 = vmul.f32 %v3801_v8, %v1494_v31 }
 0x46f   :  { %v3803_v1 = vpop.eup %3802  ;;  %v1477_v3 = vadd.f32 %v3799_v23, %v1476_v13 }
 0x470   :  { %v1496_v29 = vadd.f32 %v3801_v8, %v1495_v61  ;;  %v1513_v53 = vmul.f32 %v3803_v1, %v1511_v28  ;;  %v3805_v24 = vpop.eup %3804  ;;  %vm1518_vm8 = vweird.f32 %v3803_v1  ;;  %v1523_v61 = vand.u32 2147483648, %v1511_v28 }
 0x471   :  { %v1481_v63 = vsel %vm1480_vm4, %v3799_v23, %v1477_v3  ;;  %vm1519_vm10 = vmor %vm1517_vm9, %vm1518_vm8 }
 0x472   :  { %v1486_v18 = vsel %vm1483_vm6, %v1485_v12, %v1481_v63  ;;  %v1500_v2 = vsel %vm1499_vm5, %v3801_v8, %v1496_v29  ;;  %v1514_v22 = vsub.f32 1.0, %v1513_v53  ;;  %v1524_v32 = vor.u32 1.1754944e-38, %v1523_v61  ;;  %v7043_v63 = vld [vmem:[#allocation83_spill] sm:$0xff] }
 0x473   :  { %v1505_v31 = vsel %vm1502_vm7, %v1504_v11, %v1500_v2  ;;  %v1528_v55 = vmul.f32 %v3805_v24, %v1486_v18  ;;  %v7044_v24 = vld [vmem:[#allocation73_spill] sm:$0xff] }
 0x474   :  { %v1527_v59 = vmul.f32 %v1505_v31, %v5290_v9  ;;  %v1515_v13 = vmul.f32 %v3803_v1, %v1514_v22  ;;  %v7041_v9 = vld [vmem:[#allocation81_spill] sm:$0xff]  ;;  %v628_v2 = vadd.f32 %v7044_v24, %v7043_v63  ;;  %v7045_v24 = vld [vmem:[#allocation71_spill] sm:$0xff] }
 0x476   :  { %v5372_v17 = vadd.f32 %v1528_v55, %v1527_v59  ;;  %v1516_v33 = vadd.f32 %v3803_v1, %v1515_v13  ;;  %v7042_v59 = vld [vmem:[#allocation70_spill] sm:$0xff] }
 0x477   :  { %v669_v55 = vadd.f32 %v7042_v59, %v7041_v9  ;;  %v2049_v59 = vld [vmem:[#allocation13 + $0x1a0] sm:$0xff] }
 0x478   :  { %3806 = vtanh.f32 %v5372_v17  ;;  %v1520_v23 = vsel %vm1519_vm10, %v3803_v1, %v1516_v33 }
 0x479   :  { %v1525_v8 = vsel %vm1522_vm11, %v1524_v32, %v1520_v23 }
 0x47e   :  { %v3807_v7 = vpop.eup %3806 }
 0x47f   :  { %v5375_v19 = vmul.f32 %v3807_v7, %v1525_v8 }
 0x481   :  { %1553 = vmatmul.f32.vlgmr.msra.gmra.mxu0 %v5375_v19  ;;  %1573 = vmatmul.f32.vlgmr.msra.gmra.mxu1 %v5375_v19 }
 0x482   :  { %1593 = vmatmul.f32.vlgmr.msra.gmra.mxu2 %v5375_v19  ;;  %1613 = vmatmul.f32.vlgmr.msrb.gmra.mxu3 %v5375_v19 }
 0x483   :  { %1841 = vmatpush.msra.mxu0 %v5007_v15  ;;  %1861 = vmatpush.msra.mxu1 %v5010_v27  ;;  %v7011_v15 = vld [vmem:[#allocation29_spill] sm:$0xff]  ;;  %v7012_v27 = vld [vmem:[#allocation27_spill] sm:$0xff] }
 0x484   :  { %1881 = vmatpush.msra.mxu2 %v5013_v5  ;;  %1901 = vmatpush.msrb.mxu3 %v5016_v14  ;;  %v7013_v5 = vld [vmem:[#allocation28_spill] sm:$0xff]  ;;  %v7014_v14 = vld [vmem:[#allocation39_spill] sm:$0xff] }
 0x485   :  { %1842 = vmatpush.msra.mxu0 %v5019_v60  ;;  %1862 = vmatpush.msra.mxu1 %v5022_v37  ;;  %v7015_v60 = vld [vmem:[#allocation32_spill] sm:$0xff]  ;;  %v7016_v37 = vld [vmem:[#allocation30_spill] sm:$0xff] }
 0x486   :  { %1882 = vmatpush.msra.mxu2 %v5025_v21  ;;  %1902 = vmatpush.msrb.mxu3 %v5028_v30  ;;  %v7017_v21 = vld [vmem:[#allocation31_spill] sm:$0xff]  ;;  %v7018_v30 = vld [vmem:[#allocation41_spill] sm:$0xff] }
 0x487   :  { %1843 = vmatpush.msra.mxu0 %v5031_v25  ;;  %1863 = vmatpush.msra.mxu1 %v5034_v56  ;;  %v7019_v25 = vld [vmem:[#allocation35_spill] sm:$0xff]  ;;  %v7020_v56 = vld [vmem:[#allocation33_spill] sm:$0xff] }
 0x488   :  { %1883 = vmatpush.msra.mxu2 %v5037_v36  ;;  %1903 = vmatpush.msrb.mxu3 %v5040_v48  ;;  %v7021_v36 = vld [vmem:[#allocation34_spill] sm:$0xff]  ;;  %v7022_v48 = vld [vmem:[#allocation44_spill] sm:$0xff] }
 0x489   :  { %1844 = vmatpush.msra.mxu0 %v5043_v4  ;;  %1864 = vmatpush.msra.mxu1 %v5046_v26  ;;  %v7023_v4 = vld [vmem:[#allocation51_spill] sm:$0xff]  ;;  %v7024_v26 = vld [vmem:[#allocation40_spill] sm:$0xff] }
 0x48a   :  { %1884 = vmatpush.msra.mxu2 %v5049_v34  ;;  %1904 = vmatpush.msrb.mxu3 %v5052_v10  ;;  %v7025_v34 = vld [vmem:[#allocation37_spill] sm:$0xff]  ;;  %v7026_v10 = vld [vmem:[#allocation38_spill] sm:$0xff] }
 0x48b   :  { %1845 = vmatpush.msra.mxu0 %v5055_v0  ;;  %1865 = vmatpush.msra.mxu1 %v5058_v49  ;;  %v7027_v0 = vld [vmem:[#allocation49_spill] sm:$0xff]  ;;  %v7028_v49 = vld [vmem:[#allocation46_spill] sm:$0xff] }
 0x48c   :  { %1885 = vmatpush.msra.mxu2 %v5061_v20  ;;  %1905 = vmatpush.msrb.mxu3 %v5064_v6  ;;  %v7029_v20 = vld [vmem:[#allocation47_spill] sm:$0xff]  ;;  %v7030_v6 = vld [vmem:[#allocation45_spill] sm:$0xff] }
 0x48d   :  { %1846 = vmatpush.msra.mxu0 %v5067_v40  ;;  %1866 = vmatpush.msra.mxu1 %v5070_v45  ;;  %v7031_v40 = vld [vmem:[#allocation48_spill] sm:$0xff] }
 0x48e   :  { %1886 = vmatpush.msra.mxu2 %v5073_v35  ;;  %1906 = vmatpush.msrb.mxu3 %v5076_v38  ;;  %v7032_v45 = vld [vmem:[#allocation52_spill] sm:$0xff]  ;;  %v7033_v35 = vld [vmem:[#allocation42_spill] sm:$0xff] }
 0x48f   :  { %1847 = vmatpush.msra.mxu0 %v5079_v39  ;;  %1867 = vmatpush.msra.mxu1 %v5082_v41  ;;  %v7034_v38 = vld [vmem:[#allocation50_spill] sm:$0xff]  ;;  %v7036_v41 = vld [vmem:[#allocation53_spill] sm:$0xff] }
 0x490   :  { %1887 = vmatpush.msra.mxu2 %v5085_v42  ;;  %1907 = vmatpush.msrb.mxu3 %v5088_v43  ;;  %v7035_v39 = vld [vmem:[#allocation26_spill] sm:$0xff]  ;;  %v7037_v42 = vld [vmem:[#allocation77_spill] sm:$0xff]  ;;  %v7038_v43 = vld [vmem:[#allocation67_spill] sm:$0xff] }
 0x491   :  { %1848 = vmatpush.msra.mxu0 %v5091_v44  ;;  %1868 = vmatpush.msra.mxu1 %v5094_v46  ;;  %v546_v44 = vadd.f32 %v7038_v43, %v7037_v42  ;;  %v7039_v46 = vld [vmem:[#allocation78_spill] sm:$0xff] }
 0x492   :  { %1888 = vmatpush.msra.mxu2 %v5097_v47  ;;  %1908 = vmatpush.msrb.mxu3 %v5100_v50  ;;  %v7040_v47 = vld [vmem:[#allocation68_spill] sm:$0xff] }
 0x493   :  { %1849 = vmatpush.msra.mxu0 %v5103_v51  ;;  %1869 = vmatpush.msra.mxu1 %v5106_v52  ;;  %v587_v50 = vadd.f32 %v7040_v47, %v7039_v46 }
 0x494   :  { %1889 = vmatpush.msra.mxu2 %v5109_v54  ;;  %1909 = vmatpush.msrb.mxu3 %v5112_v57 }
 0x495   :  { %1850 = vmatpush.msra.mxu0 %v5115_v58  ;;  %1870 = vmatpush.msra.mxu1 %v5118_v62 }
 0x496   :  { %1890 = vmatpush.msra.mxu2 %v7011_v15  ;;  %1910 = vmatpush.msrb.mxu3 %v7012_v27 }
 0x497   :  { %1851 = vmatpush.msra.mxu0 %v7013_v5  ;;  %1871 = vmatpush.msra.mxu1 %v7014_v14 }
 0x498   :  { %1891 = vmatpush.msra.mxu2 %v7015_v60  ;;  %1911 = vmatpush.msrb.mxu3 %v7016_v37 }
 0x499   :  { %1852 = vmatpush.msra.mxu0 %v7017_v21  ;;  %1872 = vmatpush.msra.mxu1 %v7018_v30 }
 0x49a   :  { %1892 = vmatpush.msra.mxu2 %v7019_v25  ;;  %1912 = vmatpush.msrb.mxu3 %v7020_v56 }
 0x49b   :  { %1853 = vmatpush.msra.mxu0 %v7021_v36  ;;  %1873 = vmatpush.msra.mxu1 %v7022_v48 }
 0x49c   :  { %1893 = vmatpush.msra.mxu2 %v7023_v4  ;;  %1913 = vmatpush.msrb.mxu3 %v7024_v26 }
 0x49d   :  { %1854 = vmatpush.msra.mxu0 %v7025_v34  ;;  %1874 = vmatpush.msra.mxu1 %v7026_v10 }
 0x49e   :  { %1894 = vmatpush.msra.mxu2 %v7027_v0  ;;  %1914 = vmatpush.msrb.mxu3 %v7028_v49 }
 0x49f   :  { %1855 = vmatpush.msra.mxu0 %v7029_v20  ;;  %1875 = vmatpush.msra.mxu1 %v7030_v6 }
 0x4a0   :  { %1895 = vmatpush.msra.mxu2 %v7031_v40  ;;  %1915 = vmatpush.msrb.mxu3 %v7032_v45 }
 0x4a1   :  { %1856 = vmatpush.msra.mxu0 %v7033_v35  ;;  %1876 = vmatpush.msra.mxu1 %v7034_v38 }
 0x4a2   :  { %1896 = vmatpush.msra.mxu2 %v7035_v39  ;;  %1916 = vmatpush.msrb.mxu3 %v7036_v41 }
 0x4fe   :  { %v1554_v51 = vpop.f32.mrf.mxu0  ;;  %v1574_v52 = vpop.f32.mrf.mxu1 }
 0x4ff   :  { %v1617_v54 = vadd.f32 %v1554_v51, %v546_v44  ;;  %v1618_v57 = vadd.f32 %v1574_v52, %v587_v50  ;;  %v2058_v50 = vld [vmem:[#allocation13 + $0x1e8] sm:$0xff]  ;;  %v2059_v51 = vld [vmem:[#allocation13 + $0x1f0] sm:$0xff]  ;;  %v2060_v52 = vld [vmem:[#allocation13 + $0x1f8] sm:$0xff] }
 0x501   :  { %v3662_v58 = vmul.f32 -1.442695, %v1617_v54  ;;  %v3663_v62 = vmul.f32 -1.442695, %v1618_v57  ;;  %v2053_v54 = vld [vmem:[#allocation13 + $0x1c0] sm:$0xff]  ;;  %v2054_v57 = vld [vmem:[#allocation13 + $0x1c8] sm:$0xff] }
 0x503   :  { %3808 = vpow2.f32 %v3662_v58  ;;  %v2055_v58 = vld [vmem:[#allocation13 + $0x1d0] sm:$0xff] }
 0x504   :  { %3810 = vpow2.f32 %v3663_v62  ;;  %v2056_v62 = vld [vmem:[#allocation13 + $0x1d8] sm:$0xff] }
 0x505   :  { %v1614_v22 = vpop.f32.mrf.mxu3  ;;  %v1594_v53 = vpop.f32.mrf.mxu2 }
 0x506   :  { %v1620_v1 = vadd.f32 %v1614_v22, %v669_v55  ;;  %v1619_v33 = vadd.f32 %v1594_v53, %v628_v2  ;;  %v2050_v55 = vld [vmem:[#allocation13 + $0x1a8] sm:$0xff]  ;;  %v2051_v22 = vld [vmem:[#allocation13 + $0x1b0] sm:$0xff]  ;;  %v549_v2 = vadd.f32 %v7045_v24, %v7037_v42 }
 0x507   :  { %v2042_v53 = vld [vmem:[#allocation13 + $0x168] sm:$0xff] }
 0x508   :  { %v3664_v18 = vmul.f32 -1.442695, %v1620_v1  ;;  %v2052_v1 = vld [vmem:[#allocation13 + $0x1b8] sm:$0xff] }
 0x509   :  { %v3809_v28 = vpop.eup %3808 }
 0x50a   :  { %v3811_v3 = vpop.eup %3810  ;;  %v1624_v12 = vadd.f32 1.0, %v3809_v28  ;;  %3812 = vpow2.f32 %v3664_v18  ;;  %v2045_v18 = vld [vmem:[#allocation13 + $0x180] sm:$0xff]  ;;  %v2046_v28 = vld [vmem:[#allocation13 + $0x188] sm:$0xff] }
 0x50b   :  { %v1643_v29 = vadd.f32 1.0, %v3811_v3  ;;  %v2047_v3 = vld [vmem:[#allocation13 + $0x190] sm:$0xff] }
 0x50c   :  { %3814 = vrcp.f32 %v1624_v12  ;;  %v1636_v8 = vand.u32 2147483648, %v1624_v12  ;;  %v1634_v5 = vand.u32 2147483647, %v1624_v12  ;;  %vm1630_vm14 = vweird.f32 %v1624_v12 }
 0x50d   :  { %3816 = vrcp.f32 %v1643_v29  ;;  %v1655_v15 = vand.u32 2147483648, %v1643_v29  ;;  %v1653_v60 = vand.u32 2147483647, %v1643_v29  ;;  %vm1649_vm15 = vweird.f32 %v1643_v29 }
 0x50e   :  { %v1637_v30 = vor.u32 1.1754944e-38, %v1636_v8  ;;  %vm1635_vm2 = vcmp.eq.f32.partialorder %v1634_v5, 8.507059e+37  ;;  %v2033_v5 = vld [vmem:[#allocation13 + $0x120] sm:$0xff] }
 0x50f   :  { %v1656_v36 = vor.u32 1.1754944e-38, %v1655_v15  ;;  %vm1654_vm3 = vcmp.eq.f32.partialorder %v1653_v60, 8.507059e+37  ;;  %v2035_v60 = vld [vmem:[#allocation13 + $0x130] sm:$0xff] }
 0x510   :  { %v3813_v11 = vpop.eup %3812 }
 0x511   :  { %v1663_v31 = vadd.f32 1.0, %v3813_v11  ;;  %v2043_v11 = vld [vmem:[#allocation13 + $0x170] sm:$0xff] }
 0x512   :  { %v3815_v13 = vpop.eup %3814 }
 0x513   :  { %v3817_v61 = vpop.eup %3816  ;;  %v1626_v16 = vmul.f32 %v3815_v13, %v1624_v12  ;;  %3818 = vrcp.f32 %v1663_v31  ;;  %vm1631_vm12 = vweird.f32 %v3815_v13  ;;  %v1675_v35 = vand.u32 2147483648, %v1663_v31  ;;  %v2048_v12 = vld [vmem:[#allocation13 + $0x198] sm:$0xff] }
 0x514   :  { %v1645_v23 = vmul.f32 %v3817_v61, %v1643_v29  ;;  %3820 = vtanh.f32 %v1619_v33  ;;  %vm1650_vm13 = vweird.f32 %v3817_v61  ;;  %vm1632_vm0 = vmor %vm1630_vm14, %vm1631_vm12  ;;  %vm1669_vm5 = vweird.f32 %v1663_v31  ;;  %v2041_v29 = vld [vmem:[#allocation13 + $0x160] sm:$0xff]  ;;  %v2044_v33 = vld [vmem:[#allocation13 + $0x178] sm:$0xff] }
 0x515   :  { %v1627_v32 = vsub.f32 1.0, %v1626_v16  ;;  %vm1651_vm1 = vmor %vm1649_vm15, %vm1650_vm13  ;;  %v1673_v38 = vand.u32 2147483647, %v1663_v31  ;;  %v1676_v41 = vor.u32 1.1754944e-38, %v1675_v35  ;;  %v2022_v35 = vld [vmem:[#allocation13 + $0xc8] sm:$0xff] }
 0x516   :  { %v1646_v7 = vsub.f32 1.0, %v1645_v23  ;;  %v2037_v23 = vld [vmem:[#allocation13 + $0x140] sm:$0xff] }
 0x517   :  { %v1628_v27 = vmul.f32 %v3815_v13, %v1627_v32  ;;  %vm1674_vm7 = vcmp.eq.f32.partialorder %v1673_v38, 8.507059e+37  ;;  %v2038_v32 = vld [vmem:[#allocation13 + $0x148] sm:$0xff]  ;;  %v2023_v38 = vld [vmem:[#allocation13 + $0xd0] sm:$0xff] }
 0x518   :  { %v1647_v14 = vmul.f32 %v3817_v61, %v1646_v7  ;;  %v2039_v7 = vld [vmem:[#allocation13 + $0x150] sm:$0xff] }
 0x519   :  { %v3819_v37 = vpop.eup %3818  ;;  %v1629_v21 = vadd.f32 %v3815_v13, %v1628_v27  ;;  %v2040_v27 = vld [vmem:[#allocation13 + $0x158] sm:$0xff] }
 0x51a   :  { %v1648_v25 = vadd.f32 %v3817_v61, %v1647_v14  ;;  %v1665_v56 = vmul.f32 %v3819_v37, %v1663_v31  ;;  %v3821_v4 = vpop.eup %3820  ;;  %vm1670_vm4 = vweird.f32 %v3819_v37  ;;  %v7046_v31 = vld [vmem:[#allocation72_spill] sm:$0xff]  ;;  %v2034_v14 = vld [vmem:[#allocation13 + $0x128] sm:$0xff] }
 0x51b   :  { %v1633_v48 = vsel %vm1632_vm0, %v3815_v13, %v1629_v21  ;;  %vm1671_vm6 = vmor %vm1669_vm5, %vm1670_vm4  ;;  %v590_v13 = vadd.f32 %v7046_v31, %v7039_v46  ;;  %v2003_v31 = vld [vmem:[#allocation13 + $0x30] sm:$0xff] }
 0x51c   :  { %v1638_v26 = vsel %vm1635_vm2, %v1637_v30, %v1633_v48  ;;  %v1652_v34 = vsel %vm1651_vm1, %v3817_v61, %v1648_v25  ;;  %v1666_v10 = vsub.f32 1.0, %v1665_v56  ;;  %v2036_v30 = vld [vmem:[#allocation13 + $0x138] sm:$0xff]  ;;  %v2029_v25 = vld [vmem:[#allocation13 + $0x100] sm:$0xff]  ;;  %v2030_v56 = vld [vmem:[#allocation13 + $0x108] sm:$0xff] }
 0x51d   :  { %v1657_v0 = vsel %vm1654_vm3, %v1656_v36, %v1652_v34  ;;  %v1680_v49 = vmul.f32 %v3821_v4, %v1638_v26  ;;  %v2031_v36 = vld [vmem:[#allocation13 + $0x110] sm:$0xff]  ;;  %v2032_v48 = vld [vmem:[#allocation13 + $0x118] sm:$0xff]  ;;  %v7047_v4 = vld [vmem:[#allocation74_spill] sm:$0xff] }
 0x51e   :  { %v1679_v20 = vmul.f32 %v1657_v0, %v5372_v17  ;;  %v1667_v6 = vmul.f32 %v3819_v37, %v1666_v10  ;;  %v2057_v17 = vld [vmem:[#allocation13 + $0x1e0] sm:$0xff]  ;;  %v672_v26 = vadd.f32 %v7047_v4, %v7041_v9  ;;  %v2026_v10 = vld [vmem:[#allocation13 + $0xe8] sm:$0xff]  ;;  %v2027_v0 = vld [vmem:[#allocation13 + $0xf0] sm:$0xff] }
 0x51f   :  { %v2025_v34 = vld [vmem:[#allocation13 + $0xe0] sm:$0xff] }
 0x520   :  { %v5454_v40 = vadd.f32 %v1680_v49, %v1679_v20  ;;  %v1668_v45 = vadd.f32 %v3819_v37, %v1667_v6  ;;  %v2028_v20 = vld [vmem:[#allocation13 + $0xf8] sm:$0xff] }
 0x522   :  { %3822 = vtanh.f32 %v5454_v40  ;;  %v1672_v39 = vsel %vm1671_vm6, %v3819_v37, %v1668_v45  ;;  %v2021_v45 = vld [vmem:[#allocation13 + $0xc0] sm:$0xff] }
 0x523   :  { %v1677_v44 = vsel %vm1674_vm7, %v1676_v41, %v1672_v39  ;;  %v2024_v39 = vld [vmem:[#allocation13 + $0xd8] sm:$0xff] }
 0x528   :  { %v3823_v43 = vpop.eup %3822 }
 0x529   :  { %v5457_v47 = vmul.f32 %v3823_v43, %v1677_v44  ;;  %v2017_v43 = vld [vmem:[#allocation13 + $0xa0] sm:$0xff]  ;;  %v2018_v44 = vld [vmem:[#allocation13 + $0xa8] sm:$0xff] }
 0x52b   :  { %1705 = vmatmul.f32.vlgmr.msrb.gmra.mxu0 %v5457_v47  ;;  %1725 = vmatmul.f32.vlgmr.msrb.gmra.mxu1 %v5457_v47 }
 0x52c   :  { %1745 = vmatmul.f32.vlgmr.msrb.gmra.mxu2 %v5457_v47  ;;  %1765 = vmatmul.f32.vlgmr.msra.gmra.mxu3 %v5457_v47 }
 0x52d   :  { %2071 = vmatpush.msrb.mxu0 %v2057_v17  ;;  %2112 = vmatpush.msrb.mxu1 %v2058_v50  ;;  %v2019_v17 = vld [vmem:[#allocation13 + $0xb0] sm:$0xff] }
 0x52e   :  { %2153 = vmatpush.msrb.mxu2 %v2059_v51  ;;  %2194 = vmatpush.msra.mxu3 %v2060_v52  ;;  %v2020_v51 = vld [vmem:[#allocation13 + $0xb8] sm:$0xff]  ;;  %v2013_v52 = vld [vmem:[#allocation13 + $0x80] sm:$0xff] }
 0x52f   :  { %2072 = vmatpush.msrb.mxu0 %v2053_v54  ;;  %2113 = vmatpush.msrb.mxu1 %v2054_v57  ;;  %v2014_v54 = vld [vmem:[#allocation13 + $0x88] sm:$0xff] }
 0x530   :  { %2154 = vmatpush.msrb.mxu2 %v2055_v58  ;;  %2195 = vmatpush.msra.mxu3 %v2056_v62  ;;  %v2015_v62 = vld [vmem:[#allocation13 + $0x90] sm:$0xff] }
 0x531   :  { %2073 = vmatpush.msrb.mxu0 %v2049_v59  ;;  %2114 = vmatpush.msrb.mxu1 %v2050_v55  ;;  %v2016_v59 = vld [vmem:[#allocation13 + $0x98] sm:$0xff] }
 0x532   :  { %2155 = vmatpush.msrb.mxu2 %v2051_v22  ;;  %2196 = vmatpush.msra.mxu3 %v2052_v1  ;;  %v2009_v22 = vld [vmem:[#allocation13 + $0x60] sm:$0xff]  ;;  %v2010_v1 = vld [vmem:[#allocation13 + $0x68] sm:$0xff] }
 0x533   :  { %2074 = vmatpush.msrb.mxu0 %v2045_v18  ;;  %2115 = vmatpush.msrb.mxu1 %v2046_v28  ;;  %v2011_v18 = vld [vmem:[#allocation13 + $0x70] sm:$0xff]  ;;  %v2012_v28 = vld [vmem:[#allocation13 + $0x78] sm:$0xff] }
 0x534   :  { %2156 = vmatpush.msrb.mxu2 %v2047_v3  ;;  %2197 = vmatpush.msra.mxu3 %v2048_v12  ;;  %v2005_v3 = vld [vmem:[#allocation13 + $0x40] sm:$0xff]  ;;  %v2006_v12 = vld [vmem:[#allocation13 + $0x48] sm:$0xff] }
 0x535   :  { %2075 = vmatpush.msrb.mxu0 %v2041_v29  ;;  %2116 = vmatpush.msrb.mxu1 %v2042_v53  ;;  %v2007_v29 = vld [vmem:[#allocation13 + $0x50] sm:$0xff]  ;;  %v2008_v53 = vld [vmem:[#allocation13 + $0x58] sm:$0xff] }
 0x536   :  { %2157 = vmatpush.msrb.mxu2 %v2043_v11  ;;  %2198 = vmatpush.msra.mxu3 %v2044_v33  ;;  %v2001_v11 = vld [vmem:[#allocation13 + $0x20] sm:$0xff] }
 0x537   :  { %2076 = vmatpush.msrb.mxu0 %v2037_v23  ;;  %2117 = vmatpush.msrb.mxu1 %v2038_v32  ;;  %v1997_v23 = vld [vmem:[#allocation13] sm:$0xff]  ;;  %v1998_v32 = vld [vmem:[#allocation13 + $0x8] sm:$0xff] }
 0x538   :  { %2158 = vmatpush.msrb.mxu2 %v2039_v7  ;;  %2199 = vmatpush.msra.mxu3 %v2040_v27 }
 0x539   :  { %2077 = vmatpush.msrb.mxu0 %v2033_v5  ;;  %2118 = vmatpush.msrb.mxu1 %v2034_v14 }
 0x53a   :  { %2159 = vmatpush.msrb.mxu2 %v2035_v60  ;;  %2200 = vmatpush.msra.mxu3 %v2036_v30 }
 0x53b   :  { %2078 = vmatpush.msrb.mxu0 %v2029_v25  ;;  %2119 = vmatpush.msrb.mxu1 %v2030_v56 }
 0x53c   :  { %2160 = vmatpush.msrb.mxu2 %v2031_v36  ;;  %2201 = vmatpush.msra.mxu3 %v2032_v48 }
 0x53d   :  { %2079 = vmatpush.msrb.mxu0 %v2025_v34  ;;  %2120 = vmatpush.msrb.mxu1 %v2026_v10 }
 0x53e   :  { %2161 = vmatpush.msrb.mxu2 %v2027_v0  ;;  %2202 = vmatpush.msra.mxu3 %v2028_v20 }
 0x53f   :  { %2080 = vmatpush.msrb.mxu0 %v2021_v45  ;;  %2121 = vmatpush.msrb.mxu1 %v2022_v35 }
 0x540   :  { %2162 = vmatpush.msrb.mxu2 %v2023_v38  ;;  %2203 = vmatpush.msra.mxu3 %v2024_v39 }
 0x541   :  { %2081 = vmatpush.msrb.mxu0 %v2017_v43  ;;  %2122 = vmatpush.msrb.mxu1 %v2018_v44 }
 0x542   :  { %2163 = vmatpush.msrb.mxu2 %v2019_v17  ;;  %2204 = vmatpush.msra.mxu3 %v2020_v51 }
 0x543   :  { %2082 = vmatpush.msrb.mxu0 %v2013_v52  ;;  %2123 = vmatpush.msrb.mxu1 %v2014_v54 }
 0x544   :  { %2164 = vmatpush.msrb.mxu2 %v2015_v62  ;;  %2205 = vmatpush.msra.mxu3 %v2016_v59 }
 0x545   :  { %2083 = vmatpush.msrb.mxu0 %v2009_v22  ;;  %2124 = vmatpush.msrb.mxu1 %v2010_v1  ;;  %v7050_v1 = vld [vmem:[#allocation36_spill] sm:$0xff] }
 0x546   :  { %2165 = vmatpush.msrb.mxu2 %v2011_v18  ;;  %2206 = vmatpush.msra.mxu3 %v2012_v28  ;;  %v7051_v18 = vld [vmem:[#allocation43_spill] sm:$0xff]  ;;  %v5501_v28 = vld [vmem:[#allocation15 + $0x1e0] sm:$0xff] }
 0x547   :  { %2084 = vmatpush.msrb.mxu0 %v2005_v3  ;;  %2125 = vmatpush.msrb.mxu1 %v2006_v12  ;;  %7052 = vst [vmem:[#allocation54_spill] sm:$0xff] %v5501_v28  ;;  %v5503_v3 = vld [vmem:[#allocation15 + $0x1e8] sm:$0xff]  ;;  %v5505_v12 = vld [vmem:[#allocation15 + $0x1c0] sm:$0xff] }
 0x548   :  { %2166 = vmatpush.msrb.mxu2 %v2007_v29  ;;  %2207 = vmatpush.msra.mxu3 %v2008_v53  ;;  %v5509_v29 = vld [vmem:[#allocation15 + $0x1c8] sm:$0xff]  ;;  %v5511_v53 = vld [vmem:[#allocation15 + $0x1f8] sm:$0xff] }
 0x549   :  { %2085 = vmatpush.msrb.mxu0 %v2001_v11  ;;  %7053 = vst [vmem:[#allocation56_spill] sm:$0xff] %v5509_v29  ;;  %v5514_v11 = vld [vmem:[#allocation15 + $0x1a0] sm:$0xff] }
 0x54a   :  { %2167 = vmatpush.msrb.mxu2 %v2003_v31  ;;  %v7056_v31 = vld [vmem:[#allocation55_spill] sm:$0xff] }
 0x54b   :  { %2086 = vmatpush.msrb.mxu0 %v1997_v23  ;;  %v5549_v23 = vld [vmem:[#allocation15 + $0x188] sm:$0xff] }
 0x5a8   :  { %v1706_v61 = vpop.f32.mrf.mxu0  ;;  %v1726_v16 = vpop.f32.mrf.mxu1 }
 0x5a9   :  { %v1769_v8 = vadd.f32 %v1706_v61, %v549_v2  ;;  %v1770_v15 = vadd.f32 %v1726_v16, %v590_v13  ;;  %v2002_v2 = vld [vmem:[#allocation13 + $0x28] sm:$0xff]  ;;  %v2004_v13 = vld [vmem:[#allocation13 + $0x38] sm:$0xff] }
 0x5aa   :  { %v7048_v61 = vld [vmem:[#allocation79_spill] sm:$0xff]  ;;  %2126 = vmatpush.msrb.mxu1 %v2002_v2  ;;  %2208 = vmatpush.msra.mxu3 %v2004_v13  ;;  %v5518_v2 = vld [vmem:[#allocation15 + $0x1d8] sm:$0xff] }
 0x5ab   :  { %v3665_v37 = vmul.f32 -1.442695, %v1769_v8  ;;  %v3666_v21 = vmul.f32 -1.442695, %v1770_v15  ;;  %v631_v16 = vadd.f32 %v7048_v61, %v7043_v63  ;;  %v1999_v8 = vld [vmem:[#allocation13 + $0x10] sm:$0xff]  ;;  %v2000_v15 = vld [vmem:[#allocation13 + $0x18] sm:$0xff] }
 0x5ac   :  { %2127 = vmatpush.msrb.mxu1 %v1998_v32  ;;  %2168 = vmatpush.msrb.mxu2 %v1999_v8  ;;  %7055 = vst [vmem:[#allocation59_spill] sm:$0xff] %v5518_v2  ;;  %v5537_v13 = vld [vmem:[#allocation15 + $0x1f0] sm:$0xff]  ;;  %v5557_v32 = vld [vmem:[#allocation15 + $0x168] sm:$0xff] }
 0x5ad   :  { %3824 = vpow2.f32 %v3665_v37  ;;  %2209 = vmatpush.msra.mxu3 %v2000_v15  ;;  %v5545_v61 = vld [vmem:[#allocation15 + $0x1b0] sm:$0xff]  ;;  %v5567_v15 = vld [vmem:[#allocation15 + $0x178] sm:$0xff] }
 0x5ae   :  { %3826 = vpow2.f32 %v3666_v21  ;;  %v5561_v8 = vld [vmem:[#allocation15 + $0x190] sm:$0xff] }
 0x5af   :  { %v1766_v49 = vpop.f32.mrf.mxu3  ;;  %v1746_v24 = vpop.f32.mrf.mxu2 }
 0x5b0   :  { %v1772_v6 = vadd.f32 %v1766_v49, %v672_v26  ;;  %v1771_v5 = vadd.f32 %v1746_v24, %v631_v16  ;;  %v5516_v24 = vld [vmem:[#allocation15 + $0x1a8] sm:$0xff]  ;;  %v5547_v16 = vld [vmem:[#allocation15 + $0x180] sm:$0xff] }
 0x5b1   :  { %7054 = vst [vmem:[#allocation57_spill] sm:$0xff] %v5516_v24 }
 0x5b2   :  { %v3667_v41 = vmul.f32 -1.442695, %v1772_v6  ;;  %7058 = vst [vmem:[#allocation60_spill] sm:$0xff] %v5547_v16 }
 0x5b3   :  { %v3825_v50 = vpop.eup %3824 }
 0x5b4   :  { %v3827_v57 = vpop.eup %3826  ;;  %v5469_v58 = vadd.f32 1.0, %v3825_v50  ;;  %3828 = vpow2.f32 %v3667_v41 }
 0x5b5   :  { %v5471_v55 = vadd.f32 1.0, %v3827_v57 }
 0x5b6   :  { %3830 = vrcp.f32 %v5469_v58  ;;  %v1788_v25 = vand.u32 2147483648, %v5469_v58  ;;  %v1786_v48 = vand.u32 2147483647, %v5469_v58  ;;  %vm1782_vm10 = vweird.f32 %v5469_v58 }
 0x5b7   :  { %3832 = vrcp.f32 %v5471_v55  ;;  %v1807_v56 = vand.u32 2147483648, %v5471_v55  ;;  %v1805_v26 = vand.u32 2147483647, %v5471_v55  ;;  %vm1801_vm11 = vweird.f32 %v5471_v55 }
 0x5b8   :  { %v1789_v0 = vor.u32 1.1754944e-38, %v1788_v25  ;;  %vm1787_vm14 = vcmp.eq.f32.partialorder %v1786_v48, 8.507059e+37  ;;  %v5581_v25 = vld [vmem:[#allocation15 + $0x158] sm:$0xff]  ;;  %v5585_v48 = vld [vmem:[#allocation15 + $0x150] sm:$0xff] }
 0x5b9   :  { %v1808_v6 = vor.u32 1.1754944e-38, %v1807_v56  ;;  %vm1806_vm15 = vcmp.eq.f32.partialorder %v1805_v26, 8.507059e+37 }
 0x5ba   :  { %v3829_v33 = vpop.eup %3828 }
 0x5bb   :  { %v1815_v7 = vadd.f32 1.0, %v3829_v33  ;;  %v5540_v33 = vld [vmem:[#allocation15 + $0x1d0] sm:$0xff] }
 0x5bc   :  { %v3831_v27 = vpop.eup %3830 }
 0x5bd   :  { %v3833_v14 = vpop.eup %3832  ;;  %v1778_v60 = vmul.f32 %v3831_v27, %v5469_v58  ;;  %3834 = vrcp.f32 %v1815_v7  ;;  %vm1783_vm8 = vweird.f32 %v3831_v27  ;;  %v1827_v54 = vand.u32 2147483648, %v1815_v7 }
 0x5be   :  { %v1797_v37 = vmul.f32 %v3833_v14, %v5471_v55  ;;  %3836 = vtanh.f32 %v1771_v5  ;;  %vm1802_vm9 = vweird.f32 %v3833_v14  ;;  %vm1784_vm12 = vmor %vm1782_vm10, %vm1783_vm8  ;;  %vm1821_vm1 = vweird.f32 %v1815_v7  ;;  %v7059_v5 = vld [vmem:[#allocation75_spill] sm:$0xff] }
 0x5bf   :  { %v1779_v21 = vsub.f32 1.0, %v1778_v60  ;;  %vm1803_vm13 = vmor %vm1801_vm11, %vm1802_vm9  ;;  %v1825_v57 = vand.u32 2147483647, %v1815_v7  ;;  %v1828_v62 = vor.u32 1.1754944e-38, %v1827_v54  ;;  %v7060_v60 = vld [vmem:[#allocation76_spill] sm:$0xff]  ;;  %v5627_v54 = vld [vmem:[#allocation15 + $0xa0] sm:$0xff] }
 0x5c0   :  { %v1798_v30 = vsub.f32 1.0, %v1797_v37  ;;  %v593_v37 = vadd.f32 %v7060_v60, %v7039_v46  ;;  %v5592_v46 = vld [vmem:[#allocation15 + $0x138] sm:$0xff]  ;;  %7063 = vst [vmem:[#allocation63_spill] sm:$0xff] %v5627_v54 }
 0x5c1   :  { %v1780_v36 = vmul.f32 %v3831_v27, %v1779_v21  ;;  %vm1826_vm3 = vcmp.eq.f32.partialorder %v1825_v57, 8.507059e+37  ;;  %v5577_v21 = vld [vmem:[#allocation15 + $0x140] sm:$0xff]  ;;  %v5629_v57 = vld [vmem:[#allocation15 + $0xa8] sm:$0xff] }
 0x5c2   :  { %v1799_v4 = vmul.f32 %v3833_v14, %v1798_v30  ;;  %v5579_v30 = vld [vmem:[#allocation15 + $0x148] sm:$0xff]  ;;  %7064 = vst [vmem:[#allocation62_spill] sm:$0xff] %v5629_v57 }
 0x5c3   :  { %v3835_v34 = vpop.eup %3834  ;;  %v1781_v10 = vadd.f32 %v3831_v27, %v1780_v36 }
 0x5c4   :  { %v1800_v49 = vadd.f32 %v3833_v14, %v1799_v4  ;;  %v1817_v20 = vmul.f32 %v3835_v34, %v1815_v7  ;;  %v3837_v35 = vpop.eup %3836  ;;  %vm1822_vm0 = vweird.f32 %v3835_v34  ;;  %v5559_v7 = vld [vmem:[#allocation15 + $0x198] sm:$0xff] }
 0x5c5   :  { %v1785_v45 = vsel %vm1784_vm12, %v3831_v27, %v1781_v10  ;;  %vm1823_vm2 = vmor %vm1821_vm1, %vm1822_vm0  ;;  %v5569_v27 = vld [vmem:[#allocation15 + $0x170] sm:$0xff] }
 0x5c6   :  { %v1790_v38 = vsel %vm1787_vm14, %v1789_v0, %v1785_v45  ;;  %v1804_v39 = vsel %vm1803_vm13, %v3833_v14, %v1800_v49  ;;  %v1818_v41 = vsub.f32 1.0, %v1817_v20  ;;  %v552_v14 = vadd.f32 %v7059_v5, %v7037_v42  ;;  %v5587_v42 = vld [vmem:[#allocation15 + $0x120] sm:$0xff]  ;;  %v5597_v10 = vld [vmem:[#allocation15 + $0x130] sm:$0xff] }
 0x5c7   :  { %v1809_v43 = vsel %vm1806_vm15, %v1808_v6, %v1804_v39  ;;  %v1832_v44 = vmul.f32 %v3837_v35, %v1790_v38  ;;  %v5599_v20 = vld [vmem:[#allocation15 + $0x100] sm:$0xff]  ;;  %v5601_v6 = vld [vmem:[#allocation15 + $0x108] sm:$0xff]  ;;  %v5611_v38 = vld [vmem:[#allocation15 + $0x118] sm:$0xff] }
 0x5c8   :  { %v1831_v17 = vmul.f32 %v1809_v43, %v5454_v40  ;;  %v1819_v50 = vmul.f32 %v3835_v34, %v1818_v41  ;;  %v7049_v40 = vld [vmem:[#allocation84_spill] sm:$0xff]  ;;  %v5607_v45 = vld [vmem:[#allocation15 + $0xe0] sm:$0xff]  ;;  %v5609_v35 = vld [vmem:[#allocation15 + $0xe8] sm:$0xff] }
 0x5c9   :  { %v5614_v39 = vld [vmem:[#allocation15 + $0xc0] sm:$0xff]  ;;  %v5616_v41 = vld [vmem:[#allocation15 + $0xc8] sm:$0xff]  ;;  %v5618_v43 = vld [vmem:[#allocation15 + $0xf8] sm:$0xff] }
 0x5ca   :  { %v5486_v51 = vadd.f32 %v1832_v44, %v1831_v17  ;;  %v1820_v52 = vadd.f32 %v3835_v34, %v1819_v50  ;;  %v7061_v44 = vld [vmem:[#allocation80_spill] sm:$0xff]  ;;  %v5653_v5 = vld [vmem:[#allocation15 + $0x60] sm:$0xff] }
 0x5cb   :  { %v675_v17 = vadd.f32 %v7061_v44, %v7041_v9  ;;  %v5624_v50 = vld [vmem:[#allocation15 + $0xd8] sm:$0xff]  ;;  %7070 = vst [vmem:[#allocation27_spill] sm:$0xff] %v5653_v5  ;;  %v5681_v44 = vld [vmem:[#allocation15 + $0x20] sm:$0xff] }
 0x5cc   :  { %3838 = vtanh.f32 %v5486_v51  ;;  %v1824_v58 = vsel %vm1823_vm2, %v3835_v34, %v1820_v52  ;;  %v5589_v34 = vld [vmem:[#allocation15 + $0x128] sm:$0xff]  ;;  %7062 = vst [vmem:[#allocation61_spill] sm:$0xff] %v5624_v50  ;;  %v5635_v9 = vld [vmem:[#allocation15 + $0xb8] sm:$0xff] }
 0x5cd   :  { %v1829_v55 = vsel %vm1826_vm3, %v1828_v62, %v1824_v58  ;;  %v5631_v58 = vld [vmem:[#allocation15 + $0x110] sm:$0xff]  ;;  %7065 = vst [vmem:[#allocation64_spill] sm:$0xff] %v5635_v9 }
 0x5ce   :  { %7077 = vst [vmem:[#allocation35_spill] sm:$0xff] %v5681_v44 }
 0x5d2   :  { %v3839_v59 = vpop.eup %3838 }
 0x5d3   :  { %v1835_v22 = vmul.f32 %v3839_v59, %v1829_v55  ;;  %v5637_v59 = vld [vmem:[#allocation15 + $0xf0] sm:$0xff]  ;;  %v5641_v55 = vld [vmem:[#allocation15 + $0x80] sm:$0xff] }
 0x5d4   :  { %7066 = vst [vmem:[#allocation65_spill] sm:$0xff] %v5641_v55 }
 0x5d5   :  { %1857 = vmatmul.f32.vlgmr.msra.gmra.mxu0 %v1835_v22  ;;  %1877 = vmatmul.f32.vlgmr.msra.gmra.mxu1 %v1835_v22 }
 0x5d6   :  { %1897 = vmatmul.f32.vlgmr.msra.gmra.mxu2 %v1835_v22  ;;  %1917 = vmatmul.f32.vlgmr.msrb.gmra.mxu3 %v1835_v22 }
 0x5d7   :  { %2335 = vmatpush.msra.mxu0 %v5501_v28  ;;  %2355 = vmatpush.msra.mxu1 %v5503_v3 }
 0x5d8   :  { %2395 = vmatpush.msrb.mxu3 %v5511_v53  ;;  %2375 = vmatpush.msra.mxu2 %v5537_v13 }
 0x5d9   :  { %2336 = vmatpush.msra.mxu0 %v5505_v12  ;;  %2356 = vmatpush.msra.mxu1 %v5509_v29 }
 0x5da   :  { %2396 = vmatpush.msrb.mxu3 %v5518_v2  ;;  %2376 = vmatpush.msra.mxu2 %v5540_v33 }
 0x5db   :  { %2337 = vmatpush.msra.mxu0 %v5514_v11  ;;  %2357 = vmatpush.msra.mxu1 %v5516_v24 }
 0x5dc   :  { %2377 = vmatpush.msra.mxu2 %v5545_v61 }
 0x5dd   :  { %2087 = vmatmul.f32.vlgmr.msrb.gmra.mxu0 %v7049_v40  ;;  %2128 = vmatmul.f32.vlgmr.msrb.gmra.mxu1 %v7049_v40 }
 0x5de   :  { %2169 = vmatmul.f32.vlgmr.msrb.gmra.mxu2 %v7049_v40  ;;  %2210 = vmatmul.f32.vlgmr.msra.gmra.mxu3 %v7049_v40 }
 0x5df   :  { %2338 = vmatpush.msra.mxu0 %v5547_v16  ;;  %2358 = vmatpush.msra.mxu1 %v5549_v23 }
 0x5e0   :  { %2378 = vmatpush.msra.mxu2 %v5561_v8 }
 0x5e1   :  { %2359 = vmatpush.msra.mxu1 %v5557_v32 }
 0x5e2   :  { %2379 = vmatpush.msra.mxu2 %v5569_v27 }
 0x5e3   :  { %2360 = vmatpush.msra.mxu1 %v5579_v30 }
 0x5e4   :  { %2380 = vmatpush.msra.mxu2 %v5585_v48 }
 0x5e5   :  { %2090 = vmatmul.f32.gmra.mxu0 %v7050_v1  ;;  %2131 = vmatmul.f32.gmra.mxu1 %v7050_v1 }
 0x5e6   :  { %2172 = vmatmul.f32.gmra.mxu2 %v7050_v1  ;;  %2213 = vmatmul.f32.gmra.mxu3 %v7050_v1  ;;  %v5647_v1 = vld [vmem:[#allocation15 + $0x98] sm:$0xff] }
 0x5e7   :  { %2361 = vmatpush.msra.mxu1 %v5589_v34  ;;  %2381 = vmatpush.msra.mxu2 %v5597_v10  ;;  %7068 = vst [vmem:[#allocation69_spill] sm:$0xff] %v5647_v1 }
 0x5e9   :  { %2362 = vmatpush.msra.mxu1 %v5601_v6  ;;  %2382 = vmatpush.msra.mxu2 %v5631_v58 }
 0x5eb   :  { %2363 = vmatpush.msra.mxu1 %v5609_v35  ;;  %2383 = vmatpush.msra.mxu2 %v5637_v59 }
 0x5ed   :  { %2093 = vmatmul.f32.gmra.mxu0 %v7051_v18  ;;  %2134 = vmatmul.f32.gmra.mxu1 %v7051_v18 }
 0x5ee   :  { %2175 = vmatmul.f32.gmra.mxu2 %v7051_v18  ;;  %2216 = vmatmul.f32.gmra.mxu3 %v7051_v18  ;;  %v5649_v18 = vld [vmem:[#allocation15 + $0xd0] sm:$0xff] }
 0x5ef   :  { %2364 = vmatpush.msra.mxu1 %v5616_v41  ;;  %7069 = vst [vmem:[#allocation29_spill] sm:$0xff] %v5649_v18  ;;  %2384 = vmatpush.msra.mxu2 %v5649_v18 }
 0x5f1   :  { %2365 = vmatpush.msra.mxu1 %v5629_v57 }
 0x5f5   :  { %2096 = vmatmul.f32.gmra.mxu0 %v7056_v31  ;;  %2137 = vmatmul.f32.gmra.mxu1 %v7056_v31 }
 0x5f6   :  { %2178 = vmatmul.f32.gmra.mxu2 %v7056_v31  ;;  %2219 = vmatmul.f32.gmra.mxu3 %v7056_v31 }
 0x5fd   :  { %2099 = vmatmul.f32.gmra.mxu0 %v5375_v19  ;;  %2140 = vmatmul.f32.gmra.mxu1 %v5375_v19 }
 0x5fe   :  { %2181 = vmatmul.f32.gmra.mxu2 %v5375_v19  ;;  %2222 = vmatmul.f32.gmra.mxu3 %v5375_v19  ;;  %v5543_v19 = vld [vmem:[#allocation15 + $0x1b8] sm:$0xff] }
 0x5ff   :  { %7057 = vst [vmem:[#allocation58_spill] sm:$0xff] %v5543_v19  ;;  %2397 = vmatpush.msrb.mxu3 %v5543_v19 }
 0x601   :  { %2398 = vmatpush.msrb.mxu3 %v5559_v7 }
 0x603   :  { %2399 = vmatpush.msrb.mxu3 %v5567_v15 }
 0x605   :  { %2102 = vmatmul.f32.gmra.mxu0 %v5457_v47  ;;  %2143 = vmatmul.f32.gmra.mxu1 %v5457_v47 }
 0x606   :  { %2184 = vmatmul.f32.gmra.mxu2 %v5457_v47  ;;  %2225 = vmatmul.f32.gmra.mxu3 %v5457_v47  ;;  %v5552_v47 = vld [vmem:[#allocation15 + $0x160] sm:$0xff] }
 0x607   :  { %2339 = vmatpush.msra.mxu0 %v5552_v47  ;;  %2400 = vmatpush.msrb.mxu3 %v5581_v25 }
 0x609   :  { %2340 = vmatpush.msra.mxu0 %v5577_v21  ;;  %2401 = vmatpush.msrb.mxu3 %v5592_v46 }
 0x60b   :  { %2341 = vmatpush.msra.mxu0 %v5587_v42  ;;  %2402 = vmatpush.msrb.mxu3 %v5611_v38 }
 0x60d   :  { %2105 = vmatmul.f32.gmra.mxu0 %v1835_v22  ;;  %2146 = vmatmul.f32.gmra.mxu1 %v1835_v22 }
 0x60e   :  { %2187 = vmatmul.f32.gmra.mxu2 %v1835_v22  ;;  %2228 = vmatmul.f32.gmra.mxu3 %v1835_v22  ;;  %v5643_v22 = vld [vmem:[#allocation15 + $0x88] sm:$0xff] }
 0x60f   :  { %2342 = vmatpush.msra.mxu0 %v5599_v20  ;;  %2403 = vmatpush.msrb.mxu3 %v5618_v43  ;;  %7067 = vst [vmem:[#allocation66_spill] sm:$0xff] %v5643_v22 }
 0x610   :  { %2366 = vmatpush.msra.mxu1 %v5643_v22 }
 0x611   :  { %2343 = vmatpush.msra.mxu0 %v5607_v45  ;;  %2404 = vmatpush.msrb.mxu3 %v5624_v50 }
 0x613   :  { %2344 = vmatpush.msra.mxu0 %v5614_v39  ;;  %2405 = vmatpush.msrb.mxu3 %v5635_v9 }
 0x615   :  { %2345 = vmatpush.msra.mxu0 %v5627_v54  ;;  %2406 = vmatpush.msrb.mxu3 %v5647_v1  ;;  %v5705_v1 = vld [vmem:[#allocation15 + $0x18] sm:$0xff] }
 0x616   :  { %7086 = vst [vmem:[#allocation49_spill] sm:$0xff] %v5705_v1 }
 0x617   :  { %2346 = vmatpush.msra.mxu0 %v5641_v55 }
 0x619   :  { %2347 = vmatpush.msra.mxu0 %v5653_v5 }
 0x652   :  { %v1858_v56 = vpop.f32.mrf.mxu0  ;;  %v1878_v36 = vpop.f32.mrf.mxu1 }
 0x653   :  { %v1921_v4 = vadd.f32 %v1858_v56, %v552_v14  ;;  %v1922_v26 = vadd.f32 %v1878_v36, %v593_v37  ;;  %v5655_v14 = vld [vmem:[#allocation15 + $0x68] sm:$0xff]  ;;  %v5661_v56 = vld [vmem:[#allocation15 + $0xb0] sm:$0xff]  ;;  %v5663_v36 = vld [vmem:[#allocation15 + $0x78] sm:$0xff] }
 0x654   :  { %7071 = vst [vmem:[#allocation28_spill] sm:$0xff] %v5655_v14  ;;  %2367 = vmatpush.msra.mxu1 %v5655_v14  ;;  %2385 = vmatpush.msra.mxu2 %v5661_v56  ;;  %v7083_v14 = vld [vmem:[#allocation82_spill] sm:$0xff] }
 0x655   :  { %v3668_v0 = vmul.f32 -1.442695, %v1921_v4  ;;  %v3669_v49 = vmul.f32 -1.442695, %v1922_v26  ;;  %7072 = vst [vmem:[#allocation39_spill] sm:$0xff] %v5661_v56  ;;  %v5669_v26 = vld [vmem:[#allocation15 + $0x40] sm:$0xff]  ;;  %2407 = vmatpush.msrb.mxu3 %v5663_v36  ;;  %v634_v5 = vadd.f32 %v7083_v14, %v7043_v63 }
 0x656   :  { %7073 = vst [vmem:[#allocation32_spill] sm:$0xff] %v5663_v36  ;;  %2348 = vmatpush.msra.mxu0 %v5669_v26  ;;  %v5713_v63 = vld [vmem:[#allocation15 + $0x30] sm:$0xff] }
 0x657   :  { %3840 = vpow2.f32 %v3668_v0  ;;  %7074 = vst [vmem:[#allocation30_spill] sm:$0xff] %v5669_v26  ;;  %v5671_v0 = vld [vmem:[#allocation15 + $0x48] sm:$0xff]  ;;  %v5703_v26 = vld [vmem:[#allocation15 + $0x38] sm:$0xff] }
 0x658   :  { %3842 = vpow2.f32 %v3669_v49  ;;  %7075 = vst [vmem:[#allocation31_spill] sm:$0xff] %v5671_v0  ;;  %v5676_v49 = vld [vmem:[#allocation15 + $0x90] sm:$0xff]  ;;  %2368 = vmatpush.msra.mxu1 %v5671_v0  ;;  %2349 = vmatpush.msra.mxu0 %v5681_v44 }
 0x659   :  { %v1918_v52 = vpop.f32.mrf.mxu3  ;;  %7076 = vst [vmem:[#allocation41_spill] sm:$0xff] %v5676_v49  ;;  %2386 = vmatpush.msra.mxu2 %v5676_v49  ;;  %v5701_v0 = vld [vmem:[#allocation15 + $0x50] sm:$0xff] }
 0x65a   :  { %v1924_v62 = vadd.f32 %v1918_v52, %v675_v17  ;;  %v5683_v17 = vld [vmem:[#allocation15 + $0x28] sm:$0xff]  ;;  %v5685_v52 = vld [vmem:[#allocation15 + $0x58] sm:$0xff]  ;;  %7084 = vst [vmem:[#allocation37_spill] sm:$0xff] %v5701_v0 }
 0x65b   :  { %7078 = vst [vmem:[#allocation33_spill] sm:$0xff] %v5683_v17  ;;  %2408 = vmatpush.msrb.mxu3 %v5685_v52  ;;  %2369 = vmatpush.msra.mxu1 %v5683_v17 }
 0x65c   :  { %v3670_v40 = vmul.f32 -1.442695, %v1924_v62  ;;  %7079 = vst [vmem:[#allocation34_spill] sm:$0xff] %v5685_v52  ;;  %v5689_v62 = vld [vmem:[#allocation15 + $0x70] sm:$0xff] }
 0x65d   :  { %v3841_v31 = vpop.eup %3840  ;;  %7080 = vst [vmem:[#allocation44_spill] sm:$0xff] %v5689_v62  ;;  %2387 = vmatpush.msra.mxu2 %v5689_v62  ;;  %2409 = vmatpush.msrb.mxu3 %v5703_v26 }
 0x65e   :  { %v3843_v60 = vpop.eup %3842  ;;  %v5657_v37 = vadd.f32 1.0, %v3841_v31  ;;  %3844 = vpow2.f32 %v3670_v40  ;;  %v1898_v40 = vpop.f32.mrf.mxu2  ;;  %v5693_v31 = vld [vmem:[#allocation15] sm:$0xff]  ;;  %7085 = vst [vmem:[#allocation38_spill] sm:$0xff] %v5703_v26  ;;  %v5720_v26 = vld [vmem:[#allocation15 + $0x10] sm:$0xff] }
 0x65f   :  { %v5665_v4 = vadd.f32 1.0, %v3843_v60  ;;  %7081 = vst [vmem:[#allocation51_spill] sm:$0xff] %v5693_v31  ;;  %v5695_v60 = vld [vmem:[#allocation15 + $0x8] sm:$0xff]  ;;  %v1923_v22 = vadd.f32 %v1898_v40, %v634_v5  ;;  %2350 = vmatpush.msra.mxu0 %v5693_v31  ;;  %2388 = vmatpush.msra.mxu2 %v5701_v0 }
 0x660   :  { %3846 = vrcp.f32 %v5657_v37  ;;  %7082 = vst [vmem:[#allocation40_spill] sm:$0xff] %v5695_v60  ;;  %2370 = vmatpush.msra.mxu1 %v5695_v60  ;;  %2410 = vmatpush.msrb.mxu3 %v5705_v1  ;;  %v1940_v60 = vand.u32 2147483648, %v5657_v37  ;;  %vm1934_vm6 = vweird.f32 %v5657_v37 }
 0x661   :  { %3848 = vrcp.f32 %v5665_v4  ;;  %7087 = vst [vmem:[#allocation46_spill] sm:$0xff] %v5713_v63  ;;  %2487 = vmatpush.msrb.mxu0 %v5501_v28  ;;  %2389 = vmatpush.msra.mxu2 %v5713_v63  ;;  %v1959_v1 = vand.u32 2147483648, %v5665_v4  ;;  %v1938_v28 = vand.u32 2147483647, %v5657_v37  ;;  %vm1953_vm7 = vweird.f32 %v5665_v4 }
 0x662   :  { %7088 = vst [vmem:[#allocation47_spill] sm:$0xff] %v5720_v26  ;;  %2507 = vmatpush.msrb.mxu1 %v5503_v3  ;;  %2547 = vmatpush.msra.mxu3 %v5511_v53 }
 0x663   :  { %2488 = vmatpush.msrb.mxu0 %v5505_v12  ;;  %2390 = vmatpush.msra.mxu2 %v5720_v26  ;;  %vm1939_vm10 = vcmp.eq.f32.partialorder %v1938_v28, 8.507059e+37 }
 0x664   :  { %v3845_v36 = vpop.eup %3844  ;;  %2508 = vmatpush.msrb.mxu1 %v5509_v29  ;;  %2548 = vmatpush.msra.mxu3 %v5518_v2 }
 0x665   :  { %v5707_v49 = vadd.f32 1.0, %v3845_v36  ;;  %2527 = vmatpush.msrb.mxu2 %v5537_v13  ;;  %2489 = vmatpush.msrb.mxu0 %v5514_v11 }
 0x666   :  { %v3847_v52 = vpop.eup %3846  ;;  %2509 = vmatpush.msrb.mxu1 %v5516_v24  ;;  %2549 = vmatpush.msra.mxu3 %v5543_v19 }
 0x667   :  { %v3849_v14 = vpop.eup %3848  ;;  %v1930_v17 = vmul.f32 %v3847_v52, %v5657_v37  ;;  %3850 = vrcp.f32 %v5707_v49  ;;  %vm1935_vm4 = vweird.f32 %v3847_v52  ;;  %2528 = vmatpush.msrb.mxu2 %v5540_v33  ;;  %2490 = vmatpush.msrb.mxu0 %v5547_v16  ;;  %v1960_v37 = vor.u32 1.1754944e-38, %v1959_v1 }
 0x668   :  { %v1949_v36 = vmul.f32 %v3849_v14, %v5665_v4  ;;  %3852 = vtanh.f32 %v1923_v22  ;;  %vm1954_vm5 = vweird.f32 %v3849_v14  ;;  %vm1936_vm8 = vmor %vm1934_vm6, %vm1935_vm4  ;;  %2510 = vmatpush.msrb.mxu1 %v5549_v23  ;;  %2550 = vmatpush.msra.mxu3 %v5559_v7  ;;  %vm1973_vm13 = vweird.f32 %v5707_v49 }
 0x669   :  { %v1931_v5 = vsub.f32 1.0, %v1930_v17  ;;  %vm1955_vm9 = vmor %vm1953_vm7, %vm1954_vm5  ;;  %2529 = vmatpush.msrb.mxu2 %v5545_v61  ;;  %2491 = vmatpush.msrb.mxu0 %v5552_v47 }
 0x66a   :  { %v1950_v40 = vsub.f32 1.0, %v1949_v36  ;;  %v1957_v36 = vand.u32 2147483647, %v5665_v4  ;;  %2511 = vmatpush.msrb.mxu1 %v5557_v32  ;;  %2551 = vmatpush.msra.mxu3 %v5567_v15 }
 0x66b   :  { %v1932_v31 = vmul.f32 %v3847_v52, %v1931_v5  ;;  %v1941_v5 = vor.u32 1.1754944e-38, %v1940_v60  ;;  %2530 = vmatpush.msrb.mxu2 %v5561_v8  ;;  %2492 = vmatpush.msrb.mxu0 %v5577_v21 }
 0x66c   :  { %v1951_v17 = vmul.f32 %v3849_v14, %v1950_v40  ;;  %vm1958_vm11 = vcmp.eq.f32.partialorder %v1957_v36, 8.507059e+37  ;;  %2512 = vmatpush.msrb.mxu1 %v5579_v30  ;;  %2552 = vmatpush.msra.mxu3 %v5581_v25  ;;  %v7089_v36 = vld [vmem:[#allocation66_spill] sm:$0xff] }
 0x66d   :  { %v5736_v22 = vpop.eup %3850  ;;  %v1933_v29 = vadd.f32 %v3847_v52, %v1932_v31  ;;  %2531 = vmatpush.msrb.mxu2 %v5569_v27  ;;  %2493 = vmatpush.msrb.mxu0 %v5587_v42 }
 0x66e   :  { %v1952_v40 = vadd.f32 %v3849_v14, %v1951_v17  ;;  %v1969_v2 = vmul.f32 %v5736_v22, %v5707_v49  ;;  %v3853_v4 = vpop.eup %3852  ;;  %vm1974_vm12 = vweird.f32 %v5736_v22  ;;  %2513 = vmatpush.msrb.mxu1 %v5589_v34  ;;  %2553 = vmatpush.msra.mxu3 %v5592_v46 }
 0x66f   :  { %v1937_v31 = vsel %vm1936_vm8, %v3847_v52, %v1933_v29  ;;  %2532 = vmatpush.msrb.mxu2 %v5585_v48  ;;  %2494 = vmatpush.msrb.mxu0 %v5599_v20  ;;  %vm1975_vm14 = vmor %vm1973_vm13, %vm1974_vm12 }
 0x670   :  { %v1942_v19 = vsel %vm1939_vm10, %v1941_v5, %v1937_v31  ;;  %v1956_v60 = vsel %vm1955_vm9, %v3849_v14, %v1952_v40  ;;  %v1970_v17 = vsub.f32 1.0, %v1969_v2  ;;  %2514 = vmatpush.msrb.mxu1 %v5601_v6  ;;  %2554 = vmatpush.msra.mxu3 %v5611_v38  ;;  %v7091_v5 = vld [vmem:[#allocation41_spill] sm:$0xff]  ;;  %v7092_v40 = vld [vmem:[#allocation27_spill] sm:$0xff]  ;;  %v7094_v31 = vld [vmem:[#allocation32_spill] sm:$0xff] }
 0x671   :  { %v1961_v24 = vsel %vm1958_vm11, %v1960_v37, %v1956_v60  ;;  %v1984_v16 = vmul.f32 %v3853_v4, %v1942_v19  ;;  %2533 = vmatpush.msrb.mxu2 %v5597_v10  ;;  %2495 = vmatpush.msrb.mxu0 %v5607_v45  ;;  %v7093_v37 = vld [vmem:[#allocation28_spill] sm:$0xff]  ;;  %v7095_v4 = vld [vmem:[#allocation30_spill] sm:$0xff]  ;;  %v7096_v60 = vld [vmem:[#allocation31_spill] sm:$0xff] }
 0x672   :  { %v1983_v28 = vmul.f32 %v1961_v24, %v5486_v51  ;;  %v1971_v29 = vmul.f32 %v5736_v22, %v1970_v17  ;;  %v1979_v51 = vand.u32 2147483648, %v5707_v49  ;;  %v1977_v24 = vand.u32 2147483647, %v5707_v49  ;;  %2515 = vmatpush.msrb.mxu1 %v5609_v35  ;;  %2555 = vmatpush.msra.mxu3 %v5618_v43  ;;  %v7097_v17 = vld [vmem:[#allocation34_spill] sm:$0xff] }
 0x673   :  { %2534 = vmatpush.msrb.mxu2 %v5631_v58  ;;  %2496 = vmatpush.msrb.mxu0 %v5614_v39 }
 0x674   :  { %v1985_v2 = vadd.f32 %v1984_v16, %v1983_v28  ;;  %v1972_v19 = vadd.f32 %v5736_v22, %v1971_v29  ;;  %v1980_v1 = vor.u32 1.1754944e-38, %v1979_v51  ;;  %vm1978_vm15 = vcmp.eq.f32.partialorder %v1977_v24, 8.507059e+37  ;;  %2516 = vmatpush.msrb.mxu1 %v5616_v41  ;;  %2556 = vmatpush.msra.mxu3 %v5624_v50  ;;  %v7099_v29 = vld [vmem:[#allocation33_spill] sm:$0xff]  ;;  %v7102_v51 = vld [vmem:[#allocation40_spill] sm:$0xff] }
 0x675   :  { %2535 = vmatpush.msrb.mxu2 %v5637_v59  ;;  %2497 = vmatpush.msrb.mxu0 %v5627_v54  ;;  %v7098_v28 = vmov 0.0   ;;  %v7103_v24 = vld [vmem:[#allocation49_spill] sm:$0xff] }
 0x676   :  { %3854 = vtanh.f32 %v1985_v2  ;;  %v1976_v16 = vsel %vm1975_vm14, %v5736_v22, %v1972_v19  ;;  %2517 = vmatpush.msrb.mxu1 %v5629_v57  ;;  %2557 = vmatpush.msra.mxu3 %v5635_v9  ;;  %v7090_v22 = vld [vmem:[#allocation69_spill] sm:$0xff]  ;;  %v7100_v2 = vld [vmem:[#allocation38_spill] sm:$0xff]  ;;  %v7101_v19 = vld [vmem:[#allocation51_spill] sm:$0xff] }
 0x677   :  { %v1981_v52 = vsel %vm1978_vm15, %v1980_v1, %v1976_v16  ;;  %2536 = vmatpush.msrb.mxu2 %v5649_v18  ;;  %2498 = vmatpush.msrb.mxu0 %v5641_v55  ;;  %v7104_v16 = vld [vmem:[#allocation54_spill] sm:$0xff]  ;;  %v7105_v1 = vld [vmem:[#allocation56_spill] sm:$0xff] }
 0x678   :  { %2518 = vmatpush.msrb.mxu1 %v7089_v36  ;;  %2558 = vmatpush.msra.mxu3 %v7090_v22 }
 0x679   :  { %2537 = vmatpush.msrb.mxu2 %v5661_v56  ;;  %2499 = vmatpush.msrb.mxu0 %v7092_v40 }
 0x67a   :  { %2519 = vmatpush.msrb.mxu1 %v7093_v37  ;;  %2559 = vmatpush.msra.mxu3 %v7094_v31 }
 0x67b   :  { %2538 = vmatpush.msrb.mxu2 %v7091_v5  ;;  %2500 = vmatpush.msrb.mxu0 %v7095_v4 }
 0x67c   :  { %v3855_v49 = vpop.eup %3854  ;;  %2520 = vmatpush.msrb.mxu1 %v7096_v60  ;;  %2560 = vmatpush.msra.mxu3 %v7097_v17 }
 0x67d   :  { %v1987_v14 = vmul.f32 %v3855_v49, %v1981_v52  ;;  %2539 = vmatpush.msrb.mxu2 %v5689_v62  ;;  %2501 = vmatpush.msrb.mxu0 %v5681_v44  ;;  %v7106_v49 = vld [vmem:[#allocation59_spill] sm:$0xff]  ;;  %v7107_v52 = vld [vmem:[#allocation57_spill] sm:$0xff] }
 0x67e   :  { %2521 = vmatpush.msrb.mxu1 %v7099_v29  ;;  %2561 = vmatpush.msra.mxu3 %v7100_v2 }
 0x67f   :  { %2108 = vmatmul.f32.gmra.mxu0 %v1987_v14  ;;  %2149 = vmatmul.f32.gmra.mxu1 %v1987_v14 }
 0x680   :  { %2190 = vmatmul.f32.gmra.mxu2 %v1987_v14  ;;  %2231 = vmatmul.f32.gmra.mxu3 %v1987_v14  ;;  %v7108_v14 = vld [vmem:[#allocation58_spill] sm:$0xff] }
 0x681   :  { %2540 = vmatpush.msrb.mxu2 %v5701_v0  ;;  %2502 = vmatpush.msrb.mxu0 %v7101_v19 }
 0x682   :  { %2522 = vmatpush.msrb.mxu1 %v7102_v51  ;;  %2562 = vmatpush.msra.mxu3 %v7103_v24 }
 0x683   :  { %2541 = vmatpush.msrb.mxu2 %v5713_v63 }
 0x685   :  { %2542 = vmatpush.msrb.mxu2 %v5720_v26 }
 0x687   :  { %2351 = vmatmul.f32.vlgmr.msra.gmra.mxu0 %v7098_v28  ;;  %2371 = vmatmul.f32.vlgmr.msra.gmra.mxu1 %v7098_v28 }
 0x688   :  { %2391 = vmatmul.f32.vlgmr.msra.gmra.mxu2 %v7098_v28  ;;  %2411 = vmatmul.f32.vlgmr.msrb.gmra.mxu3 %v7098_v28  ;;  %v7109_v28 = vld [vmem:[#allocation60_spill] sm:$0xff] }
 0x689   :  { %2639 = vmatpush.msra.mxu0 %v7104_v16  ;;  %2659 = vmatpush.msra.mxu1 %v5503_v3 }
 0x68a   :  { %2679 = vmatpush.msra.mxu2 %v5537_v13  ;;  %2699 = vmatpush.msrb.mxu3 %v5511_v53 }
 0x68b   :  { %2640 = vmatpush.msra.mxu0 %v5505_v12  ;;  %2660 = vmatpush.msra.mxu1 %v7105_v1 }
 0x68c   :  { %2680 = vmatpush.msra.mxu2 %v5540_v33  ;;  %2700 = vmatpush.msrb.mxu3 %v7106_v49 }
 0x68d   :  { %2641 = vmatpush.msra.mxu0 %v5514_v11  ;;  %2661 = vmatpush.msra.mxu1 %v7107_v52 }
 0x68e   :  { %2681 = vmatpush.msra.mxu2 %v5545_v61  ;;  %2701 = vmatpush.msrb.mxu3 %v7108_v14 }
 0x68f   :  { %2642 = vmatpush.msra.mxu0 %v7109_v28  ;;  %2662 = vmatpush.msra.mxu1 %v5549_v23 }
 0x690   :  { %2682 = vmatpush.msra.mxu2 %v5561_v8  ;;  %2702 = vmatpush.msrb.mxu3 %v5559_v7 }
 0x691   :  { %2643 = vmatpush.msra.mxu0 %v5552_v47  ;;  %2663 = vmatpush.msra.mxu1 %v5557_v32 }
 0x692   :  { %2683 = vmatpush.msra.mxu2 %v5569_v27  ;;  %2703 = vmatpush.msrb.mxu3 %v5567_v15 }
 0x693   :  { %2644 = vmatpush.msra.mxu0 %v5577_v21  ;;  %2664 = vmatpush.msra.mxu1 %v5579_v30 }
 0x694   :  { %2684 = vmatpush.msra.mxu2 %v5585_v48  ;;  %2704 = vmatpush.msrb.mxu3 %v5581_v25 }
 0x695   :  { %2645 = vmatpush.msra.mxu0 %v5587_v42  ;;  %2665 = vmatpush.msra.mxu1 %v5589_v34 }
 0x696   :  { %2685 = vmatpush.msra.mxu2 %v5597_v10  ;;  %2705 = vmatpush.msrb.mxu3 %v5592_v46 }
 0x697   :  { %2646 = vmatpush.msra.mxu0 %v5599_v20  ;;  %2666 = vmatpush.msra.mxu1 %v5601_v6 }
 0x698   :  { %2686 = vmatpush.msra.mxu2 %v5631_v58  ;;  %2706 = vmatpush.msrb.mxu3 %v5611_v38 }
 0x699   :  { %2647 = vmatpush.msra.mxu0 %v5607_v45  ;;  %2667 = vmatpush.msra.mxu1 %v5609_v35 }
 0x69a   :  { %2687 = vmatpush.msra.mxu2 %v5637_v59  ;;  %2707 = vmatpush.msrb.mxu3 %v5618_v43 }
 0x69b   :  { %2648 = vmatpush.msra.mxu0 %v5614_v39  ;;  %2668 = vmatpush.msra.mxu1 %v5616_v41 }
 0x69c   :  { %2688 = vmatpush.msra.mxu2 %v5649_v18  ;;  %2708 = vmatpush.msrb.mxu3 %v5624_v50 }
 0x69d   :  { %2649 = vmatpush.msra.mxu0 %v5627_v54  ;;  %2669 = vmatpush.msra.mxu1 %v5629_v57 }
 0x69e   :  { %2689 = vmatpush.msra.mxu2 %v5661_v56  ;;  %2709 = vmatpush.msrb.mxu3 %v5635_v9 }
 0x69f   :  { %2650 = vmatpush.msra.mxu0 %v5641_v55  ;;  %2670 = vmatpush.msra.mxu1 %v7089_v36 }
 0x6a0   :  { %2690 = vmatpush.msra.mxu2 %v7091_v5  ;;  %2710 = vmatpush.msrb.mxu3 %v7090_v22 }
 0x6a1   :  { %2651 = vmatpush.msra.mxu0 %v7092_v40  ;;  %2671 = vmatpush.msra.mxu1 %v7093_v37 }
 0x6a2   :  { %2691 = vmatpush.msra.mxu2 %v5689_v62  ;;  %2711 = vmatpush.msrb.mxu3 %v7094_v31 }
 0x6a3   :  { %2652 = vmatpush.msra.mxu0 %v7095_v4  ;;  %2672 = vmatpush.msra.mxu1 %v7096_v60  ;;  %v2088_v60 = vpop.f32.mrf.mxu0  ;;  %v2211_v4 = vpop.f32.mrf.mxu3 }
 0x6a4   :  { %2692 = vmatpush.msra.mxu2 %v5701_v0  ;;  %2712 = vmatpush.msrb.mxu3 %v7097_v17  ;;  %v2129_v0 = vpop.f32.mrf.mxu1 }
 0x6a5   :  { %2653 = vmatpush.msra.mxu0 %v5681_v44  ;;  %2673 = vmatpush.msra.mxu1 %v7099_v29  ;;  %v2170_v29 = vpop.f32.mrf.mxu2 }
 0x6a6   :  { %2693 = vmatpush.msra.mxu2 %v5713_v63  ;;  %2713 = vmatpush.msrb.mxu3 %v7100_v2 }
 0x6a7   :  { %2654 = vmatpush.msra.mxu0 %v7101_v19  ;;  %2674 = vmatpush.msra.mxu1 %v7102_v51 }
 0x6a8   :  { %2694 = vmatpush.msra.mxu2 %v5720_v26  ;;  %2714 = vmatpush.msrb.mxu3 %v7103_v24 }
 0x6ab   :  { %v5876_v17 = vpop.f32.mrf.mxu0  ;;  %v5880_v31 = vpop.f32.mrf.mxu3 }
 0x6ac   :  { %7110 = vst [vmem:[#allocation45_spill] sm:$0xff] %v5876_v17  ;;  %v5878_v44 = vpop.f32.mrf.mxu1 }
 0x6ad   :  { %7111 = vst [vmem:[#allocation48_spill] sm:$0xff] %v5878_v44  ;;  %v5886_v19 = vpop.f32.mrf.mxu2 }
 0x6ae   :  { %7112 = vst [vmem:[#allocation52_spill] sm:$0xff] %v5880_v31 }
 0x6af   :  { %7115 = vst [vmem:[#allocation26_spill] sm:$0xff] %v5886_v19 }
 0x6b3   :  { %v5882_v63 = vpop.f32.mrf.mxu0  ;;  %v5888_v51 = vpop.f32.mrf.mxu3 }
 0x6b4   :  { %7113 = vst [vmem:[#allocation42_spill] sm:$0xff] %v5882_v63  ;;  %v5884_v2 = vpop.f32.mrf.mxu1 }
 0x6b5   :  { %7114 = vst [vmem:[#allocation50_spill] sm:$0xff] %v5884_v2  ;;  %v5894_v62 = vpop.f32.mrf.mxu2 }
 0x6b6   :  { %7116 = vst [vmem:[#allocation53_spill] sm:$0xff] %v5888_v51 }
 0x6b7   :  { %7119 = vst [vmem:[#allocation78_spill] sm:$0xff] %v5894_v62 }
 0x6bb   :  { %v5890_v26 = vpop.f32.mrf.mxu0  ;;  %v5896_v17 = vpop.f32.mrf.mxu3 }
 0x6bc   :  { %7117 = vst [vmem:[#allocation77_spill] sm:$0xff] %v5890_v26  ;;  %v5892_v24 = vpop.f32.mrf.mxu1 }
 0x6bd   :  { %7118 = vst [vmem:[#allocation67_spill] sm:$0xff] %v5892_v24  ;;  %v5902_v31 = vpop.f32.mrf.mxu2 }
 0x6be   :  { %7120 = vst [vmem:[#allocation68_spill] sm:$0xff] %v5896_v17 }
 0x6bf   :  { %7123 = vst [vmem:[#allocation83_spill] sm:$0xff] %v5902_v31 }
 0x6c3   :  { %v5898_v44 = vpop.f32.mrf.mxu0  ;;  %v5904_v63 = vpop.f32.mrf.mxu3 }
 0x6c4   :  { %7121 = vst [vmem:[#allocation81_spill] sm:$0xff] %v5898_v44  ;;  %v5900_v37 = vpop.f32.mrf.mxu1 }
 0x6c5   :  { %7122 = vst [vmem:[#allocation70_spill] sm:$0xff] %v5900_v37  ;;  %v5910_v51 = vpop.f32.mrf.mxu2  ;;  %v2061_v37 = vld [vmem:[#allocation16] sm:$0xf] }
 0x6c6   :  { %7124 = vst [vmem:[#allocation73_spill] sm:$0xff] %v5904_v63  ;;  %v5936_v5 = vperm.slane %v2061_v37, 3 }
 0x6c7   :  { %7127 = vst [vmem:[#allocation74_spill] sm:$0xff] %v5910_v51 }
 0x6c8   :  { %7139 = vst [vmem:[#allocation59_spill] sm:$0xff] %v5936_v5  ;;  %v2212_v36 = vadd.f32 %v2211_v4, %v5936_v5 }
 0x6cb   :  { %v5906_v2 = vpop.f32.mrf.mxu0  ;;  %v5912_v26 = vpop.f32.mrf.mxu3 }
 0x6cc   :  { %7125 = vst [vmem:[#allocation71_spill] sm:$0xff] %v5906_v2  ;;  %v5908_v19 = vpop.f32.mrf.mxu1  ;;  %v5926_v2 = vperm.slane %v2061_v37, 0 }
 0x6cd   :  { %7126 = vst [vmem:[#allocation72_spill] sm:$0xff] %v5908_v19  ;;  %v5918_v17 = vpop.f32.mrf.mxu2  ;;  %v5928_v19 = vperm.slane %v2061_v37, 1 }
 0x6ce   :  { %7128 = vst [vmem:[#allocation79_spill] sm:$0xff] %v5912_v26  ;;  %v2089_v51 = vadd.f32 %v2088_v60, %v5926_v2 }
 0x6cf   :  { %7131 = vst [vmem:[#allocation43_spill] sm:$0xff] %v5918_v17  ;;  %v2130_v26 = vadd.f32 %v2129_v0, %v5928_v19 }
 0x6d0   :  { %7135 = vst [vmem:[#allocation80_spill] sm:$0xff] %v5926_v2 }
 0x6d1   :  { %7136 = vst [vmem:[#allocation82_spill] sm:$0xff] %v5928_v19 }
 0x6d3   :  { %v5914_v24 = vpop.f32.mrf.mxu0  ;;  %v5920_v44 = vpop.f32.mrf.mxu3 }
 0x6d4   :  { %7129 = vst [vmem:[#allocation84_spill] sm:$0xff] %v5914_v24  ;;  %v5916_v62 = vpop.f32.mrf.mxu1 }
 0x6d5   :  { %7130 = vst [vmem:[#allocation36_spill] sm:$0xff] %v5916_v62  ;;  %v5932_v24 = vpop.f32.mrf.mxu2 }
 0x6d6   :  { %7132 = vst [vmem:[#allocation55_spill] sm:$0xff] %v5920_v44 }
 0x6d7   :  { %7137 = vst [vmem:[#allocation54_spill] sm:$0xff] %v5932_v24 }
 0x6fc   :  { %v5922_v31 = vpop.f32.mrf.mxu0  ;;  %v5924_v63 = vpop.f32.mrf.mxu1 }
 0x6fd   :  { %7133 = vst [vmem:[#allocation75_spill] sm:$0xff] %v5922_v31 }
 0x6fe   :  { %7134 = vst [vmem:[#allocation76_spill] sm:$0xff] %v5924_v63 }
 0x703   :  { %v5934_v62 = vpop.f32.mrf.mxu3  ;;  %v5939_v55 = vpop.f32.mrf.mxu2 }
 0x704   :  { %7138 = vst [vmem:[#allocation56_spill] sm:$0xff] %v5934_v62  ;;  %v2352_v17 = vpop.f32.mrf.mxu0  ;;  %v2372_v40 = vpop.f32.mrf.mxu1 }
 0x705   :  { %v2415_v44 = vadd.f32 %v2352_v17, %v2089_v51  ;;  %v2416_v22 = vadd.f32 %v2372_v40, %v2130_v26  ;;  %7140 = vst [vmem:[#allocation57_spill] sm:$0xff] %v5939_v55  ;;  %v5941_v17 = vperm.slane %v2061_v37, 2 }
 0x707   :  { %v3671_v31 = vmul.f32 -1.442695, %v2415_v44  ;;  %v3672_v63 = vmul.f32 -1.442695, %v2416_v22  ;;  %7141 = vst [vmem:[#allocation58_spill] sm:$0xff] %v5941_v17  ;;  %v2171_v22 = vadd.f32 %v2170_v29, %v5941_v17 }
 0x709   :  { %3856 = vpow2.f32 %v3671_v31 }
 0x70a   :  { %3858 = vpow2.f32 %v3672_v63 }
 0x70b   :  { %v2412_v60 = vpop.f32.mrf.mxu3  ;;  %v2392_v26 = vpop.f32.mrf.mxu2 }
 0x70c   :  { %v2418_v0 = vadd.f32 %v2412_v60, %v2212_v36  ;;  %v2417_v31 = vadd.f32 %v2392_v26, %v2171_v22 }
 0x70e   :  { %v3673_v19 = vmul.f32 -1.442695, %v2418_v0 }
 0x70f   :  { %v3857_v24 = vpop.eup %3856 }
 0x710   :  { %v3859_v2 = vpop.eup %3858  ;;  %v2422_v62 = vadd.f32 1.0, %v3857_v24  ;;  %3860 = vpow2.f32 %v3673_v19 }
 0x711   :  { %v2441_v9 = vadd.f32 1.0, %v3859_v2 }
 0x712   :  { %3862 = vrcp.f32 %v2422_v62  ;;  %v2434_v24 = vand.u32 2147483648, %v2422_v62  ;;  %v2432_v19 = vand.u32 2147483647, %v2422_v62  ;;  %vm2428_vm2 = vweird.f32 %v2422_v62 }
 0x713   :  { %3864 = vrcp.f32 %v2441_v9  ;;  %v2453_v2 = vand.u32 2147483648, %v2441_v9  ;;  %v2451_v5 = vand.u32 2147483647, %v2441_v9  ;;  %vm2447_vm3 = vweird.f32 %v2441_v9 }
 0x714   :  { %v2435_v26 = vor.u32 1.1754944e-38, %v2434_v24  ;;  %vm2433_vm5 = vcmp.eq.f32.partialorder %v2432_v19, 8.507059e+37 }
 0x715   :  { %v2454_v17 = vor.u32 1.1754944e-38, %v2453_v2  ;;  %vm2452_vm7 = vcmp.eq.f32.partialorder %v2451_v5, 8.507059e+37 }
 0x716   :  { %v3861_v44 = vpop.eup %3860 }
 0x717   :  { %v2461_v40 = vadd.f32 1.0, %v3861_v44 }
 0x718   :  { %v3863_v63 = vpop.eup %3862 }
 0x719   :  { %v3865_v4 = vpop.eup %3864  ;;  %v2424_v51 = vmul.f32 %v3863_v63, %v2422_v62  ;;  %3866 = vrcp.f32 %v2461_v40  ;;  %vm2429_vm0 = vweird.f32 %v3863_v63  ;;  %vm2467_vm9 = vweird.f32 %v2461_v40 }
 0x71a   :  { %v2443_v36 = vmul.f32 %v3865_v4, %v2441_v9  ;;  %3868 = vtanh.f32 %v2417_v31  ;;  %vm2448_vm1 = vweird.f32 %v3865_v4  ;;  %vm2430_vm4 = vmor %vm2428_vm2, %vm2429_vm0  ;;  %v2471_v62 = vand.u32 2147483647, %v2461_v40 }
 0x71b   :  { %v2425_v60 = vsub.f32 1.0, %v2424_v51  ;;  %vm2449_vm6 = vmor %vm2447_vm3, %vm2448_vm1 }
 0x71c   :  { %v2444_v0 = vsub.f32 1.0, %v2443_v36  ;;  %vm2472_vm11 = vcmp.eq.f32.partialorder %v2471_v62, 8.507059e+37 }
 0x71d   :  { %v2426_v37 = vmul.f32 %v3863_v63, %v2425_v60 }
 0x71e   :  { %v2445_v55 = vmul.f32 %v3865_v4, %v2444_v0 }
 0x71f   :  { %v3867_v56 = vpop.eup %3866  ;;  %v2427_v29 = vadd.f32 %v3863_v63, %v2426_v37 }
 0x720   :  { %v2446_v44 = vadd.f32 %v3865_v4, %v2445_v55  ;;  %v2463_v22 = vmul.f32 %v3867_v56, %v2461_v40  ;;  %v3869_v31 = vpop.eup %3868  ;;  %vm2468_vm8 = vweird.f32 %v3867_v56  ;;  %v2473_v55 = vand.u32 2147483648, %v2461_v40 }
 0x721   :  { %v2431_v51 = vsel %vm2430_vm4, %v3863_v63, %v2427_v29  ;;  %vm2469_vm10 = vmor %vm2467_vm9, %vm2468_vm8 }
 0x722   :  { %v2436_v36 = vsel %vm2433_vm5, %v2435_v26, %v2431_v51  ;;  %v2450_v60 = vsel %vm2449_vm6, %v3865_v4, %v2446_v44  ;;  %v2464_v57 = vsub.f32 1.0, %v2463_v22  ;;  %v2474_v24 = vor.u32 1.1754944e-38, %v2473_v55  ;;  %v7175_v51 = vld [vmem:[#allocation58_spill] sm:$0xff] }
 0x723   :  { %v2455_v0 = vsel %vm2452_vm7, %v2454_v17, %v2450_v60  ;;  %v2478_v54 = vmul.f32 %v3869_v31, %v2436_v36  ;;  %v7176_v31 = vld [vmem:[#allocation26_spill] sm:$0xff] }
 0x724   :  { %v2477_v50 = vmul.f32 0.0, %v2455_v0  ;;  %v2465_v18 = vmul.f32 %v3867_v56, %v2464_v57  ;;  %v2174_v36 = vadd.f32 %v7176_v31, %v7175_v51  ;;  %v6089_v31 = vld [vmem:[#allocation15 + $0x170] sm:$0xff] }
 0x726   :  { %v5944_v37 = vadd.f32 %v2478_v54, %v2477_v50  ;;  %v2466_v9 = vadd.f32 %v3867_v56, %v2465_v18  ;;  %v7172_v50 = vld [vmem:[#allocation48_spill] sm:$0xff] }
 0x728   :  { %3870 = vtanh.f32 %v5944_v37  ;;  %v2470_v63 = vsel %vm2469_vm10, %v3867_v56, %v2466_v9 }
 0x729   :  { %v2475_v5 = vsel %vm2472_vm11, %v2474_v24, %v2470_v63 }
 0x72e   :  { %v3871_v4 = vpop.eup %3870 }
 0x72f   :  { %v5947_v2 = vmul.f32 %v3871_v4, %v2475_v5 }
 0x731   :  { %7142 = vst [vmem:[#allocation60_spill] sm:$0xff] %v5947_v2  ;;  %2503 = vmatmul.f32.vlgmr.msrb.gmra.mxu0 %v5947_v2  ;;  %2523 = vmatmul.f32.vlgmr.msrb.gmra.mxu1 %v5947_v2 }
 0x732   :  { %2543 = vmatmul.f32.vlgmr.msrb.gmra.mxu2 %v5947_v2  ;;  %2563 = vmatmul.f32.vlgmr.msra.gmra.mxu3 %v5947_v2  ;;  %v6206_v2 = vld [vmem:[#allocation15 + $0x28] sm:$0xff] }
 0x733   :  { %2791 = vmatpush.msrb.mxu0 %v7104_v16  ;;  %2811 = vmatpush.msrb.mxu1 %v5503_v3  ;;  %v7143_v3 = vld [vmem:[#allocation29_spill] sm:$0xff] }
 0x734   :  { %2831 = vmatpush.msrb.mxu2 %v5537_v13  ;;  %2851 = vmatpush.msra.mxu3 %v5511_v53  ;;  %v7145_v53 = vld [vmem:[#allocation63_spill] sm:$0xff] }
 0x735   :  { %2792 = vmatpush.msrb.mxu0 %v5505_v12  ;;  %2812 = vmatpush.msrb.mxu1 %v7105_v1  ;;  %v7144_v12 = vld [vmem:[#allocation61_spill] sm:$0xff]  ;;  %v7147_v13 = vld [vmem:[#allocation39_spill] sm:$0xff] }
 0x736   :  { %2832 = vmatpush.msrb.mxu2 %v5540_v33  ;;  %2852 = vmatpush.msra.mxu3 %v7106_v49  ;;  %v7148_v33 = vld [vmem:[#allocation64_spill] sm:$0xff]  ;;  %v7173_v1 = vld [vmem:[#allocation59_spill] sm:$0xff] }
 0x737   :  { %2793 = vmatpush.msrb.mxu0 %v5514_v11  ;;  %2813 = vmatpush.msrb.mxu1 %v7107_v52  ;;  %v7146_v11 = vld [vmem:[#allocation62_spill] sm:$0xff]  ;;  %v7174_v49 = vld [vmem:[#allocation52_spill] sm:$0xff] }
 0x738   :  { %2833 = vmatpush.msrb.mxu2 %v5545_v61  ;;  %2853 = vmatpush.msra.mxu3 %v7108_v14  ;;  %v7149_v61 = vld [vmem:[#allocation65_spill] sm:$0xff]  ;;  %v2215_v52 = vadd.f32 %v7174_v49, %v7173_v1 }
 0x739   :  { %2794 = vmatpush.msrb.mxu0 %v7109_v28  ;;  %2814 = vmatpush.msrb.mxu1 %v5549_v23  ;;  %v7150_v23 = vld [vmem:[#allocation66_spill] sm:$0xff]  ;;  %v6056_v49 = vld [vmem:[#allocation15 + $0x1d8] sm:$0xff] }
 0x73a   :  { %2834 = vmatpush.msrb.mxu2 %v5561_v8  ;;  %2854 = vmatpush.msra.mxu3 %v5559_v7  ;;  %v7153_v7 = vld [vmem:[#allocation27_spill] sm:$0xff]  ;;  %v7154_v8 = vld [vmem:[#allocation28_spill] sm:$0xff] }
 0x73b   :  { %2795 = vmatpush.msrb.mxu0 %v5552_v47  ;;  %2815 = vmatpush.msrb.mxu1 %v5557_v32  ;;  %v7151_v47 = vld [vmem:[#allocation41_spill] sm:$0xff] }
 0x73c   :  { %2835 = vmatpush.msrb.mxu2 %v5569_v27  ;;  %2855 = vmatpush.msra.mxu3 %v5567_v15  ;;  %v7152_v32 = vld [vmem:[#allocation69_spill] sm:$0xff]  ;;  %v7155_v15 = vld [vmem:[#allocation44_spill] sm:$0xff] }
 0x73d   :  { %2796 = vmatpush.msrb.mxu0 %v5577_v21  ;;  %2816 = vmatpush.msrb.mxu1 %v5579_v30  ;;  %v7156_v27 = vld [vmem:[#allocation32_spill] sm:$0xff]  ;;  %v7157_v21 = vld [vmem:[#allocation30_spill] sm:$0xff]  ;;  %v7158_v30 = vld [vmem:[#allocation31_spill] sm:$0xff] }
 0x73e   :  { %2836 = vmatpush.msrb.mxu2 %v5585_v48  ;;  %2856 = vmatpush.msra.mxu3 %v5581_v25  ;;  %v7159_v25 = vld [vmem:[#allocation37_spill] sm:$0xff]  ;;  %v7160_v48 = vld [vmem:[#allocation34_spill] sm:$0xff] }
 0x73f   :  { %2797 = vmatpush.msrb.mxu0 %v5587_v42  ;;  %2817 = vmatpush.msrb.mxu1 %v5589_v34  ;;  %v7161_v42 = vld [vmem:[#allocation35_spill] sm:$0xff]  ;;  %v7162_v34 = vld [vmem:[#allocation33_spill] sm:$0xff] }
 0x740   :  { %2837 = vmatpush.msrb.mxu2 %v5597_v10  ;;  %2857 = vmatpush.msra.mxu3 %v5592_v46  ;;  %v7163_v46 = vld [vmem:[#allocation46_spill] sm:$0xff] }
 0x741   :  { %2798 = vmatpush.msrb.mxu0 %v5599_v20  ;;  %2818 = vmatpush.msrb.mxu1 %v5601_v6  ;;  %v7164_v10 = vld [vmem:[#allocation38_spill] sm:$0xff]  ;;  %v7165_v20 = vld [vmem:[#allocation51_spill] sm:$0xff]  ;;  %v7166_v6 = vld [vmem:[#allocation40_spill] sm:$0xff]  ;;  %7197 = vst [vmem:[#allocation46_spill] sm:$0xff] %v6206_v2 }
 0x742   :  { %2838 = vmatpush.msrb.mxu2 %v5631_v58  ;;  %2858 = vmatpush.msra.mxu3 %v5611_v38  ;;  %v7169_v38 = vld [vmem:[#allocation80_spill] sm:$0xff] }
 0x743   :  { %2799 = vmatpush.msrb.mxu0 %v5607_v45  ;;  %2819 = vmatpush.msrb.mxu1 %v5609_v35  ;;  %v7167_v45 = vld [vmem:[#allocation47_spill] sm:$0xff]  ;;  %v7168_v35 = vld [vmem:[#allocation49_spill] sm:$0xff] }
 0x744   :  { %2839 = vmatpush.msrb.mxu2 %v5637_v59  ;;  %2859 = vmatpush.msra.mxu3 %v5618_v43  ;;  %v7171_v43 = vld [vmem:[#allocation82_spill] sm:$0xff] }
 0x745   :  { %2800 = vmatpush.msrb.mxu0 %v5614_v39  ;;  %2820 = vmatpush.msrb.mxu1 %v5616_v41  ;;  %v7170_v39 = vld [vmem:[#allocation45_spill] sm:$0xff]  ;;  %v2133_v54 = vadd.f32 %v7172_v50, %v7171_v43 }
 0x746   :  { %2840 = vmatpush.msrb.mxu2 %v7143_v3  ;;  %2860 = vmatpush.msra.mxu3 %v7144_v12  ;;  %v2092_v41 = vadd.f32 %v7170_v39, %v7169_v38 }
 0x747   :  { %2801 = vmatpush.msrb.mxu0 %v7145_v53  ;;  %2821 = vmatpush.msrb.mxu1 %v7146_v11 }
 0x748   :  { %2841 = vmatpush.msrb.mxu2 %v7147_v13  ;;  %2861 = vmatpush.msra.mxu3 %v7148_v33 }
 0x749   :  { %2802 = vmatpush.msrb.mxu0 %v7149_v61  ;;  %2822 = vmatpush.msrb.mxu1 %v7150_v23 }
 0x74a   :  { %2842 = vmatpush.msrb.mxu2 %v7151_v47  ;;  %2862 = vmatpush.msra.mxu3 %v7152_v32 }
 0x74b   :  { %2803 = vmatpush.msrb.mxu0 %v7153_v7  ;;  %2823 = vmatpush.msrb.mxu1 %v7154_v8 }
 0x74c   :  { %2843 = vmatpush.msrb.mxu2 %v7155_v15  ;;  %2863 = vmatpush.msra.mxu3 %v7156_v27 }
 0x74d   :  { %2804 = vmatpush.msrb.mxu0 %v7157_v21  ;;  %2824 = vmatpush.msrb.mxu1 %v7158_v30 }
 0x74e   :  { %2844 = vmatpush.msrb.mxu2 %v7159_v25  ;;  %2864 = vmatpush.msra.mxu3 %v7160_v48 }
 0x74f   :  { %2805 = vmatpush.msrb.mxu0 %v7161_v42  ;;  %2825 = vmatpush.msrb.mxu1 %v7162_v34 }
 0x750   :  { %2845 = vmatpush.msrb.mxu2 %v7163_v46  ;;  %2865 = vmatpush.msra.mxu3 %v7164_v10 }
 0x751   :  { %2806 = vmatpush.msrb.mxu0 %v7165_v20  ;;  %2826 = vmatpush.msrb.mxu1 %v7166_v6 }
 0x752   :  { %2846 = vmatpush.msrb.mxu2 %v7167_v45  ;;  %2866 = vmatpush.msra.mxu3 %v7168_v35 }
 0x7ae   :  { %v2504_v57 = vpop.f32.mrf.mxu0  ;;  %v2524_v58 = vpop.f32.mrf.mxu1 }
 0x7af   :  { %v2567_v59 = vadd.f32 %v2504_v57, %v2092_v41  ;;  %v2568_v18 = vadd.f32 %v2524_v58, %v2133_v54  ;;  %v6038_v57 = vld [vmem:[#allocation15 + $0x1e8] sm:$0xff]  ;;  %v6041_v58 = vld [vmem:[#allocation15 + $0x1f0] sm:$0xff] }
 0x7b1   :  { %v3674_v56 = vmul.f32 -1.442695, %v2567_v59  ;;  %v3675_v16 = vmul.f32 -1.442695, %v2568_v18  ;;  %v6044_v59 = vld [vmem:[#allocation15 + $0x1f8] sm:$0xff]  ;;  %v6047_v18 = vld [vmem:[#allocation15 + $0x1c0] sm:$0xff] }
 0x7b3   :  { %3872 = vpow2.f32 %v3674_v56  ;;  %v6050_v56 = vld [vmem:[#allocation15 + $0x1c8] sm:$0xff] }
 0x7b4   :  { %3874 = vpow2.f32 %v3675_v16  ;;  %v6053_v16 = vld [vmem:[#allocation15 + $0x1d0] sm:$0xff] }
 0x7b5   :  { %v2564_v14 = vpop.f32.mrf.mxu3  ;;  %v2544_v44 = vpop.f32.mrf.mxu2 }
 0x7b6   :  { %v2570_v28 = vadd.f32 %v2564_v14, %v2215_v52  ;;  %v2569_v9 = vadd.f32 %v2544_v44, %v2174_v36  ;;  %v6059_v52 = vld [vmem:[#allocation15 + $0x1a0] sm:$0xff]  ;;  %v6062_v14 = vld [vmem:[#allocation15 + $0x1a8] sm:$0xff]  ;;  %v6092_v36 = vld [vmem:[#allocation15 + $0x178] sm:$0xff] }
 0x7b7   :  { %v6083_v44 = vld [vmem:[#allocation15 + $0x160] sm:$0xff] }
 0x7b8   :  { %v3676_v17 = vmul.f32 -1.442695, %v2570_v28  ;;  %v6065_v28 = vld [vmem:[#allocation15 + $0x1b0] sm:$0xff] }
 0x7b9   :  { %v3873_v40 = vpop.eup %3872 }
 0x7ba   :  { %v3875_v19 = vpop.eup %3874  ;;  %v2574_v29 = vadd.f32 1.0, %v3873_v40  ;;  %3876 = vpow2.f32 %v3676_v17  ;;  %v6068_v17 = vld [vmem:[#allocation15 + $0x1b8] sm:$0xff]  ;;  %v6071_v40 = vld [vmem:[#allocation15 + $0x180] sm:$0xff] }
 0x7bb   :  { %v2593_v26 = vadd.f32 1.0, %v3875_v19  ;;  %v6074_v19 = vld [vmem:[#allocation15 + $0x188] sm:$0xff] }
 0x7bc   :  { %3878 = vrcp.f32 %v2574_v29  ;;  %v2586_v5 = vand.u32 2147483648, %v2574_v29  ;;  %v2584_v53 = vand.u32 2147483647, %v2574_v29  ;;  %vm2580_vm14 = vweird.f32 %v2574_v29 }
 0x7bd   :  { %3880 = vrcp.f32 %v2593_v26  ;;  %v2605_v3 = vand.u32 2147483648, %v2593_v26  ;;  %v2603_v13 = vand.u32 2147483647, %v2593_v26  ;;  %vm2599_vm15 = vweird.f32 %v2593_v26 }
 0x7be   :  { %v2587_v23 = vor.u32 1.1754944e-38, %v2586_v5  ;;  %vm2585_vm2 = vcmp.eq.f32.partialorder %v2584_v53, 8.507059e+37  ;;  %v6119_v5 = vld [vmem:[#allocation15 + $0x100] sm:$0xff]  ;;  %v6128_v53 = vld [vmem:[#allocation15 + $0x118] sm:$0xff] }
 0x7bf   :  { %v2606_v7 = vor.u32 1.1754944e-38, %v2605_v3  ;;  %vm2604_vm3 = vcmp.eq.f32.partialorder %v2603_v13, 8.507059e+37  ;;  %v6122_v3 = vld [vmem:[#allocation15 + $0x108] sm:$0xff] }
 0x7c0   :  { %v3877_v22 = vpop.eup %3876  ;;  %v6134_v13 = vld [vmem:[#allocation15 + $0xe8] sm:$0xff] }
 0x7c1   :  { %v2613_v60 = vadd.f32 1.0, %v3877_v22  ;;  %v6086_v22 = vld [vmem:[#allocation15 + $0x168] sm:$0xff] }
 0x7c2   :  { %v3879_v0 = vpop.eup %3878 }
 0x7c3   :  { %v3881_v55 = vpop.eup %3880  ;;  %v2576_v62 = vmul.f32 %v3879_v0, %v2574_v29  ;;  %3882 = vrcp.f32 %v2613_v60  ;;  %vm2581_vm12 = vweird.f32 %v3879_v0  ;;  %v2625_v20 = vand.u32 2147483648, %v2613_v60  ;;  %v6077_v29 = vld [vmem:[#allocation15 + $0x190] sm:$0xff] }
 0x7c4   :  { %v2595_v63 = vmul.f32 %v3881_v55, %v2593_v26  ;;  %3884 = vtanh.f32 %v2569_v9  ;;  %vm2600_vm13 = vweird.f32 %v3881_v55  ;;  %vm2582_vm0 = vmor %vm2580_vm14, %vm2581_vm12  ;;  %vm2619_vm5 = vweird.f32 %v2613_v60  ;;  %v6080_v26 = vld [vmem:[#allocation15 + $0x198] sm:$0xff]  ;;  %v6101_v9 = vld [vmem:[#allocation15 + $0x150] sm:$0xff] }
 0x7c5   :  { %v2577_v24 = vsub.f32 1.0, %v2576_v62  ;;  %vm2601_vm1 = vmor %vm2599_vm15, %vm2600_vm13  ;;  %v2623_v6 = vand.u32 2147483647, %v2613_v60  ;;  %v2626_v39 = vor.u32 1.1754944e-38, %v2625_v20  ;;  %v6107_v62 = vld [vmem:[#allocation15 + $0x120] sm:$0xff]  ;;  %v6185_v20 = vld [vmem:[#allocation15 + $0x70] sm:$0xff] }
 0x7c6   :  { %v2596_v4 = vsub.f32 1.0, %v2595_v63  ;;  %v6110_v63 = vld [vmem:[#allocation15 + $0x128] sm:$0xff]  ;;  %7190 = vst [vmem:[#allocation32_spill] sm:$0xff] %v6185_v20 }
 0x7c7   :  { %v2578_v12 = vmul.f32 %v3879_v0, %v2577_v24  ;;  %vm2624_vm7 = vcmp.eq.f32.partialorder %v2623_v6, 8.507059e+37  ;;  %v6113_v24 = vld [vmem:[#allocation15 + $0x130] sm:$0xff]  ;;  %v6188_v6 = vld [vmem:[#allocation15 + $0x78] sm:$0xff] }
 0x7c8   :  { %v2597_v11 = vmul.f32 %v3881_v55, %v2596_v4  ;;  %v6116_v4 = vld [vmem:[#allocation15 + $0x138] sm:$0xff]  ;;  %7191 = vst [vmem:[#allocation30_spill] sm:$0xff] %v6188_v6 }
 0x7c9   :  { %v3883_v33 = vpop.eup %3882  ;;  %v2579_v61 = vadd.f32 %v3879_v0, %v2578_v12  ;;  %v6125_v12 = vld [vmem:[#allocation15 + $0x110] sm:$0xff] }
 0x7ca   :  { %v2598_v47 = vadd.f32 %v3881_v55, %v2597_v11  ;;  %v2615_v32 = vmul.f32 %v3883_v33, %v2613_v60  ;;  %v3885_v15 = vpop.eup %3884  ;;  %vm2620_vm4 = vweird.f32 %v3883_v33  ;;  %v6095_v60 = vld [vmem:[#allocation15 + $0x140] sm:$0xff] }
 0x7cb   :  { %v2583_v8 = vsel %vm2582_vm0, %v3879_v0, %v2579_v61  ;;  %vm2621_vm6 = vmor %vm2619_vm5, %vm2620_vm4  ;;  %v6098_v0 = vld [vmem:[#allocation15 + $0x148] sm:$0xff]  ;;  %v6131_v11 = vld [vmem:[#allocation15 + $0xe0] sm:$0xff] }
 0x7cc   :  { %v2588_v27 = vsel %vm2585_vm2, %v2587_v23, %v2583_v8  ;;  %v2602_v21 = vsel %vm2601_vm1, %v3881_v55, %v2598_v47  ;;  %v2616_v30 = vsub.f32 1.0, %v2615_v32  ;;  %v6104_v55 = vld [vmem:[#allocation15 + $0x158] sm:$0xff]  ;;  %v6143_v23 = vld [vmem:[#allocation15 + $0xc0] sm:$0xff]  ;;  %v6146_v47 = vld [vmem:[#allocation15 + $0xc8] sm:$0xff] }
 0x7cd   :  { %v2607_v25 = vsel %vm2604_vm3, %v2606_v7, %v2602_v21  ;;  %v2630_v48 = vmul.f32 %v3885_v15, %v2588_v27  ;;  %v6140_v61 = vld [vmem:[#allocation15 + $0xf8] sm:$0xff]  ;;  %v6149_v32 = vld [vmem:[#allocation15 + $0xd0] sm:$0xff]  ;;  %v6155_v8 = vld [vmem:[#allocation15 + $0xa0] sm:$0xff] }
 0x7ce   :  { %v2629_v42 = vmul.f32 %v2607_v25, %v5944_v37  ;;  %v2617_v34 = vmul.f32 %v3883_v33, %v2616_v30  ;;  %v6035_v37 = vld [vmem:[#allocation15 + $0x1e0] sm:$0xff]  ;;  %7178 = vst [vmem:[#allocation61_spill] sm:$0xff] %v6149_v32  ;;  %v6152_v7 = vld [vmem:[#allocation15 + $0xd8] sm:$0xff]  ;;  %v6158_v15 = vld [vmem:[#allocation15 + $0xa8] sm:$0xff] }
 0x7cf   :  { %7179 = vst [vmem:[#allocation63_spill] sm:$0xff] %v6152_v7  ;;  %v6161_v27 = vld [vmem:[#allocation15 + $0xb0] sm:$0xff]  ;;  %v6164_v21 = vld [vmem:[#allocation15 + $0xb8] sm:$0xff]  ;;  %v6167_v30 = vld [vmem:[#allocation15 + $0x80] sm:$0xff] }
 0x7d0   :  { %v6026_v46 = vadd.f32 %v2630_v48, %v2629_v42  ;;  %v2618_v10 = vadd.f32 %v3883_v33, %v2617_v34  ;;  %7180 = vst [vmem:[#allocation62_spill] sm:$0xff] %v6155_v8  ;;  %v6170_v25 = vld [vmem:[#allocation15 + $0x88] sm:$0xff]  ;;  %v6173_v48 = vld [vmem:[#allocation15 + $0x90] sm:$0xff]  ;;  %v6176_v42 = vld [vmem:[#allocation15 + $0x98] sm:$0xff] }
 0x7d1   :  { %7181 = vst [vmem:[#allocation39_spill] sm:$0xff] %v6158_v15  ;;  %v6179_v34 = vld [vmem:[#allocation15 + $0x60] sm:$0xff] }
 0x7d2   :  { %3886 = vtanh.f32 %v6026_v46  ;;  %v2622_v35 = vsel %vm2621_vm6, %v3883_v33, %v2618_v10  ;;  %v6137_v33 = vld [vmem:[#allocation15 + $0xf0] sm:$0xff]  ;;  %7182 = vst [vmem:[#allocation64_spill] sm:$0xff] %v6161_v27  ;;  %v6182_v10 = vld [vmem:[#allocation15 + $0x68] sm:$0xff] }
 0x7d3   :  { %v2627_v50 = vsel %vm2624_vm7, %v2626_v39, %v2622_v35  ;;  %7183 = vst [vmem:[#allocation65_spill] sm:$0xff] %v6164_v21  ;;  %v6191_v35 = vld [vmem:[#allocation15 + $0x40] sm:$0xff]  ;;  %v6194_v39 = vld [vmem:[#allocation15 + $0x48] sm:$0xff] }
 0x7d4   :  { %7184 = vst [vmem:[#allocation66_spill] sm:$0xff] %v6167_v30 }
 0x7d5   :  { %7185 = vst [vmem:[#allocation41_spill] sm:$0xff] %v6170_v25 }
 0x7d6   :  { %7186 = vst [vmem:[#allocation69_spill] sm:$0xff] %v6173_v48 }
 0x7d7   :  { %7187 = vst [vmem:[#allocation27_spill] sm:$0xff] %v6176_v42 }
 0x7d8   :  { %v3887_v41 = vpop.eup %3886  ;;  %7188 = vst [vmem:[#allocation28_spill] sm:$0xff] %v6179_v34 }
 0x7d9   :  { %v6029_v54 = vmul.f32 %v3887_v41, %v2627_v50  ;;  %7189 = vst [vmem:[#allocation44_spill] sm:$0xff] %v6182_v10  ;;  %v6197_v41 = vld [vmem:[#allocation15 + $0x50] sm:$0xff]  ;;  %v6200_v50 = vld [vmem:[#allocation15 + $0x58] sm:$0xff] }
 0x7da   :  { %7192 = vst [vmem:[#allocation31_spill] sm:$0xff] %v6191_v35 }
 0x7db   :  { %7177 = vst [vmem:[#allocation29_spill] sm:$0xff] %v6029_v54  ;;  %2655 = vmatmul.f32.vlgmr.msra.gmra.mxu0 %v6029_v54  ;;  %2675 = vmatmul.f32.vlgmr.msra.gmra.mxu1 %v6029_v54 }
 0x7dc   :  { %2695 = vmatmul.f32.vlgmr.msra.gmra.mxu2 %v6029_v54  ;;  %2715 = vmatmul.f32.vlgmr.msrb.gmra.mxu3 %v6029_v54  ;;  %7193 = vst [vmem:[#allocation37_spill] sm:$0xff] %v6194_v39  ;;  %v6203_v54 = vld [vmem:[#allocation15 + $0x20] sm:$0xff] }
 0x7dd   :  { %2943 = vmatpush.msra.mxu0 %v6035_v37  ;;  %2963 = vmatpush.msra.mxu1 %v6038_v57  ;;  %7194 = vst [vmem:[#allocation34_spill] sm:$0xff] %v6197_v41 }
 0x7de   :  { %2983 = vmatpush.msra.mxu2 %v6041_v58  ;;  %3003 = vmatpush.msrb.mxu3 %v6044_v59  ;;  %7195 = vst [vmem:[#allocation35_spill] sm:$0xff] %v6200_v50 }
 0x7df   :  { %2944 = vmatpush.msra.mxu0 %v6047_v18  ;;  %2964 = vmatpush.msra.mxu1 %v6050_v56  ;;  %7196 = vst [vmem:[#allocation33_spill] sm:$0xff] %v6203_v54 }
 0x7e0   :  { %2984 = vmatpush.msra.mxu2 %v6053_v16  ;;  %3004 = vmatpush.msrb.mxu3 %v6056_v49 }
 0x7e1   :  { %2945 = vmatpush.msra.mxu0 %v6059_v52  ;;  %2965 = vmatpush.msra.mxu1 %v6062_v14 }
 0x7e2   :  { %2985 = vmatpush.msra.mxu2 %v6065_v28  ;;  %3005 = vmatpush.msrb.mxu3 %v6068_v17 }
 0x7e3   :  { %2946 = vmatpush.msra.mxu0 %v6071_v40  ;;  %2966 = vmatpush.msra.mxu1 %v6074_v19 }
 0x7e4   :  { %2986 = vmatpush.msra.mxu2 %v6077_v29  ;;  %3006 = vmatpush.msrb.mxu3 %v6080_v26 }
 0x7e5   :  { %2947 = vmatpush.msra.mxu0 %v6083_v44  ;;  %2967 = vmatpush.msra.mxu1 %v6086_v22 }
 0x7e6   :  { %2987 = vmatpush.msra.mxu2 %v6089_v31  ;;  %3007 = vmatpush.msrb.mxu3 %v6092_v36 }
 0x7e7   :  { %2948 = vmatpush.msra.mxu0 %v6095_v60  ;;  %2968 = vmatpush.msra.mxu1 %v6098_v0 }
 0x7e8   :  { %2988 = vmatpush.msra.mxu2 %v6101_v9  ;;  %3008 = vmatpush.msrb.mxu3 %v6104_v55 }
 0x7e9   :  { %2949 = vmatpush.msra.mxu0 %v6107_v62  ;;  %2969 = vmatpush.msra.mxu1 %v6110_v63 }
 0x7ea   :  { %2989 = vmatpush.msra.mxu2 %v6113_v24  ;;  %3009 = vmatpush.msrb.mxu3 %v6116_v4 }
 0x7eb   :  { %2950 = vmatpush.msra.mxu0 %v6119_v5  ;;  %2970 = vmatpush.msra.mxu1 %v6122_v3 }
 0x7ec   :  { %2990 = vmatpush.msra.mxu2 %v6125_v12  ;;  %3010 = vmatpush.msrb.mxu3 %v6128_v53 }
 0x7ed   :  { %2951 = vmatpush.msra.mxu0 %v6131_v11  ;;  %2971 = vmatpush.msra.mxu1 %v6134_v13 }
 0x7ee   :  { %2991 = vmatpush.msra.mxu2 %v6137_v33  ;;  %3011 = vmatpush.msrb.mxu3 %v6140_v61 }
 0x7ef   :  { %2952 = vmatpush.msra.mxu0 %v6143_v23  ;;  %2972 = vmatpush.msra.mxu1 %v6146_v47 }
 0x7f0   :  { %2992 = vmatpush.msra.mxu2 %v6149_v32  ;;  %3012 = vmatpush.msrb.mxu3 %v6152_v7 }
 0x7f1   :  { %2953 = vmatpush.msra.mxu0 %v6155_v8  ;;  %2973 = vmatpush.msra.mxu1 %v6158_v15 }
 0x7f2   :  { %2993 = vmatpush.msra.mxu2 %v6161_v27  ;;  %3013 = vmatpush.msrb.mxu3 %v6164_v21 }
 0x7f3   :  { %2954 = vmatpush.msra.mxu0 %v6167_v30  ;;  %2974 = vmatpush.msra.mxu1 %v6170_v25 }
 0x7f4   :  { %2994 = vmatpush.msra.mxu2 %v6173_v48  ;;  %3014 = vmatpush.msrb.mxu3 %v6176_v42 }
 0x7f5   :  { %2955 = vmatpush.msra.mxu0 %v6179_v34  ;;  %2975 = vmatpush.msra.mxu1 %v6182_v10 }
 0x7f6   :  { %2995 = vmatpush.msra.mxu2 %v6185_v20  ;;  %3015 = vmatpush.msrb.mxu3 %v6188_v6  ;;  %v7204_v6 = vld [vmem:[#allocation50_spill] sm:$0xff] }
 0x7f7   :  { %2956 = vmatpush.msra.mxu0 %v6191_v35  ;;  %2976 = vmatpush.msra.mxu1 %v6194_v39  ;;  %v6209_v35 = vld [vmem:[#allocation15 + $0x30] sm:$0xff]  ;;  %v6212_v39 = vld [vmem:[#allocation15 + $0x38] sm:$0xff] }
 0x7f8   :  { %2996 = vmatpush.msra.mxu2 %v6197_v41  ;;  %3016 = vmatpush.msrb.mxu3 %v6200_v50  ;;  %7198 = vst [vmem:[#allocation38_spill] sm:$0xff] %v6209_v35  ;;  %v6215_v41 = vld [vmem:[#allocation15] sm:$0xff]  ;;  %v6218_v50 = vld [vmem:[#allocation15 + $0x8] sm:$0xff] }
 0x7f9   :  { %2957 = vmatpush.msra.mxu0 %v6203_v54  ;;  %2977 = vmatpush.msra.mxu1 %v6206_v2  ;;  %7199 = vst [vmem:[#allocation51_spill] sm:$0xff] %v6212_v39  ;;  %v6222_v54 = vld [vmem:[#allocation15 + $0x18] sm:$0xff] }
 0x7fa   :  { %2997 = vmatpush.msra.mxu2 %v6209_v35  ;;  %3017 = vmatpush.msrb.mxu3 %v6212_v39  ;;  %7200 = vst [vmem:[#allocation40_spill] sm:$0xff] %v6215_v41  ;;  %v7203_v35 = vld [vmem:[#allocation42_spill] sm:$0xff]  ;;  %v2136_v39 = vadd.f32 %v7204_v6, %v7171_v43 }
 0x7fb   :  { %2958 = vmatpush.msra.mxu0 %v6215_v41  ;;  %7201 = vst [vmem:[#allocation47_spill] sm:$0xff] %v6218_v50  ;;  %2978 = vmatpush.msra.mxu1 %v6218_v50  ;;  %v2095_v2 = vadd.f32 %v7203_v35, %v7169_v38  ;;  %v7205_v50 = vld [vmem:[#allocation53_spill] sm:$0xff] }
 0x7fc   :  { %2998 = vmatpush.msra.mxu2 %v7167_v45  ;;  %7202 = vst [vmem:[#allocation49_spill] sm:$0xff] %v6222_v54  ;;  %3018 = vmatpush.msrb.mxu3 %v6222_v54  ;;  %v2218_v45 = vadd.f32 %v7205_v50, %v7173_v1 }
 0x858   :  { %v2656_v20 = vpop.f32.mrf.mxu0  ;;  %v2676_v10 = vpop.f32.mrf.mxu1 }
 0x859   :  { %v2719_v34 = vadd.f32 %v2656_v20, %v2095_v2  ;;  %v2720_v41 = vadd.f32 %v2676_v10, %v2136_v39 }
 0x85b   :  { %v3677_v42 = vmul.f32 -1.442695, %v2719_v34  ;;  %v3678_v48 = vmul.f32 -1.442695, %v2720_v41  ;;  %v7206_v34 = vld [vmem:[#allocation78_spill] sm:$0xff] }
 0x85c   :  { %v2177_v10 = vadd.f32 %v7206_v34, %v7175_v51 }
 0x85d   :  { %3888 = vpow2.f32 %v3677_v42 }
 0x85e   :  { %3890 = vpow2.f32 %v3678_v48 }
 0x85f   :  { %v2716_v25 = vpop.f32.mrf.mxu3  ;;  %v2696_v6 = vpop.f32.mrf.mxu2 }
 0x860   :  { %v2722_v30 = vadd.f32 %v2716_v25, %v2218_v45  ;;  %v2721_v39 = vadd.f32 %v2696_v6, %v2177_v10 }
 0x862   :  { %v3679_v54 = vmul.f32 -1.442695, %v2722_v30 }
 0x863   :  { %v3889_v21 = vpop.eup %3888 }
 0x864   :  { %v3891_v27 = vpop.eup %3890  ;;  %v2726_v35 = vadd.f32 1.0, %v3889_v21  ;;  %3892 = vpow2.f32 %v3679_v54 }
 0x865   :  { %v2745_v38 = vadd.f32 1.0, %v3891_v27 }
 0x866   :  { %3894 = vrcp.f32 %v2726_v35  ;;  %v2738_v45 = vand.u32 2147483648, %v2726_v35  ;;  %v2736_v21 = vand.u32 2147483647, %v2726_v35  ;;  %vm2732_vm10 = vweird.f32 %v2726_v35 }
 0x867   :  { %3896 = vrcp.f32 %v2745_v38  ;;  %v2757_v54 = vand.u32 2147483648, %v2745_v38  ;;  %v2755_v43 = vand.u32 2147483647, %v2745_v38  ;;  %vm2751_vm11 = vweird.f32 %v2745_v38 }
 0x868   :  { %v2739_v6 = vor.u32 1.1754944e-38, %v2738_v45  ;;  %vm2737_vm14 = vcmp.eq.f32.partialorder %v2736_v21, 8.507059e+37 }
 0x869   :  { %vm2756_vm15 = vcmp.eq.f32.partialorder %v2755_v43, 8.507059e+37 }
 0x86a   :  { %v3893_v2 = vpop.eup %3892 }
 0x86b   :  { %v2765_v42 = vadd.f32 1.0, %v3893_v2 }
 0x86c   :  { %v3895_v20 = vpop.eup %3894 }
 0x86d   :  { %v3897_v41 = vpop.eup %3896  ;;  %v2728_v48 = vmul.f32 %v3895_v20, %v2726_v35  ;;  %3898 = vrcp.f32 %v2765_v42  ;;  %vm2733_vm8 = vweird.f32 %v3895_v20  ;;  %vm2771_vm1 = vweird.f32 %v2765_v42 }
 0x86e   :  { %v2747_v25 = vmul.f32 %v3897_v41, %v2745_v38  ;;  %3900 = vtanh.f32 %v2721_v39  ;;  %vm2752_vm9 = vweird.f32 %v3897_v41  ;;  %vm2734_vm12 = vmor %vm2732_vm10, %vm2733_vm8 }
 0x86f   :  { %v2729_v30 = vsub.f32 1.0, %v2728_v48  ;;  %vm2753_vm13 = vmor %vm2751_vm11, %vm2752_vm9  ;;  %v2758_v48 = vor.u32 1.1754944e-38, %v2757_v54 }
 0x870   :  { %v2748_v50 = vsub.f32 1.0, %v2747_v25 }
 0x871   :  { %v2730_v27 = vmul.f32 %v3895_v20, %v2729_v30 }
 0x872   :  { %v2749_v1 = vmul.f32 %v3897_v41, %v2748_v50 }
 0x873   :  { %v3899_v15 = vpop.eup %3898  ;;  %v2731_v34 = vadd.f32 %v3895_v20, %v2730_v27 }
 0x874   :  { %v2750_v2 = vadd.f32 %v3897_v41, %v2749_v1  ;;  %v2767_v10 = vmul.f32 %v3899_v15, %v2765_v42  ;;  %v3901_v39 = vpop.eup %3900  ;;  %vm2772_vm0 = vweird.f32 %v3899_v15  ;;  %v2777_v1 = vand.u32 2147483648, %v2765_v42 }
 0x875   :  { %v2735_v25 = vsel %vm2734_vm12, %v3895_v20, %v2731_v34  ;;  %v2775_v20 = vand.u32 2147483647, %v2765_v42  ;;  %vm2773_vm2 = vmor %vm2771_vm1, %vm2772_vm0  ;;  %v7214_v42 = vld [vmem:[#allocation66_spill] sm:$0xff]  ;;  %v7215_v34 = vld [vmem:[#allocation41_spill] sm:$0xff] }
 0x876   :  { %v2740_v51 = vsel %vm2737_vm14, %v2739_v6, %v2735_v25  ;;  %v2754_v30 = vsel %vm2753_vm13, %v3897_v41, %v2750_v2  ;;  %v2768_v8 = vsub.f32 1.0, %v2767_v10  ;;  %v2778_v54 = vor.u32 1.1754944e-38, %v2777_v1  ;;  %v7216_v6 = vld [vmem:[#allocation69_spill] sm:$0xff]  ;;  %v7217_v2 = vld [vmem:[#allocation27_spill] sm:$0xff]  ;;  %v7218_v10 = vld [vmem:[#allocation28_spill] sm:$0xff] }
 0x877   :  { %v2759_v50 = vsel %vm2756_vm15, %v2758_v48, %v2754_v30  ;;  %v2782_v7 = vmul.f32 %v3901_v39, %v2740_v51  ;;  %vm2776_vm3 = vcmp.eq.f32.partialorder %v2775_v20, 8.507059e+37  ;;  %v7208_v51 = vld [vmem:[#allocation61_spill] sm:$0xff]  ;;  %v7219_v48 = vld [vmem:[#allocation44_spill] sm:$0xff]  ;;  %v7221_v39 = vld [vmem:[#allocation30_spill] sm:$0xff] }
 0x878   :  { %v2781_v32 = vmul.f32 %v2759_v50, %v6026_v46  ;;  %v2769_v27 = vmul.f32 %v3899_v15, %v2768_v8  ;;  %v7209_v46 = vld [vmem:[#allocation63_spill] sm:$0xff]  ;;  %v7212_v8 = vld [vmem:[#allocation64_spill] sm:$0xff]  ;;  %v7223_v50 = vld [vmem:[#allocation37_spill] sm:$0xff] }
 0x879   :  { %v7220_v25 = vld [vmem:[#allocation32_spill] sm:$0xff]  ;;  %v7222_v30 = vld [vmem:[#allocation31_spill] sm:$0xff]  ;;  %v7226_v1 = vld [vmem:[#allocation33_spill] sm:$0xff] }
 0x87a   :  { %v6234_v35 = vadd.f32 %v2782_v7, %v2781_v32  ;;  %v2770_v38 = vadd.f32 %v3899_v15, %v2769_v27  ;;  %v7210_v32 = vld [vmem:[#allocation62_spill] sm:$0xff]  ;;  %v7211_v7 = vld [vmem:[#allocation39_spill] sm:$0xff] }
 0x87b   :  { %v7224_v27 = vld [vmem:[#allocation34_spill] sm:$0xff] }
 0x87c   :  { %3902 = vtanh.f32 %v6234_v35  ;;  %v2774_v45 = vsel %vm2773_vm2, %v3899_v15, %v2770_v38  ;;  %v7213_v15 = vld [vmem:[#allocation65_spill] sm:$0xff]  ;;  %v7225_v38 = vld [vmem:[#allocation35_spill] sm:$0xff]  ;;  %v7227_v20 = vld [vmem:[#allocation46_spill] sm:$0xff] }
 0x87d   :  { %v2779_v41 = vsel %vm2776_vm3, %v2778_v54, %v2774_v45  ;;  %v7228_v45 = vld [vmem:[#allocation38_spill] sm:$0xff]  ;;  %v7229_v54 = vld [vmem:[#allocation51_spill] sm:$0xff] }
 0x882   :  { %v3903_v43 = vpop.eup %3902 }
 0x883   :  { %v6237_v21 = vmul.f32 %v3903_v43, %v2779_v41  ;;  %v7230_v43 = vld [vmem:[#allocation40_spill] sm:$0xff]  ;;  %v7231_v41 = vld [vmem:[#allocation47_spill] sm:$0xff] }
 0x885   :  { %7207 = vst [vmem:[#allocation45_spill] sm:$0xff] %v6237_v21  ;;  %2807 = vmatmul.f32.vlgmr.msrb.gmra.mxu0 %v6237_v21  ;;  %2827 = vmatmul.f32.vlgmr.msrb.gmra.mxu1 %v6237_v21 }
 0x886   :  { %2847 = vmatmul.f32.vlgmr.msrb.gmra.mxu2 %v6237_v21  ;;  %2867 = vmatmul.f32.vlgmr.msra.gmra.mxu3 %v6237_v21  ;;  %v6305_v21 = vld [vmem:[#allocation15 + $0x10] sm:$0xff] }
 0x887   :  { %3095 = vmatpush.msrb.mxu0 %v6035_v37  ;;  %3115 = vmatpush.msrb.mxu1 %v6038_v57  ;;  %7232 = vst [vmem:[#allocation48_spill] sm:$0xff] %v6305_v21 }
 0x888   :  { %3135 = vmatpush.msrb.mxu2 %v6041_v58  ;;  %3155 = vmatpush.msra.mxu3 %v6044_v59 }
 0x889   :  { %3096 = vmatpush.msrb.mxu0 %v6047_v18  ;;  %3116 = vmatpush.msrb.mxu1 %v6050_v56 }
 0x88a   :  { %3136 = vmatpush.msrb.mxu2 %v6053_v16  ;;  %3156 = vmatpush.msra.mxu3 %v6056_v49 }
 0x88b   :  { %3097 = vmatpush.msrb.mxu0 %v6059_v52  ;;  %3117 = vmatpush.msrb.mxu1 %v6062_v14 }
 0x88c   :  { %3137 = vmatpush.msrb.mxu2 %v6065_v28  ;;  %3157 = vmatpush.msra.mxu3 %v6068_v17 }
 0x88d   :  { %3098 = vmatpush.msrb.mxu0 %v6071_v40  ;;  %3118 = vmatpush.msrb.mxu1 %v6074_v19 }
 0x88e   :  { %3138 = vmatpush.msrb.mxu2 %v6077_v29  ;;  %3158 = vmatpush.msra.mxu3 %v6080_v26 }
 0x88f   :  { %3099 = vmatpush.msrb.mxu0 %v6083_v44  ;;  %3119 = vmatpush.msrb.mxu1 %v6086_v22 }
 0x890   :  { %3139 = vmatpush.msrb.mxu2 %v6089_v31  ;;  %3159 = vmatpush.msra.mxu3 %v6092_v36 }
 0x891   :  { %3100 = vmatpush.msrb.mxu0 %v6095_v60  ;;  %3120 = vmatpush.msrb.mxu1 %v6098_v0 }
 0x892   :  { %3140 = vmatpush.msrb.mxu2 %v6101_v9  ;;  %3160 = vmatpush.msra.mxu3 %v6104_v55 }
 0x893   :  { %3101 = vmatpush.msrb.mxu0 %v6107_v62  ;;  %3121 = vmatpush.msrb.mxu1 %v6110_v63 }
 0x894   :  { %3141 = vmatpush.msrb.mxu2 %v6113_v24  ;;  %3161 = vmatpush.msra.mxu3 %v6116_v4 }
 0x895   :  { %3102 = vmatpush.msrb.mxu0 %v6119_v5  ;;  %3122 = vmatpush.msrb.mxu1 %v6122_v3 }
 0x896   :  { %3142 = vmatpush.msrb.mxu2 %v6125_v12  ;;  %3162 = vmatpush.msra.mxu3 %v6128_v53 }
 0x897   :  { %3103 = vmatpush.msrb.mxu0 %v6131_v11  ;;  %3123 = vmatpush.msrb.mxu1 %v6134_v13 }
 0x898   :  { %3143 = vmatpush.msrb.mxu2 %v6137_v33  ;;  %3163 = vmatpush.msra.mxu3 %v6140_v61 }
 0x899   :  { %3104 = vmatpush.msrb.mxu0 %v6143_v23  ;;  %3124 = vmatpush.msrb.mxu1 %v6146_v47 }
 0x89a   :  { %3144 = vmatpush.msrb.mxu2 %v7208_v51  ;;  %3164 = vmatpush.msra.mxu3 %v7209_v46 }
 0x89b   :  { %3105 = vmatpush.msrb.mxu0 %v7210_v32  ;;  %3125 = vmatpush.msrb.mxu1 %v7211_v7 }
 0x89c   :  { %3145 = vmatpush.msrb.mxu2 %v7212_v8  ;;  %3165 = vmatpush.msra.mxu3 %v7213_v15 }
 0x89d   :  { %3106 = vmatpush.msrb.mxu0 %v7214_v42  ;;  %3126 = vmatpush.msrb.mxu1 %v7215_v34 }
 0x89e   :  { %3146 = vmatpush.msrb.mxu2 %v7216_v6  ;;  %3166 = vmatpush.msra.mxu3 %v7217_v2  ;;  %v7239_v2 = vld [vmem:[#allocation68_spill] sm:$0xff] }
 0x89f   :  { %3107 = vmatpush.msrb.mxu0 %v7218_v10  ;;  %3127 = vmatpush.msrb.mxu1 %v7219_v48 }
 0x8a0   :  { %3147 = vmatpush.msrb.mxu2 %v7220_v25  ;;  %3167 = vmatpush.msra.mxu3 %v7221_v39  ;;  %v7237_v39 = vld [vmem:[#allocation67_spill] sm:$0xff] }
 0x8a1   :  { %3108 = vmatpush.msrb.mxu0 %v7222_v30  ;;  %3128 = vmatpush.msrb.mxu1 %v7223_v50  ;;  %v7233_v50 = vld [vmem:[#allocation49_spill] sm:$0xff] }
 0x8a2   :  { %3148 = vmatpush.msrb.mxu2 %v7224_v27  ;;  %3168 = vmatpush.msra.mxu3 %v7225_v38  ;;  %v7234_v27 = vld [vmem:[#allocation80_spill] sm:$0xff]  ;;  %v7235_v38 = vld [vmem:[#allocation77_spill] sm:$0xff] }
 0x8a3   :  { %3109 = vmatpush.msrb.mxu0 %v7226_v1  ;;  %3129 = vmatpush.msrb.mxu1 %v7227_v20  ;;  %v2098_v30 = vadd.f32 %v7235_v38, %v7234_v27  ;;  %v7236_v1 = vld [vmem:[#allocation82_spill] sm:$0xff] }
 0x8a4   :  { %3149 = vmatpush.msrb.mxu2 %v7228_v45  ;;  %3169 = vmatpush.msra.mxu3 %v7229_v54  ;;  %v2139_v20 = vadd.f32 %v7237_v39, %v7236_v1 }
 0x8a5   :  { %3110 = vmatpush.msrb.mxu0 %v7230_v43  ;;  %3130 = vmatpush.msrb.mxu1 %v7231_v41  ;;  %v7238_v41 = vld [vmem:[#allocation59_spill] sm:$0xff] }
 0x8a6   :  { %3150 = vmatpush.msrb.mxu2 %v6305_v21  ;;  %3170 = vmatpush.msra.mxu3 %v7233_v50  ;;  %v2221_v6 = vadd.f32 %v7239_v2, %v7238_v41 }
 0x902   :  { %v2808_v25 = vpop.f32.mrf.mxu0  ;;  %v2828_v45 = vpop.f32.mrf.mxu1 }
 0x903   :  { %v2871_v48 = vadd.f32 %v2808_v25, %v2098_v30  ;;  %v2872_v54 = vadd.f32 %v2828_v45, %v2139_v20  ;;  %v7240_v30 = vld [vmem:[#allocation58_spill] sm:$0xff] }
 0x905   :  { %v3680_v10 = vmul.f32 -1.442695, %v2871_v48  ;;  %v3681_v43 = vmul.f32 -1.442695, %v2872_v54  ;;  %v7241_v48 = vld [vmem:[#allocation83_spill] sm:$0xff] }
 0x906   :  { %v2180_v20 = vadd.f32 %v7241_v48, %v7240_v30 }
 0x907   :  { %3904 = vpow2.f32 %v3680_v10 }
 0x908   :  { %3906 = vpow2.f32 %v3681_v43 }
 0x909   :  { %v2868_v21 = vpop.f32.mrf.mxu3  ;;  %v2848_v39 = vpop.f32.mrf.mxu2 }
 0x90a   :  { %v2874_v34 = vadd.f32 %v2868_v21, %v2221_v6  ;;  %v2873_v54 = vadd.f32 %v2848_v39, %v2180_v20 }
 0x90c   :  { %v3682_v50 = vmul.f32 -1.442695, %v2874_v34 }
 0x90d   :  { %v3905_v42 = vpop.eup %3904 }
 0x90e   :  { %v3907_v15 = vpop.eup %3906  ;;  %v2878_v38 = vadd.f32 1.0, %v3905_v42  ;;  %3908 = vpow2.f32 %v3682_v50 }
 0x90f   :  { %v2897_v27 = vadd.f32 1.0, %v3907_v15 }
 0x910   :  { %3910 = vrcp.f32 %v2878_v38  ;;  %v2890_v41 = vand.u32 2147483648, %v2878_v38  ;;  %v2888_v50 = vand.u32 2147483647, %v2878_v38  ;;  %vm2884_vm6 = vweird.f32 %v2878_v38 }
 0x911   :  { %3912 = vrcp.f32 %v2897_v27  ;;  %v2909_v42 = vand.u32 2147483648, %v2897_v27  ;;  %v2907_v8 = vand.u32 2147483647, %v2897_v27  ;;  %vm2903_vm7 = vweird.f32 %v2897_v27 }
 0x912   :  { %v2891_v39 = vor.u32 1.1754944e-38, %v2890_v41  ;;  %vm2889_vm10 = vcmp.eq.f32.partialorder %v2888_v50, 8.507059e+37 }
 0x913   :  { %vm2908_vm11 = vcmp.eq.f32.partialorder %v2907_v8, 8.507059e+37 }
 0x914   :  { %v3909_v25 = vpop.eup %3908 }
 0x915   :  { %v2917_v10 = vadd.f32 1.0, %v3909_v25 }
 0x916   :  { %v3911_v45 = vpop.eup %3910 }
 0x917   :  { %v3913_v2 = vpop.eup %3912  ;;  %v2880_v43 = vmul.f32 %v3911_v45, %v2878_v38  ;;  %3914 = vrcp.f32 %v2917_v10  ;;  %vm2885_vm4 = vweird.f32 %v3911_v45  ;;  %vm2923_vm13 = vweird.f32 %v2917_v10 }
 0x918   :  { %v2899_v21 = vmul.f32 %v3913_v2, %v2897_v27  ;;  %3916 = vtanh.f32 %v2873_v54  ;;  %vm2904_vm5 = vweird.f32 %v3913_v2  ;;  %vm2886_vm8 = vmor %vm2884_vm6, %vm2885_vm4  ;;  %v2927_v41 = vand.u32 2147483647, %v2917_v10 }
 0x919   :  { %v2881_v34 = vsub.f32 1.0, %v2880_v43  ;;  %vm2905_vm9 = vmor %vm2903_vm7, %vm2904_vm5  ;;  %v2910_v43 = vor.u32 1.1754944e-38, %v2909_v42 }
 0x91a   :  { %v2900_v6 = vsub.f32 1.0, %v2899_v21  ;;  %vm2928_vm15 = vcmp.eq.f32.partialorder %v2927_v41, 8.507059e+37  ;;  %v7262_v41 = vld [vmem:[#allocation46_spill] sm:$0xff] }
 0x91b   :  { %v2882_v15 = vmul.f32 %v3911_v45, %v2881_v34 }
 0x91c   :  { %v2901_v1 = vmul.f32 %v3913_v2, %v2900_v6 }
 0x91d   :  { %v3915_v7 = vpop.eup %3914  ;;  %v2883_v48 = vadd.f32 %v3911_v45, %v2882_v15 }
 0x91e   :  { %v2902_v25 = vadd.f32 %v3913_v2, %v2901_v1  ;;  %v2919_v20 = vmul.f32 %v3915_v7, %v2917_v10  ;;  %v3917_v54 = vpop.eup %3916  ;;  %vm2924_vm12 = vweird.f32 %v3915_v7  ;;  %v2929_v1 = vand.u32 2147483648, %v2917_v10  ;;  %v7249_v10 = vld [vmem:[#allocation66_spill] sm:$0xff] }
 0x91f   :  { %v2887_v21 = vsel %vm2886_vm8, %v3911_v45, %v2883_v48  ;;  %vm2925_vm14 = vmor %vm2923_vm13, %vm2924_vm12  ;;  %v7250_v48 = vld [vmem:[#allocation41_spill] sm:$0xff] }
 0x920   :  { %v2892_v30 = vsel %vm2889_vm10, %v2891_v39, %v2887_v21  ;;  %v2906_v34 = vsel %vm2905_vm9, %v3913_v2, %v2902_v25  ;;  %v2920_v32 = vsub.f32 1.0, %v2919_v20  ;;  %v2930_v42 = vor.u32 1.1754944e-38, %v2929_v1  ;;  %v7251_v39 = vld [vmem:[#allocation69_spill] sm:$0xff]  ;;  %v7252_v25 = vld [vmem:[#allocation27_spill] sm:$0xff]  ;;  %v7253_v20 = vld [vmem:[#allocation28_spill] sm:$0xff] }
 0x921   :  { %v2911_v6 = vsel %vm2908_vm11, %v2910_v43, %v2906_v34  ;;  %v2934_v46 = vmul.f32 %v3917_v54, %v2892_v30  ;;  %v7248_v30 = vld [vmem:[#allocation65_spill] sm:$0xff]  ;;  %v7254_v43 = vld [vmem:[#allocation44_spill] sm:$0xff]  ;;  %v7256_v54 = vld [vmem:[#allocation30_spill] sm:$0xff] }
 0x922   :  { %v2933_v51 = vmul.f32 %v2911_v6, %v6234_v35  ;;  %v2921_v15 = vmul.f32 %v3915_v7, %v2920_v32  ;;  %v7243_v35 = vld [vmem:[#allocation61_spill] sm:$0xff]  ;;  %v7246_v32 = vld [vmem:[#allocation39_spill] sm:$0xff]  ;;  %v7255_v21 = vld [vmem:[#allocation32_spill] sm:$0xff] }
 0x923   :  { %v7257_v34 = vld [vmem:[#allocation31_spill] sm:$0xff]  ;;  %v7258_v6 = vld [vmem:[#allocation37_spill] sm:$0xff] }
 0x924   :  { %v6318_v38 = vadd.f32 %v2934_v46, %v2933_v51  ;;  %v2922_v27 = vadd.f32 %v3915_v7, %v2921_v15  ;;  %v7244_v51 = vld [vmem:[#allocation63_spill] sm:$0xff]  ;;  %v7245_v46 = vld [vmem:[#allocation62_spill] sm:$0xff]  ;;  %v7261_v1 = vld [vmem:[#allocation33_spill] sm:$0xff] }
 0x925   :  { %v7259_v15 = vld [vmem:[#allocation34_spill] sm:$0xff] }
 0x926   :  { %3918 = vtanh.f32 %v6318_v38  ;;  %v2926_v45 = vsel %vm2925_vm14, %v3915_v7, %v2922_v27  ;;  %v7247_v7 = vld [vmem:[#allocation64_spill] sm:$0xff]  ;;  %v7260_v27 = vld [vmem:[#allocation35_spill] sm:$0xff] }
 0x927   :  { %v2931_v2 = vsel %vm2928_vm15, %v2930_v42, %v2926_v45  ;;  %v7263_v45 = vld [vmem:[#allocation38_spill] sm:$0xff]  ;;  %v7264_v42 = vld [vmem:[#allocation51_spill] sm:$0xff] }
 0x92c   :  { %v3919_v8 = vpop.eup %3918 }
 0x92d   :  { %v6321_v50 = vmul.f32 %v3919_v8, %v2931_v2  ;;  %v7265_v8 = vld [vmem:[#allocation40_spill] sm:$0xff]  ;;  %v7266_v2 = vld [vmem:[#allocation47_spill] sm:$0xff] }
 0x92f   :  { %7242 = vst [vmem:[#allocation52_spill] sm:$0xff] %v6321_v50  ;;  %2959 = vmatmul.f32.vlgmr.msra.gmra.mxu0 %v6321_v50  ;;  %2979 = vmatmul.f32.vlgmr.msra.gmra.mxu1 %v6321_v50 }
 0x930   :  { %2999 = vmatmul.f32.vlgmr.msra.gmra.mxu2 %v6321_v50  ;;  %3019 = vmatmul.f32.vlgmr.msrb.gmra.mxu3 %v6321_v50  ;;  %v7267_v50 = vld [vmem:[#allocation48_spill] sm:$0xff] }
 0x931   :  { %3247 = vmatpush.msra.mxu0 %v6035_v37  ;;  %3267 = vmatpush.msra.mxu1 %v6038_v57 }
 0x932   :  { %3287 = vmatpush.msra.mxu2 %v6041_v58  ;;  %3307 = vmatpush.msrb.mxu3 %v6044_v59 }
 0x933   :  { %3248 = vmatpush.msra.mxu0 %v6047_v18  ;;  %3268 = vmatpush.msra.mxu1 %v6050_v56 }
 0x934   :  { %3288 = vmatpush.msra.mxu2 %v6053_v16  ;;  %3308 = vmatpush.msrb.mxu3 %v6056_v49 }
 0x935   :  { %3249 = vmatpush.msra.mxu0 %v6059_v52  ;;  %3269 = vmatpush.msra.mxu1 %v6062_v14 }
 0x936   :  { %3289 = vmatpush.msra.mxu2 %v6065_v28  ;;  %3309 = vmatpush.msrb.mxu3 %v6068_v17 }
 0x937   :  { %3250 = vmatpush.msra.mxu0 %v6071_v40  ;;  %3270 = vmatpush.msra.mxu1 %v6074_v19 }
 0x938   :  { %3290 = vmatpush.msra.mxu2 %v6077_v29  ;;  %3310 = vmatpush.msrb.mxu3 %v6080_v26 }
 0x939   :  { %3251 = vmatpush.msra.mxu0 %v6083_v44  ;;  %3271 = vmatpush.msra.mxu1 %v6086_v22 }
 0x93a   :  { %3291 = vmatpush.msra.mxu2 %v6089_v31  ;;  %3311 = vmatpush.msrb.mxu3 %v6092_v36 }
 0x93b   :  { %3252 = vmatpush.msra.mxu0 %v6095_v60  ;;  %3272 = vmatpush.msra.mxu1 %v6098_v0 }
 0x93c   :  { %3292 = vmatpush.msra.mxu2 %v6101_v9  ;;  %3312 = vmatpush.msrb.mxu3 %v6104_v55 }
 0x93d   :  { %3253 = vmatpush.msra.mxu0 %v6107_v62  ;;  %3273 = vmatpush.msra.mxu1 %v6110_v63 }
 0x93e   :  { %3293 = vmatpush.msra.mxu2 %v6113_v24  ;;  %3313 = vmatpush.msrb.mxu3 %v6116_v4 }
 0x93f   :  { %3254 = vmatpush.msra.mxu0 %v6119_v5  ;;  %3274 = vmatpush.msra.mxu1 %v6122_v3 }
 0x940   :  { %3294 = vmatpush.msra.mxu2 %v6125_v12  ;;  %3314 = vmatpush.msrb.mxu3 %v6128_v53 }
 0x941   :  { %3255 = vmatpush.msra.mxu0 %v6131_v11  ;;  %3275 = vmatpush.msra.mxu1 %v6134_v13 }
 0x942   :  { %3295 = vmatpush.msra.mxu2 %v6137_v33  ;;  %3315 = vmatpush.msrb.mxu3 %v6140_v61 }
 0x943   :  { %3256 = vmatpush.msra.mxu0 %v6143_v23  ;;  %3276 = vmatpush.msra.mxu1 %v6146_v47 }
 0x944   :  { %3296 = vmatpush.msra.mxu2 %v7243_v35  ;;  %3316 = vmatpush.msrb.mxu3 %v7244_v51 }
 0x945   :  { %3257 = vmatpush.msra.mxu0 %v7245_v46  ;;  %3277 = vmatpush.msra.mxu1 %v7246_v32 }
 0x946   :  { %3297 = vmatpush.msra.mxu2 %v7247_v7  ;;  %3317 = vmatpush.msrb.mxu3 %v7248_v30 }
 0x947   :  { %3258 = vmatpush.msra.mxu0 %v7249_v10  ;;  %3278 = vmatpush.msra.mxu1 %v7250_v48 }
 0x948   :  { %3298 = vmatpush.msra.mxu2 %v7251_v39  ;;  %3318 = vmatpush.msrb.mxu3 %v7252_v25  ;;  %v7274_v39 = vld [vmem:[#allocation73_spill] sm:$0xff] }
 0x949   :  { %3259 = vmatpush.msra.mxu0 %v7253_v20  ;;  %3279 = vmatpush.msra.mxu1 %v7254_v43 }
 0x94a   :  { %3299 = vmatpush.msra.mxu2 %v7255_v21  ;;  %3319 = vmatpush.msrb.mxu3 %v7256_v54  ;;  %v7272_v21 = vld [vmem:[#allocation70_spill] sm:$0xff] }
 0x94b   :  { %3260 = vmatpush.msra.mxu0 %v7257_v34  ;;  %3280 = vmatpush.msra.mxu1 %v7258_v6  ;;  %v7268_v34 = vld [vmem:[#allocation49_spill] sm:$0xff]  ;;  %v7269_v6 = vld [vmem:[#allocation80_spill] sm:$0xff] }
 0x94c   :  { %3300 = vmatpush.msra.mxu2 %v7259_v15  ;;  %3320 = vmatpush.msrb.mxu3 %v7260_v27  ;;  %v7270_v15 = vld [vmem:[#allocation81_spill] sm:$0xff]  ;;  %v7271_v27 = vld [vmem:[#allocation82_spill] sm:$0xff] }
 0x94d   :  { %3261 = vmatpush.msra.mxu0 %v7261_v1  ;;  %3281 = vmatpush.msra.mxu1 %v7262_v41  ;;  %v2101_v54 = vadd.f32 %v7270_v15, %v7269_v6  ;;  %v2142_v1 = vadd.f32 %v7272_v21, %v7271_v27 }
 0x94e   :  { %3301 = vmatpush.msra.mxu2 %v7263_v45  ;;  %3321 = vmatpush.msrb.mxu3 %v7264_v42 }
 0x94f   :  { %3262 = vmatpush.msra.mxu0 %v7265_v8  ;;  %3282 = vmatpush.msra.mxu1 %v7266_v2  ;;  %v7273_v8 = vld [vmem:[#allocation59_spill] sm:$0xff] }
 0x950   :  { %3302 = vmatpush.msra.mxu2 %v7267_v50  ;;  %3322 = vmatpush.msrb.mxu3 %v7268_v34  ;;  %v2224_v2 = vadd.f32 %v7274_v39, %v7273_v8 }
 0x9ac   :  { %v2960_v43 = vpop.f32.mrf.mxu0  ;;  %v2980_v41 = vpop.f32.mrf.mxu1 }
 0x9ad   :  { %v3023_v20 = vadd.f32 %v2960_v43, %v2101_v54  ;;  %v3024_v45 = vadd.f32 %v2980_v41, %v2142_v1  ;;  %v7275_v54 = vld [vmem:[#allocation58_spill] sm:$0xff] }
 0x9af   :  { %v3683_v25 = vmul.f32 -1.442695, %v3023_v20  ;;  %v3684_v42 = vmul.f32 -1.442695, %v3024_v45  ;;  %v7276_v20 = vld [vmem:[#allocation74_spill] sm:$0xff] }
 0x9b0   :  { %v2183_v1 = vadd.f32 %v7276_v20, %v7275_v54 }
 0x9b1   :  { %3920 = vpow2.f32 %v3683_v25 }
 0x9b2   :  { %3922 = vpow2.f32 %v3684_v42 }
 0x9b3   :  { %v3020_v50 = vpop.f32.mrf.mxu3  ;;  %v3000_v21 = vpop.f32.mrf.mxu2 }
 0x9b4   :  { %v3026_v48 = vadd.f32 %v3020_v50, %v2224_v2  ;;  %v3025_v45 = vadd.f32 %v3000_v21, %v2183_v1 }
 0x9b6   :  { %v3685_v34 = vmul.f32 -1.442695, %v3026_v48 }
 0x9b7   :  { %v3921_v10 = vpop.eup %3920 }
 0x9b8   :  { %v3923_v30 = vpop.eup %3922  ;;  %v3030_v15 = vadd.f32 1.0, %v3921_v10  ;;  %3924 = vpow2.f32 %v3685_v34 }
 0x9b9   :  { %v3049_v6 = vadd.f32 1.0, %v3923_v30 }
 0x9ba   :  { %3926 = vrcp.f32 %v3030_v15  ;;  %v3042_v8 = vand.u32 2147483648, %v3030_v15  ;;  %v3040_v34 = vand.u32 2147483647, %v3030_v15  ;;  %vm3036_vm2 = vweird.f32 %v3030_v15 }
 0x9bb   :  { %3928 = vrcp.f32 %v3049_v6  ;;  %v3061_v10 = vand.u32 2147483648, %v3049_v6  ;;  %v3059_v7 = vand.u32 2147483647, %v3049_v6  ;;  %vm3055_vm3 = vweird.f32 %v3049_v6 }
 0x9bc   :  { %v3043_v21 = vor.u32 1.1754944e-38, %v3042_v8  ;;  %vm3041_vm6 = vcmp.eq.f32.partialorder %v3040_v34, 8.507059e+37 }
 0x9bd   :  { %vm3060_vm7 = vcmp.eq.f32.partialorder %v3059_v7, 8.507059e+37 }
 0x9be   :  { %v3925_v43 = vpop.eup %3924 }
 0x9bf   :  { %v3069_v25 = vadd.f32 1.0, %v3925_v43 }
 0x9c0   :  { %v3927_v41 = vpop.eup %3926 }
 0x9c1   :  { %v3929_v39 = vpop.eup %3928  ;;  %v3032_v42 = vmul.f32 %v3927_v41, %v3030_v15  ;;  %3930 = vrcp.f32 %v3069_v25  ;;  %vm3037_vm0 = vweird.f32 %v3927_v41  ;;  %vm3075_vm9 = vweird.f32 %v3069_v25 }
 0x9c2   :  { %v3051_v50 = vmul.f32 %v3929_v39, %v3049_v6  ;;  %3932 = vtanh.f32 %v3025_v45  ;;  %vm3056_vm1 = vweird.f32 %v3929_v39  ;;  %vm3038_vm4 = vmor %vm3036_vm2, %vm3037_vm0  ;;  %v3079_v8 = vand.u32 2147483647, %v3069_v25 }
 0x9c3   :  { %v3033_v48 = vsub.f32 1.0, %v3032_v42  ;;  %vm3057_vm5 = vmor %vm3055_vm3, %vm3056_vm1  ;;  %v3062_v42 = vor.u32 1.1754944e-38, %v3061_v10 }
 0x9c4   :  { %v3052_v2 = vsub.f32 1.0, %v3051_v50  ;;  %vm3080_vm11 = vcmp.eq.f32.partialorder %v3079_v8, 8.507059e+37 }
 0x9c5   :  { %v3034_v30 = vmul.f32 %v3927_v41, %v3033_v48 }
 0x9c6   :  { %v3053_v27 = vmul.f32 %v3929_v39, %v3052_v2 }
 0x9c7   :  { %v3931_v32 = vpop.eup %3930  ;;  %v3035_v20 = vadd.f32 %v3927_v41, %v3034_v30 }
 0x9c8   :  { %v3054_v43 = vadd.f32 %v3929_v39, %v3053_v27  ;;  %v3071_v1 = vmul.f32 %v3931_v32, %v3069_v25  ;;  %v3933_v45 = vpop.eup %3932  ;;  %vm3076_vm8 = vweird.f32 %v3931_v32  ;;  %v3081_v27 = vand.u32 2147483648, %v3069_v25 }
 0x9c9   :  { %v3039_v50 = vsel %vm3038_vm4, %v3927_v41, %v3035_v20  ;;  %vm3077_vm10 = vmor %vm3075_vm9, %vm3076_vm8 }
 0x9ca   :  { %v3044_v54 = vsel %vm3041_vm6, %v3043_v21, %v3039_v50  ;;  %v3058_v48 = vsel %vm3057_vm5, %v3929_v39, %v3054_v43  ;;  %v3072_v46 = vsub.f32 1.0, %v3071_v1  ;;  %v3082_v10 = vor.u32 1.1754944e-38, %v3081_v27  ;;  %v7309_v50 = vld [vmem:[#allocation58_spill] sm:$0xff] }
 0x9cb   :  { %v3063_v2 = vsel %vm3060_vm7, %v3062_v42, %v3058_v48  ;;  %v3086_v51 = vmul.f32 %v3933_v45, %v3044_v54  ;;  %v7310_v45 = vld [vmem:[#allocation43_spill] sm:$0xff] }
 0x9cc   :  { %v3085_v35 = vmul.f32 %v3063_v2, %v6318_v38  ;;  %v3073_v30 = vmul.f32 %v3931_v32, %v3072_v46  ;;  %v7307_v38 = vld [vmem:[#allocation59_spill] sm:$0xff]  ;;  %v2186_v48 = vadd.f32 %v7310_v45, %v7309_v50 }
 0x9cd   :  { %v7313_v45 = vld [vmem:[#allocation55_spill] sm:$0xff] }
 0x9ce   :  { %v6400_v15 = vadd.f32 %v3086_v51, %v3085_v35  ;;  %v3074_v6 = vadd.f32 %v3931_v32, %v3073_v30  ;;  %v7308_v35 = vld [vmem:[#allocation79_spill] sm:$0xff] }
 0x9cf   :  { %v2227_v51 = vadd.f32 %v7308_v35, %v7307_v38 }
 0x9d0   :  { %3934 = vtanh.f32 %v6400_v15  ;;  %v3078_v41 = vsel %vm3077_vm10, %v3931_v32, %v3074_v6 }
 0x9d1   :  { %v3083_v39 = vsel %vm3080_vm11, %v3082_v10, %v3078_v41 }
 0x9d6   :  { %v3935_v7 = vpop.eup %3934 }
 0x9d7   :  { %v6403_v34 = vmul.f32 %v3935_v7, %v3083_v39 }
 0x9d9   :  { %3111 = vmatmul.f32.vlgmr.msrb.gmra.mxu0 %v6403_v34  ;;  %3131 = vmatmul.f32.vlgmr.msrb.gmra.mxu1 %v6403_v34 }
 0x9da   :  { %3151 = vmatmul.f32.vlgmr.msrb.gmra.mxu2 %v6403_v34  ;;  %3171 = vmatmul.f32.vlgmr.msra.gmra.mxu3 %v6403_v34 }
 0x9db   :  { %3399 = vmatpush.msrb.mxu0 %v6035_v37  ;;  %3419 = vmatpush.msrb.mxu1 %v6038_v57  ;;  %v7277_v37 = vld [vmem:[#allocation61_spill] sm:$0xff]  ;;  %v7278_v57 = vld [vmem:[#allocation63_spill] sm:$0xff] }
 0x9dc   :  { %3439 = vmatpush.msrb.mxu2 %v6041_v58  ;;  %3459 = vmatpush.msra.mxu3 %v6044_v59  ;;  %v7279_v58 = vld [vmem:[#allocation62_spill] sm:$0xff]  ;;  %v7280_v59 = vld [vmem:[#allocation39_spill] sm:$0xff] }
 0x9dd   :  { %3400 = vmatpush.msrb.mxu0 %v6047_v18  ;;  %3420 = vmatpush.msrb.mxu1 %v6050_v56  ;;  %v7281_v18 = vld [vmem:[#allocation64_spill] sm:$0xff]  ;;  %v7282_v56 = vld [vmem:[#allocation65_spill] sm:$0xff] }
 0x9de   :  { %3440 = vmatpush.msrb.mxu2 %v6053_v16  ;;  %3460 = vmatpush.msra.mxu3 %v6056_v49  ;;  %v7283_v16 = vld [vmem:[#allocation66_spill] sm:$0xff]  ;;  %v7284_v49 = vld [vmem:[#allocation41_spill] sm:$0xff] }
 0x9df   :  { %3401 = vmatpush.msrb.mxu0 %v6059_v52  ;;  %3421 = vmatpush.msrb.mxu1 %v6062_v14  ;;  %v7285_v52 = vld [vmem:[#allocation69_spill] sm:$0xff]  ;;  %v7286_v14 = vld [vmem:[#allocation27_spill] sm:$0xff] }
 0x9e0   :  { %3441 = vmatpush.msrb.mxu2 %v6065_v28  ;;  %3461 = vmatpush.msra.mxu3 %v6068_v17  ;;  %v7287_v28 = vld [vmem:[#allocation28_spill] sm:$0xff] }
 0x9e1   :  { %3402 = vmatpush.msrb.mxu0 %v6071_v40  ;;  %3422 = vmatpush.msrb.mxu1 %v6074_v19  ;;  %v7288_v17 = vld [vmem:[#allocation44_spill] sm:$0xff]  ;;  %v7290_v19 = vld [vmem:[#allocation30_spill] sm:$0xff] }
 0x9e2   :  { %3442 = vmatpush.msrb.mxu2 %v6077_v29  ;;  %3462 = vmatpush.msra.mxu3 %v6080_v26  ;;  %v7289_v40 = vld [vmem:[#allocation32_spill] sm:$0xff]  ;;  %v7291_v29 = vld [vmem:[#allocation31_spill] sm:$0xff]  ;;  %v7292_v26 = vld [vmem:[#allocation37_spill] sm:$0xff] }
 0x9e3   :  { %3403 = vmatpush.msrb.mxu0 %v6083_v44  ;;  %3423 = vmatpush.msrb.mxu1 %v6086_v22  ;;  %v7293_v44 = vld [vmem:[#allocation34_spill] sm:$0xff]  ;;  %v7294_v22 = vld [vmem:[#allocation35_spill] sm:$0xff] }
 0x9e4   :  { %3443 = vmatpush.msrb.mxu2 %v6089_v31  ;;  %3463 = vmatpush.msra.mxu3 %v6092_v36  ;;  %v7295_v31 = vld [vmem:[#allocation33_spill] sm:$0xff]  ;;  %v7296_v36 = vld [vmem:[#allocation46_spill] sm:$0xff] }
 0x9e5   :  { %3404 = vmatpush.msrb.mxu0 %v6095_v60  ;;  %3424 = vmatpush.msrb.mxu1 %v6098_v0  ;;  %v7297_v60 = vld [vmem:[#allocation38_spill] sm:$0xff]  ;;  %v7298_v0 = vld [vmem:[#allocation51_spill] sm:$0xff] }
 0x9e6   :  { %3444 = vmatpush.msrb.mxu2 %v6101_v9  ;;  %3464 = vmatpush.msra.mxu3 %v6104_v55  ;;  %v7299_v9 = vld [vmem:[#allocation40_spill] sm:$0xff]  ;;  %v7300_v55 = vld [vmem:[#allocation47_spill] sm:$0xff] }
 0x9e7   :  { %3405 = vmatpush.msrb.mxu0 %v6107_v62  ;;  %3425 = vmatpush.msrb.mxu1 %v6110_v63  ;;  %v7301_v62 = vld [vmem:[#allocation48_spill] sm:$0xff]  ;;  %v7302_v63 = vld [vmem:[#allocation49_spill] sm:$0xff] }
 0x9e8   :  { %3445 = vmatpush.msrb.mxu2 %v6113_v24  ;;  %3465 = vmatpush.msra.mxu3 %v6116_v4  ;;  %v7303_v24 = vld [vmem:[#allocation80_spill] sm:$0xff]  ;;  %v7304_v4 = vld [vmem:[#allocation71_spill] sm:$0xff] }
 0x9e9   :  { %3406 = vmatpush.msrb.mxu0 %v6119_v5  ;;  %3426 = vmatpush.msrb.mxu1 %v6122_v3  ;;  %v2104_v5 = vadd.f32 %v7304_v4, %v7303_v24  ;;  %v7305_v3 = vld [vmem:[#allocation82_spill] sm:$0xff] }
 0x9ea   :  { %3446 = vmatpush.msrb.mxu2 %v6125_v12  ;;  %3466 = vmatpush.msra.mxu3 %v6128_v53  ;;  %v7306_v12 = vld [vmem:[#allocation72_spill] sm:$0xff] }
 0x9eb   :  { %3407 = vmatpush.msrb.mxu0 %v6131_v11  ;;  %3427 = vmatpush.msrb.mxu1 %v6134_v13  ;;  %v2145_v53 = vadd.f32 %v7306_v12, %v7305_v3 }
 0x9ec   :  { %3447 = vmatpush.msrb.mxu2 %v6137_v33  ;;  %3467 = vmatpush.msra.mxu3 %v6140_v61 }
 0x9ed   :  { %3408 = vmatpush.msrb.mxu0 %v6143_v23  ;;  %3428 = vmatpush.msrb.mxu1 %v6146_v47 }
 0x9ee   :  { %3448 = vmatpush.msrb.mxu2 %v7277_v37  ;;  %3468 = vmatpush.msra.mxu3 %v7278_v57 }
 0x9ef   :  { %3409 = vmatpush.msrb.mxu0 %v7279_v58  ;;  %3429 = vmatpush.msrb.mxu1 %v7280_v59 }
 0x9f0   :  { %3449 = vmatpush.msrb.mxu2 %v7281_v18  ;;  %3469 = vmatpush.msra.mxu3 %v7282_v56 }
 0x9f1   :  { %3410 = vmatpush.msrb.mxu0 %v7283_v16  ;;  %3430 = vmatpush.msrb.mxu1 %v7284_v49 }
 0x9f2   :  { %3450 = vmatpush.msrb.mxu2 %v7285_v52  ;;  %3470 = vmatpush.msra.mxu3 %v7286_v14 }
 0x9f3   :  { %3411 = vmatpush.msrb.mxu0 %v7287_v28  ;;  %3431 = vmatpush.msrb.mxu1 %v7288_v17 }
 0x9f4   :  { %3451 = vmatpush.msrb.mxu2 %v7289_v40  ;;  %3471 = vmatpush.msra.mxu3 %v7290_v19 }
 0x9f5   :  { %3412 = vmatpush.msrb.mxu0 %v7291_v29  ;;  %3432 = vmatpush.msrb.mxu1 %v7292_v26 }
 0x9f6   :  { %3452 = vmatpush.msrb.mxu2 %v7293_v44  ;;  %3472 = vmatpush.msra.mxu3 %v7294_v22 }
 0x9f7   :  { %3413 = vmatpush.msrb.mxu0 %v7295_v31  ;;  %3433 = vmatpush.msrb.mxu1 %v7296_v36 }
 0x9f8   :  { %3453 = vmatpush.msrb.mxu2 %v7297_v60  ;;  %3473 = vmatpush.msra.mxu3 %v7298_v0 }
 0x9f9   :  { %3414 = vmatpush.msrb.mxu0 %v7299_v9  ;;  %3434 = vmatpush.msrb.mxu1 %v7300_v55 }
 0x9fa   :  { %3454 = vmatpush.msrb.mxu2 %v7301_v62  ;;  %3474 = vmatpush.msra.mxu3 %v7302_v63 }
 0xa56   :  { %v3112_v11 = vpop.f32.mrf.mxu0  ;;  %v3132_v13 = vpop.f32.mrf.mxu1 }
 0xa57   :  { %v3175_v33 = vadd.f32 %v3112_v11, %v2104_v5  ;;  %v3176_v61 = vadd.f32 %v3132_v13, %v2145_v53  ;;  %v3569_v53 = vld [vmem:[#allocation18 + $0x70] sm:$0xff]  ;;  %v3568_v11 = vld [vmem:[#allocation18 + $0x68] sm:$0xff]  ;;  %v3567_v13 = vld [vmem:[#allocation18 + $0x60] sm:$0xff] }
 0xa59   :  { %v3686_v23 = vmul.f32 -1.442695, %v3175_v33  ;;  %v3687_v47 = vmul.f32 -1.442695, %v3176_v61  ;;  %v3566_v33 = vld [vmem:[#allocation18 + $0x58] sm:$0xff]  ;;  %v7311_v61 = vld [vmem:[#allocation84_spill] sm:$0xff] }
 0xa5b   :  { %3936 = vpow2.f32 %v3686_v23  ;;  %v2107_v23 = vadd.f32 %v7311_v61, %v7303_v24 }
 0xa5c   :  { %3938 = vpow2.f32 %v3687_v47  ;;  %v7312_v47 = vld [vmem:[#allocation36_spill] sm:$0xff] }
 0xa5d   :  { %v3172_v46 = vpop.f32.mrf.mxu3  ;;  %v3152_v1 = vpop.f32.mrf.mxu2  ;;  %v2148_v35 = vadd.f32 %v7312_v47, %v7305_v3 }
 0xa5e   :  { %v3178_v32 = vadd.f32 %v3172_v46, %v2227_v51  ;;  %v3177_v6 = vadd.f32 %v3152_v1, %v2186_v48  ;;  %v3563_v1 = vld [vmem:[#allocation18 + $0x40] sm:$0xff]  ;;  %v2230_v48 = vadd.f32 %v7313_v45, %v7307_v38 }
 0xa60   :  { %v3688_v54 = vmul.f32 -1.442695, %v3178_v32  ;;  %v3565_v32 = vld [vmem:[#allocation18 + $0x50] sm:$0xff] }
 0xa61   :  { %v3937_v25 = vpop.eup %3936 }
 0xa62   :  { %v3939_v20 = vpop.eup %3938  ;;  %v3182_v21 = vadd.f32 1.0, %v3937_v25  ;;  %3940 = vpow2.f32 %v3688_v54 }
 0xa63   :  { %v3201_v43 = vadd.f32 1.0, %v3939_v20  ;;  %v3564_v20 = vld [vmem:[#allocation18 + $0x48] sm:$0xff] }
 0xa64   :  { %3942 = vrcp.f32 %v3182_v21  ;;  %v3194_v39 = vand.u32 2147483648, %v3182_v21  ;;  %v3192_v58 = vand.u32 2147483647, %v3182_v21  ;;  %vm3188_vm14 = vweird.f32 %v3182_v21 }
 0xa65   :  { %3944 = vrcp.f32 %v3201_v43  ;;  %v3213_v37 = vand.u32 2147483648, %v3201_v43  ;;  %v3211_v18 = vand.u32 2147483647, %v3201_v43  ;;  %vm3207_vm15 = vweird.f32 %v3201_v43 }
 0xa66   :  { %v3195_v49 = vor.u32 1.1754944e-38, %v3194_v39  ;;  %vm3193_vm2 = vcmp.eq.f32.partialorder %v3192_v58, 8.507059e+37  ;;  %v3557_v58 = vld [vmem:[#allocation18 + $0x10] sm:$0xff] }
 0xa67   :  { %v3214_v28 = vor.u32 1.1754944e-38, %v3213_v37  ;;  %vm3212_vm3 = vcmp.eq.f32.partialorder %v3211_v18, 8.507059e+37 }
 0xa68   :  { %v3941_v42 = vpop.eup %3940 }
 0xa69   :  { %v3221_v2 = vadd.f32 1.0, %v3941_v42  ;;  %v3562_v42 = vld [vmem:[#allocation18 + $0x38] sm:$0xff] }
 0xa6a   :  { %v3943_v30 = vpop.eup %3942 }
 0xa6b   :  { %v3945_v27 = vpop.eup %3944  ;;  %v3184_v8 = vmul.f32 %v3943_v30, %v3182_v21  ;;  %3946 = vrcp.f32 %v3221_v2  ;;  %vm3189_vm12 = vweird.f32 %v3943_v30  ;;  %v3233_v9 = vand.u32 2147483648, %v3221_v2 }
 0xa6c   :  { %v3203_v41 = vmul.f32 %v3945_v27, %v3201_v43  ;;  %3948 = vtanh.f32 %v3177_v6  ;;  %vm3208_vm13 = vweird.f32 %v3945_v27  ;;  %vm3190_vm0 = vmor %vm3188_vm14, %vm3189_vm12  ;;  %vm3227_vm5 = vweird.f32 %v3221_v2 }
 0xa6d   :  { %v3185_v10 = vsub.f32 1.0, %v3184_v8  ;;  %vm3209_vm1 = vmor %vm3207_vm15, %vm3208_vm13  ;;  %v3231_v55 = vand.u32 2147483647, %v3221_v2  ;;  %v3234_v63 = vor.u32 1.1754944e-38, %v3233_v9 }
 0xa6e   :  { %v3204_v7 = vsub.f32 1.0, %v3203_v41  ;;  %v3559_v41 = vld [vmem:[#allocation18 + $0x20] sm:$0xff] }
 0xa6f   :  { %v3186_v57 = vmul.f32 %v3943_v30, %v3185_v10  ;;  %vm3232_vm7 = vcmp.eq.f32.partialorder %v3231_v55, 8.507059e+37 }
 0xa70   :  { %v3205_v59 = vmul.f32 %v3945_v27, %v3204_v7 }
 0xa71   :  { %v3947_v56 = vpop.eup %3946  ;;  %v3187_v16 = vadd.f32 %v3943_v30, %v3186_v57  ;;  %v3558_v57 = vld [vmem:[#allocation18 + $0x18] sm:$0xff] }
 0xa72   :  { %v3206_v52 = vadd.f32 %v3945_v27, %v3205_v59  ;;  %v3223_v14 = vmul.f32 %v3947_v56, %v3221_v2  ;;  %v3949_v40 = vpop.eup %3948  ;;  %vm3228_vm4 = vweird.f32 %v3947_v56  ;;  %v3561_v2 = vld [vmem:[#allocation18 + $0x30] sm:$0xff]  ;;  %v3556_v59 = vld [vmem:[#allocation18 + $0x8] sm:$0xff] }
 0xa73   :  { %v3191_v17 = vsel %vm3190_vm0, %v3943_v30, %v3187_v16  ;;  %vm3229_vm6 = vmor %vm3227_vm5, %vm3228_vm4  ;;  %v7314_v16 = vld [vmem:[#allocation54_spill] sm:$0xff] }
 0xa74   :  { %v3196_v19 = vsel %vm3193_vm2, %v3195_v49, %v3191_v17  ;;  %v3210_v29 = vsel %vm3209_vm1, %v3945_v27, %v3206_v52  ;;  %v3224_v26 = vsub.f32 1.0, %v3223_v14  ;;  %v3560_v27 = vld [vmem:[#allocation18 + $0x28] sm:$0xff]  ;;  %v2189_v49 = vadd.f32 %v7314_v16, %v7309_v50  ;;  %v3555_v52 = vld [vmem:[#allocation18] sm:$0xff] }
 0xa75   :  { %v3215_v44 = vsel %vm3212_vm3, %v3214_v28, %v3210_v29  ;;  %v3238_v22 = vmul.f32 %v3949_v40, %v3196_v19 }
 0xa76   :  { %v3237_v31 = vmul.f32 %v3215_v44, %v6400_v15  ;;  %v3225_v36 = vmul.f32 %v3947_v56, %v3224_v26  ;;  %v3570_v15 = vld [vmem:[#allocation18 + $0x78] sm:$0xff] }
 0xa78   :  { %v6482_v60 = vadd.f32 %v3238_v22, %v3237_v31  ;;  %v3226_v0 = vadd.f32 %v3947_v56, %v3225_v36 }
 0xa7a   :  { %3950 = vtanh.f32 %v6482_v60  ;;  %v3230_v62 = vsel %vm3229_vm6, %v3947_v56, %v3226_v0 }
 0xa7b   :  { %v3235_v5 = vsel %vm3232_vm7, %v3234_v63, %v3230_v62 }
 0xa80   :  { %v3951_v4 = vpop.eup %3950 }
 0xa81   :  { %v6485_v12 = vmul.f32 %v3951_v4, %v3235_v5 }
 0xa83   :  { %3263 = vmatmul.f32.vlgmr.msra.gmra.mxu0 %v6485_v12  ;;  %3283 = vmatmul.f32.vlgmr.msra.gmra.mxu1 %v6485_v12 }
 0xa84   :  { %3303 = vmatmul.f32.vlgmr.msra.gmra.mxu2 %v6485_v12  ;;  %3323 = vmatmul.f32.vlgmr.msrb.gmra.mxu3 %v6485_v12 }
 0xa85   :  { %3575 = vmatpush.msra.mxu0 %v3570_v15 }
 0xa87   :  { %3576 = vmatpush.msra.mxu0 %v3569_v53 }
 0xa89   :  { %3577 = vmatpush.msra.mxu0 %v3568_v11 }
 0xa8b   :  { %3578 = vmatpush.msra.mxu0 %v3567_v13 }
 0xa8d   :  { %3579 = vmatpush.msra.mxu0 %v3566_v33 }
 0xa8f   :  { %3580 = vmatpush.msra.mxu0 %v3565_v32 }
 0xa91   :  { %3581 = vmatpush.msra.mxu0 %v3564_v20 }
 0xa93   :  { %3582 = vmatpush.msra.mxu0 %v3563_v1 }
 0xa95   :  { %3583 = vmatpush.msra.mxu0 %v3562_v42 }
 0xa97   :  { %3584 = vmatpush.msra.mxu0 %v3561_v2  ;;  %v7317_v2 = vld [vmem:[#allocation45_spill] sm:$0xff] }
 0xa99   :  { %3585 = vmatpush.msra.mxu0 %v3560_v27 }
 0xa9b   :  { %3586 = vmatpush.msra.mxu0 %v3559_v41 }
 0xa9d   :  { %3587 = vmatpush.msra.mxu0 %v3558_v57 }
 0xa9f   :  { %3588 = vmatpush.msra.mxu0 %v3557_v58 }
 0xaa1   :  { %3589 = vmatpush.msra.mxu0 %v3556_v59 }
 0xaa3   :  { %3590 = vmatpush.msra.mxu0 %v3555_v52 }
 0xb00   :  { %v3264_v51 = vpop.f32.mrf.mxu0  ;;  %v3284_v46 = vpop.f32.mrf.mxu1 }
 0xb01   :  { %v3327_v54 = vadd.f32 %v3264_v51, %v2107_v23  ;;  %v3328_v25 = vadd.f32 %v3284_v46, %v2148_v35 }
 0xb03   :  { %v3689_v21 = vmul.f32 -1.442695, %v3327_v54  ;;  %v3690_v43 = vmul.f32 -1.442695, %v3328_v25 }
 0xb05   :  { %3952 = vpow2.f32 %v3689_v21 }
 0xb06   :  { %3954 = vpow2.f32 %v3690_v43 }
 0xb07   :  { %v3324_v30 = vpop.f32.mrf.mxu3  ;;  %v3304_v18 = vpop.f32.mrf.mxu2 }
 0xb08   :  { %v3330_v6 = vadd.f32 %v3324_v30, %v2230_v48  ;;  %v3329_v17 = vadd.f32 %v3304_v18, %v2189_v49  ;;  %v7316_v48 = vld [vmem:[#allocation29_spill] sm:$0xff]  ;;  %v7318_v30 = vld [vmem:[#allocation52_spill] sm:$0xff] }
 0xb0a   :  { %v3691_v8 = vmul.f32 -1.442695, %v3330_v6  ;;  %v7319_v6 = vld [vmem:[#allocation75_spill] sm:$0xff] }
 0xb0b   :  { %v3953_v10 = vpop.eup %3952  ;;  %v2110_v27 = vadd.f32 %v7319_v6, %v7303_v24 }
 0xb0c   :  { %v3955_v7 = vpop.eup %3954  ;;  %v3334_v39 = vadd.f32 1.0, %v3953_v10  ;;  %3956 = vpow2.f32 %v3691_v8  ;;  %v7320_v8 = vld [vmem:[#allocation76_spill] sm:$0xff] }
 0xb0d   :  { %v3353_v37 = vadd.f32 1.0, %v3955_v7  ;;  %v2151_v41 = vadd.f32 %v7320_v8, %v7305_v3 }
 0xb0e   :  { %3958 = vrcp.f32 %v3334_v39  ;;  %v3346_v22 = vand.u32 2147483648, %v3334_v39  ;;  %v3344_v0 = vand.u32 2147483647, %v3334_v39  ;;  %vm3340_vm10 = vweird.f32 %v3334_v39 }
 0xb0f   :  { %3960 = vrcp.f32 %v3353_v37  ;;  %v3365_v31 = vand.u32 2147483648, %v3353_v37  ;;  %v3363_v55 = vand.u32 2147483647, %v3353_v37  ;;  %vm3359_vm11 = vweird.f32 %v3353_v37 }
 0xb10   :  { %v3347_v4 = vor.u32 1.1754944e-38, %v3346_v22  ;;  %vm3345_vm14 = vcmp.eq.f32.partialorder %v3344_v0, 8.507059e+37 }
 0xb11   :  { %v3366_v53 = vor.u32 1.1754944e-38, %v3365_v31  ;;  %vm3364_vm15 = vcmp.eq.f32.partialorder %v3363_v55, 8.507059e+37 }
 0xb12   :  { %v3957_v56 = vpop.eup %3956 }
 0xb13   :  { %v3373_v14 = vadd.f32 1.0, %v3957_v56 }
 0xb14   :  { %v3959_v28 = vpop.eup %3958 }
 0xb15   :  { %v3961_v40 = vpop.eup %3960  ;;  %v3336_v19 = vmul.f32 %v3959_v28, %v3334_v39  ;;  %3962 = vrcp.f32 %v3373_v14  ;;  %vm3341_vm8 = vweird.f32 %v3959_v28  ;;  %v3385_v25 = vand.u32 2147483648, %v3373_v14 }
 0xb16   :  { %v3355_v29 = vmul.f32 %v3961_v40, %v3353_v37  ;;  %3964 = vtanh.f32 %v3329_v17  ;;  %vm3360_vm9 = vweird.f32 %v3961_v40  ;;  %vm3342_vm12 = vmor %vm3340_vm10, %vm3341_vm8  ;;  %vm3379_vm1 = vweird.f32 %v3373_v14 }
 0xb17   :  { %v3337_v26 = vsub.f32 1.0, %v3336_v19  ;;  %vm3361_vm13 = vmor %vm3359_vm11, %vm3360_vm9  ;;  %v3383_v20 = vand.u32 2147483647, %v3373_v14  ;;  %v3386_v43 = vor.u32 1.1754944e-38, %v3385_v25 }
 0xb18   :  { %v3356_v44 = vsub.f32 1.0, %v3355_v29  ;;  %v7322_v29 = vld [vmem:[#allocation57_spill] sm:$0xff] }
 0xb19   :  { %v3338_v36 = vmul.f32 %v3959_v28, %v3337_v26  ;;  %vm3384_vm3 = vcmp.eq.f32.partialorder %v3383_v20, 8.507059e+37  ;;  %v2192_v26 = vadd.f32 %v7322_v29, %v7309_v50 }
 0xb1a   :  { %v3357_v9 = vmul.f32 %v3961_v40, %v3356_v44 }
 0xb1b   :  { %v3963_v62 = vpop.eup %3962  ;;  %v3339_v63 = vadd.f32 %v3959_v28, %v3338_v36 }
 0xb1c   :  { %v3358_v5 = vadd.f32 %v3961_v40, %v3357_v9  ;;  %v3375_v15 = vmul.f32 %v3963_v62, %v3373_v14  ;;  %v3965_v13 = vpop.eup %3964  ;;  %vm3380_vm0 = vweird.f32 %v3963_v62 }
 0xb1d   :  { %v3343_v11 = vsel %vm3342_vm12, %v3959_v28, %v3339_v63  ;;  %vm3381_vm2 = vmor %vm3379_vm1, %vm3380_vm0 }
 0xb1e   :  { %v3348_v33 = vsel %vm3345_vm14, %v3347_v4, %v3343_v11  ;;  %v3362_v61 = vsel %vm3361_vm13, %v3961_v40, %v3358_v5  ;;  %v3376_v23 = vsub.f32 1.0, %v3375_v15 }
 0xb1f   :  { %v3367_v47 = vsel %vm3364_vm15, %v3366_v53, %v3362_v61  ;;  %v3390_v35 = vmul.f32 %v3965_v13, %v3348_v33 }
 0xb20   :  { %v3389_v51 = vmul.f32 %v3367_v47, %v6482_v60  ;;  %v3377_v46 = vmul.f32 %v3963_v62, %v3376_v23  ;;  %v7315_v60 = vld [vmem:[#allocation60_spill] sm:$0xff] }
 0xb22   :  { %v6500_v32 = vadd.f32 %v3390_v35, %v3389_v51  ;;  %v3378_v54 = vadd.f32 %v3963_v62, %v3377_v46 }
 0xb24   :  { %3966 = vtanh.f32 %v6500_v32  ;;  %v3382_v21 = vsel %vm3381_vm2, %v3963_v62, %v3378_v54 }
 0xb25   :  { %v3387_v42 = vsel %vm3384_vm3, %v3386_v43, %v3382_v21 }
 0xb2a   :  { %v3967_v1 = vpop.eup %3966 }
 0xb2b   :  { %v3393_v45 = vmul.f32 %v3967_v1, %v3387_v42 }
 0xb2d   :  { %3415 = vmatmul.f32.vlgmr.msrb.gmra.mxu0 %v3393_v45  ;;  %3435 = vmatmul.f32.vlgmr.msrb.gmra.mxu1 %v3393_v45 }
 0xb2e   :  { %3455 = vmatmul.f32.vlgmr.msrb.gmra.mxu2 %v3393_v45  ;;  %3475 = vmatmul.f32.vlgmr.msra.gmra.mxu3 %v3393_v45 }
 0xb35   :  { %3591 = vmatmul.f32.vlgmr.msra.gmra.mxu0 %v7315_v60 }
 0xb3d   :  { %3594 = vmatmul.f32.gmra.mxu0 %v7316_v48 }
 0xb45   :  { %3597 = vmatmul.f32.gmra.mxu0 %v7317_v2 }
 0xb4d   :  { %3600 = vmatmul.f32.gmra.mxu0 %v7318_v30 }
 0xb55   :  { %3603 = vmatmul.f32.gmra.mxu0 %v6403_v34  ;;  %v6516_v34 = vld [vmem:[%s6547_s10] ss:$0 sm:$0xff]  ;;  %s4378_s10 = smov [#allocation19]  }
 0xb56   :  { %s3628_s21 = sshll.u32 %s4378_s10, 4  ;;  %s3629_s21 = int_to_ptr.vmem [resolvable:$true] %s3628_s21 }
 0xb5d   :  { %3606 = vmatmul.f32.gmra.mxu0 %v6485_v12  ;;  %v7321_v12 = vld [vmem:[#allocation56_spill] sm:$0xff] }
 0xb5e   :  { %v2233_v59 = vadd.f32 %v7321_v12, %v7307_v38 }
 0xb65   :  { %3609 = vmatmul.f32.gmra.mxu0 %v3393_v45 }
 0xbaa   :  { %v3416_v10 = vpop.f32.mrf.mxu0  ;;  %v3436_v7 = vpop.f32.mrf.mxu1 }
 0xbab   :  { %v3479_v39 = vadd.f32 %v3416_v10, %v2110_v27  ;;  %v3480_v37 = vadd.f32 %v3436_v7, %v2151_v41 }
 0xbad   :  { %v3692_v57 = vmul.f32 -1.442695, %v3479_v39  ;;  %v3693_v58 = vmul.f32 -1.442695, %v3480_v37 }
 0xbaf   :  { %3968 = vpow2.f32 %v3692_v57 }
 0xbb0   :  { %3970 = vpow2.f32 %v3693_v58 }
 0xbb1   :  { %v3476_v24 = vpop.f32.mrf.mxu3  ;;  %v3456_v40 = vpop.f32.mrf.mxu2 }
 0xbb2   :  { %v3482_v18 = vadd.f32 %v3476_v24, %v2233_v59  ;;  %v3592_v56 = vpop.f32.mrf.mxu0  ;;  %v3481_v31 = vadd.f32 %v3456_v40, %v2192_v26 }
 0xbb3   :  { %v3593_v3 = vadd.f32 %v6516_v34, %v3592_v56 }
 0xbb4   :  { %v3694_v16 = vmul.f32 -1.442695, %v3482_v18 }
 0xbb5   :  { %v3969_v49 = vpop.eup %3968  ;;  %3616 = vst [vmem:[#allocation19] sm:$0xff] %v3593_v3 }
 0xbb6   :  { %v3971_v52 = vpop.eup %3970  ;;  %v3486_v14 = vadd.f32 1.0, %v3969_v49  ;;  %3972 = vpow2.f32 %v3694_v16 }
 0xbb7   :  { %v3505_v28 = vadd.f32 1.0, %v3971_v52 }
 0xbb8   :  { %3974 = vrcp.f32 %v3486_v14  ;;  %v3496_v63 = vand.u32 2147483647, %v3486_v14  ;;  %v3498_v4 = vand.u32 2147483648, %v3486_v14  ;;  %vm3492_vm6 = vweird.f32 %v3486_v14 }
 0xbb9   :  { %3976 = vrcp.f32 %v3505_v28  ;;  %v3517_v15 = vand.u32 2147483648, %v3505_v28  ;;  %v3515_v13 = vand.u32 2147483647, %v3505_v28  ;;  %vm3511_vm7 = vweird.f32 %v3505_v28 }
 0xbba   :  { %v3595_v17 = vpop.f32.mrf.mxu0  ;;  %v3499_v23 = vor.u32 1.1754944e-38, %v3498_v4  ;;  %vm3497_vm10 = vcmp.eq.f32.partialorder %v3496_v63, 8.507059e+37 }
 0xbbb   :  { %v3596_v19 = vadd.f32 %v6516_v34, %v3595_v17  ;;  %v3518_v51 = vor.u32 1.1754944e-38, %v3517_v15  ;;  %vm3516_vm11 = vcmp.eq.f32.partialorder %v3515_v13, 8.507059e+37 }
 0xbbc   :  { %v3973_v38 = vpop.eup %3972 }
 0xbbd   :  { %v3525_v44 = vadd.f32 1.0, %v3973_v38  ;;  %3617 = vst [vmem:[#allocation19 + $0x8] sm:$0xff] %v3596_v19 }
 0xbbe   :  { %v3975_v22 = vpop.eup %3974 }
 0xbbf   :  { %v3977_v36 = vpop.eup %3976  ;;  %v3488_v0 = vmul.f32 %v3975_v22, %v3486_v14  ;;  %3978 = vrcp.f32 %v3525_v44  ;;  %vm3493_vm4 = vweird.f32 %v3975_v22  ;;  %v3537_v6 = vand.u32 2147483648, %v3525_v44 }
 0xbc0   :  { %v3507_v9 = vmul.f32 %v3977_v36, %v3505_v28  ;;  %3980 = vtanh.f32 %v3481_v31  ;;  %vm3512_vm5 = vweird.f32 %v3977_v36  ;;  %vm3494_vm8 = vmor %vm3492_vm6, %vm3493_vm4  ;;  %vm3531_vm13 = vweird.f32 %v3525_v44 }
 0xbc1   :  { %v3489_v55 = vsub.f32 1.0, %v3488_v0  ;;  %vm3513_vm9 = vmor %vm3511_vm7, %vm3512_vm5  ;;  %v3535_v27 = vand.u32 2147483647, %v3525_v44  ;;  %v3538_v10 = vor.u32 1.1754944e-38, %v3537_v6 }
 0xbc2   :  { %v3508_v62 = vsub.f32 1.0, %v3507_v9  ;;  %v3598_v5 = vpop.f32.mrf.mxu0 }
 0xbc3   :  { %v3490_v53 = vmul.f32 %v3975_v22, %v3489_v55  ;;  %v3599_v11 = vadd.f32 %v6516_v34, %v3598_v5  ;;  %vm3536_vm15 = vcmp.eq.f32.partialorder %v3535_v27, 8.507059e+37 }
 0xbc4   :  { %v3509_v50 = vmul.f32 %v3977_v36, %v3508_v62 }
 0xbc5   :  { %v3979_v33 = vpop.eup %3978  ;;  %v3491_v61 = vadd.f32 %v3975_v22, %v3490_v53  ;;  %3618 = vst [vmem:[#allocation19 + $0x10] sm:$0xff] %v3599_v11 }
 0xbc6   :  { %v3510_v47 = vadd.f32 %v3977_v36, %v3509_v50  ;;  %v3527_v35 = vmul.f32 %v3979_v33, %v3525_v44  ;;  %v3981_v54 = vpop.eup %3980  ;;  %vm3532_vm12 = vweird.f32 %v3979_v33 }
 0xbc7   :  { %v3495_v46 = vsel %vm3494_vm8, %v3975_v22, %v3491_v61  ;;  %vm3533_vm14 = vmor %vm3531_vm13, %vm3532_vm12 }
 0xbc8   :  { %v3500_v25 = vsel %vm3497_vm10, %v3499_v23, %v3495_v46  ;;  %v3514_v20 = vsel %vm3513_vm9, %v3977_v36, %v3510_v47  ;;  %v3528_v21 = vsub.f32 1.0, %v3527_v35 }
 0xbc9   :  { %v3519_v43 = vsel %vm3516_vm11, %v3518_v51, %v3514_v20  ;;  %v3542_v1 = vmul.f32 %v3981_v54, %v3500_v25 }
 0xbca   :  { %v3541_v42 = vmul.f32 %v3519_v43, %v6500_v32  ;;  %v3601_v45 = vpop.f32.mrf.mxu0  ;;  %v3529_v60 = vmul.f32 %v3979_v33, %v3528_v21 }
 0xbcb   :  { %v3602_v48 = vadd.f32 %v6516_v34, %v3601_v45 }
 0xbcc   :  { %v3543_v2 = vadd.f32 %v3542_v1, %v3541_v42  ;;  %v3530_v30 = vadd.f32 %v3979_v33, %v3529_v60 }
 0xbcd   :  { %3619 = vst [vmem:[#allocation19 + $0x18] sm:$0xff] %v3602_v48 }
 0xbce   :  { %3982 = vtanh.f32 %v3543_v2  ;;  %v3534_v8 = vsel %vm3533_vm14, %v3979_v33, %v3530_v30 }
 0xbcf   :  { %v3539_v39 = vsel %vm3536_vm15, %v3538_v10, %v3534_v8 }
 0xbd2   :  { %v3604_v41 = vpop.f32.mrf.mxu0 }
 0xbd3   :  { %v3605_v7 = vadd.f32 %v6516_v34, %v3604_v41 }
 0xbd4   :  { %v3983_v32 = vpop.eup %3982 }
 0xbd5   :  { %3620 = vst [vmem:[#allocation19 + $0x20] sm:$0xff] %v3605_v7  ;;  %v3545_v37 = vmul.f32 %v3983_v32, %v3539_v39 }
 0xbd7   :  { %3612 = vmatmul.f32.gmra.mxu0 %v3545_v37 }
 0xbda   :  { %v3607_v57 = vpop.f32.mrf.mxu0 }
 0xbdb   :  { %v3608_v58 = vadd.f32 %v6516_v34, %v3607_v57 }
 0xbdd   :  { %3621 = vst [vmem:[#allocation19 + $0x28] sm:$0xff] %v3608_v58 }
 0xbe2   :  { %v3610_v12 = vpop.f32.mrf.mxu0 }
 0xbe3   :  { %v3611_v59 = vadd.f32 %v6516_v34, %v3610_v12 }
 0xbe5   :  { %3622 = vst [vmem:[#allocation19 + $0x30] sm:$0xff] %v3611_v59 }
 0xc54   :  { %v3613_v24 = vpop.f32.mrf.mxu0 }
 0xc55   :  { %v3614_v18 = vadd.f32 %v6516_v34, %v3613_v24 }
 0xc57   :  { %3623 = vst [vmem:[#allocation19 + $0x38] sm:$0xff] %v3614_v18 }
 0xc58   :  { %3636 = dma.vmem_to_hbm [thread:$0]  %s3629_s21, 1024, %s3631_s8, [#allocation6], %s4365_s22, %s4365_s22, %s4366_s23  }
 0xc59   :  { %4362 = dma.done.wait [#allocation6], 1024  }
 0xc5a   :  { %4363 = vsyncadd [#allocation6], 4294966272 }
 0xc5b   :  { %3641 = vsyncpa [#allocation5], 1 }
 0xc5c   :  { %3642 = vsyncpa [#allocation8], 1 }
 0xc5d   :  { %3643 = vsyncpa [#allocation11], 1 }
 0xc5e   :  { %3644 = vsyncpa [#allocation14], 1 }
 0xc5f   :  { %3645 = vsyncpa [#allocation17], 1 }
 0xc60   :  { %3646 = vsyncpa [#allocation6], 1 }

</bundles_post_ra>
